<compile_context>
chip_gen: v5e
topology: v5e:2x2
jax: 0.10.0
libtpu: 0.0.40
codegen_flags: <defaults>
</compile_context>

<pallas_src>
import functools

import numpy as np
import jax
import jax.numpy as jnp
from jax import lax
from jax.experimental import pallas as pl
from jax.experimental.pallas import tpu as pltpu


def _round_up(x, m):
    return ((x + m - 1) // m) * m


# ----------------------------------------------------------------------------
# Tiled fused matmul:  o = act(a @ b + bias)
# ----------------------------------------------------------------------------
def _mm_kernel(a_ref, b_ref, bias_ref, o_ref, acc_ref, *, relu):
    @pl.when(pl.program_id(2) == 0)
    def _():
        acc_ref[...] = jnp.zeros_like(acc_ref)

    acc_ref[...] += jnp.dot(a_ref[...], b_ref[...],
                            preferred_element_type=jnp.float32)

    @pl.when(pl.program_id(2) == pl.num_programs(2) - 1)
    def _():
        out = acc_ref[...] + bias_ref[...]
        if relu:
            out = jnp.maximum(out, 0.0)
        o_ref[...] = out.astype(o_ref.dtype)


def pallas_mm(a, b, bias=None, relu=False, use_bf16=True):
    """Tiled, pipelined matmul + bias + optional ReLU.

    a: (M, K), b: (K, N), bias: (N,) or None.  Returns f32 (M, N).
    Inputs are cast to bf16 for the MXU when use_bf16=True (accumulation is f32).
    """
    M, K = a.shape
    K2, N = b.shape
    assert K == K2
    if bias is None:
        bias = jnp.zeros((N,), jnp.float32)

    in_dtype = jnp.bfloat16 if use_bf16 else jnp.float32

    tm = min(256, _round_up(M, 8))
    tn = min(256, _round_up(N, 128))
    tk = K if K <= 4096 else 2048

    Mp = _round_up(M, tm)
    Np = _round_up(N, tn)
    Kp = _round_up(K, tk)

    a_p = jnp.pad(a.astype(in_dtype), ((0, Mp - M), (0, Kp - K)))
    b_p = jnp.pad(b.astype(in_dtype), ((0, Kp - K), (0, Np - N)))
    bias_p = jnp.pad(bias.astype(jnp.float32), ((0, Np - N),)).reshape(1, Np)

    grid = (Mp // tm, Np // tn, Kp // tk)
    kernel = functools.partial(_mm_kernel, relu=relu)

    itemsize = 2 if use_bf16 else 4
    cost = pl.CostEstimate(
        flops=2 * Mp * Np * Kp,
        transcendentals=0,
        bytes_accessed=(Mp * Kp + Kp * Np) * itemsize + Mp * Np * 4,
    )

    out = pl.pallas_call(
        kernel,
        out_shape=jax.ShapeDtypeStruct((Mp, Np), jnp.float32),
        grid_spec=pltpu.PrefetchScalarGridSpec(
            num_scalar_prefetch=0,
            grid=grid,
            in_specs=[
                pl.BlockSpec((tm, tk), lambda i, j, k: (i, k)),
                pl.BlockSpec((tk, tn), lambda i, j, k: (k, j)),
                pl.BlockSpec((1, tn), lambda i, j, k: (0, j)),
            ],
            out_specs=pl.BlockSpec((tm, tn), lambda i, j, k: (i, j)),
            scratch_shapes=[pltpu.VMEM((tm, tn), jnp.float32)],
        ),
        compiler_params=pltpu.CompilerParams(
            dimension_semantics=("parallel", "parallel", "arbitrary"),
            vmem_limit_bytes=32 * 1024 * 1024,
        ),
        cost_estimate=cost,
    )(a_p, b_p, bias_p)

    if Mp != M or Np != N:
        out = out[:M, :N]
    return out


# ----------------------------------------------------------------------------
# grid_sample (bilinear, border, align_corners=True) — separable tent weights
# ----------------------------------------------------------------------------
def _grid_sample_kernel(gxy_ref, img_ref, out_ref, *, H, W, C):
    g = gxy_ref[0]                     # (2, n): row 0 = x, row 1 = y in [-1, 1]
    n = g.shape[-1]
    gx = g[0:1, :]                     # (1, n)
    gy = g[1:2, :]                     # (1, n)

    # border clamp + align_corners=True mapping to source pixel coords
    ix = jnp.clip((gx + 1.0) * 0.5 * (W - 1), 0.0, float(W - 1))
    iy = jnp.clip((gy + 1.0) * 0.5 * (H - 1), 0.0, float(H - 1))

    # Separable bilinear "tent" weights: at most two non-zero taps per axis.
    wpos = lax.broadcasted_iota(jnp.int32, (W, n), 0).astype(jnp.float32)
    hpos = lax.broadcasted_iota(jnp.int32, (H, n), 0).astype(jnp.float32)
    tx = jnp.maximum(0.0, 1.0 - jnp.abs(wpos - ix))      # (W, n)
    ty = jnp.maximum(0.0, 1.0 - jnp.abs(hpos - iy))      # (H, n)

    img = img_ref[0]                                      # (C*H, W), rows = (c, h)
    rx = jnp.dot(img, tx, preferred_element_type=jnp.float32)   # (C*H, n)
    rx3 = rx.reshape(C, H, n)                             # layout-preserving (H%8==0, n%128==0)
    out_ref[0] = jnp.sum(rx3 * ty[None, :, :], axis=1)    # (C, n), lane-dense


def pallas_grid_sample(img2d, grid_b2n, *, H, W, C):
    """img2d: (B, C*H, W) f32; grid_b2n: (B, 2, n) with row 0 = x, row 1 = y."""
    B = img2d.shape[0]
    n = grid_b2n.shape[2]
    kernel = functools.partial(_grid_sample_kernel, H=H, W=W, C=C)
    return pl.pallas_call(
        kernel,
        out_shape=jax.ShapeDtypeStruct((B, C, n), jnp.float32),
        grid=(B,),
        in_specs=[
            pl.BlockSpec((1, 2, n), lambda b: (b, 0, 0)),
            pl.BlockSpec((1, C * H, W), lambda b: (b, 0, 0)),
        ],
        out_specs=pl.BlockSpec((1, C, n), lambda b: (b, 0, 0)),
        compiler_params=pltpu.CompilerParams(dimension_semantics=("parallel",)),
    )(grid_b2n.astype(jnp.float32), img2d.astype(jnp.float32))


# ----------------------------------------------------------------------------
# Localization network (im2col conv -> tiled Pallas matmul), pooling glue in JAX
# ----------------------------------------------------------------------------
# TODO(synk): fuse im2col + 2x2 maxpool into the conv matmul kernel to avoid the
#             9x patch round-trip through HBM (secondary item in the perf review).
def conv3x3_bn_relu(x_nhwc, w_oihw, gamma, beta, mean, var, eps=1e-5):
    B, H, W, Cin = x_nhwc.shape
    Cout = w_oihw.shape[0]
    xp = jnp.pad(x_nhwc, ((0, 0), (1, 1), (1, 1), (0, 0)))
    cols = [xp[:, dh:dh + H, dw:dw + W, :] for dh in range(3) for dw in range(3)]
    patches = jnp.concatenate(cols, axis=-1).reshape(B * H * W, 9 * Cin)
    # (Cout, Cin, kh, kw) -> (kh, kw, Cin, Cout) -> (9*Cin, Cout)  (matches patch order)
    w_mat = jnp.transpose(w_oihw, (2, 3, 1, 0)).reshape(9 * Cin, Cout)
    # Fold BN scale into the weights; epilogue in the kernel is just +bias, ReLU.
    scale = gamma / jnp.sqrt(var + eps)
    bias = beta - mean * scale
    w_folded = w_mat * scale[None, :]
    y = pallas_mm(patches, w_folded, bias, relu=True, use_bf16=True)
    return y.reshape(B, H, W, Cout)


def maxpool2x2(x_nhwc):
    B, H, W, C = x_nhwc.shape
    return x_nhwc.reshape(B, H // 2, 2, W // 2, 2, C).max(axis=(2, 4))


def localization_network(x_nchw, p, F):
    B = x_nchw.shape[0]
    x = jnp.transpose(x_nchw, (0, 2, 3, 1)).astype(jnp.float32)   # NCHW -> NHWC
    x = conv3x3_bn_relu(x, p["conv1_w"], *p["bn1"]); x = maxpool2x2(x)
    x = conv3x3_bn_relu(x, p["conv2_w"], *p["bn2"]); x = maxpool2x2(x)
    x = conv3x3_bn_relu(x, p["conv3_w"], *p["bn3"]); x = maxpool2x2(x)
    x = conv3x3_bn_relu(x, p["conv4_w"], *p["bn4"])
    feat = jnp.mean(x, axis=(1, 2))                                # AdaptiveAvgPool2d(1)
    h = pallas_mm(feat, p["fc1_w"], p["fc1_b"], relu=True, use_bf16=True)
    out = pallas_mm(h, p["fc2_w"], p["fc2_b"], relu=False, use_bf16=True)
    return out.reshape(B, F, 2)


# ----------------------------------------------------------------------------
# GridGenerator constants (host-side numpy, identical math to the PyTorch code),
# collapsed to a single precomputed matrix A^T = (P_hat @ inv_delta_C)^T.
# ----------------------------------------------------------------------------
def build_tps_constants(F, I_r_size, eps=1e-6):
    I_r_height, I_r_width = I_r_size
    ctrl_pts_x = np.linspace(-1.0, 1.0, F // 2)
    C = np.concatenate(
        [np.stack([ctrl_pts_x, -1 * np.ones(F // 2)], axis=1),
         np.stack([ctrl_pts_x, np.ones(F // 2)], axis=1)], axis=0)  # F x 2

    hat_C = np.zeros((F, F), dtype=float)
    for i in range(F):
        for j in range(i, F):
            r = np.linalg.norm(C[i] - C[j])
            hat_C[i, j] = r
            hat_C[j, i] = r
    np.fill_diagonal(hat_C, 1)
    hat_C = (hat_C ** 2) * np.log(hat_C)
    delta_C = np.concatenate(
        [np.concatenate([np.ones((F, 1)), C, hat_C], axis=1),
         np.concatenate([np.zeros((2, 3)), np.transpose(C)], axis=1),
         np.concatenate([np.zeros((1, 3)), np.ones((1, F))], axis=1)], axis=0)
    inv_delta_C = np.linalg.inv(delta_C)                            # (F+3, F+3)

    I_r_grid_x = (np.arange(-I_r_width, I_r_width, 2) + 1.0) / I_r_width
    I_r_grid_y = (np.arange(-I_r_height, I_r_height, 2) + 1.0) / I_r_height
    P = np.stack(np.meshgrid(I_r_grid_x, I_r_grid_y), axis=2).reshape(-1, 2)  # n x 2

    n = P.shape[0]
    P_diff = np.tile(np.expand_dims(P, 1), (1, F, 1)) - np.expand_dims(C, 0)
    rbf_norm = np.linalg.norm(P_diff, ord=2, axis=2)
    rbf = np.square(rbf_norm) * np.log(rbf_norm + eps)
    P_hat = np.concatenate([np.ones((n, 1)), rbf, P], axis=1)       # n x (F+3)

    A = P_hat @ inv_delta_C                                         # (n, F+3)
    return jnp.asarray(A.T, jnp.float32)                            # (F+3, n)


def build_P_prime_T(batch_C_prime, A_T):
    """Return sampling grid as (B, 2, n): row 0 = x, row 1 = y."""
    B, F, _ = batch_C_prime.shape
    Cz = jnp.concatenate(
        [batch_C_prime, jnp.zeros((B, 3, 2), jnp.float32)], axis=1)  # (B, F+3, 2)
    Czf = jnp.transpose(Cz, (0, 2, 1)).reshape(2 * B, F + 3)         # (2B, F+3)
    n = A_T.shape[1]
    G2 = pallas_mm(Czf, A_T, None, relu=False, use_bf16=False)       # (2B, n), lane-dense
    return G2.reshape(B, 2, n)


# ----------------------------------------------------------------------------
# TPS module
# ----------------------------------------------------------------------------
def init_params(key, in_channels, F):
    ks = jax.random.split(key, 6)

    def conv_w(k, cout, cin):
        return (jax.random.normal(k, (cout, cin, 3, 3), jnp.float32)
                * (1.0 / np.sqrt(9.0 * cin)))

    def bn(c):
        return (jnp.ones((c,), jnp.float32), jnp.zeros((c,), jnp.float32),
                jnp.zeros((c,), jnp.float32), jnp.ones((c,), jnp.float32))

    half = F // 2
    ctrl_x = np.linspace(-1.0, 1.0, half)
    init_bias = np.concatenate(
        [np.stack([ctrl_x, np.linspace(0.0, -1.0, half)], axis=1),
         np.stack([ctrl_x, np.linspace(1.0, 0.0, half)], axis=1)], axis=0).reshape(-1)

    return {
        "conv1_w": conv_w(ks[0], 64, in_channels), "bn1": bn(64),
        "conv2_w": conv_w(ks[1], 128, 64), "bn2": bn(128),
        "conv3_w": conv_w(ks[2], 256, 128), "bn3": bn(256),
        "conv4_w": conv_w(ks[3], 512, 256), "bn4": bn(512),
        # stored as (in, out) so that y = x @ W (same math as PyTorch x @ W.T + b)
        "fc1_w": jax.random.normal(ks[4], (512, 256), jnp.float32) * (1.0 / np.sqrt(512.0)),
        "fc1_b": jax.random.normal(ks[5], (256,), jnp.float32) * 0.01,
        "fc2_w": jnp.zeros((256, 2 * F), jnp.float32),
        "fc2_b": jnp.asarray(init_bias, jnp.float32),
    }


def tps_forward(x_nchw, params, A_T, F):
    B, C, H, W = x_nchw.shape
    batch_C_prime = localization_network(x_nchw, params, F)          # (B, F, 2)
    G = build_P_prime_T(batch_C_prime, A_T)                          # (B, 2, H*W)
    img2d = x_nchw.reshape(B, C * H, W).astype(jnp.float32)          # rows = (c, h)
    sampled = pallas_grid_sample(img2d, G, H=H, W=W, C=C)            # (B, C, H*W)
    return sampled.reshape(B, C, H, W)                               # NCHW


# ----------------------------------------------------------------------------
if __name__ == "__main__":
    config = {"num_fiducial": 20, "imgH": 16, "imgW": 32, "input_channel": 3}
    F = config["num_fiducial"]
    H, W, Cin = config["imgH"], config["imgW"], config["input_channel"]
    B = 2

    key = jax.random.PRNGKey(0)
    k_param, k_x = jax.random.split(key)
    params = init_params(k_param, Cin, F)
    A_T = build_tps_constants(F, (H, W))

    x = jax.random.normal(k_x, (B, Cin, H, W), jnp.float32)

    fwd = jax.jit(functools.partial(tps_forward, F=F))
    out = fwd(x, params, A_T)
    out = jax.block_until_ready(out)

    assert out.shape == (B, Cin, H, W), out.shape
    assert bool(jnp.all(jnp.isfinite(out)))
    print("KERNEL_OK")
</pallas_src>

<mosaic_0001>
module attributes {stable_mosaic.version = 11 : i64} {
  func.func @_mm_kernel(%arg0: i32, %arg1: i32, %arg2: i32, %arg3: memref<256x27xbf16, #tpu.memory_space<vmem>>, %arg4: memref<27x128xbf16, #tpu.memory_space<vmem>>, %arg5: memref<1x128xf32, #tpu.memory_space<vmem>>, %arg6: memref<256x128xf32, #tpu.memory_space<vmem>>, %arg7: memref<256x128xf32, #tpu.memory_space<vmem>>) attributes {dimension_semantics = [#tpu.dimension_semantics<parallel>, #tpu.dimension_semantics<parallel>, #tpu.dimension_semantics<arbitrary>], iteration_bounds = array<i64: 4, 1, 1>, scalar_prefetch = 0 : i64, scratch_operands = 1 : i64, tpu.core_type = #tpu.core_type<tc>, window_params = [{transform_indices = @transform_0, window_bounds = array<i64: 256, 27>}, {transform_indices = @transform_1, window_bounds = array<i64: 27, 128>}, {transform_indices = @transform_2, window_bounds = array<i64: 1, 128>}, {transform_indices = @transform_3, window_bounds = array<i64: 256, 128>}]} {
    %c0_i32 = arith.constant 0 : i32
    %0 = arith.cmpi eq, %arg2, %c0_i32 : i32
    %1 = arith.extui %0 : i1 to i32
    %c0_i32_0 = arith.constant 0 : i32
    %2 = arith.cmpi ne, %1, %c0_i32_0 : i32
    scf.if %2 {
      %cst_10 = arith.constant 0.000000e+00 : f32
      %12 = vector.broadcast %cst_10 : f32 to vector<256x128xf32>
      %c0_11 = arith.constant 0 : index
      %c0_12 = arith.constant 0 : index
      %13 = vector.load %arg7[%c0_11, %c0_12] : memref<256x128xf32, #tpu.memory_space<vmem>>, vector<256x128xf32>
      tpu.vector_store %arg7[%c0_11, %c0_12], %12 {strides = array<i32>} : memref<256x128xf32, #tpu.memory_space<vmem>>, vector<256x128xf32>,
    } else {
    }
    %c0 = arith.constant 0 : index
    %c0_1 = arith.constant 0 : index
    %3 = vector.load %arg7[%c0, %c0_1] : memref<256x128xf32, #tpu.memory_space<vmem>>, vector<256x128xf32>
    %c0_2 = arith.constant 0 : index
    %c0_3 = arith.constant 0 : index
    %4 = vector.load %arg3[%c0_2, %c0_3] : memref<256x27xbf16, #tpu.memory_space<vmem>>, vector<256x27xbf16>
    %c0_4 = arith.constant 0 : index
    %c0_5 = arith.constant 0 : index
    %5 = vector.load %arg4[%c0_4, %c0_5] : memref<27x128xbf16, #tpu.memory_space<vmem>>, vector<27x128xbf16>
    %cst = arith.constant dense<0.000000e+00> : vector<256x128xf32>
    %6 = tpu.matmul %4, %5, %cst {dimension_numbers = #tpu.dot_dimension_numbers<[1], [0], [0], [1], [0, 0, 1, 1], [], []>} : vector<256x27xbf16>, vector<27x128xbf16>, vector<256x128xf32> -> vector<256x128xf32>
    %7 = arith.addf %3, %6 : vector<256x128xf32>
    %c0_6 = arith.constant 0 : index
    %c0_7 = arith.constant 0 : index
    %8 = vector.load %arg7[%c0_6, %c0_7] : memref<256x128xf32, #tpu.memory_space<vmem>>, vector<256x128xf32>
    tpu.vector_store %arg7[%c0_6, %c0_7], %7 {strides = array<i32>} : memref<256x128xf32, #tpu.memory_space<vmem>>, vector<256x128xf32>,
    %c0_i32_8 = arith.constant 0 : i32
    %9 = arith.cmpi eq, %arg2, %c0_i32_8 : i32
    %10 = arith.extui %9 : i1 to i32
    %c0_i32_9 = arith.constant 0 : i32
    %11 = arith.cmpi ne, %10, %c0_i32_9 : i32
    scf.if %11 {
      %c0_10 = arith.constant 0 : index
      %c0_11 = arith.constant 0 : index
      %12 = vector.load %arg7[%c0_10, %c0_11] : memref<256x128xf32, #tpu.memory_space<vmem>>, vector<256x128xf32>
      %c0_12 = arith.constant 0 : index
      %c0_13 = arith.constant 0 : index
      %13 = vector.load %arg5[%c0_12, %c0_13] : memref<1x128xf32, #tpu.memory_space<vmem>>, vector<1x128xf32>
      %14 = vector.broadcast %13 : vector<1x128xf32> to vector<256x128xf32>
      %15 = arith.addf %12, %14 : vector<256x128xf32>
      %cst_14 = arith.constant 0.000000e+00 : f32
      %16 = vector.broadcast %cst_14 : f32 to vector<256x128xf32>
      %17 = arith.maximumf %15, %16 : vector<256x128xf32>
      %c0_15 = arith.constant 0 : index
      %c0_16 = arith.constant 0 : index
      %18 = vector.load %arg6[%c0_15, %c0_16] : memref<256x128xf32, #tpu.memory_space<vmem>>, vector<256x128xf32>
      tpu.vector_store %arg6[%c0_15, %c0_16], %17 {strides = array<i32>} : memref<256x128xf32, #tpu.memory_space<vmem>>, vector<256x128xf32>,
    } else {
    }
    return
  }
  func.func @transform_0(%arg0: i32, %arg1: i32, %arg2: i32) -> (i32, i32) {
    %c0_i32 = arith.constant 0 : i32
    return %arg0, %arg2 : i32, i32
  }
  func.func @transform_1(%arg0: i32, %arg1: i32, %arg2: i32) -> (i32, i32) {
    %c0_i32 = arith.constant 0 : i32
    return %arg2, %arg1 : i32, i32
  }
  func.func @transform_2(%arg0: i32, %arg1: i32, %arg2: i32) -> (i32, i32) {
    %c0_i32 = arith.constant 0 : i32
    %c0_i32_0 = arith.constant 0 : i32
    return %c0_i32, %arg1 : i32, i32
  }
  func.func @transform_3(%arg0: i32, %arg1: i32, %arg2: i32) -> (i32, i32) {
    %c0_i32 = arith.constant 0 : i32
    return %arg0, %arg1 : i32, i32
  }
}

module attributes {stable_mosaic.version = 11 : i64} {
  func.func @_mm_kernel(%arg0: i32, %arg1: i32, %arg2: i32, %arg3: memref<256x576xbf16, #tpu.memory_space<vmem>>, %arg4: memref<576x128xbf16, #tpu.memory_space<vmem>>, %arg5: memref<1x128xf32, #tpu.memory_space<vmem>>, %arg6: memref<256x128xf32, #tpu.memory_space<vmem>>, %arg7: memref<256x128xf32, #tpu.memory_space<vmem>>) attributes {dimension_semantics = [#tpu.dimension_semantics<parallel>, #tpu.dimension_semantics<parallel>, #tpu.dimension_semantics<arbitrary>], iteration_bounds = array<i64: 1, 1, 1>, scalar_prefetch = 0 : i64, scratch_operands = 1 : i64, tpu.core_type = #tpu.core_type<tc>, window_params = [{transform_indices = @transform_0, window_bounds = array<i64: 256, 576>}, {transform_indices = @transform_1, window_bounds = array<i64: 576, 128>}, {transform_indices = @transform_2, window_bounds = array<i64: 1, 128>}, {transform_indices = @transform_3, window_bounds = array<i64: 256, 128>}]} {
    %c0_i32 = arith.constant 0 : i32
    %0 = arith.cmpi eq, %arg2, %c0_i32 : i32
    %1 = arith.extui %0 : i1 to i32
    %c0_i32_0 = arith.constant 0 : i32
    %2 = arith.cmpi ne, %1, %c0_i32_0 : i32
    scf.if %2 {
      %cst_10 = arith.constant 0.000000e+00 : f32
      %12 = vector.broadcast %cst_10 : f32 to vector<256x128xf32>
      %c0_11 = arith.constant 0 : index
      %c0_12 = arith.constant 0 : index
      %13 = vector.load %arg7[%c0_11, %c0_12] : memref<256x128xf32, #tpu.memory_space<vmem>>, vector<256x128xf32>
      tpu.vector_store %arg7[%c0_11, %c0_12], %12 {strides = array<i32>} : memref<256x128xf32, #tpu.memory_space<vmem>>, vector<256x128xf32>,
    } else {
    }
    %c0 = arith.constant 0 : index
    %c0_1 = arith.constant 0 : index
    %3 = vector.load %arg7[%c0, %c0_1] : memref<256x128xf32, #tpu.memory_space<vmem>>, vector<256x128xf32>
    %c0_2 = arith.constant 0 : index
    %c0_3 = arith.constant 0 : index
    %4 = vector.load %arg3[%c0_2, %c0_3] : memref<256x576xbf16, #tpu.memory_space<vmem>>, vector<256x576xbf16>
    %c0_4 = arith.constant 0 : index
    %c0_5 = arith.constant 0 : index
    %5 = vector.load %arg4[%c0_4, %c0_5] : memref<576x128xbf16, #tpu.memory_space<vmem>>, vector<576x128xbf16>
    %cst = arith.constant dense<0.000000e+00> : vector<256x128xf32>
    %6 = tpu.matmul %4, %5, %cst {dimension_numbers = #tpu.dot_dimension_numbers<[1], [0], [0], [1], [0, 0, 1, 1], [], []>} : vector<256x576xbf16>, vector<576x128xbf16>, vector<256x128xf32> -> vector<256x128xf32>
    %7 = arith.addf %3, %6 : vector<256x128xf32>
    %c0_6 = arith.constant 0 : index
    %c0_7 = arith.constant 0 : index
    %8 = vector.load %arg7[%c0_6, %c0_7] : memref<256x128xf32, #tpu.memory_space<vmem>>, vector<256x128xf32>
    tpu.vector_store %arg7[%c0_6, %c0_7], %7 {strides = array<i32>} : memref<256x128xf32, #tpu.memory_space<vmem>>, vector<256x128xf32>,
    %c0_i32_8 = arith.constant 0 : i32
    %9 = arith.cmpi eq, %arg2, %c0_i32_8 : i32
    %10 = arith.extui %9 : i1 to i32
    %c0_i32_9 = arith.constant 0 : i32
    %11 = arith.cmpi ne, %10, %c0_i32_9 : i32
    scf.if %11 {
      %c0_10 = arith.constant 0 : index
      %c0_11 = arith.constant 0 : index
      %12 = vector.load %arg7[%c0_10, %c0_11] : memref<256x128xf32, #tpu.memory_space<vmem>>, vector<256x128xf32>
      %c0_12 = arith.constant 0 : index
      %c0_13 = arith.constant 0 : index
      %13 = vector.load %arg5[%c0_12, %c0_13] : memref<1x128xf32, #tpu.memory_space<vmem>>, vector<1x128xf32>
      %14 = vector.broadcast %13 : vector<1x128xf32> to vector<256x128xf32>
      %15 = arith.addf %12, %14 : vector<256x128xf32>
      %cst_14 = arith.constant 0.000000e+00 : f32
      %16 = vector.broadcast %cst_14 : f32 to vector<256x128xf32>
      %17 = arith.maximumf %15, %16 : vector<256x128xf32>
      %c0_15 = arith.constant 0 : index
      %c0_16 = arith.constant 0 : index
      %18 = vector.load %arg6[%c0_15, %c0_16] : memref<256x128xf32, #tpu.memory_space<vmem>>, vector<256x128xf32>
      tpu.vector_store %arg6[%c0_15, %c0_16], %17 {strides = array<i32>} : memref<256x128xf32, #tpu.memory_space<vmem>>, vector<256x128xf32>,
    } else {
    }
    return
  }
  func.func @transform_0(%arg0: i32, %arg1: i32, %arg2: i32) -> (i32, i32) {
    %c0_i32 = arith.constant 0 : i32
    return %arg0, %arg2 : i32, i32
  }
  func.func @transform_1(%arg0: i32, %arg1: i32, %arg2: i32) -> (i32, i32) {
    %c0_i32 = arith.constant 0 : i32
    return %arg2, %arg1 : i32, i32
  }
  func.func @transform_2(%arg0: i32, %arg1: i32, %arg2: i32) -> (i32, i32) {
    %c0_i32 = arith.constant 0 : i32
    %c0_i32_0 = arith.constant 0 : i32
    return %c0_i32, %arg1 : i32, i32
  }
  func.func @transform_3(%arg0: i32, %arg1: i32, %arg2: i32) -> (i32, i32) {
    %c0_i32 = arith.constant 0 : i32
    return %arg0, %arg1 : i32, i32
  }
}

module attributes {stable_mosaic.version = 11 : i64} {
  func.func @_mm_kernel(%arg0: i32, %arg1: i32, %arg2: i32, %arg3: memref<64x1152xbf16, #tpu.memory_space<vmem>>, %arg4: memref<1152x256xbf16, #tpu.memory_space<vmem>>, %arg5: memref<1x256xf32, #tpu.memory_space<vmem>>, %arg6: memref<64x256xf32, #tpu.memory_space<vmem>>, %arg7: memref<64x256xf32, #tpu.memory_space<vmem>>) attributes {dimension_semantics = [#tpu.dimension_semantics<parallel>, #tpu.dimension_semantics<parallel>, #tpu.dimension_semantics<arbitrary>], iteration_bounds = array<i64: 1, 1, 1>, scalar_prefetch = 0 : i64, scratch_operands = 1 : i64, tpu.core_type = #tpu.core_type<tc>, window_params = [{transform_indices = @transform_0, window_bounds = array<i64: 64, 1152>}, {transform_indices = @transform_1, window_bounds = array<i64: 1152, 256>}, {transform_indices = @transform_2, window_bounds = array<i64: 1, 256>}, {transform_indices = @transform_3, window_bounds = array<i64: 64, 256>}]} {
    %c0_i32 = arith.constant 0 : i32
    %0 = arith.cmpi eq, %arg2, %c0_i32 : i32
    %1 = arith.extui %0 : i1 to i32
    %c0_i32_0 = arith.constant 0 : i32
    %2 = arith.cmpi ne, %1, %c0_i32_0 : i32
    scf.if %2 {
      %cst_10 = arith.constant 0.000000e+00 : f32
      %12 = vector.broadcast %cst_10 : f32 to vector<64x256xf32>
      %c0_11 = arith.constant 0 : index
      %c0_12 = arith.constant 0 : index
      %13 = vector.load %arg7[%c0_11, %c0_12] : memref<64x256xf32, #tpu.memory_space<vmem>>, vector<64x256xf32>
      tpu.vector_store %arg7[%c0_11, %c0_12], %12 {strides = array<i32>} : memref<64x256xf32, #tpu.memory_space<vmem>>, vector<64x256xf32>,
    } else {
    }
    %c0 = arith.constant 0 : index
    %c0_1 = arith.constant 0 : index
    %3 = vector.load %arg7[%c0, %c0_1] : memref<64x256xf32, #tpu.memory_space<vmem>>, vector<64x256xf32>
    %c0_2 = arith.constant 0 : index
    %c0_3 = arith.constant 0 : index
    %4 = vector.load %arg3[%c0_2, %c0_3] : memref<64x1152xbf16, #tpu.memory_space<vmem>>, vector<64x1152xbf16>
    %c0_4 = arith.constant 0 : index
    %c0_5 = arith.constant 0 : index
    %5 = vector.load %arg4[%c0_4, %c0_5] : memref<1152x256xbf16, #tpu.memory_space<vmem>>, vector<1152x256xbf16>
    %cst = arith.constant dense<0.000000e+00> : vector<64x256xf32>
    %6 = tpu.matmul %4, %5, %cst {dimension_numbers = #tpu.dot_dimension_numbers<[1], [0], [0], [1], [0, 0, 1, 1], [], []>} : vector<64x1152xbf16>, vector<1152x256xbf16>, vector<64x256xf32> -> vector<64x256xf32>
    %7 = arith.addf %3, %6 : vector<64x256xf32>
    %c0_6 = arith.constant 0 : index
    %c0_7 = arith.constant 0 : index
    %8 = vector.load %arg7[%c0_6, %c0_7] : memref<64x256xf32, #tpu.memory_space<vmem>>, vector<64x256xf32>
    tpu.vector_store %arg7[%c0_6, %c0_7], %7 {strides = array<i32>} : memref<64x256xf32, #tpu.memory_space<vmem>>, vector<64x256xf32>,
    %c0_i32_8 = arith.constant 0 : i32
    %9 = arith.cmpi eq, %arg2, %c0_i32_8 : i32
    %10 = arith.extui %9 : i1 to i32
    %c0_i32_9 = arith.constant 0 : i32
    %11 = arith.cmpi ne, %10, %c0_i32_9 : i32
    scf.if %11 {
      %c0_10 = arith.constant 0 : index
      %c0_11 = arith.constant 0 : index
      %12 = vector.load %arg7[%c0_10, %c0_11] : memref<64x256xf32, #tpu.memory_space<vmem>>, vector<64x256xf32>
      %c0_12 = arith.constant 0 : index
      %c0_13 = arith.constant 0 : index
      %13 = vector.load %arg5[%c0_12, %c0_13] : memref<1x256xf32, #tpu.memory_space<vmem>>, vector<1x256xf32>
      %14 = vector.broadcast %13 : vector<1x256xf32> to vector<64x256xf32>
      %15 = arith.addf %12, %14 : vector<64x256xf32>
      %cst_14 = arith.constant 0.000000e+00 : f32
      %16 = vector.broadcast %cst_14 : f32 to vector<64x256xf32>
      %17 = arith.maximumf %15, %16 : vector<64x256xf32>
      %c0_15 = arith.constant 0 : index
      %c0_16 = arith.constant 0 : index
      %18 = vector.load %arg6[%c0_15, %c0_16] : memref<64x256xf32, #tpu.memory_space<vmem>>, vector<64x256xf32>
      tpu.vector_store %arg6[%c0_15, %c0_16], %17 {strides = array<i32>} : memref<64x256xf32, #tpu.memory_space<vmem>>, vector<64x256xf32>,
    } else {
    }
    return
  }
  func.func @transform_0(%arg0: i32, %arg1: i32, %arg2: i32) -> (i32, i32) {
    %c0_i32 = arith.constant 0 : i32
    return %arg0, %arg2 : i32, i32
  }
  func.func @transform_1(%arg0: i32, %arg1: i32, %arg2: i32) -> (i32, i32) {
    %c0_i32 = arith.constant 0 : i32
    return %arg2, %arg1 : i32, i32
  }
  func.func @transform_2(%arg0: i32, %arg1: i32, %arg2: i32) -> (i32, i32) {
    %c0_i32 = arith.constant 0 : i32
    %c0_i32_0 = arith.constant 0 : i32
    return %c0_i32, %arg1 : i32, i32
  }
  func.func @transform_3(%arg0: i32, %arg1: i32, %arg2: i32) -> (i32, i32) {
    %c0_i32 = arith.constant 0 : i32
    return %arg0, %arg1 : i32, i32
  }
}

module attributes {stable_mosaic.version = 11 : i64} {
  func.func @_mm_kernel(%arg0: i32, %arg1: i32, %arg2: i32, %arg3: memref<16x2304xbf16, #tpu.memory_space<vmem>>, %arg4: memref<2304x256xbf16, #tpu.memory_space<vmem>>, %arg5: memref<1x256xf32, #tpu.memory_space<vmem>>, %arg6: memref<16x256xf32, #tpu.memory_space<vmem>>, %arg7: memref<16x256xf32, #tpu.memory_space<vmem>>) attributes {dimension_semantics = [#tpu.dimension_semantics<parallel>, #tpu.dimension_semantics<parallel>, #tpu.dimension_semantics<arbitrary>], iteration_bounds = array<i64: 1, 2, 1>, scalar_prefetch = 0 : i64, scratch_operands = 1 : i64, tpu.core_type = #tpu.core_type<tc>, window_params = [{transform_indices = @transform_0, window_bounds = array<i64: 16, 2304>}, {transform_indices = @transform_1, window_bounds = array<i64: 2304, 256>}, {transform_indices = @transform_2, window_bounds = array<i64: 1, 256>}, {transform_indices = @transform_3, window_bounds = array<i64: 16, 256>}]} {
    %c0_i32 = arith.constant 0 : i32
    %0 = arith.cmpi eq, %arg2, %c0_i32 : i32
    %1 = arith.extui %0 : i1 to i32
    %c0_i32_0 = arith.constant 0 : i32
    %2 = arith.cmpi ne, %1, %c0_i32_0 : i32
    scf.if %2 {
      %cst_10 = arith.constant 0.000000e+00 : f32
      %12 = vector.broadcast %cst_10 : f32 to vector<16x256xf32>
      %c0_11 = arith.constant 0 : index
      %c0_12 = arith.constant 0 : index
      %13 = vector.load %arg7[%c0_11, %c0_12] : memref<16x256xf32, #tpu.memory_space<vmem>>, vector<16x256xf32>
      tpu.vector_store %arg7[%c0_11, %c0_12], %12 {strides = array<i32>} : memref<16x256xf32, #tpu.memory_space<vmem>>, vector<16x256xf32>,
    } else {
    }
    %c0 = arith.constant 0 : index
    %c0_1 = arith.constant 0 : index
    %3 = vector.load %arg7[%c0, %c0_1] : memref<16x256xf32, #tpu.memory_space<vmem>>, vector<16x256xf32>
    %c0_2 = arith.constant 0 : index
    %c0_3 = arith.constant 0 : index
    %4 = vector.load %arg3[%c0_2, %c0_3] : memref<16x2304xbf16, #tpu.memory_space<vmem>>, vector<16x2304xbf16>
    %c0_4 = arith.constant 0 : index
    %c0_5 = arith.constant 0 : index
    %5 = vector.load %arg4[%c0_4, %c0_5] : memref<2304x256xbf16, #tpu.memory_space<vmem>>, vector<2304x256xbf16>
    %cst = arith.constant dense<0.000000e+00> : vector<16x256xf32>
    %6 = tpu.matmul %4, %5, %cst {dimension_numbers = #tpu.dot_dimension_numbers<[1], [0], [0], [1], [0, 0, 1, 1], [], []>} : vector<16x2304xbf16>, vector<2304x256xbf16>, vector<16x256xf32> -> vector<16x256xf32>
    %7 = arith.addf %3, %6 : vector<16x256xf32>
    %c0_6 = arith.constant 0 : index
    %c0_7 = arith.constant 0 : index
    %8 = vector.load %arg7[%c0_6, %c0_7] : memref<16x256xf32, #tpu.memory_space<vmem>>, vector<16x256xf32>
    tpu.vector_store %arg7[%c0_6, %c0_7], %7 {strides = array<i32>} : memref<16x256xf32, #tpu.memory_space<vmem>>, vector<16x256xf32>,
    %c0_i32_8 = arith.constant 0 : i32
    %9 = arith.cmpi eq, %arg2, %c0_i32_8 : i32
    %10 = arith.extui %9 : i1 to i32
    %c0_i32_9 = arith.constant 0 : i32
    %11 = arith.cmpi ne, %10, %c0_i32_9 : i32
    scf.if %11 {
      %c0_10 = arith.constant 0 : index
      %c0_11 = arith.constant 0 : index
      %12 = vector.load %arg7[%c0_10, %c0_11] : memref<16x256xf32, #tpu.memory_space<vmem>>, vector<16x256xf32>
      %c0_12 = arith.constant 0 : index
      %c0_13 = arith.constant 0 : index
      %13 = vector.load %arg5[%c0_12, %c0_13] : memref<1x256xf32, #tpu.memory_space<vmem>>, vector<1x256xf32>
      %14 = vector.broadcast %13 : vector<1x256xf32> to vector<16x256xf32>
      %15 = arith.addf %12, %14 : vector<16x256xf32>
      %cst_14 = arith.constant 0.000000e+00 : f32
      %16 = vector.broadcast %cst_14 : f32 to vector<16x256xf32>
      %17 = arith.maximumf %15, %16 : vector<16x256xf32>
      %c0_15 = arith.constant 0 : index
      %c0_16 = arith.constant 0 : index
      %18 = vector.load %arg6[%c0_15, %c0_16] : memref<16x256xf32, #tpu.memory_space<vmem>>, vector<16x256xf32>
      tpu.vector_store %arg6[%c0_15, %c0_16], %17 {strides = array<i32>} : memref<16x256xf32, #tpu.memory_space<vmem>>, vector<16x256xf32>,
    } else {
    }
    return
  }
  func.func @transform_0(%arg0: i32, %arg1: i32, %arg2: i32) -> (i32, i32) {
    %c0_i32 = arith.constant 0 : i32
    return %arg0, %arg2 : i32, i32
  }
  func.func @transform_1(%arg0: i32, %arg1: i32, %arg2: i32) -> (i32, i32) {
    %c0_i32 = arith.constant 0 : i32
    return %arg2, %arg1 : i32, i32
  }
  func.func @transform_2(%arg0: i32, %arg1: i32, %arg2: i32) -> (i32, i32) {
    %c0_i32 = arith.constant 0 : i32
    %c0_i32_0 = arith.constant 0 : i32
    return %c0_i32, %arg1 : i32, i32
  }
  func.func @transform_3(%arg0: i32, %arg1: i32, %arg2: i32) -> (i32, i32) {
    %c0_i32 = arith.constant 0 : i32
    return %arg0, %arg1 : i32, i32
  }
}

module attributes {stable_mosaic.version = 11 : i64} {
  func.func @_mm_kernel(%arg0: i32, %arg1: i32, %arg2: i32, %arg3: memref<8x512xbf16, #tpu.memory_space<vmem>>, %arg4: memref<512x256xbf16, #tpu.memory_space<vmem>>, %arg5: memref<1x256xf32, #tpu.memory_space<vmem>>, %arg6: memref<8x256xf32, #tpu.memory_space<vmem>>, %arg7: memref<8x256xf32, #tpu.memory_space<vmem>>) attributes {dimension_semantics = [#tpu.dimension_semantics<parallel>, #tpu.dimension_semantics<parallel>, #tpu.dimension_semantics<arbitrary>], iteration_bounds = array<i64: 1, 1, 1>, scalar_prefetch = 0 : i64, scratch_operands = 1 : i64, tpu.core_type = #tpu.core_type<tc>, window_params = [{transform_indices = @transform_0, window_bounds = array<i64: 8, 512>}, {transform_indices = @transform_1, window_bounds = array<i64: 512, 256>}, {transform_indices = @transform_2, window_bounds = array<i64: 1, 256>}, {transform_indices = @transform_3, window_bounds = array<i64: 8, 256>}]} {
    %c0_i32 = arith.constant 0 : i32
    %0 = arith.cmpi eq, %arg2, %c0_i32 : i32
    %1 = arith.extui %0 : i1 to i32
    %c0_i32_0 = arith.constant 0 : i32
    %2 = arith.cmpi ne, %1, %c0_i32_0 : i32
    scf.if %2 {
      %cst_10 = arith.constant 0.000000e+00 : f32
      %12 = vector.broadcast %cst_10 : f32 to vector<8x256xf32>
      %c0_11 = arith.constant 0 : index
      %c0_12 = arith.constant 0 : index
      %13 = vector.load %arg7[%c0_11, %c0_12] : memref<8x256xf32, #tpu.memory_space<vmem>>, vector<8x256xf32>
      tpu.vector_store %arg7[%c0_11, %c0_12], %12 {strides = array<i32>} : memref<8x256xf32, #tpu.memory_space<vmem>>, vector<8x256xf32>,
    } else {
    }
    %c0 = arith.constant 0 : index
    %c0_1 = arith.constant 0 : index
    %3 = vector.load %arg7[%c0, %c0_1] : memref<8x256xf32, #tpu.memory_space<vmem>>, vector<8x256xf32>
    %c0_2 = arith.constant 0 : index
    %c0_3 = arith.constant 0 : index
    %4 = vector.load %arg3[%c0_2, %c0_3] : memref<8x512xbf16, #tpu.memory_space<vmem>>, vector<8x512xbf16>
    %c0_4 = arith.constant 0 : index
    %c0_5 = arith.constant 0 : index
    %5 = vector.load %arg4[%c0_4, %c0_5] : memref<512x256xbf16, #tpu.memory_space<vmem>>, vector<512x256xbf16>
    %cst = arith.constant dense<0.000000e+00> : vector<8x256xf32>
    %6 = tpu.matmul %4, %5, %cst {dimension_numbers = #tpu.dot_dimension_numbers<[1], [0], [0], [1], [0, 0, 1, 1], [], []>} : vector<8x512xbf16>, vector<512x256xbf16>, vector<8x256xf32> -> vector<8x256xf32>
    %7 = arith.addf %3, %6 : vector<8x256xf32>
    %c0_6 = arith.constant 0 : index
    %c0_7 = arith.constant 0 : index
    %8 = vector.load %arg7[%c0_6, %c0_7] : memref<8x256xf32, #tpu.memory_space<vmem>>, vector<8x256xf32>
    tpu.vector_store %arg7[%c0_6, %c0_7], %7 {strides = array<i32>} : memref<8x256xf32, #tpu.memory_space<vmem>>, vector<8x256xf32>,
    %c0_i32_8 = arith.constant 0 : i32
    %9 = arith.cmpi eq, %arg2, %c0_i32_8 : i32
    %10 = arith.extui %9 : i1 to i32
    %c0_i32_9 = arith.constant 0 : i32
    %11 = arith.cmpi ne, %10, %c0_i32_9 : i32
    scf.if %11 {
      %c0_10 = arith.constant 0 : index
      %c0_11 = arith.constant 0 : index
      %12 = vector.load %arg7[%c0_10, %c0_11] : memref<8x256xf32, #tpu.memory_space<vmem>>, vector<8x256xf32>
      %c0_12 = arith.constant 0 : index
      %c0_13 = arith.constant 0 : index
      %13 = vector.load %arg5[%c0_12, %c0_13] : memref<1x256xf32, #tpu.memory_space<vmem>>, vector<1x256xf32>
      %14 = vector.broadcast %13 : vector<1x256xf32> to vector<8x256xf32>
      %15 = arith.addf %12, %14 : vector<8x256xf32>
      %cst_14 = arith.constant 0.000000e+00 : f32
      %16 = vector.broadcast %cst_14 : f32 to vector<8x256xf32>
      %17 = arith.maximumf %15, %16 : vector<8x256xf32>
      %c0_15 = arith.constant 0 : index
      %c0_16 = arith.constant 0 : index
      %18 = vector.load %arg6[%c0_15, %c0_16] : memref<8x256xf32, #tpu.memory_space<vmem>>, vector<8x256xf32>
      tpu.vector_store %arg6[%c0_15, %c0_16], %17 {strides = array<i32>} : memref<8x256xf32, #tpu.memory_space<vmem>>, vector<8x256xf32>,
    } else {
    }
    return
  }
  func.func @transform_0(%arg0: i32, %arg1: i32, %arg2: i32) -> (i32, i32) {
    %c0_i32 = arith.constant 0 : i32
    return %arg0, %arg2 : i32, i32
  }
  func.func @transform_1(%arg0: i32, %arg1: i32, %arg2: i32) -> (i32, i32) {
    %c0_i32 = arith.constant 0 : i32
    return %arg2, %arg1 : i32, i32
  }
  func.func @transform_2(%arg0: i32, %arg1: i32, %arg2: i32) -> (i32, i32) {
    %c0_i32 = arith.constant 0 : i32
    %c0_i32_0 = arith.constant 0 : i32
    return %c0_i32, %arg1 : i32, i32
  }
  func.func @transform_3(%arg0: i32, %arg1: i32, %arg2: i32) -> (i32, i32) {
    %c0_i32 = arith.constant 0 : i32
    return %arg0, %arg1 : i32, i32
  }
}

module attributes {stable_mosaic.version = 11 : i64} {
  func.func @_mm_kernel(%arg0: i32, %arg1: i32, %arg2: i32, %arg3: memref<8x256xbf16, #tpu.memory_space<vmem>>, %arg4: memref<256x128xbf16, #tpu.memory_space<vmem>>, %arg5: memref<1x128xf32, #tpu.memory_space<vmem>>, %arg6: memref<8x128xf32, #tpu.memory_space<vmem>>, %arg7: memref<8x128xf32, #tpu.memory_space<vmem>>) attributes {dimension_semantics = [#tpu.dimension_semantics<parallel>, #tpu.dimension_semantics<parallel>, #tpu.dimension_semantics<arbitrary>], iteration_bounds = array<i64: 1, 1, 1>, scalar_prefetch = 0 : i64, scratch_operands = 1 : i64, tpu.core_type = #tpu.core_type<tc>, window_params = [{transform_indices = @transform_0, window_bounds = array<i64: 8, 256>}, {transform_indices = @transform_1, window_bounds = array<i64: 256, 128>}, {transform_indices = @transform_2, window_bounds = array<i64: 1, 128>}, {transform_indices = @transform_3, window_bounds = array<i64: 8, 128>}]} {
    %c0_i32 = arith.constant 0 : i32
    %0 = arith.cmpi eq, %arg2, %c0_i32 : i32
    %1 = arith.extui %0 : i1 to i32
    %c0_i32_0 = arith.constant 0 : i32
    %2 = arith.cmpi ne, %1, %c0_i32_0 : i32
    scf.if %2 {
      %cst_10 = arith.constant 0.000000e+00 : f32
      %12 = vector.broadcast %cst_10 : f32 to vector<8x128xf32>
      %c0_11 = arith.constant 0 : index
      %c0_12 = arith.constant 0 : index
      %13 = vector.load %arg7[%c0_11, %c0_12] : memref<8x128xf32, #tpu.memory_space<vmem>>, vector<8x128xf32>
      tpu.vector_store %arg7[%c0_11, %c0_12], %12 {strides = array<i32>} : memref<8x128xf32, #tpu.memory_space<vmem>>, vector<8x128xf32>,
    } else {
    }
    %c0 = arith.constant 0 : index
    %c0_1 = arith.constant 0 : index
    %3 = vector.load %arg7[%c0, %c0_1] : memref<8x128xf32, #tpu.memory_space<vmem>>, vector<8x128xf32>
    %c0_2 = arith.constant 0 : index
    %c0_3 = arith.constant 0 : index
    %4 = vector.load %arg3[%c0_2, %c0_3] : memref<8x256xbf16, #tpu.memory_space<vmem>>, vector<8x256xbf16>
    %c0_4 = arith.constant 0 : index
    %c0_5 = arith.constant 0 : index
    %5 = vector.load %arg4[%c0_4, %c0_5] : memref<256x128xbf16, #tpu.memory_space<vmem>>, vector<256x128xbf16>
    %cst = arith.constant dense<0.000000e+00> : vector<8x128xf32>
    %6 = tpu.matmul %4, %5, %cst {dimension_numbers = #tpu.dot_dimension_numbers<[1], [0], [0], [1], [0, 0, 1, 1], [], []>} : vector<8x256xbf16>, vector<256x128xbf16>, vector<8x128xf32> -> vector<8x128xf32>
    %7 = arith.addf %3, %6 : vector<8x128xf32>
    %c0_6 = arith.constant 0 : index
    %c0_7 = arith.constant 0 : index
    %8 = vector.load %arg7[%c0_6, %c0_7] : memref<8x128xf32, #tpu.memory_space<vmem>>, vector<8x128xf32>
    tpu.vector_store %arg7[%c0_6, %c0_7], %7 {strides = array<i32>} : memref<8x128xf32, #tpu.memory_space<vmem>>, vector<8x128xf32>,
    %c0_i32_8 = arith.constant 0 : i32
    %9 = arith.cmpi eq, %arg2, %c0_i32_8 : i32
    %10 = arith.extui %9 : i1 to i32
    %c0_i32_9 = arith.constant 0 : i32
    %11 = arith.cmpi ne, %10, %c0_i32_9 : i32
    scf.if %11 {
      %c0_10 = arith.constant 0 : index
      %c0_11 = arith.constant 0 : index
      %12 = vector.load %arg7[%c0_10, %c0_11] : memref<8x128xf32, #tpu.memory_space<vmem>>, vector<8x128xf32>
      %c0_12 = arith.constant 0 : index
      %c0_13 = arith.constant 0 : index
      %13 = vector.load %arg5[%c0_12, %c0_13] : memref<1x128xf32, #tpu.memory_space<vmem>>, vector<1x128xf32>
      %14 = vector.broadcast %13 : vector<1x128xf32> to vector<8x128xf32>
      %15 = arith.addf %12, %14 : vector<8x128xf32>
      %c0_14 = arith.constant 0 : index
      %c0_15 = arith.constant 0 : index
      %16 = vector.load %arg6[%c0_14, %c0_15] : memref<8x128xf32, #tpu.memory_space<vmem>>, vector<8x128xf32>
      tpu.vector_store %arg6[%c0_14, %c0_15], %15 {strides = array<i32>} : memref<8x128xf32, #tpu.memory_space<vmem>>, vector<8x128xf32>,
    } else {
    }
    return
  }
  func.func @transform_0(%arg0: i32, %arg1: i32, %arg2: i32) -> (i32, i32) {
    %c0_i32 = arith.constant 0 : i32
    return %arg0, %arg2 : i32, i32
  }
  func.func @transform_1(%arg0: i32, %arg1: i32, %arg2: i32) -> (i32, i32) {
    %c0_i32 = arith.constant 0 : i32
    return %arg2, %arg1 : i32, i32
  }
  func.func @transform_2(%arg0: i32, %arg1: i32, %arg2: i32) -> (i32, i32) {
    %c0_i32 = arith.constant 0 : i32
    %c0_i32_0 = arith.constant 0 : i32
    return %c0_i32, %arg1 : i32, i32
  }
  func.func @transform_3(%arg0: i32, %arg1: i32, %arg2: i32) -> (i32, i32) {
    %c0_i32 = arith.constant 0 : i32
    return %arg0, %arg1 : i32, i32
  }
}

module attributes {stable_mosaic.version = 11 : i64} {
  func.func @_mm_kernel(%arg0: i32, %arg1: i32, %arg2: i32, %arg3: memref<8x23xf32, #tpu.memory_space<vmem>>, %arg4: memref<23x256xf32, #tpu.memory_space<vmem>>, %arg5: memref<1x256xf32, #tpu.memory_space<vmem>>, %arg6: memref<8x256xf32, #tpu.memory_space<vmem>>, %arg7: memref<8x256xf32, #tpu.memory_space<vmem>>) attributes {dimension_semantics = [#tpu.dimension_semantics<parallel>, #tpu.dimension_semantics<parallel>, #tpu.dimension_semantics<arbitrary>], iteration_bounds = array<i64: 1, 2, 1>, scalar_prefetch = 0 : i64, scratch_operands = 1 : i64, tpu.core_type = #tpu.core_type<tc>, window_params = [{transform_indices = @transform_0, window_bounds = array<i64: 8, 23>}, {transform_indices = @transform_1, window_bounds = array<i64: 23, 256>}, {transform_indices = @transform_2, window_bounds = array<i64: 1, 256>}, {transform_indices = @transform_3, window_bounds = array<i64: 8, 256>}]} {
    %c0_i32 = arith.constant 0 : i32
    %0 = arith.cmpi eq, %arg2, %c0_i32 : i32
    %1 = arith.extui %0 : i1 to i32
    %c0_i32_0 = arith.constant 0 : i32
    %2 = arith.cmpi ne, %1, %c0_i32_0 : i32
    scf.if %2 {
      %cst_10 = arith.constant 0.000000e+00 : f32
      %12 = vector.broadcast %cst_10 : f32 to vector<8x256xf32>
      %c0_11 = arith.constant 0 : index
      %c0_12 = arith.constant 0 : index
      %13 = vector.load %arg7[%c0_11, %c0_12] : memref<8x256xf32, #tpu.memory_space<vmem>>, vector<8x256xf32>
      tpu.vector_store %arg7[%c0_11, %c0_12], %12 {strides = array<i32>} : memref<8x256xf32, #tpu.memory_space<vmem>>, vector<8x256xf32>,
    } else {
    }
    %c0 = arith.constant 0 : index
    %c0_1 = arith.constant 0 : index
    %3 = vector.load %arg7[%c0, %c0_1] : memref<8x256xf32, #tpu.memory_space<vmem>>, vector<8x256xf32>
    %c0_2 = arith.constant 0 : index
    %c0_3 = arith.constant 0 : index
    %4 = vector.load %arg3[%c0_2, %c0_3] : memref<8x23xf32, #tpu.memory_space<vmem>>, vector<8x23xf32>
    %c0_4 = arith.constant 0 : index
    %c0_5 = arith.constant 0 : index
    %5 = vector.load %arg4[%c0_4, %c0_5] : memref<23x256xf32, #tpu.memory_space<vmem>>, vector<23x256xf32>
    %cst = arith.constant dense<0.000000e+00> : vector<8x256xf32>
    %6 = tpu.matmul %4, %5, %cst {dimension_numbers = #tpu.dot_dimension_numbers<[1], [0], [0], [1], [0, 0, 1, 1], [], []>} : vector<8x23xf32>, vector<23x256xf32>, vector<8x256xf32> -> vector<8x256xf32>
    %7 = arith.addf %3, %6 : vector<8x256xf32>
    %c0_6 = arith.constant 0 : index
    %c0_7 = arith.constant 0 : index
    %8 = vector.load %arg7[%c0_6, %c0_7] : memref<8x256xf32, #tpu.memory_space<vmem>>, vector<8x256xf32>
    tpu.vector_store %arg7[%c0_6, %c0_7], %7 {strides = array<i32>} : memref<8x256xf32, #tpu.memory_space<vmem>>, vector<8x256xf32>,
    %c0_i32_8 = arith.constant 0 : i32
    %9 = arith.cmpi eq, %arg2, %c0_i32_8 : i32
    %10 = arith.extui %9 : i1 to i32
    %c0_i32_9 = arith.constant 0 : i32
    %11 = arith.cmpi ne, %10, %c0_i32_9 : i32
    scf.if %11 {
      %c0_10 = arith.constant 0 : index
      %c0_11 = arith.constant 0 : index
      %12 = vector.load %arg7[%c0_10, %c0_11] : memref<8x256xf32, #tpu.memory_space<vmem>>, vector<8x256xf32>
      %c0_12 = arith.constant 0 : index
      %c0_13 = arith.constant 0 : index
      %13 = vector.load %arg5[%c0_12, %c0_13] : memref<1x256xf32, #tpu.memory_space<vmem>>, vector<1x256xf32>
      %14 = vector.broadcast %13 : vector<1x256xf32> to vector<8x256xf32>
      %15 = arith.addf %12, %14 : vector<8x256xf32>
      %c0_14 = arith.constant 0 : index
      %c0_15 = arith.constant 0 : index
      %16 = vector.load %arg6[%c0_14, %c0_15] : memref<8x256xf32, #tpu.memory_space<vmem>>, vector<8x256xf32>
      tpu.vector_store %arg6[%c0_14, %c0_15], %15 {strides = array<i32>} : memref<8x256xf32, #tpu.memory_space<vmem>>, vector<8x256xf32>,
    } else {
    }
    return
  }
  func.func @transform_0(%arg0: i32, %arg1: i32, %arg2: i32) -> (i32, i32) {
    %c0_i32 = arith.constant 0 : i32
    return %arg0, %arg2 : i32, i32
  }
  func.func @transform_1(%arg0: i32, %arg1: i32, %arg2: i32) -> (i32, i32) {
    %c0_i32 = arith.constant 0 : i32
    return %arg2, %arg1 : i32, i32
  }
  func.func @transform_2(%arg0: i32, %arg1: i32, %arg2: i32) -> (i32, i32) {
    %c0_i32 = arith.constant 0 : i32
    %c0_i32_0 = arith.constant 0 : i32
    return %c0_i32, %arg1 : i32, i32
  }
  func.func @transform_3(%arg0: i32, %arg1: i32, %arg2: i32) -> (i32, i32) {
    %c0_i32 = arith.constant 0 : i32
    return %arg0, %arg1 : i32, i32
  }
}

module attributes {stable_mosaic.version = 11 : i64} {
  func.func @_grid_sample_kernel(%arg0: i32, %arg1: memref<1x2x512xf32, #tpu.memory_space<vmem>>, %arg2: memref<1x48x32xf32, #tpu.memory_space<vmem>>, %arg3: memref<1x3x512xf32, #tpu.memory_space<vmem>>) attributes {dimension_semantics = [#tpu.dimension_semantics<parallel>], iteration_bounds = array<i64: 2>, scalar_prefetch = 0 : i64, scratch_operands = 0 : i64, tpu.core_type = #tpu.core_type<tc>, window_params = [{transform_indices = @transform_0, window_bounds = array<i64: 1, 2, 512>}, {transform_indices = @transform_1, window_bounds = array<i64: 1, 48, 32>}, {transform_indices = @transform_2, window_bounds = array<i64: 1, 3, 512>}]} {
    %c0 = arith.constant 0 : index
    %c0_0 = arith.constant 0 : index
    %c0_1 = arith.constant 0 : index
    %0 = vector.load %arg1[%c0, %c0_0, %c0_1] : memref<1x2x512xf32, #tpu.memory_space<vmem>>, vector<1x2x512xf32>
    %1 = vector.shape_cast %0 : vector<1x2x512xf32> to vector<2x512xf32>
    %2 = vector.extract_strided_slice %1 {offsets = [0, 0], sizes = [1, 512], strides = [1, 1]} : vector<2x512xf32> to vector<1x512xf32>
    %3 = vector.extract_strided_slice %1 {offsets = [1, 0], sizes = [1, 512], strides = [1, 1]} : vector<2x512xf32> to vector<1x512xf32>
    %cst = arith.constant 1.000000e+00 : f32
    %4 = vector.broadcast %cst : f32 to vector<1x512xf32>
    %5 = arith.addf %2, %4 : vector<1x512xf32>
    %cst_2 = arith.constant 5.000000e-01 : f32
    %6 = vector.broadcast %cst_2 : f32 to vector<1x512xf32>
    %7 = arith.mulf %5, %6 : vector<1x512xf32>
    %cst_3 = arith.constant 3.100000e+01 : f32
    %8 = vector.broadcast %cst_3 : f32 to vector<1x512xf32>
    %9 = arith.mulf %7, %8 : vector<1x512xf32>
    %cst_4 = arith.constant 0.000000e+00 : f32
    %cst_5 = arith.constant 3.100000e+01 : f32
    %10 = vector.broadcast %cst_4 : f32 to vector<1x512xf32>
    %11 = arith.maximumf %10, %9 : vector<1x512xf32>
    %12 = vector.broadcast %cst_5 : f32 to vector<1x512xf32>
    %13 = arith.minimumf %12, %11 : vector<1x512xf32>
    %cst_6 = arith.constant 1.000000e+00 : f32
    %14 = vector.broadcast %cst_6 : f32 to vector<1x512xf32>
    %15 = arith.addf %3, %14 : vector<1x512xf32>
    %cst_7 = arith.constant 5.000000e-01 : f32
    %16 = vector.broadcast %cst_7 : f32 to vector<1x512xf32>
    %17 = arith.mulf %15, %16 : vector<1x512xf32>
    %cst_8 = arith.constant 1.500000e+01 : f32
    %18 = vector.broadcast %cst_8 : f32 to vector<1x512xf32>
    %19 = arith.mulf %17, %18 : vector<1x512xf32>
    %cst_9 = arith.constant 0.000000e+00 : f32
    %cst_10 = arith.constant 1.500000e+01 : f32
    %20 = vector.broadcast %cst_9 : f32 to vector<1x512xf32>
    %21 = arith.maximumf %20, %19 : vector<1x512xf32>
    %22 = vector.broadcast %cst_10 : f32 to vector<1x512xf32>
    %23 = arith.minimumf %22, %21 : vector<1x512xf32>
    %24 = tpu.iota {dimensions = array<i32: 0>} : vector<32x512xi32>
    %25 = arith.sitofp %24 : vector<32x512xi32> to vector<32x512xf32>
    %26 = tpu.iota {dimensions = array<i32: 0>} : vector<16x512xi32>
    %27 = arith.sitofp %26 : vector<16x512xi32> to vector<16x512xf32>
    %28 = vector.broadcast %13 : vector<1x512xf32> to vector<32x512xf32>
    %29 = arith.subf %25, %28 : vector<32x512xf32>
    %30 = math.absf %29 : vector<32x512xf32>
    %cst_11 = arith.constant 1.000000e+00 : f32
    %31 = vector.broadcast %cst_11 : f32 to vector<32x512xf32>
    %32 = arith.subf %31, %30 : vector<32x512xf32>
    %cst_12 = arith.constant 0.000000e+00 : f32
    %33 = vector.broadcast %cst_12 : f32 to vector<32x512xf32>
    %34 = arith.maximumf %33, %32 : vector<32x512xf32>
    %35 = vector.broadcast %23 : vector<1x512xf32> to vector<16x512xf32>
    %36 = arith.subf %27, %35 : vector<16x512xf32>
    %37 = math.absf %36 : vector<16x512xf32>
    %cst_13 = arith.constant 1.000000e+00 : f32
    %38 = vector.broadcast %cst_13 : f32 to vector<16x512xf32>
    %39 = arith.subf %38, %37 : vector<16x512xf32>
    %cst_14 = arith.constant 0.000000e+00 : f32
    %40 = vector.broadcast %cst_14 : f32 to vector<16x512xf32>
    %41 = arith.maximumf %40, %39 : vector<16x512xf32>
    %c0_15 = arith.constant 0 : index
    %c0_16 = arith.constant 0 : index
    %c0_17 = arith.constant 0 : index
    %42 = vector.load %arg2[%c0_15, %c0_16, %c0_17] : memref<1x48x32xf32, #tpu.memory_space<vmem>>, vector<1x48x32xf32>
    %43 = vector.shape_cast %42 : vector<1x48x32xf32> to vector<48x32xf32>
    %cst_18 = arith.constant dense<0.000000e+00> : vector<48x512xf32>
    %44 = tpu.matmul %43, %34, %cst_18 {dimension_numbers = #tpu.dot_dimension_numbers<[1], [0], [0], [1], [0, 0, 1, 1], [], []>} : vector<48x32xf32>, vector<32x512xf32>, vector<48x512xf32> -> vector<48x512xf32>
    %45 = vector.shape_cast %44 : vector<48x512xf32> to vector<3x16x512xf32>
    %46 = vector.shape_cast %41 : vector<16x512xf32> to vector<1x16x512xf32>
    %47 = vector.broadcast %46 : vector<1x16x512xf32> to vector<3x16x512xf32>
    %48 = arith.mulf %45, %47 : vector<3x16x512xf32>
    %cst_19 = arith.constant dense<0.000000e+00> : vector<3x512xf32>
    %49 = vector.multi_reduction <add>, %48, %cst_19 [1] : vector<3x16x512xf32> to vector<3x512xf32>
    %c0_20 = arith.constant 0 : index
    %c0_21 = arith.constant 0 : index
    %c0_22 = arith.constant 0 : index
    %50 = vector.load %arg3[%c0_20, %c0_21, %c0_22] : memref<1x3x512xf32, #tpu.memory_space<vmem>>, vector<1x3x512xf32>
    %51 = vector.shape_cast %50 : vector<1x3x512xf32> to vector<3x512xf32>
    %52 = vector.shape_cast %49 : vector<3x512xf32> to vector<1x3x512xf32>
    tpu.vector_store %arg3[%c0_20, %c0_21, %c0_22], %52 {strides = array<i32>} : memref<1x3x512xf32, #tpu.memory_space<vmem>>, vector<1x3x512xf32>,
    return
  }
  func.func @transform_0(%arg0: i32) -> (i32, i32, i32) {
    %c0_i32 = arith.constant 0 : i32
    %c0_i32_0 = arith.constant 0 : i32
    %c0_i32_1 = arith.constant 0 : i32
    return %arg0, %c0_i32, %c0_i32_0 : i32, i32, i32
  }
  func.func @transform_1(%arg0: i32) -> (i32, i32, i32) {
    %c0_i32 = arith.constant 0 : i32
    %c0_i32_0 = arith.constant 0 : i32
    %c0_i32_1 = arith.constant 0 : i32
    return %arg0, %c0_i32, %c0_i32_0 : i32, i32, i32
  }
  func.func @transform_2(%arg0: i32) -> (i32, i32, i32) {
    %c0_i32 = arith.constant 0 : i32
    %c0_i32_0 = arith.constant 0 : i32
    %c0_i32_1 = arith.constant 0 : i32
    return %arg0, %c0_i32, %c0_i32_0 : i32, i32, i32
  }
}

</mosaic_0001>

<bundles_post_ra>
// kernel: tps_forward.8
= control target key start
LH: loop header
LB: loop body
LE: loop exit
PB: predicated region body
PF: predicated region fallthrough
CT: control target
= control target key end

     0   :  { %s1106_s12 = smov 0   ;;  %s1108_s13 = smov 0   ;;  %s1257_s0 = inlined_call_operand.vmem [shape: bf16[1024,27], index: 0, kind: input, shape index: {}]   ;;  %s1258_s1 = inlined_call_operand.vmem [shape: bf16[27,128], index: 1, kind: input, shape index: {}]   ;;  %s1259_s2 = inlined_call_operand.vmem [shape: f32[1,128], index: 2, kind: input, shape index: {}]   ;;  %s1260_s3 = inlined_call_operand.vmem [shape: f32[1024,128], index: 3, kind: output, shape index: {}]  }
   0x1   :  { %s1110_s14 = smov 0  }
   0x2 LB: > { %s32_s15 = sadd.s32 1, %s1079_s13  ;;  %p916_p0 = scmp.ge.s32.totalorder %s1083_s14, 1  ;;  %s1083_s14 = sphi %s1110_s14, %s13_s14   ;;  %s1079_s13 = sphi %s1108_s13, %s1262_s13   ;;  %s1075_s12 = sphi %s1106_s12, %s1261_s12  }
   0x3   : > { %p34_p1 = scmp.ge.s32.totalorder %s32_s15, 4  ;;  %p188_p2 = scmp.lt.s32.totalorder %s1083_s14, 5 }
   0x5   : > { %s1264_s15 = smov (%p34_p1, %s32_s15), 0  ;;  %p189_p3 = pnand %p916_p0, %p188_p2 }
   0x6   : > { %s917_s20 = sshll.u32 (!%p189_p3), %s1075_s12, 5 }
   0x7   : > { %192 = sbr.rel (%p189_p3) target bundleno = 220 (0xdc), region = 32  ;;  %p230_p4 = scmp.lt.s32.totalorder (!%p189_p3), %s917_s20, 127 }
   0xc   : > { %v991_v0 = vld [vmem:[%s1258_s1 + $0x8] sm:$0xf]  ;;  %v1028_v1 = vld [vmem:[%s1258_s1 + $0x8] sm:$0x30]  ;;  %vm504_vm0 = vcmask 1044480   ;;  %vm505_vm1 = vcmask 1045504  }
   0xd   : > { %v992_v2 = vor.u32 %v1028_v1, %v991_v0  ;;  %v1085_v3 = vmov 65535   ;;  %s1266_s20 = smov (!%p230_p4, %s917_s20), 127  ;;  %v1027_v7 = vld [vmem:[%s1258_s1] sm:$0xff]  ;;  %vm455_vm2 = vcmask 220160  }
   0xe   : > { %v506_v4 = vsel %vm504_vm0, 4294967295, %v1085_v3  ;;  %s918_s23 = sshll.u32 %s1266_s20, 2  ;;  %v1176_v24 = vld [vmem:[%s1259_s2] ss:$0 sm:$0xff]  ;;  %s920_s29 = sshll.u32 %s1266_s20, 3 }
   0xf   : > { %v507_v5 = vsel %vm505_vm1, %v506_v4, 0  ;;  %s1139_s26 = scalar_lea.vmem %s1257_s0, %s918_s23  ;;  %s1184_s5 = scalar_lea.vmem %s1260_s3, %s920_s29 }
  0x10   : > { %v509_v6 = vand.u32 %v992_v2, %v507_v5  ;;  %v1011_v8 = vld [vmem:[%s1139_s26] sm:$0xff]  ;;  %v1012_v12 = vld [vmem:[%s1139_s26 + $0x8] sm:$0xff]  ;;  %v1013_v16 = vld [vmem:[%s1139_s26 + $0x10] sm:$0xff] }
  0x11   : > { %v1015_v9 = vld [vmem:[%s1139_s26 + $0x20] sm:$0xff]  ;;  %v1016_v13 = vld [vmem:[%s1139_s26 + $0x28] sm:$0xff]  ;;  %v1017_v17 = vld [vmem:[%s1139_s26 + $0x30] sm:$0xff] }
  0x12   : > { %517 = vmatpush.bf16.msra.mxu0 %v509_v6  ;;  %1029 = vmatpush.bf16.msra.mxu1 %v509_v6  ;;  %v1019_v10 = vld [vmem:[%s1139_s26 + $0x40] sm:$0xff]  ;;  %v1020_v14 = vld [vmem:[%s1139_s26 + $0x48] sm:$0xff]  ;;  %v1021_v18 = vld [vmem:[%s1139_s26 + $0x50] sm:$0xff] }
  0x13   : > { %1030 = vmatpush.bf16.msra.mxu2 %v509_v6  ;;  %1031 = vmatpush.bf16.msra.mxu3 %v509_v6  ;;  %v1023_v11 = vld [vmem:[%s1139_s26 + $0x60] sm:$0xff]  ;;  %v1024_v15 = vld [vmem:[%s1139_s26 + $0x68] sm:$0xff]  ;;  %v1025_v19 = vld [vmem:[%s1139_s26 + $0x70] sm:$0xff] }
  0x14   : > { %v1014_v20 = vld [vmem:[%s1139_s26 + $0x18] sm:$0xff] }
  0x15   : > { %v1018_v21 = vld [vmem:[%s1139_s26 + $0x38] sm:$0xff] }
  0x16   : > { %518 = vmatpush.bf16.msra.mxu0 %v1027_v7  ;;  %1032 = vmatpush.bf16.msra.mxu1 %v1027_v7  ;;  %v1022_v22 = vld [vmem:[%s1139_s26 + $0x58] sm:$0xff] }
  0x17   : > { %1033 = vmatpush.bf16.msra.mxu2 %v1027_v7  ;;  %1034 = vmatpush.bf16.msra.mxu3 %v1027_v7  ;;  %v1026_v23 = vld [vmem:[%s1139_s26 + $0x78] sm:$0xff] }
  0x19   : > { %993 = vmatmul.msk.bf16.vlgmr.msra.gmra.mxu0 %vm455_vm2, %v1011_v8  ;;  %997 = vmatmul.msk.bf16.vlgmr.msra.gmra.mxu1 %vm455_vm2, %v1015_v9 }
  0x1a   : > { %1001 = vmatmul.msk.bf16.vlgmr.msra.gmra.mxu2 %vm455_vm2, %v1019_v10  ;;  %1005 = vmatmul.msk.bf16.vlgmr.msra.gmra.mxu3 %vm455_vm2, %v1023_v11 }
  0x29   : > { %994 = vmatmul.msk.bf16.gmra.mxu0 %vm455_vm2, %v1012_v12  ;;  %998 = vmatmul.msk.bf16.gmra.mxu1 %vm455_vm2, %v1016_v13 }
  0x2a   : > { %1002 = vmatmul.msk.bf16.gmra.mxu2 %vm455_vm2, %v1020_v14  ;;  %1006 = vmatmul.msk.bf16.gmra.mxu3 %vm455_vm2, %v1024_v15 }
  0x39   : > { %995 = vmatmul.msk.bf16.gmra.mxu0 %vm455_vm2, %v1013_v16  ;;  %999 = vmatmul.msk.bf16.gmra.mxu1 %vm455_vm2, %v1017_v17 }
  0x3a   : > { %1003 = vmatmul.msk.bf16.gmra.mxu2 %vm455_vm2, %v1021_v18  ;;  %1007 = vmatmul.msk.bf16.gmra.mxu3 %vm455_vm2, %v1025_v19 }
  0x49   : > { %996 = vmatmul.msk.bf16.gmra.mxu0 %vm455_vm2, %v1014_v20  ;;  %1000 = vmatmul.msk.bf16.gmra.mxu1 %vm455_vm2, %v1018_v21 }
  0x4a   : > { %1004 = vmatmul.msk.bf16.gmra.mxu2 %vm455_vm2, %v1022_v22  ;;  %1008 = vmatmul.msk.bf16.gmra.mxu3 %vm455_vm2, %v1026_v23 }
  0x96   : > { %v520_v25 = vpop.f32.mrf.mxu0  ;;  %v540_v26 = vpop.f32.mrf.mxu1 }
  0x97   : > { %v703_v27 = vadd.f32 %v1176_v24, %v520_v25  ;;  %v711_v28 = vadd.f32 %v1176_v24, %v540_v26 }
  0x99   : > { %v735_v29 = vmax.f32 %v703_v27, 0.0  ;;  %v743_v30 = vmax.f32 %v711_v28, 0.0 }
  0x9b   : > { %767 = vst [vmem:[%s1184_s5] sm:$0xff] %v735_v29 }
  0x9c   : > { %775 = vst [vmem:[%s1184_s5 + $0x40] sm:$0xff] %v743_v30 }
  0x9d   : > { %v560_v31 = vpop.f32.mrf.mxu2  ;;  %v580_v32 = vpop.f32.mrf.mxu3 }
  0x9e   : > { %v719_v33 = vadd.f32 %v1176_v24, %v560_v31  ;;  %v727_v34 = vadd.f32 %v1176_v24, %v580_v32  ;;  %v522_v35 = vpop.f32.mrf.mxu0  ;;  %v542_v36 = vpop.f32.mrf.mxu1 }
  0x9f   : > { %v704_v37 = vadd.f32 %v1176_v24, %v522_v35  ;;  %v712_v38 = vadd.f32 %v1176_v24, %v542_v36 }
  0xa0   : > { %v751_v39 = vmax.f32 %v719_v33, 0.0  ;;  %v759_v40 = vmax.f32 %v727_v34, 0.0 }
  0xa1   : > { %v736_v41 = vmax.f32 %v704_v37, 0.0  ;;  %v744_v42 = vmax.f32 %v712_v38, 0.0 }
  0xa2   : > { %783 = vst [vmem:[%s1184_s5 + $0x80] sm:$0xff] %v751_v39 }
  0xa3   : > { %791 = vst [vmem:[%s1184_s5 + $0xc0] sm:$0xff] %v759_v40 }
  0xa4   : > { %768 = vst [vmem:[%s1184_s5 + $0x8] sm:$0xff] %v736_v41 }
  0xa5   : > { %776 = vst [vmem:[%s1184_s5 + $0x48] sm:$0xff] %v744_v42  ;;  %v562_v43 = vpop.f32.mrf.mxu2  ;;  %v582_v44 = vpop.f32.mrf.mxu3 }
  0xa6   : > { %v720_v45 = vadd.f32 %v1176_v24, %v562_v43  ;;  %v728_v46 = vadd.f32 %v1176_v24, %v582_v44  ;;  %v525_v47 = vpop.f32.mrf.mxu0  ;;  %v545_v48 = vpop.f32.mrf.mxu1 }
  0xa7   : > { %v705_v49 = vadd.f32 %v1176_v24, %v525_v47  ;;  %v713_v50 = vadd.f32 %v1176_v24, %v545_v48 }
  0xa8   : > { %v752_v51 = vmax.f32 %v720_v45, 0.0  ;;  %v760_v52 = vmax.f32 %v728_v46, 0.0 }
  0xa9   : > { %v737_v53 = vmax.f32 %v705_v49, 0.0  ;;  %v745_v54 = vmax.f32 %v713_v50, 0.0 }
  0xaa   : > { %784 = vst [vmem:[%s1184_s5 + $0x88] sm:$0xff] %v752_v51 }
  0xab   : > { %792 = vst [vmem:[%s1184_s5 + $0xc8] sm:$0xff] %v760_v52 }
  0xac   : > { %769 = vst [vmem:[%s1184_s5 + $0x10] sm:$0xff] %v737_v53 }
  0xad   : > { %777 = vst [vmem:[%s1184_s5 + $0x50] sm:$0xff] %v745_v54  ;;  %v565_v55 = vpop.f32.mrf.mxu2  ;;  %v585_v56 = vpop.f32.mrf.mxu3 }
  0xae   : > { %v721_v57 = vadd.f32 %v1176_v24, %v565_v55  ;;  %v729_v58 = vadd.f32 %v1176_v24, %v585_v56  ;;  %v527_v59 = vpop.f32.mrf.mxu0  ;;  %v547_v60 = vpop.f32.mrf.mxu1 }
  0xaf   : > { %v706_v61 = vadd.f32 %v1176_v24, %v527_v59  ;;  %v714_v62 = vadd.f32 %v1176_v24, %v547_v60 }
  0xb0   : > { %v753_v63 = vmax.f32 %v721_v57, 0.0  ;;  %v761_v0 = vmax.f32 %v729_v58, 0.0 }
  0xb1   : > { %v738_v1 = vmax.f32 %v706_v61, 0.0  ;;  %v746_v2 = vmax.f32 %v714_v62, 0.0 }
  0xb2   : > { %785 = vst [vmem:[%s1184_s5 + $0x90] sm:$0xff] %v753_v63 }
  0xb3   : > { %793 = vst [vmem:[%s1184_s5 + $0xd0] sm:$0xff] %v761_v0 }
  0xb4   : > { %770 = vst [vmem:[%s1184_s5 + $0x18] sm:$0xff] %v738_v1 }
  0xb5   : > { %778 = vst [vmem:[%s1184_s5 + $0x58] sm:$0xff] %v746_v2  ;;  %v567_v3 = vpop.f32.mrf.mxu2  ;;  %v587_v4 = vpop.f32.mrf.mxu3 }
  0xb6   : > { %v722_v5 = vadd.f32 %v1176_v24, %v567_v3  ;;  %v730_v6 = vadd.f32 %v1176_v24, %v587_v4  ;;  %v530_v7 = vpop.f32.mrf.mxu0  ;;  %v550_v8 = vpop.f32.mrf.mxu1 }
  0xb7   : > { %v707_v9 = vadd.f32 %v1176_v24, %v530_v7  ;;  %v715_v10 = vadd.f32 %v1176_v24, %v550_v8 }
  0xb8   : > { %v754_v11 = vmax.f32 %v722_v5, 0.0  ;;  %v762_v12 = vmax.f32 %v730_v6, 0.0 }
  0xb9   : > { %v739_v13 = vmax.f32 %v707_v9, 0.0  ;;  %v747_v14 = vmax.f32 %v715_v10, 0.0 }
  0xba   : > { %786 = vst [vmem:[%s1184_s5 + $0x98] sm:$0xff] %v754_v11 }
  0xbb   : > { %794 = vst [vmem:[%s1184_s5 + $0xd8] sm:$0xff] %v762_v12 }
  0xbc   : > { %771 = vst [vmem:[%s1184_s5 + $0x20] sm:$0xff] %v739_v13 }
  0xbd   : > { %779 = vst [vmem:[%s1184_s5 + $0x60] sm:$0xff] %v747_v14  ;;  %v570_v15 = vpop.f32.mrf.mxu2  ;;  %v590_v16 = vpop.f32.mrf.mxu3 }
  0xbe   : > { %v723_v17 = vadd.f32 %v1176_v24, %v570_v15  ;;  %v731_v18 = vadd.f32 %v1176_v24, %v590_v16  ;;  %v532_v19 = vpop.f32.mrf.mxu0  ;;  %v552_v20 = vpop.f32.mrf.mxu1 }
  0xbf   : > { %v708_v21 = vadd.f32 %v1176_v24, %v532_v19  ;;  %v716_v22 = vadd.f32 %v1176_v24, %v552_v20 }
  0xc0   : > { %v755_v23 = vmax.f32 %v723_v17, 0.0  ;;  %v763_v25 = vmax.f32 %v731_v18, 0.0 }
  0xc1   : > { %v740_v26 = vmax.f32 %v708_v21, 0.0  ;;  %v748_v27 = vmax.f32 %v716_v22, 0.0 }
  0xc2   : > { %787 = vst [vmem:[%s1184_s5 + $0xa0] sm:$0xff] %v755_v23 }
  0xc3   : > { %795 = vst [vmem:[%s1184_s5 + $0xe0] sm:$0xff] %v763_v25 }
  0xc4   : > { %772 = vst [vmem:[%s1184_s5 + $0x28] sm:$0xff] %v740_v26 }
  0xc5   : > { %780 = vst [vmem:[%s1184_s5 + $0x68] sm:$0xff] %v748_v27  ;;  %v572_v28 = vpop.f32.mrf.mxu2  ;;  %v592_v29 = vpop.f32.mrf.mxu3 }
  0xc6   : > { %v724_v30 = vadd.f32 %v1176_v24, %v572_v28  ;;  %v732_v31 = vadd.f32 %v1176_v24, %v592_v29  ;;  %v535_v32 = vpop.f32.mrf.mxu0  ;;  %v555_v33 = vpop.f32.mrf.mxu1 }
  0xc7   : > { %v709_v34 = vadd.f32 %v1176_v24, %v535_v32  ;;  %v717_v35 = vadd.f32 %v1176_v24, %v555_v33 }
  0xc8   : > { %v756_v36 = vmax.f32 %v724_v30, 0.0  ;;  %v764_v37 = vmax.f32 %v732_v31, 0.0 }
  0xc9   : > { %v741_v38 = vmax.f32 %v709_v34, 0.0  ;;  %v749_v39 = vmax.f32 %v717_v35, 0.0 }
  0xca   : > { %788 = vst [vmem:[%s1184_s5 + $0xa8] sm:$0xff] %v756_v36 }
  0xcb   : > { %796 = vst [vmem:[%s1184_s5 + $0xe8] sm:$0xff] %v764_v37 }
  0xcc   : > { %773 = vst [vmem:[%s1184_s5 + $0x30] sm:$0xff] %v741_v38 }
  0xcd   : > { %781 = vst [vmem:[%s1184_s5 + $0x70] sm:$0xff] %v749_v39  ;;  %v575_v40 = vpop.f32.mrf.mxu2  ;;  %v595_v41 = vpop.f32.mrf.mxu3 }
  0xce   : > { %v725_v42 = vadd.f32 %v1176_v24, %v575_v40  ;;  %v733_v43 = vadd.f32 %v1176_v24, %v595_v41  ;;  %v537_v44 = vpop.f32.mrf.mxu0  ;;  %v557_v45 = vpop.f32.mrf.mxu1 }
  0xcf   : > { %v710_v46 = vadd.f32 %v1176_v24, %v537_v44  ;;  %v718_v47 = vadd.f32 %v1176_v24, %v557_v45 }
  0xd0   : > { %v757_v48 = vmax.f32 %v725_v42, 0.0  ;;  %v765_v49 = vmax.f32 %v733_v43, 0.0 }
  0xd1   : > { %v742_v50 = vmax.f32 %v710_v46, 0.0  ;;  %v750_v51 = vmax.f32 %v718_v47, 0.0 }
  0xd2   : > { %789 = vst [vmem:[%s1184_s5 + $0xb0] sm:$0xff] %v757_v48 }
  0xd3   : > { %797 = vst [vmem:[%s1184_s5 + $0xf0] sm:$0xff] %v765_v49 }
  0xd4   : > { %774 = vst [vmem:[%s1184_s5 + $0x38] sm:$0xff] %v742_v50 }
  0xd5   : > { %782 = vst [vmem:[%s1184_s5 + $0x78] sm:$0xff] %v750_v51  ;;  %v577_v52 = vpop.f32.mrf.mxu2  ;;  %v597_v53 = vpop.f32.mrf.mxu3 }
  0xd6   : > { %v726_v54 = vadd.f32 %v1176_v24, %v577_v52  ;;  %v734_v55 = vadd.f32 %v1176_v24, %v597_v53 }
  0xd8   : > { %v758_v56 = vmax.f32 %v726_v54, 0.0  ;;  %v766_v57 = vmax.f32 %v734_v55, 0.0 }
  0xda   : > { %790 = vst [vmem:[%s1184_s5 + $0xb8] sm:$0xff] %v758_v56 }
  0xdb   : > { %798 = vst [vmem:[%s1184_s5 + $0xf8] sm:$0xff] %v766_v57 }
  0xdc PF: > { %s13_s14 = sadd.s32 1, %s1083_s14   ;;  %s1261_s12 = smov %s1079_s13 }
  0xdd   : > { %p10_p5 = scmp.ge.s32.totalorder %s13_s14, 6   ;;  %s1262_s13 = smov %s1264_s15 }
  0xdf   :  { %12 = sbr.rel (!%p10_p5) target bundleno = 2 (0x2), region = 76 }

// kernel: tps_forward.9
= control target key start
LH: loop header
LB: loop body
LE: loop exit
PB: predicated region body
PF: predicated region fallthrough
CT: control target
= control target key end

     0   :  { %vm867_vm0 = vcmask 523264   ;;  %s3038_s1 = inlined_call_operand.vmem [shape: bf16[576,128], index: 1, kind: input, shape index: {}]   ;;  %s3039_s0 = inlined_call_operand.vmem [shape: bf16[256,576], index: 0, kind: input, shape index: {}]   ;;  %s3040_s2 = inlined_call_operand.vmem [shape: f32[1,128], index: 2, kind: input, shape index: {}]   ;;  %s3041_s3 = inlined_call_operand.vmem [shape: f32[256,128], index: 3, kind: output, shape index: {}]  }
   0x1   :  { %v2131_v0 = vld [vmem:[%s3038_s1 + $0x38] sm:$0xff]  ;;  %v2130_v1 = vld [vmem:[%s3038_s1 + $0x30] sm:$0xff]  ;;  %v2129_v2 = vld [vmem:[%s3038_s1 + $0x28] sm:$0xff] }
   0x2   :  { %2160 = vmatpush.bf16.msra.mxu1 %v2131_v0  ;;  %2161 = vmatpush.bf16.msra.mxu2 %v2131_v0  ;;  %v2128_v3 = vld [vmem:[%s3038_s1 + $0x20] sm:$0xff]  ;;  %v2127_v4 = vld [vmem:[%s3038_s1 + $0x18] sm:$0xff]  ;;  %v2126_v5 = vld [vmem:[%s3038_s1 + $0x10] sm:$0xff] }
   0x3   :  { %2162 = vmatpush.bf16.msra.mxu3 %v2131_v0  ;;  %916 = vmatpush.bf16.msra.mxu0 %v2131_v0  ;;  %v2125_v6 = vld [vmem:[%s3038_s1 + $0x8] sm:$0xff]  ;;  %v2124_v7 = vld [vmem:[%s3038_s1] sm:$0xff]  ;;  %v2066_v9 = vld [vmem:[%s3039_s0 + $0xb0] sm:$0xf0] }
   0x4   :  { %v1646_v8 = vld [vmem:[%s3039_s0 + $0xa0] sm:$0xf]  ;;  %v2086_v11 = vld [vmem:[%s3039_s0 + $0x150] sm:$0xf0]  ;;  %v2147_v16 = vld [vmem:[%s3038_s1 + $0xb8] sm:$0xff] }
   0x5   :  { %v1726_v10 = vld [vmem:[%s3039_s0 + $0x140] sm:$0xf]  ;;  %v2106_v13 = vld [vmem:[%s3039_s0 + $0x1f0] sm:$0xf0]  ;;  %v2155_v17 = vld [vmem:[%s3038_s1 + $0xf8] sm:$0xff]  ;;  %v1647_v18 = vor.u32 %v2066_v9, %v1646_v8 }
   0x6   :  { %2163 = vmatpush.bf16.msra.mxu1 %v2130_v1  ;;  %2164 = vmatpush.bf16.msra.mxu2 %v2130_v1  ;;  %v1806_v12 = vld [vmem:[%s3039_s0 + $0x1e0] sm:$0xf]  ;;  %v2046_v15 = vld [vmem:[%s3039_s0 + $0x10] sm:$0xf0]  ;;  %v1727_v19 = vor.u32 %v2086_v11, %v1726_v10  ;;  %v2139_v22 = vld [vmem:[%s3038_s1 + $0x78] sm:$0xff] }
   0x7   :  { %2165 = vmatpush.bf16.msra.mxu3 %v2130_v1  ;;  %917 = vmatpush.bf16.msra.mxu0 %v2130_v1  ;;  %v1566_v14 = vld [vmem:[%s3039_s0] sm:$0xf]  ;;  %v1807_v20 = vor.u32 %v2106_v13, %v1806_v12  ;;  %v2159_v23 = vld [vmem:[%s3038_s1 + $0x118] sm:$0xff]  ;;  %v2146_v24 = vld [vmem:[%s3038_s1 + $0xb0] sm:$0xff] }
   0x8   :  { %v1567_v21 = vor.u32 %v2046_v15, %v1566_v14  ;;  %v2154_v25 = vld [vmem:[%s3038_s1 + $0xf0] sm:$0xff]  ;;  %v2145_v28 = vld [vmem:[%s3038_s1 + $0xa8] sm:$0xff]  ;;  %v2144_v32 = vld [vmem:[%s3038_s1 + $0xa0] sm:$0xff] }
   0x9   :  { %v2138_v26 = vld [vmem:[%s3038_s1 + $0x70] sm:$0xff]  ;;  %v2153_v29 = vld [vmem:[%s3038_s1 + $0xe8] sm:$0xff]  ;;  %v2152_v33 = vld [vmem:[%s3038_s1 + $0xe0] sm:$0xff] }
   0xa   :  { %2166 = vmatpush.bf16.msra.mxu1 %v2129_v2  ;;  %2167 = vmatpush.bf16.msra.mxu2 %v2129_v2  ;;  %v2158_v27 = vld [vmem:[%s3038_s1 + $0x110] sm:$0xff]  ;;  %v2137_v30 = vld [vmem:[%s3038_s1 + $0x68] sm:$0xff]  ;;  %v2071_v35 = vld [vmem:[%s3039_s0 + $0xd8] sm:$0xf0] }
   0xb   :  { %2168 = vmatpush.bf16.msra.mxu3 %v2129_v2  ;;  %918 = vmatpush.bf16.msra.mxu0 %v2129_v2  ;;  %v2157_v31 = vld [vmem:[%s3038_s1 + $0x108] sm:$0xff]  ;;  %v2091_v37 = vld [vmem:[%s3039_s0 + $0x178] sm:$0xf0]  ;;  %v2136_v42 = vld [vmem:[%s3038_s1 + $0x60] sm:$0xff] }
   0xc   :  { %v1666_v34 = vld [vmem:[%s3039_s0 + $0xc8] sm:$0xf]  ;;  %v2111_v39 = vld [vmem:[%s3039_s0 + $0x218] sm:$0xf0]  ;;  %v2142_v50 = vld [vmem:[%s3038_s1 + $0x90] sm:$0xff] }
   0xd   :  { %v1746_v36 = vld [vmem:[%s3039_s0 + $0x168] sm:$0xf]  ;;  %v2051_v41 = vld [vmem:[%s3039_s0 + $0x38] sm:$0xf0]  ;;  %v1667_v45 = vor.u32 %v2071_v35, %v1666_v34  ;;  %v2150_v51 = vld [vmem:[%s3038_s1 + $0xd0] sm:$0xff] }
   0xe   :  { %2169 = vmatpush.bf16.msra.mxu1 %v2128_v3  ;;  %2170 = vmatpush.bf16.msra.mxu2 %v2128_v3  ;;  %v1826_v38 = vld [vmem:[%s3039_s0 + $0x208] sm:$0xf]  ;;  %v2143_v43 = vld [vmem:[%s3038_s1 + $0x98] sm:$0xff]  ;;  %v1747_v46 = vor.u32 %v2091_v37, %v1746_v36  ;;  %v2134_v52 = vld [vmem:[%s3038_s1 + $0x50] sm:$0xff] }
   0xf   :  { %2171 = vmatpush.bf16.msra.mxu3 %v2128_v3  ;;  %919 = vmatpush.bf16.msra.mxu0 %v2128_v3  ;;  %v1586_v40 = vld [vmem:[%s3039_s0 + $0x28] sm:$0xf]  ;;  %v2151_v44 = vld [vmem:[%s3038_s1 + $0xd8] sm:$0xff]  ;;  %v1827_v47 = vor.u32 %v2111_v39, %v1826_v38  ;;  %v2156_v53 = vld [vmem:[%s3038_s1 + $0x100] sm:$0xff] }
  0x10   :  { %v1587_v48 = vor.u32 %v2051_v41, %v1586_v40  ;;  %v2135_v49 = vld [vmem:[%s3038_s1 + $0x58] sm:$0xff]  ;;  %v2141_v54 = vld [vmem:[%s3038_s1 + $0x88] sm:$0xff]  ;;  %v2140_v57 = vld [vmem:[%s3038_s1 + $0x80] sm:$0xff] }
  0x11   :  { %v2149_v55 = vld [vmem:[%s3038_s1 + $0xc8] sm:$0xff]  ;;  %v2148_v58 = vld [vmem:[%s3038_s1 + $0xc0] sm:$0xff]  ;;  %v1686_v59 = vld [vmem:[%s3039_s0 + $0xf0] sm:$0xf] }
  0x12   :  { %2172 = vmatpush.bf16.msra.mxu1 %v2127_v4  ;;  %2173 = vmatpush.bf16.msra.mxu2 %v2127_v4  ;;  %v2133_v56 = vld [vmem:[%s3038_s1 + $0x48] sm:$0xff]  ;;  %v2076_v60 = vld [vmem:[%s3039_s0 + $0x100] sm:$0xf0]  ;;  %v1766_v61 = vld [vmem:[%s3039_s0 + $0x190] sm:$0xf] }
  0x13   :  { %2174 = vmatpush.bf16.msra.mxu3 %v2127_v4  ;;  %920 = vmatpush.bf16.msra.mxu0 %v2127_v4  ;;  %v2096_v62 = vld [vmem:[%s3039_s0 + $0x1a0] sm:$0xf0]  ;;  %v1846_v63 = vld [vmem:[%s3039_s0 + $0x230] sm:$0xf]  ;;  %v1687_v4 = vor.u32 %v2076_v60, %v1686_v59  ;;  %v1706_v8 = vld [vmem:[%s3039_s0 + $0x118] sm:$0xf] }
  0x14   :  { %v2116_v0 = vld [vmem:[%s3039_s0 + $0x240] sm:$0xf0]  ;;  %v1606_v1 = vld [vmem:[%s3039_s0 + $0x50] sm:$0xf]  ;;  %v2081_v9 = vld [vmem:[%s3039_s0 + $0x128] sm:$0xf0] }
  0x15   :  { %v2056_v2 = vld [vmem:[%s3039_s0 + $0x60] sm:$0xf0]  ;;  %v1786_v10 = vld [vmem:[%s3039_s0 + $0x1b8] sm:$0xf]  ;;  %v2101_v11 = vld [vmem:[%s3039_s0 + $0x1c8] sm:$0xf0] }
  0x16   :  { %2175 = vmatpush.bf16.msra.mxu1 %v2126_v5  ;;  %2176 = vmatpush.bf16.msra.mxu2 %v2126_v5  ;;  %v2132_v3 = vld [vmem:[%s3038_s1 + $0x40] sm:$0xff]  ;;  %v1866_v12 = vld [vmem:[%s3039_s0 + $0x258] sm:$0xf]  ;;  %v2121_v13 = vld [vmem:[%s3039_s0 + $0x268] sm:$0xf0] }
  0x17   :  { %2177 = vmatpush.bf16.msra.mxu3 %v2126_v5  ;;  %921 = vmatpush.bf16.msra.mxu0 %v2126_v5  ;;  %v1767_v5 = vor.u32 %v2096_v62, %v1766_v61  ;;  %v1626_v14 = vld [vmem:[%s3039_s0 + $0x78] sm:$0xf]  ;;  %v2061_v15 = vld [vmem:[%s3039_s0 + $0x88] sm:$0xf0]  ;;  %v1594_v34 = vld [vmem:[%s3039_s0 + $0x30] sm:$0xf] }
  0x18   :  { %v2052_v35 = vld [vmem:[%s3039_s0 + $0x40] sm:$0xf0]  ;;  %v2050_v36 = vld [vmem:[%s3039_s0 + $0x34] sm:$0xf]  ;;  %v1596_v37 = vld [vmem:[%s3039_s0 + $0x44] sm:$0xf0] }
  0x19   :  { %v1602_v38 = vld [vmem:[%s3039_s0 + $0x38] sm:$0xf]  ;;  %v2053_v39 = vld [vmem:[%s3039_s0 + $0x48] sm:$0xf0]  ;;  %v1595_v41 = vor.u32 %v2052_v35, %v1594_v34  ;;  %v2062_v59 = vld [vmem:[%s3039_s0 + $0x90] sm:$0xf0] }
  0x1a   :  { %2178 = vmatpush.bf16.msra.mxu1 %v2125_v6  ;;  %2179 = vmatpush.bf16.msra.mxu2 %v2125_v6  ;;  %v2060_v60 = vld [vmem:[%s3039_s0 + $0x84] sm:$0xf]  ;;  %v1636_v61 = vld [vmem:[%s3039_s0 + $0x94] sm:$0xf0]  ;;  %v1642_v62 = vld [vmem:[%s3039_s0 + $0x88] sm:$0xf] }
  0x1b   :  { %2180 = vmatpush.bf16.msra.mxu3 %v2125_v6  ;;  %922 = vmatpush.bf16.msra.mxu0 %v2125_v6  ;;  %v1847_v6 = vor.u32 %v2116_v0, %v1846_v63  ;;  %v2063_v63 = vld [vmem:[%s3039_s0 + $0x98] sm:$0xf0] }
  0x1e   :  { %2181 = vmatpush.bf16.msra.mxu1 %v2124_v7  ;;  %2182 = vmatpush.bf16.msra.mxu2 %v2124_v7 }
  0x1f   :  { %2183 = vmatpush.bf16.msra.mxu3 %v2124_v7  ;;  %923 = vmatpush.bf16.msra.mxu0 %v2124_v7  ;;  %v1607_v7 = vor.u32 %v2056_v2, %v1606_v1  ;;  %v1639_v2 = vor.u32 %v2060_v60, %v1636_v61 }
  0x21   :  { %944 = vmatmul.bf16.vlgmr.msra.gmra.mxu1 %v1647_v18  ;;  %964 = vmatmul.bf16.vlgmr.msra.gmra.mxu2 %v1727_v19  ;;  %v1867_v18 = vor.u32 %v2121_v13, %v1866_v12  ;;  %v1627_v19 = vor.u32 %v2061_v15, %v1626_v14 }
  0x22   :  { %1094 = vmatpush.bf16.msrb.mxu2 %v2147_v16  ;;  %984 = vmatmul.bf16.vlgmr.msra.gmra.mxu3 %v1807_v20  ;;  %v1707_v16 = vor.u32 %v2081_v9, %v1706_v8  ;;  %v2044_v20 = vld [vmem:[%s3039_s0 + $0x4] sm:$0xf]  ;;  %v2065_v8 = vld [vmem:[%s3039_s0 + $0xac] sm:$0xf]  ;;  %v1656_v9 = vld [vmem:[%s3039_s0 + $0xbc] sm:$0xf0] }
  0x23   :  { %1183 = vmatpush.bf16.msrb.mxu3 %v2155_v17  ;;  %924 = vmatmul.bf16.vlgmr.msra.gmra.mxu0 %v1567_v21  ;;  %v1787_v17 = vor.u32 %v2101_v11, %v1786_v10  ;;  %v1568_v21 = vld [vmem:[%s3039_s0 + $0x14] sm:$0xf0]  ;;  %v1662_v10 = vld [vmem:[%s3039_s0 + $0xb0] sm:$0xf]  ;;  %v2068_v11 = vld [vmem:[%s3039_s0 + $0xc0] sm:$0xf0]  ;;  %v1659_v15 = vor.u32 %v2065_v8, %v1656_v9 }
  0x24   :  { %1005 = vmatpush.bf16.msrb.mxu1 %v2139_v22  ;;  %1276 = vmatpush.bf16.msrb.mxu0 %v2159_v23  ;;  %v1574_v22 = vld [vmem:[%s3039_s0 + $0x8] sm:$0xf]  ;;  %v2047_v23 = vld [vmem:[%s3039_s0 + $0x18] sm:$0xf0] }
  0x26   :  { %1095 = vmatpush.bf16.msrb.mxu2 %v2146_v24  ;;  %v2045_v24 = vld [vmem:[%s3039_s0 + $0xc] sm:$0xf] }
  0x27   :  { %1184 = vmatpush.bf16.msrb.mxu3 %v2154_v25  ;;  %v1576_v25 = vld [vmem:[%s3039_s0 + $0x1c] sm:$0xf0] }
  0x28   :  { %1006 = vmatpush.bf16.msrb.mxu1 %v2138_v26  ;;  %1277 = vmatpush.bf16.msrb.mxu0 %v2158_v27  ;;  %v1582_v26 = vld [vmem:[%s3039_s0 + $0x10] sm:$0xf]  ;;  %v2048_v27 = vld [vmem:[%s3039_s0 + $0x20] sm:$0xf0] }
  0x2a   :  { %1096 = vmatpush.bf16.msrb.mxu2 %v2145_v28  ;;  %v1571_v28 = vor.u32 %v2044_v20, %v1568_v21 }
  0x2b   :  { %1185 = vmatpush.bf16.msrb.mxu3 %v2153_v29  ;;  %v1575_v29 = vor.u32 %v2047_v23, %v1574_v22  ;;  %v2069_v22 = vld [vmem:[%s3039_s0 + $0xcc] sm:$0xf]  ;;  %v1668_v23 = vld [vmem:[%s3039_s0 + $0xdc] sm:$0xf0] }
  0x2c   :  { %1007 = vmatpush.bf16.msrb.mxu1 %v2137_v30  ;;  %1278 = vmatpush.bf16.msrb.mxu0 %v2157_v31  ;;  %v1579_v30 = vor.u32 %v2045_v24, %v1576_v25  ;;  %v1583_v31 = vor.u32 %v2048_v27, %v1582_v26  ;;  %v1674_v24 = vld [vmem:[%s3039_s0 + $0xd0] sm:$0xf]  ;;  %v2072_v25 = vld [vmem:[%s3039_s0 + $0xe0] sm:$0xf0]  ;;  %v2070_v26 = vld [vmem:[%s3039_s0 + $0xd4] sm:$0xf] }
  0x2d   :  { %v1676_v27 = vld [vmem:[%s3039_s0 + $0xe4] sm:$0xf0] }
  0x2e   :  { %1097 = vmatpush.bf16.msrb.mxu2 %v2144_v32  ;;  %v2049_v32 = vld [vmem:[%s3039_s0 + $0x2c] sm:$0xf]  ;;  %v1679_v35 = vor.u32 %v2070_v26, %v1676_v27  ;;  %v1734_v26 = vld [vmem:[%s3039_s0 + $0x148] sm:$0xf]  ;;  %v2087_v27 = vld [vmem:[%s3039_s0 + $0x158] sm:$0xf0] }
  0x2f   :  { %1186 = vmatpush.bf16.msrb.mxu3 %v2152_v33  ;;  %v1588_v33 = vld [vmem:[%s3039_s0 + $0x3c] sm:$0xf0] }
  0x30   :  { %1008 = vmatpush.bf16.msrb.mxu1 %v2136_v42  ;;  %1279 = vmatpush.bf16.msrb.mxu0 %v2156_v53  ;;  %v1591_v40 = vor.u32 %v2049_v32, %v1588_v33  ;;  %v1599_v42 = vor.u32 %v2050_v36, %v1596_v37  ;;  %v1671_v32 = vor.u32 %v2069_v22, %v1668_v23 }
  0x31   :  { %949 = vmatmul.bf16.gmra.mxu1 %v1667_v45  ;;  %969 = vmatmul.bf16.gmra.mxu2 %v1747_v46  ;;  %v1608_v45 = vld [vmem:[%s3039_s0 + $0x64] sm:$0xf0]  ;;  %v1614_v46 = vld [vmem:[%s3039_s0 + $0x58] sm:$0xf]  ;;  %v1675_v33 = vor.u32 %v2072_v25, %v1674_v24  ;;  %v2084_v24 = vld [vmem:[%s3039_s0 + $0x144] sm:$0xf] }
  0x32   :  { %1098 = vmatpush.bf16.msrb.mxu2 %v2143_v43  ;;  %989 = vmatmul.bf16.gmra.mxu3 %v1827_v47  ;;  %v1603_v43 = vor.u32 %v2053_v39, %v1602_v38  ;;  %v2057_v47 = vld [vmem:[%s3039_s0 + $0x68] sm:$0xf0]  ;;  %v1728_v25 = vld [vmem:[%s3039_s0 + $0x154] sm:$0xf0] }
  0x33   :  { %1187 = vmatpush.bf16.msrb.mxu3 %v2151_v44  ;;  %929 = vmatmul.bf16.gmra.mxu0 %v1587_v48  ;;  %v2054_v44 = vld [vmem:[%s3039_s0 + $0x54] sm:$0xf]  ;;  %v2055_v48 = vld [vmem:[%s3039_s0 + $0x5c] sm:$0xf]  ;;  %v1615_v53 = vor.u32 %v2057_v47, %v1614_v46  ;;  %v1696_v47 = vld [vmem:[%s3039_s0 + $0x10c] sm:$0xf0] }
  0x34   :  { %1009 = vmatpush.bf16.msrb.mxu1 %v2135_v49  ;;  %v1616_v49 = vld [vmem:[%s3039_s0 + $0x6c] sm:$0xf0]  ;;  %v2075_v46 = vld [vmem:[%s3039_s0 + $0xfc] sm:$0xf] }
  0x36   :  { %1099 = vmatpush.bf16.msrb.mxu2 %v2142_v50  ;;  %v1622_v50 = vld [vmem:[%s3039_s0 + $0x60] sm:$0xf] }
  0x37   :  { %1188 = vmatpush.bf16.msrb.mxu3 %v2150_v51  ;;  %v2058_v51 = vld [vmem:[%s3039_s0 + $0x70] sm:$0xf0] }
  0x38   :  { %1010 = vmatpush.bf16.msrb.mxu1 %v2134_v52  ;;  %v1611_v52 = vor.u32 %v2054_v44, %v1608_v45  ;;  %v1694_v44 = vld [vmem:[%s3039_s0 + $0xf8] sm:$0xf]  ;;  %v2077_v45 = vld [vmem:[%s3039_s0 + $0x108] sm:$0xf0] }
  0x3a   :  { %1100 = vmatpush.bf16.msrb.mxu2 %v2141_v54  ;;  %v1619_v54 = vor.u32 %v2055_v48, %v1616_v49  ;;  %v1702_v48 = vld [vmem:[%s3039_s0 + $0x100] sm:$0xf]  ;;  %v2078_v49 = vld [vmem:[%s3039_s0 + $0x110] sm:$0xf0] }
  0x3b   :  { %1189 = vmatpush.bf16.msrb.mxu3 %v2149_v55  ;;  %v1623_v55 = vor.u32 %v2058_v51, %v1622_v50 }
  0x3c   :  { %1011 = vmatpush.bf16.msrb.mxu1 %v2133_v56  ;;  %v2059_v56 = vld [vmem:[%s3039_s0 + $0x7c] sm:$0xf] }
  0x3e   :  { %1101 = vmatpush.bf16.msrb.mxu2 %v2140_v57  ;;  %v1628_v57 = vld [vmem:[%s3039_s0 + $0x8c] sm:$0xf0] }
  0x3f   :  { %1190 = vmatpush.bf16.msrb.mxu3 %v2148_v58  ;;  %v1634_v58 = vld [vmem:[%s3039_s0 + $0x80] sm:$0xf]  ;;  %v1631_v0 = vor.u32 %v2059_v56, %v1628_v57  ;;  %v1703_v56 = vor.u32 %v2078_v49, %v1702_v48 }
  0x40   :  { %1012 = vmatpush.bf16.msrb.mxu1 %v2132_v3  ;;  %v1635_v1 = vor.u32 %v2062_v59, %v1634_v58  ;;  %v1643_v3 = vor.u32 %v2063_v63, %v1642_v62  ;;  %v2079_v62 = vld [vmem:[%s3039_s0 + $0x11c] sm:$0xf]  ;;  %v1708_v63 = vld [vmem:[%s3039_s0 + $0x12c] sm:$0xf0] }
  0x41   :  { %954 = vmatmul.bf16.gmra.mxu1 %v1687_v4  ;;  %974 = vmatmul.bf16.gmra.mxu2 %v1767_v5  ;;  %v2064_v4 = vld [vmem:[%s3039_s0 + $0xa4] sm:$0xf]  ;;  %v1648_v5 = vld [vmem:[%s3039_s0 + $0xb4] sm:$0xf0]  ;;  %v1711_v8 = vor.u32 %v2079_v62, %v1708_v63  ;;  %v2702_v62 = vld [vmem:[%s3040_s2] ss:$0 sm:$0xff] }
  0x42   :  { %994 = vmatmul.bf16.gmra.mxu3 %v1847_v6  ;;  %v1654_v6 = vld [vmem:[%s3039_s0 + $0xa8] sm:$0xf]  ;;  %v1651_v12 = vor.u32 %v2064_v4, %v1648_v5  ;;  %v2083_v5 = vld [vmem:[%s3039_s0 + $0x138] sm:$0xf0] }
  0x43   :  { %934 = vmatmul.bf16.gmra.mxu0 %v1607_v7  ;;  %v2067_v7 = vld [vmem:[%s3039_s0 + $0xb8] sm:$0xf0]  ;;  %v1722_v4 = vld [vmem:[%s3039_s0 + $0x128] sm:$0xf] }
  0x44   :  { %v1655_v13 = vor.u32 %v2067_v7, %v1654_v6 }
  0x51   :  { %959 = vmatmul.bf16.gmra.mxu1 %v1707_v16  ;;  %979 = vmatmul.bf16.gmra.mxu2 %v1787_v17  ;;  %v1663_v16 = vor.u32 %v2068_v11, %v1662_v10 }
  0x52   :  { %999 = vmatmul.bf16.gmra.mxu3 %v1867_v18 }
  0x53   :  { %939 = vmatmul.bf16.gmra.mxu0 %v1627_v19 }
  0x61   :  { %1013 = vmatmul.bf16.vlgmr.msrb.gmra.mxu1 %v1571_v28  ;;  %1102 = vmatmul.bf16.vlgmr.msrb.gmra.mxu2 %v1575_v29  ;;  %v1682_v28 = vld [vmem:[%s3039_s0 + $0xd8] sm:$0xf]  ;;  %v2073_v29 = vld [vmem:[%s3039_s0 + $0xe8] sm:$0xf0] }
  0x62   :  { %1191 = vmatmul.bf16.vlgmr.msrb.gmra.mxu3 %v1579_v30  ;;  %v1683_v36 = vor.u32 %v2073_v29, %v1682_v28  ;;  %v2085_v28 = vld [vmem:[%s3039_s0 + $0x14c] sm:$0xf]  ;;  %v1736_v29 = vld [vmem:[%s3039_s0 + $0x15c] sm:$0xf0] }
  0x63   :  { %2028 = vmatmul.msk.bf16.vlgmr.msrb.gmra.mxu0 %vm867_vm0, %v1583_v31 }
  0x71   :  { %1018 = vmatmul.bf16.gmra.mxu1 %v1591_v40  ;;  %1107 = vmatmul.bf16.gmra.mxu2 %v1595_v41 }
  0x72   :  { %1196 = vmatmul.bf16.gmra.mxu3 %v1599_v42  ;;  %v2074_v42 = vld [vmem:[%s3039_s0 + $0xf4] sm:$0xf] }
  0x73   :  { %2029 = vmatmul.msk.bf16.gmra.mxu0 %vm867_vm0, %v1603_v43  ;;  %v1688_v43 = vld [vmem:[%s3039_s0 + $0x104] sm:$0xf0] }
  0x81   :  { %1023 = vmatmul.bf16.gmra.mxu1 %v1611_v52  ;;  %1112 = vmatmul.bf16.gmra.mxu2 %v1615_v53  ;;  %v1691_v52 = vor.u32 %v2074_v42, %v1688_v43  ;;  %v1695_v53 = vor.u32 %v2077_v45, %v1694_v44  ;;  %v1731_v42 = vor.u32 %v2084_v24, %v1728_v25 }
  0x82   :  { %1201 = vmatmul.bf16.gmra.mxu3 %v1619_v54  ;;  %v1735_v43 = vor.u32 %v2087_v27, %v1734_v26  ;;  %v1739_v45 = vor.u32 %v2085_v28, %v1736_v29 }
  0x83   :  { %2030 = vmatmul.msk.bf16.gmra.mxu0 %vm867_vm0, %v1623_v55  ;;  %v1699_v55 = vor.u32 %v2075_v46, %v1696_v47 }
  0x91   :  { %1028 = vmatmul.bf16.gmra.mxu1 %v1631_v0  ;;  %1117 = vmatmul.bf16.gmra.mxu2 %v1635_v1  ;;  %v1714_v0 = vld [vmem:[%s3039_s0 + $0x120] sm:$0xf]  ;;  %v2082_v1 = vld [vmem:[%s3039_s0 + $0x130] sm:$0xf0] }
  0x92   :  { %1206 = vmatmul.bf16.gmra.mxu3 %v1639_v2  ;;  %v2080_v2 = vld [vmem:[%s3039_s0 + $0x124] sm:$0xf]  ;;  %v1715_v9 = vor.u32 %v2082_v1, %v1714_v0  ;;  %v2089_v1 = vld [vmem:[%s3039_s0 + $0x16c] sm:$0xf] }
  0x93   :  { %2031 = vmatmul.msk.bf16.gmra.mxu0 %vm867_vm0, %v1643_v3  ;;  %v1716_v3 = vld [vmem:[%s3039_s0 + $0x134] sm:$0xf0] }
  0x94   :  { %v1719_v11 = vor.u32 %v2080_v2, %v1716_v3  ;;  %v1754_v2 = vld [vmem:[%s3039_s0 + $0x170] sm:$0xf]  ;;  %v2092_v3 = vld [vmem:[%s3039_s0 + $0x180] sm:$0xf0] }
  0x95   :  { %v1755_v29 = vor.u32 %v2092_v3, %v1754_v2  ;;  %v2095_v2 = vld [vmem:[%s3039_s0 + $0x19c] sm:$0xf] }
  0x9e   :  { %v2533_v14 = vpop.f32.mrf.mxu1 }
  0xa0   :  { %v2535_v17 = vpop.f32.mrf.mxu0 }
  0xa1   :  { %1033 = vmatmul.bf16.gmra.mxu1 %v1651_v12  ;;  %1122 = vmatmul.bf16.gmra.mxu2 %v1655_v13  ;;  %v1723_v12 = vor.u32 %v2083_v5, %v1722_v4  ;;  %v2090_v4 = vld [vmem:[%s3039_s0 + $0x174] sm:$0xf] }
  0xa2   :  { %1211 = vmatmul.bf16.gmra.mxu3 %v1659_v15 }
  0xa3   :  { %2032 = vmatmul.msk.bf16.gmra.mxu0 %vm867_vm0, %v1663_v16 }
  0xa4   :  { %v2538_v18 = vpop.f32.mrf.mxu2 }
  0xa5   :  { %v2540_v19 = vpop.f32.mrf.mxu3 }
  0xa6   :  { %v2542_v20 = vpop.f32.mrf.mxu1 }
  0xa8   :  { %v2544_v21 = vpop.f32.mrf.mxu0 }
  0xac   :  { %v2570_v30 = vpop.f32.mrf.mxu2 }
  0xad   :  { %v2572_v31 = vpop.f32.mrf.mxu3 }
  0xae   :  { %v2574_v34 = vpop.f32.mrf.mxu1 }
  0xb0   :  { %v2576_v37 = vpop.f32.mrf.mxu0 }
  0xb1   :  { %1038 = vmatmul.bf16.gmra.mxu1 %v1671_v32  ;;  %1127 = vmatmul.bf16.gmra.mxu2 %v1675_v33  ;;  %v1742_v32 = vld [vmem:[%s3039_s0 + $0x150] sm:$0xf]  ;;  %v2088_v33 = vld [vmem:[%s3039_s0 + $0x160] sm:$0xf0] }
  0xb2   :  { %1216 = vmatmul.bf16.gmra.mxu3 %v1679_v35  ;;  %v1743_v46 = vor.u32 %v2088_v33, %v1742_v32 }
  0xb3   :  { %2033 = vmatmul.msk.bf16.gmra.mxu0 %vm867_vm0, %v1683_v36 }
  0xb4   :  { %v2579_v38 = vpop.f32.mrf.mxu2 }
  0xb5   :  { %v2581_v39 = vpop.f32.mrf.mxu3 }
  0xb6   :  { %v2583_v40 = vpop.f32.mrf.mxu1 }
  0xb8   :  { %v2585_v41 = vpop.f32.mrf.mxu0 }
  0xbc   :  { %v2611_v50 = vpop.f32.mrf.mxu2 }
  0xbd   :  { %v2613_v51 = vpop.f32.mrf.mxu3 }
  0xbe   :  { %v2615_v54 = vpop.f32.mrf.mxu1 }
  0xc0   :  { %v2617_v57 = vpop.f32.mrf.mxu0 }
  0xc1   :  { %1043 = vmatmul.bf16.gmra.mxu1 %v1691_v52  ;;  %1132 = vmatmul.bf16.gmra.mxu2 %v1695_v53 }
  0xc2   :  { %1221 = vmatmul.bf16.gmra.mxu3 %v1699_v55 }
  0xc3   :  { %2034 = vmatmul.msk.bf16.gmra.mxu0 %vm867_vm0, %v1703_v56 }
  0xc4   :  { %v2620_v58 = vpop.f32.mrf.mxu2 }
  0xc5   :  { %v2622_v59 = vpop.f32.mrf.mxu3 }
  0xc6   :  { %v2624_v60 = vpop.f32.mrf.mxu1 }
  0xc8   :  { %v2626_v61 = vpop.f32.mrf.mxu0 }
  0xcc   :  { %v2652_v6 = vpop.f32.mrf.mxu2 }
  0xcd   :  { %v2654_v7 = vpop.f32.mrf.mxu3 }
  0xce   :  { %v2656_v10 = vpop.f32.mrf.mxu1 }
  0xd0   :  { %v2658_v13 = vpop.f32.mrf.mxu0 }
  0xd1   :  { %1048 = vmatmul.bf16.gmra.mxu1 %v1711_v8  ;;  %1137 = vmatmul.bf16.gmra.mxu2 %v1715_v9  ;;  %v1756_v9 = vld [vmem:[%s3039_s0 + $0x184] sm:$0xf0] }
  0xd2   :  { %1226 = vmatmul.bf16.gmra.mxu3 %v1719_v11  ;;  %v1762_v11 = vld [vmem:[%s3039_s0 + $0x178] sm:$0xf] }
  0xd3   :  { %2035 = vmatmul.msk.bf16.gmra.mxu0 %vm867_vm0, %v1723_v12  ;;  %v2093_v12 = vld [vmem:[%s3039_s0 + $0x188] sm:$0xf0] }
  0xd4   :  { %v2661_v15 = vpop.f32.mrf.mxu2  ;;  %v1763_v33 = vor.u32 %v2093_v12, %v1762_v11 }
  0xd5   :  { %v2663_v16 = vpop.f32.mrf.mxu3 }
  0xd6   :  { %v2665_v22 = vpop.f32.mrf.mxu1 }
  0xd8   :  { %v2667_v23 = vpop.f32.mrf.mxu0 }
  0xdc   :  { %v2693_v35 = vpop.f32.mrf.mxu2 }
  0xdd   :  { %v2695_v36 = vpop.f32.mrf.mxu3 }
  0xde   :  { %v1014_v44 = vpop.f32.mrf.mxu1 }
  0xdf   :  { %v1015_v48 = vadd.f32 %v1014_v44, %v2535_v17  ;;  %v1748_v17 = vld [vmem:[%s3039_s0 + $0x17c] sm:$0xf0] }
  0xe0   :  { %v1281_v47 = vpop.f32.mrf.mxu0  ;;  %v1751_v28 = vor.u32 %v2089_v1, %v1748_v17  ;;  %v1774_v1 = vld [vmem:[%s3039_s0 + $0x198] sm:$0xf]  ;;  %v2097_v17 = vld [vmem:[%s3039_s0 + $0x1a8] sm:$0xf0] }
  0xe1   :  { %1053 = vmatmul.bf16.gmra.mxu1 %v1731_v42  ;;  %1142 = vmatmul.bf16.gmra.mxu2 %v1735_v43 }
  0xe2   :  { %1231 = vmatmul.bf16.gmra.mxu3 %v1739_v45 }
  0xe3   :  { %2036 = vmatmul.msk.bf16.gmra.mxu0 %vm867_vm0, %v1743_v46 }
  0xe4   :  { %v1103_v49 = vpop.f32.mrf.mxu2 }
  0xe5   :  { %v1104_v52 = vadd.f32 %v1103_v49, %v1015_v48  ;;  %v1192_v53 = vpop.f32.mrf.mxu3 }
  0xe6   :  { %v1016_v55 = vpop.f32.mrf.mxu1 }
  0xe7   :  { %v1193_v56 = vadd.f32 %v1192_v53, %v1104_v52  ;;  %v1017_v8 = vadd.f32 %v1016_v55, %v2544_v21  ;;  %v1759_v21 = vor.u32 %v2090_v4, %v1756_v9  ;;  %v2098_v9 = vld [vmem:[%s3039_s0 + $0x1b0] sm:$0xf0] }
  0xe8   :  { %v1283_v63 = vpop.f32.mrf.mxu0 }
  0xe9   :  { %v1282_v0 = vadd.f32 %v1281_v47, %v1193_v56 }
  0xeb   :  { %v1464_v5 = vadd.f32 %v2702_v62, %v1282_v0  ;;  %v2094_v0 = vld [vmem:[%s3039_s0 + $0x194] sm:$0xf] }
  0xec   :  { %v1105_v24 = vpop.f32.mrf.mxu2 }
  0xed   :  { %v1496_v25 = vmax.f32 %v1464_v5, 0.0  ;;  %v1106_v26 = vadd.f32 %v1105_v24, %v1017_v8  ;;  %v1194_v27 = vpop.f32.mrf.mxu3  ;;  %v1776_v5 = vld [vmem:[%s3039_s0 + $0x1ac] sm:$0xf0]  ;;  %v1782_v8 = vld [vmem:[%s3039_s0 + $0x1a0] sm:$0xf] }
  0xee   :  { %v1019_v32 = vpop.f32.mrf.mxu1 }
  0xef   :  { %1528 = vst [vmem:[%s3041_s3] sm:$0xff] %v1496_v25  ;;  %v1195_v42 = vadd.f32 %v1194_v27, %v1106_v26  ;;  %v1020_v46 = vadd.f32 %v1019_v32, %v2576_v37  ;;  %v1768_v37 = vld [vmem:[%s3039_s0 + $0x1a4] sm:$0xf0]  ;;  %v1775_v27 = vor.u32 %v2097_v17, %v1774_v1  ;;  %v1796_v17 = vld [vmem:[%s3039_s0 + $0x1d4] sm:$0xf0] }
  0xf0   :  { %v1286_v43 = vpop.f32.mrf.mxu0  ;;  %v1771_v26 = vor.u32 %v2094_v0, %v1768_v37  ;;  %v2100_v0 = vld [vmem:[%s3039_s0 + $0x1c4] sm:$0xf] }
  0xf1   :  { %v1284_v44 = vadd.f32 %v1283_v63, %v1195_v42  ;;  %1058 = vmatmul.bf16.gmra.mxu1 %v1751_v28  ;;  %1147 = vmatmul.bf16.gmra.mxu2 %v1755_v29  ;;  %v1783_v29 = vor.u32 %v2098_v9, %v1782_v8 }
  0xf2   :  { %1236 = vmatmul.bf16.gmra.mxu3 %v1759_v21 }
  0xf3   :  { %2037 = vmatmul.msk.bf16.gmra.mxu0 %vm867_vm0, %v1763_v33  ;;  %v1465_v45 = vadd.f32 %v2702_v62, %v1284_v44 }
  0xf4   :  { %v1108_v47 = vpop.f32.mrf.mxu2 }
  0xf5   :  { %v1497_v48 = vmax.f32 %v1465_v45, 0.0  ;;  %v1109_v49 = vadd.f32 %v1108_v47, %v1020_v46  ;;  %v1197_v52 = vpop.f32.mrf.mxu3 }
  0xf6   :  { %v1021_v53 = vpop.f32.mrf.mxu1 }
  0xf7   :  { %1529 = vst [vmem:[%s3041_s3 + $0x8] sm:$0xff] %v1497_v48  ;;  %v1198_v55 = vadd.f32 %v1197_v52, %v1109_v49  ;;  %v1022_v4 = vadd.f32 %v1021_v53, %v2585_v41  ;;  %v1779_v41 = vor.u32 %v2095_v2, %v1776_v5  ;;  %v1802_v2 = vld [vmem:[%s3039_s0 + $0x1c8] sm:$0xf] }
  0xf8   :  { %v1288_v56 = vpop.f32.mrf.mxu0 }
  0xf9   :  { %v1287_v63 = vadd.f32 %v1286_v43, %v1198_v55  ;;  %v2099_v55 = vld [vmem:[%s3039_s0 + $0x1bc] sm:$0xf] }
  0xfb   :  { %v1466_v3 = vadd.f32 %v2702_v62, %v1287_v63  ;;  %v2102_v63 = vld [vmem:[%s3039_s0 + $0x1d0] sm:$0xf0] }
  0xfc   :  { %v1110_v11 = vpop.f32.mrf.mxu2 }
  0xfd   :  { %v1498_v12 = vmax.f32 %v1466_v3, 0.0  ;;  %v1111_v24 = vadd.f32 %v1110_v11, %v1022_v4  ;;  %v1199_v25 = vpop.f32.mrf.mxu3  ;;  %v2103_v3 = vld [vmem:[%s3039_s0 + $0x1d8] sm:$0xf0] }
  0xfe   :  { %v1024_v28 = vpop.f32.mrf.mxu1 }
  0xff   :  { %1530 = vst [vmem:[%s3041_s3 + $0x10] sm:$0xff] %v1498_v12  ;;  %v1200_v32 = vadd.f32 %v1199_v25, %v1111_v24  ;;  %v1025_v43 = vadd.f32 %v1024_v28, %v2617_v57  ;;  %v1788_v57 = vld [vmem:[%s3039_s0 + $0x1cc] sm:$0xf0]  ;;  %v1803_v25 = vor.u32 %v2103_v3, %v1802_v2 }
 0x100   :  { %v1291_v21 = vpop.f32.mrf.mxu0  ;;  %v1791_v11 = vor.u32 %v2099_v55, %v1788_v57  ;;  %v1816_v57 = vld [vmem:[%s3039_s0 + $0x1fc] sm:$0xf0] }
 0x101   :  { %v1289_v33 = vadd.f32 %v1288_v56, %v1200_v32  ;;  %1063 = vmatmul.bf16.gmra.mxu1 %v1771_v26  ;;  %1152 = vmatmul.bf16.gmra.mxu2 %v1775_v27  ;;  %v1794_v56 = vld [vmem:[%s3039_s0 + $0x1c0] sm:$0xf] }
 0x102   :  { %1241 = vmatmul.bf16.gmra.mxu3 %v1779_v41  ;;  %v1795_v12 = vor.u32 %v2102_v63, %v1794_v56  ;;  %v1822_v56 = vld [vmem:[%s3039_s0 + $0x1f0] sm:$0xf]  ;;  %v2108_v63 = vld [vmem:[%s3039_s0 + $0x200] sm:$0xf0] }
 0x103   :  { %2038 = vmatmul.msk.bf16.gmra.mxu0 %vm867_vm0, %v1783_v29  ;;  %v1467_v42 = vadd.f32 %v2702_v62, %v1289_v33 }
 0x104   :  { %v1113_v44 = vpop.f32.mrf.mxu2 }
 0x105   :  { %v1499_v45 = vmax.f32 %v1467_v42, 0.0  ;;  %v1114_v46 = vadd.f32 %v1113_v44, %v1025_v43  ;;  %v1202_v47 = vpop.f32.mrf.mxu3 }
 0x106   :  { %v1026_v48 = vpop.f32.mrf.mxu1 }
 0x107   :  { %1531 = vst [vmem:[%s3041_s3 + $0x18] sm:$0xff] %v1499_v45  ;;  %v1203_v49 = vadd.f32 %v1202_v47, %v1114_v46  ;;  %v1027_v1 = vadd.f32 %v1026_v48, %v2626_v61  ;;  %v1799_v61 = vor.u32 %v2100_v0, %v1796_v17  ;;  %v2104_v47 = vld [vmem:[%s3039_s0 + $0x1e4] sm:$0xf]  ;;  %v1814_v48 = vld [vmem:[%s3039_s0 + $0x1e8] sm:$0xf] }
 0x108   :  { %v1293_v52 = vpop.f32.mrf.mxu0 }
 0x109   :  { %v1292_v53 = vadd.f32 %v1291_v21, %v1203_v49  ;;  %v2107_v49 = vld [vmem:[%s3039_s0 + $0x1f8] sm:$0xf0] }
 0x10a   :  { %v1815_v3 = vor.u32 %v2107_v49, %v1814_v48 }
 0x10b   :  { %v1468_v37 = vadd.f32 %v2702_v62, %v1292_v53 }
 0x10c   :  { %v1115_v4 = vpop.f32.mrf.mxu2 }
 0x10d   :  { %v1500_v5 = vmax.f32 %v1468_v37, 0.0  ;;  %v1116_v8 = vadd.f32 %v1115_v4, %v1027_v1  ;;  %v1204_v9 = vpop.f32.mrf.mxu3 }
 0x10e   :  { %v1029_v24 = vpop.f32.mrf.mxu1 }
 0x10f   :  { %1532 = vst [vmem:[%s3041_s3 + $0x20] sm:$0xff] %v1500_v5  ;;  %v1205_v26 = vadd.f32 %v1204_v9, %v1116_v8  ;;  %v1030_v29 = vadd.f32 %v1029_v24, %v2658_v13  ;;  %v1808_v13 = vld [vmem:[%s3039_s0 + $0x1f4] sm:$0xf0]  ;;  %v1823_v5 = vor.u32 %v2108_v63, %v1822_v56 }
 0x110   :  { %v1296_v27 = vpop.f32.mrf.mxu0  ;;  %v1811_v2 = vor.u32 %v2104_v47, %v1808_v13  ;;  %v1842_v47 = vld [vmem:[%s3039_s0 + $0x218] sm:$0xf]  ;;  %v2113_v13 = vld [vmem:[%s3039_s0 + $0x228] sm:$0xf0] }
 0x111   :  { %v1294_v28 = vadd.f32 %v1293_v52, %v1205_v26  ;;  %1068 = vmatmul.bf16.gmra.mxu1 %v1791_v11  ;;  %1157 = vmatmul.bf16.gmra.mxu2 %v1795_v12  ;;  %v2105_v52 = vld [vmem:[%s3039_s0 + $0x1ec] sm:$0xf]  ;;  %v1843_v63 = vor.u32 %v2113_v13, %v1842_v47 }
 0x112   :  { %1246 = vmatmul.bf16.gmra.mxu3 %v1799_v61 }
 0x113   :  { %2039 = vmatmul.msk.bf16.gmra.mxu0 %vm867_vm0, %v1803_v25  ;;  %v1469_v41 = vadd.f32 %v2702_v62, %v1294_v28 }
 0x114   :  { %v1118_v32 = vpop.f32.mrf.mxu2 }
 0x115   :  { %v1501_v21 = vmax.f32 %v1469_v41, 0.0  ;;  %v1119_v33 = vadd.f32 %v1118_v32, %v1030_v29  ;;  %v1207_v42 = vpop.f32.mrf.mxu3 }
 0x116   :  { %v1031_v43 = vpop.f32.mrf.mxu1 }
 0x117   :  { %1533 = vst [vmem:[%s3041_s3 + $0x28] sm:$0xff] %v1501_v21  ;;  %v1208_v44 = vadd.f32 %v1207_v42, %v1119_v33  ;;  %v1032_v55 = vadd.f32 %v1031_v43, %v2667_v23  ;;  %v1819_v23 = vor.u32 %v2105_v52, %v1816_v57  ;;  %v2109_v21 = vld [vmem:[%s3039_s0 + $0x20c] sm:$0xf]  ;;  %v1834_v33 = vld [vmem:[%s3039_s0 + $0x210] sm:$0xf] }
 0x118   :  { %v1298_v45 = vpop.f32.mrf.mxu0  ;;  %v2112_v42 = vld [vmem:[%s3039_s0 + $0x220] sm:$0xf0]  ;;  %v2110_v43 = vld [vmem:[%s3039_s0 + $0x214] sm:$0xf] }
 0x119   :  { %v1297_v46 = vadd.f32 %v1296_v27, %v1208_v44  ;;  %v1835_v57 = vor.u32 %v2112_v42, %v1834_v33 }
 0x11b   :  { %v1470_v53 = vadd.f32 %v2702_v62, %v1297_v46  ;;  %v1836_v46 = vld [vmem:[%s3039_s0 + $0x224] sm:$0xf0] }
 0x11c   :  { %v1120_v0 = vpop.f32.mrf.mxu2 }
 0x11d   :  { %v1502_v37 = vmax.f32 %v1470_v53, 0.0  ;;  %v1121_v1 = vadd.f32 %v1120_v0, %v1032_v55  ;;  %v1209_v17 = vpop.f32.mrf.mxu3 }
 0x11e   :  { %v1034_v4 = vpop.f32.mrf.mxu1 }
 0x11f   :  { %1534 = vst [vmem:[%s3041_s3 + $0x30] sm:$0xff] %v1502_v37  ;;  %v1210_v8 = vadd.f32 %v1209_v17, %v1121_v1  ;;  %v1035_v24 = vadd.f32 %v1034_v4, %v2533_v14  ;;  %v1828_v14 = vld [vmem:[%s3039_s0 + $0x21c] sm:$0xf0] }
 0x120   :  { %v1301_v9 = vpop.f32.mrf.mxu0  ;;  %v1831_v55 = vor.u32 %v2109_v21, %v1828_v14 }
 0x121   :  { %v1299_v11 = vadd.f32 %v1298_v45, %v1210_v8  ;;  %1073 = vmatmul.bf16.gmra.mxu1 %v1811_v2  ;;  %1162 = vmatmul.bf16.gmra.mxu2 %v1815_v3 }
 0x122   :  { %1251 = vmatmul.bf16.gmra.mxu3 %v1819_v23 }
 0x123   :  { %2040 = vmatmul.msk.bf16.gmra.mxu0 %vm867_vm0, %v1823_v5  ;;  %v1471_v12 = vadd.f32 %v2702_v62, %v1299_v11 }
 0x124   :  { %v1123_v61 = vpop.f32.mrf.mxu2 }
 0x125   :  { %v1503_v25 = vmax.f32 %v1471_v12, 0.0  ;;  %v1124_v26 = vadd.f32 %v1123_v61, %v1035_v24  ;;  %v1212_v27 = vpop.f32.mrf.mxu3  ;;  %v2114_v24 = vld [vmem:[%s3039_s0 + $0x234] sm:$0xf]  ;;  %v1854_v61 = vld [vmem:[%s3039_s0 + $0x238] sm:$0xf] }
 0x126   :  { %v1036_v28 = vpop.f32.mrf.mxu1 }
 0x127   :  { %1535 = vst [vmem:[%s3041_s3 + $0x38] sm:$0xff] %v1503_v25  ;;  %v1213_v41 = vadd.f32 %v1212_v27, %v1124_v26  ;;  %v1037_v45 = vadd.f32 %v1036_v28, %v2542_v20  ;;  %v1839_v20 = vor.u32 %v2110_v43, %v1836_v46  ;;  %v2117_v25 = vld [vmem:[%s3039_s0 + $0x248] sm:$0xf0]  ;;  %v2115_v26 = vld [vmem:[%s3039_s0 + $0x23c] sm:$0xf] }
 0x128   :  { %v1303_v29 = vpop.f32.mrf.mxu0 }
 0x129   :  { %v1302_v32 = vadd.f32 %v1301_v9, %v1213_v41  ;;  %v1856_v41 = vld [vmem:[%s3039_s0 + $0x24c] sm:$0xf0] }
 0x12b   :  { %v1472_v44 = vadd.f32 %v2702_v62, %v1302_v32  ;;  %v2118_v32 = vld [vmem:[%s3039_s0 + $0x250] sm:$0xf0] }
 0x12c   :  { %v1125_v48 = vpop.f32.mrf.mxu2 }
 0x12d   :  { %v1504_v49 = vmax.f32 %v1472_v44, 0.0  ;;  %v1126_v52 = vadd.f32 %v1125_v48, %v1037_v45  ;;  %v1214_v53 = vpop.f32.mrf.mxu3  ;;  %v1855_v44 = vor.u32 %v2117_v25, %v1854_v61 }
 0x12e   :  { %v1039_v56 = vpop.f32.mrf.mxu1 }
 0x12f   :  { %1536 = vst [vmem:[%s3041_s3 + $0x40] sm:$0xff] %v1504_v49  ;;  %v1215_v0 = vadd.f32 %v1214_v53, %v1126_v52  ;;  %v1040_v2 = vadd.f32 %v1039_v56, %v2574_v34  ;;  %v1848_v34 = vld [vmem:[%s3039_s0 + $0x244] sm:$0xf0] }
 0x130   :  { %v1306_v37 = vpop.f32.mrf.mxu0  ;;  %v1851_v43 = vor.u32 %v2114_v24, %v1848_v34 }
 0x131   :  { %v1304_v1 = vadd.f32 %v1303_v29, %v1215_v0  ;;  %1078 = vmatmul.bf16.gmra.mxu1 %v1831_v55  ;;  %1167 = vmatmul.bf16.gmra.mxu2 %v1835_v57  ;;  %v1862_v29 = vld [vmem:[%s3039_s0 + $0x240] sm:$0xf] }
 0x132   :  { %1256 = vmatmul.bf16.gmra.mxu3 %v1839_v20  ;;  %v1863_v46 = vor.u32 %v2118_v32, %v1862_v29 }
 0x133   :  { %2041 = vmatmul.msk.bf16.gmra.mxu0 %vm867_vm0, %v1843_v63  ;;  %v1473_v17 = vadd.f32 %v2702_v62, %v1304_v1  ;;  %v2119_v1 = vld [vmem:[%s3039_s0 + $0x25c] sm:$0xf] }
 0x134   :  { %v1128_v3 = vpop.f32.mrf.mxu2 }
 0x135   :  { %v1505_v4 = vmax.f32 %v1473_v17, 0.0  ;;  %v1129_v23 = vadd.f32 %v1128_v3, %v1040_v2  ;;  %v1217_v5 = vpop.f32.mrf.mxu3  ;;  %v1874_v17 = vld [vmem:[%s3039_s0 + $0x260] sm:$0xf]  ;;  %v2122_v2 = vld [vmem:[%s3039_s0 + $0x270] sm:$0xf0] }
 0x136   :  { %v1041_v8 = vpop.f32.mrf.mxu1  ;;  %v2120_v3 = vld [vmem:[%s3039_s0 + $0x264] sm:$0xf]  ;;  %v1875_v25 = vor.u32 %v2122_v2, %v1874_v17 }
 0x137   :  { %1537 = vst [vmem:[%s3041_s3 + $0x48] sm:$0xff] %v1505_v4  ;;  %v1218_v9 = vadd.f32 %v1217_v5, %v1129_v23  ;;  %v1042_v28 = vadd.f32 %v1041_v8, %v2583_v40  ;;  %v1859_v40 = vor.u32 %v2115_v26, %v1856_v41  ;;  %v1876_v5 = vld [vmem:[%s3039_s0 + $0x274] sm:$0xf0]  ;;  %v1882_v8 = vld [vmem:[%s3039_s0 + $0x268] sm:$0xf] }
 0x138   :  { %v1308_v11 = vpop.f32.mrf.mxu0 }
 0x139   :  { %v1307_v12 = vadd.f32 %v1306_v37, %v1218_v9  ;;  %v2123_v9 = vld [vmem:[%s3039_s0 + $0x278] sm:$0xf0] }
 0x13b   :  { %v1474_v27 = vadd.f32 %v2702_v62, %v1307_v12 }
 0x13c   :  { %v1130_v21 = vpop.f32.mrf.mxu2 }
 0x13d   :  { %v1506_v14 = vmax.f32 %v1474_v27, 0.0  ;;  %v1131_v33 = vadd.f32 %v1130_v21, %v1042_v28  ;;  %v1219_v42 = vpop.f32.mrf.mxu3  ;;  %v1883_v27 = vor.u32 %v2123_v9, %v1882_v8 }
 0x13e   :  { %v1044_v45 = vpop.f32.mrf.mxu1 }
 0x13f   :  { %1538 = vst [vmem:[%s3041_s3 + $0x50] sm:$0xff] %v1506_v14  ;;  %v1220_v47 = vadd.f32 %v1219_v42, %v1131_v33  ;;  %v1045_v52 = vadd.f32 %v1044_v45, %v2615_v54  ;;  %v1868_v54 = vld [vmem:[%s3039_s0 + $0x26c] sm:$0xf0] }
 0x140   :  { %v1311_v13 = vpop.f32.mrf.mxu0  ;;  %v1871_v61 = vor.u32 %v2119_v1, %v1868_v54 }
 0x141   :  { %v1309_v48 = vadd.f32 %v1308_v11, %v1220_v47  ;;  %1083 = vmatmul.bf16.gmra.mxu1 %v1851_v43  ;;  %1172 = vmatmul.bf16.gmra.mxu2 %v1855_v44 }
 0x142   :  { %1261 = vmatmul.bf16.gmra.mxu3 %v1859_v40 }
 0x143   :  { %2042 = vmatmul.msk.bf16.gmra.mxu0 %vm867_vm0, %v1863_v46  ;;  %v1475_v49 = vadd.f32 %v2702_v62, %v1309_v48 }
 0x144   :  { %v1133_v53 = vpop.f32.mrf.mxu2 }
 0x145   :  { %v1507_v55 = vmax.f32 %v1475_v49, 0.0  ;;  %v1134_v57 = vadd.f32 %v1133_v53, %v1045_v52  ;;  %v1222_v56 = vpop.f32.mrf.mxu3 }
 0x146   :  { %v1046_v20 = vpop.f32.mrf.mxu1 }
 0x147   :  { %1539 = vst [vmem:[%s3041_s3 + $0x58] sm:$0xff] %v1507_v55  ;;  %v1223_v63 = vadd.f32 %v1222_v56, %v1134_v57  ;;  %v1047_v23 = vadd.f32 %v1046_v20, %v2624_v60  ;;  %v1879_v60 = vor.u32 %v2120_v3, %v1876_v5 }
 0x148   :  { %v1313_v0 = vpop.f32.mrf.mxu0 }
 0x149   :  { %v1312_v37 = vadd.f32 %v1311_v13, %v1223_v63 }
 0x14b   :  { %v1476_v4 = vadd.f32 %v2702_v62, %v1312_v37 }
 0x14c   :  { %v1135_v11 = vpop.f32.mrf.mxu2 }
 0x14d   :  { %v1508_v12 = vmax.f32 %v1476_v4, 0.0  ;;  %v1136_v24 = vadd.f32 %v1135_v11, %v1047_v23  ;;  %v1224_v34 = vpop.f32.mrf.mxu3 }
 0x14e   :  { %v1049_v26 = vpop.f32.mrf.mxu1 }
 0x14f   :  { %1540 = vst [vmem:[%s3041_s3 + $0x60] sm:$0xff] %v1508_v12  ;;  %v1225_v28 = vadd.f32 %v1224_v34, %v1136_v24  ;;  %v1050_v21 = vadd.f32 %v1049_v26, %v2656_v10 }
 0x150   :  { %v1316_v41 = vpop.f32.mrf.mxu0 }
 0x151   :  { %v1314_v29 = vadd.f32 %v1313_v0, %v1225_v28  ;;  %1088 = vmatmul.bf16.gmra.mxu1 %v1871_v61  ;;  %1177 = vmatmul.bf16.gmra.mxu2 %v1875_v25 }
 0x152   :  { %1266 = vmatmul.bf16.gmra.mxu3 %v1879_v60 }
 0x153   :  { %2043 = vmatmul.msk.bf16.gmra.mxu0 %vm867_vm0, %v1883_v27  ;;  %v1477_v32 = vadd.f32 %v2702_v62, %v1314_v29 }
 0x154   :  { %v1138_v14 = vpop.f32.mrf.mxu2 }
 0x155   :  { %v1509_v33 = vmax.f32 %v1477_v32, 0.0  ;;  %v1139_v42 = vadd.f32 %v1138_v14, %v1050_v21  ;;  %v1227_v43 = vpop.f32.mrf.mxu3 }
 0x156   :  { %v1051_v44 = vpop.f32.mrf.mxu1 }
 0x157   :  { %1541 = vst [vmem:[%s3041_s3 + $0x68] sm:$0xff] %v1509_v33  ;;  %v1228_v45 = vadd.f32 %v1227_v43, %v1139_v42  ;;  %v1052_v13 = vadd.f32 %v1051_v44, %v2665_v22 }
 0x158   :  { %v1318_v40 = vpop.f32.mrf.mxu0 }
 0x159   :  { %v1317_v46 = vadd.f32 %v1316_v41, %v1228_v45 }
 0x15b   :  { %v1478_v47 = vadd.f32 %v2702_v62, %v1317_v46 }
 0x15c   :  { %v1140_v48 = vpop.f32.mrf.mxu2 }
 0x15d   :  { %v1510_v49 = vmax.f32 %v1478_v47, 0.0  ;;  %v1141_v52 = vadd.f32 %v1140_v48, %v1052_v13  ;;  %v1229_v10 = vpop.f32.mrf.mxu3 }
 0x15e   :  { %v1054_v53 = vpop.f32.mrf.mxu1 }
 0x15f   :  { %1542 = vst [vmem:[%s3041_s3 + $0x70] sm:$0xff] %v1510_v49  ;;  %v1230_v55 = vadd.f32 %v1229_v10, %v1141_v52  ;;  %v1055_v63 = vadd.f32 %v1054_v53, %v2538_v18 }
 0x160   :  { %v1321_v57 = vpop.f32.mrf.mxu0 }
 0x161   :  { %v1319_v56 = vadd.f32 %v1318_v40, %v1230_v55 }
 0x163   :  { %v1479_v20 = vadd.f32 %v2702_v62, %v1319_v56 }
 0x164   :  { %v1143_v0 = vpop.f32.mrf.mxu2 }
 0x165   :  { %v1511_v37 = vmax.f32 %v1479_v20, 0.0  ;;  %v1144_v1 = vadd.f32 %v1143_v0, %v1055_v63  ;;  %v1232_v22 = vpop.f32.mrf.mxu3 }
 0x166   :  { %v1056_v54 = vpop.f32.mrf.mxu1 }
 0x167   :  { %1543 = vst [vmem:[%s3041_s3 + $0x78] sm:$0xff] %v1511_v37  ;;  %v1233_v17 = vadd.f32 %v1232_v22, %v1144_v1  ;;  %v1057_v23 = vadd.f32 %v1056_v54, %v2570_v30 }
 0x168   :  { %v1323_v2 = vpop.f32.mrf.mxu0 }
 0x169   :  { %v1322_v3 = vadd.f32 %v1321_v57, %v1233_v17 }
 0x16b   :  { %v1480_v4 = vadd.f32 %v2702_v62, %v1322_v3 }
 0x16c   :  { %v1145_v5 = vpop.f32.mrf.mxu2 }
 0x16d   :  { %v1512_v8 = vmax.f32 %v1480_v4, 0.0  ;;  %v1146_v9 = vadd.f32 %v1145_v5, %v1057_v23  ;;  %v1234_v18 = vpop.f32.mrf.mxu3 }
 0x16e   :  { %v1059_v11 = vpop.f32.mrf.mxu1 }
 0x16f   :  { %1544 = vst [vmem:[%s3041_s3 + $0x80] sm:$0xff] %v1512_v8  ;;  %v1235_v12 = vadd.f32 %v1234_v18, %v1146_v9  ;;  %v1060_v25 = vadd.f32 %v1059_v11, %v2579_v38 }
 0x170   :  { %v1326_v24 = vpop.f32.mrf.mxu0 }
 0x171   :  { %v1324_v34 = vadd.f32 %v1323_v2, %v1235_v12 }
 0x173   :  { %v1481_v61 = vadd.f32 %v2702_v62, %v1324_v34 }
 0x174   :  { %v1148_v26 = vpop.f32.mrf.mxu2 }
 0x175   :  { %v1513_v60 = vmax.f32 %v1481_v61, 0.0  ;;  %v1149_v27 = vadd.f32 %v1148_v26, %v1060_v25  ;;  %v1237_v30 = vpop.f32.mrf.mxu3 }
 0x176   :  { %v1061_v28 = vpop.f32.mrf.mxu1 }
 0x177   :  { %1545 = vst [vmem:[%s3041_s3 + $0x88] sm:$0xff] %v1513_v60  ;;  %v1238_v41 = vadd.f32 %v1237_v30, %v1149_v27  ;;  %v1062_v14 = vadd.f32 %v1061_v28, %v2611_v50 }
 0x178   :  { %v1328_v29 = vpop.f32.mrf.mxu0 }
 0x179   :  { %v1327_v32 = vadd.f32 %v1326_v24, %v1238_v41 }
 0x17b   :  { %v1482_v21 = vadd.f32 %v2702_v62, %v1327_v32 }
 0x17c   :  { %v1150_v33 = vpop.f32.mrf.mxu2 }
 0x17d   :  { %v1514_v42 = vmax.f32 %v1482_v21, 0.0  ;;  %v1151_v43 = vadd.f32 %v1150_v33, %v1062_v14  ;;  %v1239_v38 = vpop.f32.mrf.mxu3 }
 0x17e   :  { %v1064_v44 = vpop.f32.mrf.mxu1 }
 0x17f   :  { %1546 = vst [vmem:[%s3041_s3 + $0x90] sm:$0xff] %v1514_v42  ;;  %v1240_v45 = vadd.f32 %v1239_v38, %v1151_v43  ;;  %v1065_v13 = vadd.f32 %v1064_v44, %v2620_v58 }
 0x180   :  { %v1331_v40 = vpop.f32.mrf.mxu0 }
 0x181   :  { %v1329_v46 = vadd.f32 %v1328_v29, %v1240_v45 }
 0x183   :  { %v1483_v47 = vadd.f32 %v2702_v62, %v1329_v46 }
 0x184   :  { %v1153_v48 = vpop.f32.mrf.mxu2 }
 0x185   :  { %v1515_v49 = vmax.f32 %v1483_v47, 0.0  ;;  %v1154_v52 = vadd.f32 %v1153_v48, %v1065_v13  ;;  %v1242_v50 = vpop.f32.mrf.mxu3 }
 0x186   :  { %v1066_v10 = vpop.f32.mrf.mxu1 }
 0x187   :  { %1547 = vst [vmem:[%s3041_s3 + $0x98] sm:$0xff] %v1515_v49  ;;  %v1243_v53 = vadd.f32 %v1242_v50, %v1154_v52  ;;  %v1067_v20 = vadd.f32 %v1066_v10, %v2652_v6 }
 0x188   :  { %v1333_v55 = vpop.f32.mrf.mxu0 }
 0x189   :  { %v1332_v57 = vadd.f32 %v1331_v40, %v1243_v53 }
 0x18b   :  { %v1484_v56 = vadd.f32 %v2702_v62, %v1332_v57 }
 0x18c   :  { %v1155_v63 = vpop.f32.mrf.mxu2 }
 0x18d   :  { %v1516_v0 = vmax.f32 %v1484_v56, 0.0  ;;  %v1156_v37 = vadd.f32 %v1155_v63, %v1067_v20  ;;  %v1244_v58 = vpop.f32.mrf.mxu3 }
 0x18e   :  { %v1069_v1 = vpop.f32.mrf.mxu1 }
 0x18f   :  { %1548 = vst [vmem:[%s3041_s3 + $0xa0] sm:$0xff] %v1516_v0  ;;  %v1245_v22 = vadd.f32 %v1244_v58, %v1156_v37  ;;  %v1070_v3 = vadd.f32 %v1069_v1, %v2661_v15 }
 0x190   :  { %v1336_v54 = vpop.f32.mrf.mxu0 }
 0x191   :  { %v1334_v17 = vadd.f32 %v1333_v55, %v1245_v22 }
 0x193   :  { %v1485_v2 = vadd.f32 %v2702_v62, %v1334_v17 }
 0x194   :  { %v1158_v4 = vpop.f32.mrf.mxu2 }
 0x195   :  { %v1517_v23 = vmax.f32 %v1485_v2, 0.0  ;;  %v1159_v5 = vadd.f32 %v1158_v4, %v1070_v3  ;;  %v1247_v6 = vpop.f32.mrf.mxu3 }
 0x196   :  { %v1071_v8 = vpop.f32.mrf.mxu1 }
 0x197   :  { %1549 = vst [vmem:[%s3041_s3 + $0xa8] sm:$0xff] %v1517_v23  ;;  %v1248_v9 = vadd.f32 %v1247_v6, %v1159_v5  ;;  %v1072_v24 = vadd.f32 %v1071_v8, %v2693_v35 }
 0x198   :  { %v1338_v18 = vpop.f32.mrf.mxu0 }
 0x199   :  { %v1337_v11 = vadd.f32 %v1336_v54, %v1248_v9 }
 0x19b   :  { %v1486_v12 = vadd.f32 %v2702_v62, %v1337_v11 }
 0x19c   :  { %v1160_v34 = vpop.f32.mrf.mxu2 }
 0x19d   :  { %v1518_v61 = vmax.f32 %v1486_v12, 0.0  ;;  %v1161_v25 = vadd.f32 %v1160_v34, %v1072_v24  ;;  %v1249_v15 = vpop.f32.mrf.mxu3 }
 0x19e   :  { %v1074_v26 = vpop.f32.mrf.mxu1 }
 0x19f   :  { %1550 = vst [vmem:[%s3041_s3 + $0xb0] sm:$0xff] %v1518_v61  ;;  %v1250_v60 = vadd.f32 %v1249_v15, %v1161_v25  ;;  %v1075_v41 = vadd.f32 %v1074_v26, %v2540_v19 }
 0x1a0   :  { %v1341_v27 = vpop.f32.mrf.mxu0 }
 0x1a1   :  { %v1339_v30 = vadd.f32 %v1338_v18, %v1250_v60 }
 0x1a3   :  { %v1487_v28 = vadd.f32 %v2702_v62, %v1339_v30 }
 0x1a4   :  { %v1163_v29 = vpop.f32.mrf.mxu2 }
 0x1a5   :  { %v1519_v32 = vmax.f32 %v1487_v28, 0.0  ;;  %v1164_v21 = vadd.f32 %v1163_v29, %v1075_v41  ;;  %v1252_v35 = vpop.f32.mrf.mxu3 }
 0x1a6   :  { %v1076_v14 = vpop.f32.mrf.mxu1 }
 0x1a7   :  { %1551 = vst [vmem:[%s3041_s3 + $0xb8] sm:$0xff] %v1519_v32  ;;  %v1253_v33 = vadd.f32 %v1252_v35, %v1164_v21  ;;  %v1077_v44 = vadd.f32 %v1076_v14, %v2572_v31 }
 0x1a8   :  { %v1343_v42 = vpop.f32.mrf.mxu0 }
 0x1a9   :  { %v1342_v43 = vadd.f32 %v1341_v27, %v1253_v33 }
 0x1ab   :  { %v1488_v38 = vadd.f32 %v2702_v62, %v1342_v43 }
 0x1ac   :  { %v1165_v45 = vpop.f32.mrf.mxu2 }
 0x1ad   :  { %v1520_v40 = vmax.f32 %v1488_v38, 0.0  ;;  %v1166_v46 = vadd.f32 %v1165_v45, %v1077_v44  ;;  %v1254_v19 = vpop.f32.mrf.mxu3 }
 0x1ae   :  { %v1079_v47 = vpop.f32.mrf.mxu1 }
 0x1af   :  { %1552 = vst [vmem:[%s3041_s3 + $0xc0] sm:$0xff] %v1520_v40  ;;  %v1255_v13 = vadd.f32 %v1254_v19, %v1166_v46  ;;  %v1080_v50 = vadd.f32 %v1079_v47, %v2581_v39 }
 0x1b0   :  { %v1346_v48 = vpop.f32.mrf.mxu0 }
 0x1b1   :  { %v1344_v49 = vadd.f32 %v1343_v42, %v1255_v13 }
 0x1b3   :  { %v1489_v52 = vadd.f32 %v2702_v62, %v1344_v49 }
 0x1b4   :  { %v1168_v10 = vpop.f32.mrf.mxu2 }
 0x1b5   :  { %v1521_v53 = vmax.f32 %v1489_v52, 0.0  ;;  %v1169_v55 = vadd.f32 %v1168_v10, %v1080_v50  ;;  %v1257_v31 = vpop.f32.mrf.mxu3 }
 0x1b6   :  { %v1081_v57 = vpop.f32.mrf.mxu1 }
 0x1b7   :  { %1553 = vst [vmem:[%s3041_s3 + $0xc8] sm:$0xff] %v1521_v53  ;;  %v1258_v56 = vadd.f32 %v1257_v31, %v1169_v55  ;;  %v1082_v37 = vadd.f32 %v1081_v57, %v2613_v51 }
 0x1b8   :  { %v1348_v20 = vpop.f32.mrf.mxu0 }
 0x1b9   :  { %v1347_v63 = vadd.f32 %v1346_v48, %v1258_v56 }
 0x1bb   :  { %v1490_v0 = vadd.f32 %v2702_v62, %v1347_v63 }
 0x1bc   :  { %v1170_v58 = vpop.f32.mrf.mxu2 }
 0x1bd   :  { %v1522_v1 = vmax.f32 %v1490_v0, 0.0  ;;  %v1171_v22 = vadd.f32 %v1170_v58, %v1082_v37  ;;  %v1259_v39 = vpop.f32.mrf.mxu3 }
 0x1be   :  { %v1084_v54 = vpop.f32.mrf.mxu1 }
 0x1bf   :  { %1554 = vst [vmem:[%s3041_s3 + $0xd0] sm:$0xff] %v1522_v1  ;;  %v1260_v17 = vadd.f32 %v1259_v39, %v1171_v22  ;;  %v1085_v23 = vadd.f32 %v1084_v54, %v2622_v59 }
 0x1c0   :  { %v1351_v3 = vpop.f32.mrf.mxu0 }
 0x1c1   :  { %v1349_v2 = vadd.f32 %v1348_v20, %v1260_v17 }
 0x1c3   :  { %v1491_v4 = vadd.f32 %v2702_v62, %v1349_v2 }
 0x1c4   :  { %v1173_v5 = vpop.f32.mrf.mxu2 }
 0x1c5   :  { %v1523_v6 = vmax.f32 %v1491_v4, 0.0  ;;  %v1174_v8 = vadd.f32 %v1173_v5, %v1085_v23  ;;  %v1262_v51 = vpop.f32.mrf.mxu3 }
 0x1c6   :  { %v1086_v9 = vpop.f32.mrf.mxu1 }
 0x1c7   :  { %1555 = vst [vmem:[%s3041_s3 + $0xd8] sm:$0xff] %v1523_v6  ;;  %v1263_v18 = vadd.f32 %v1262_v51, %v1174_v8  ;;  %v1087_v24 = vadd.f32 %v1086_v9, %v2654_v7 }
 0x1c8   :  { %v1353_v34 = vpop.f32.mrf.mxu0 }
 0x1c9   :  { %v1352_v11 = vadd.f32 %v1351_v3, %v1263_v18 }
 0x1cb   :  { %v1492_v12 = vadd.f32 %v2702_v62, %v1352_v11 }
 0x1cc   :  { %v1175_v61 = vpop.f32.mrf.mxu2 }
 0x1cd   :  { %v1524_v25 = vmax.f32 %v1492_v12, 0.0  ;;  %v1176_v15 = vadd.f32 %v1175_v61, %v1087_v24  ;;  %v1264_v59 = vpop.f32.mrf.mxu3 }
 0x1ce   :  { %v1089_v26 = vpop.f32.mrf.mxu1 }
 0x1cf   :  { %1556 = vst [vmem:[%s3041_s3 + $0xe0] sm:$0xff] %v1524_v25  ;;  %v1265_v60 = vadd.f32 %v1264_v59, %v1176_v15  ;;  %v1090_v28 = vadd.f32 %v1089_v26, %v2663_v16 }
 0x1d0   :  { %v1356_v21 = vpop.f32.mrf.mxu0 }
 0x1d1   :  { %v1354_v27 = vadd.f32 %v1353_v34, %v1265_v60 }
 0x1d3   :  { %v1493_v30 = vadd.f32 %v2702_v62, %v1354_v27 }
 0x1d4   :  { %v1178_v41 = vpop.f32.mrf.mxu2 }
 0x1d5   :  { %v1525_v29 = vmax.f32 %v1493_v30, 0.0  ;;  %v1179_v32 = vadd.f32 %v1178_v41, %v1090_v28  ;;  %v1267_v7 = vpop.f32.mrf.mxu3 }
 0x1d6   :  { %v1091_v14 = vpop.f32.mrf.mxu1 }
 0x1d7   :  { %1557 = vst [vmem:[%s3041_s3 + $0xe8] sm:$0xff] %v1525_v29  ;;  %v1268_v35 = vadd.f32 %v1267_v7, %v1179_v32  ;;  %v1092_v43 = vadd.f32 %v1091_v14, %v2695_v36 }
 0x1d8   :  { %v1358_v46 = vpop.f32.mrf.mxu0 }
 0x1d9   :  { %v1357_v33 = vadd.f32 %v1356_v21, %v1268_v35 }
 0x1db   :  { %v1494_v42 = vadd.f32 %v2702_v62, %v1357_v33 }
 0x1dc   :  { %v1180_v38 = vpop.f32.mrf.mxu2 }
 0x1dd   :  { %v1526_v44 = vmax.f32 %v1494_v42, 0.0  ;;  %v1181_v45 = vadd.f32 %v1180_v38, %v1092_v43  ;;  %v1269_v16 = vpop.f32.mrf.mxu3 }
 0x1df   :  { %1558 = vst [vmem:[%s3041_s3 + $0xf0] sm:$0xff] %v1526_v44  ;;  %v1270_v40 = vadd.f32 %v1269_v16, %v1181_v45 }
 0x1e1   :  { %v1359_v19 = vadd.f32 %v1358_v46, %v1270_v40 }
 0x1e3   :  { %v1495_v47 = vadd.f32 %v2702_v62, %v1359_v19 }
 0x1e5   :  { %v1527_v13 = vmax.f32 %v1495_v47, 0.0 }
 0x1e7   :  { %1559 = vst [vmem:[%s3041_s3 + $0xf8] sm:$0xff] %v1527_v13 }

// kernel: tps_forward.10
= control target key start
LH: loop header
LB: loop body
LE: loop exit
PB: predicated region body
PF: predicated region fallthrough
CT: control target
= control target key end

     0   :  { %s4193_s1 = inlined_call_operand.vmem [shape: bf16[1152,256], index: 1, kind: input, shape index: {}]   ;;  %s4194_s0 = inlined_call_operand.vmem [shape: bf16[64,1152], index: 0, kind: input, shape index: {}]   ;;  %s4195_s2 = inlined_call_operand.vmem [shape: f32[1,256], index: 2, kind: input, shape index: {}]   ;;  %s4196_s3 = inlined_call_operand.vmem [shape: f32[64,256], index: 3, kind: output, shape index: {}]  }
   0x1   :  { %v1971_v0 = vld [vmem:[%s4193_s1 + $0x70] sm:$0xf]  ;;  %v2540_v1 = vld [vmem:[%s4193_s1 + $0x74] sm:$0xf0]  ;;  %v1963_v5 = vld [vmem:[%s4193_s1 + $0x60] sm:$0xf] }
   0x2   :  { %v2035_v2 = vld [vmem:[%s4193_s1 + $0xf0] sm:$0xf]  ;;  %v1972_v3 = vor.u32 %v2540_v1, %v1971_v0  ;;  %v2556_v4 = vld [vmem:[%s4193_s1 + $0xf4] sm:$0xf0]  ;;  %v2538_v6 = vld [vmem:[%s4193_s1 + $0x64] sm:$0xf0] }
   0x3   :  { %v2036_v7 = vor.u32 %v2556_v4, %v2035_v2  ;;  %v2027_v8 = vld [vmem:[%s4193_s1 + $0xe0] sm:$0xf]  ;;  %v2554_v9 = vld [vmem:[%s4193_s1 + $0xe4] sm:$0xf0]  ;;  %v1964_v10 = vor.u32 %v2538_v6, %v1963_v5  ;;  %v1955_v12 = vld [vmem:[%s4193_s1 + $0x50] sm:$0xf] }
   0x4   :  { %2669 = vmatpush.bf16.msra.mxu2 %v1972_v3  ;;  %1138 = vmatpush.bf16.msra.mxu0 %v1972_v3  ;;  %v2028_v11 = vor.u32 %v2554_v9, %v2027_v8  ;;  %v2536_v13 = vld [vmem:[%s4193_s1 + $0x54] sm:$0xf0]  ;;  %v2019_v14 = vld [vmem:[%s4193_s1 + $0xd0] sm:$0xf]  ;;  %v1947_v18 = vld [vmem:[%s4193_s1 + $0x40] sm:$0xf] }
   0x5   :  { %2677 = vmatpush.bf16.msra.mxu3 %v2036_v7  ;;  %1167 = vmatpush.bf16.msra.mxu1 %v2036_v7  ;;  %v2552_v15 = vld [vmem:[%s4193_s1 + $0xd4] sm:$0xf0]  ;;  %v1956_v16 = vor.u32 %v2536_v13, %v1955_v12  ;;  %v2534_v19 = vld [vmem:[%s4193_s1 + $0x44] sm:$0xf0]  ;;  %v2011_v20 = vld [vmem:[%s4193_s1 + $0xc0] sm:$0xf] }
   0x6   :  { %v2020_v17 = vor.u32 %v2552_v15, %v2019_v14  ;;  %v2550_v21 = vld [vmem:[%s4193_s1 + $0xc4] sm:$0xf0]  ;;  %v1948_v22 = vor.u32 %v2534_v19, %v1947_v18  ;;  %v1939_v24 = vld [vmem:[%s4193_s1 + $0x30] sm:$0xf]  ;;  %v2532_v25 = vld [vmem:[%s4193_s1 + $0x34] sm:$0xf0] }
   0x7   :  { %v2012_v23 = vor.u32 %v2550_v21, %v2011_v20  ;;  %v2003_v26 = vld [vmem:[%s4193_s1 + $0xb0] sm:$0xf]  ;;  %v2548_v27 = vld [vmem:[%s4193_s1 + $0xb4] sm:$0xf0]  ;;  %v1940_v28 = vor.u32 %v2532_v25, %v1939_v24  ;;  %v1931_v30 = vld [vmem:[%s4193_s1 + $0x20] sm:$0xf] }
   0x8   :  { %2670 = vmatpush.bf16.msra.mxu2 %v1964_v10  ;;  %1139 = vmatpush.bf16.msra.mxu0 %v1964_v10  ;;  %v2004_v29 = vor.u32 %v2548_v27, %v2003_v26  ;;  %v2530_v31 = vld [vmem:[%s4193_s1 + $0x24] sm:$0xf0]  ;;  %v1995_v32 = vld [vmem:[%s4193_s1 + $0xa0] sm:$0xf]  ;;  %v1923_v36 = vld [vmem:[%s4193_s1 + $0x10] sm:$0xf] }
   0x9   :  { %2678 = vmatpush.bf16.msra.mxu3 %v2028_v11  ;;  %1168 = vmatpush.bf16.msra.mxu1 %v2028_v11  ;;  %v2546_v33 = vld [vmem:[%s4193_s1 + $0xa4] sm:$0xf0]  ;;  %v1932_v34 = vor.u32 %v2530_v31, %v1931_v30  ;;  %v2528_v37 = vld [vmem:[%s4193_s1 + $0x14] sm:$0xf0]  ;;  %v1987_v38 = vld [vmem:[%s4193_s1 + $0x90] sm:$0xf] }
   0xa   :  { %v1996_v35 = vor.u32 %v2546_v33, %v1995_v32  ;;  %v2544_v39 = vld [vmem:[%s4193_s1 + $0x94] sm:$0xf0]  ;;  %v1924_v40 = vor.u32 %v2528_v37, %v1923_v36  ;;  %v1915_v41 = vld [vmem:[%s4193_s1] sm:$0xf]  ;;  %v2526_v43 = vld [vmem:[%s4193_s1 + $0x4] sm:$0xf0] }
   0xb   :  { %v1988_v42 = vor.u32 %v2544_v39, %v1987_v38  ;;  %v1979_v44 = vld [vmem:[%s4193_s1 + $0x80] sm:$0xf]  ;;  %v2542_v45 = vld [vmem:[%s4193_s1 + $0x84] sm:$0xf0]  ;;  %v1843_v46 = vld [vmem:[%s4194_s0 + $0x90] sm:$0xf]  ;;  %v1916_v54 = vor.u32 %v2526_v43, %v1915_v41 }
   0xc   :  { %2671 = vmatpush.bf16.msra.mxu2 %v1956_v16  ;;  %1140 = vmatpush.bf16.msra.mxu0 %v1956_v16  ;;  %v2511_v47 = vld [vmem:[%s4194_s0 + $0xb0] sm:$0xf0]  ;;  %v2099_v48 = vld [vmem:[%s4193_s1 + $0x170] sm:$0xf]  ;;  %v1845_v50 = vld [vmem:[%s4194_s0 + $0xb4] sm:$0xf0]  ;;  %v1980_v58 = vor.u32 %v2542_v45, %v1979_v44 }
   0xd   :  { %2679 = vmatpush.bf16.msra.mxu3 %v2020_v17  ;;  %1169 = vmatpush.bf16.msra.mxu1 %v2020_v17  ;;  %v2507_v49 = vld [vmem:[%s4194_s0 + $0x94] sm:$0xf]  ;;  %v2572_v51 = vld [vmem:[%s4193_s1 + $0x174] sm:$0xf0]  ;;  %v2163_v52 = vld [vmem:[%s4193_s1 + $0x1f0] sm:$0xf]  ;;  %v2852_v3 = vor.u32 %v2511_v47, %v1843_v46 }
   0xe   :  { %v2588_v53 = vld [vmem:[%s4193_s1 + $0x1f4] sm:$0xf0]  ;;  %v1771_v55 = vld [vmem:[%s4194_s0] sm:$0xf]  ;;  %v2493_v56 = vld [vmem:[%s4194_s0 + $0x20] sm:$0xf0]  ;;  %v2100_v62 = vor.u32 %v2572_v51, %v2099_v48  ;;  %v2865_v8 = vor.u32 %v2507_v49, %v1845_v50 }
   0xf   :  { %v2489_v57 = vld [vmem:[%s4194_s0 + $0x4] sm:$0xf]  ;;  %v1773_v59 = vld [vmem:[%s4194_s0 + $0x24] sm:$0xf0]  ;;  %v2227_v60 = vld [vmem:[%s4193_s1 + $0x270] sm:$0xf]  ;;  %v2164_v63 = vor.u32 %v2588_v53, %v2163_v52  ;;  %v2854_v4 = vor.u32 %v2493_v56, %v1771_v55 }
  0x10   :  { %2672 = vmatpush.bf16.msra.mxu2 %v1948_v22  ;;  %1141 = vmatpush.bf16.msra.mxu0 %v1948_v22  ;;  %v2604_v61 = vld [vmem:[%s4193_s1 + $0x274] sm:$0xf0]  ;;  %v2091_v0 = vld [vmem:[%s4193_s1 + $0x160] sm:$0xf]  ;;  %v2291_v1 = vld [vmem:[%s4193_s1 + $0x2f0] sm:$0xf]  ;;  %v2867_v9 = vor.u32 %v2489_v57, %v1773_v59 }
  0x11   :  { %2680 = vmatpush.bf16.msra.mxu3 %v2012_v23  ;;  %1170 = vmatpush.bf16.msra.mxu1 %v2012_v23  ;;  %v2620_v2 = vld [vmem:[%s4193_s1 + $0x2f4] sm:$0xf0]  ;;  %v2570_v5 = vld [vmem:[%s4193_s1 + $0x164] sm:$0xf0]  ;;  %v2155_v6 = vld [vmem:[%s4193_s1 + $0x1e0] sm:$0xf]  ;;  %v2228_v10 = vor.u32 %v2604_v61, %v2227_v60 }
  0x12   :  { %v2586_v7 = vld [vmem:[%s4193_s1 + $0x1e4] sm:$0xf0]  ;;  %v2292_v11 = vor.u32 %v2620_v2, %v2291_v1  ;;  %v2219_v12 = vld [vmem:[%s4193_s1 + $0x260] sm:$0xf]  ;;  %v2092_v14 = vor.u32 %v2570_v5, %v2091_v0  ;;  %v2083_v16 = vld [vmem:[%s4193_s1 + $0x150] sm:$0xf] }
  0x13   :  { %v2602_v13 = vld [vmem:[%s4193_s1 + $0x264] sm:$0xf0]  ;;  %v2156_v15 = vor.u32 %v2586_v7, %v2155_v6  ;;  %v2283_v17 = vld [vmem:[%s4193_s1 + $0x2e0] sm:$0xf]  ;;  %v2568_v19 = vld [vmem:[%s4193_s1 + $0x154] sm:$0xf0] }
  0x14   :  { %2673 = vmatpush.bf16.msra.mxu2 %v1940_v28  ;;  %1142 = vmatpush.bf16.msra.mxu0 %v1940_v28  ;;  %v2618_v18 = vld [vmem:[%s4193_s1 + $0x2e4] sm:$0xf0]  ;;  %v2147_v20 = vld [vmem:[%s4193_s1 + $0x1d0] sm:$0xf]  ;;  %v2584_v21 = vld [vmem:[%s4193_s1 + $0x1d4] sm:$0xf0]  ;;  %v2220_v22 = vor.u32 %v2602_v13, %v2219_v12  ;;  %v2084_v26 = vor.u32 %v2568_v19, %v2083_v16 }
  0x15   :  { %2681 = vmatpush.bf16.msra.mxu3 %v2004_v29  ;;  %1171 = vmatpush.bf16.msra.mxu1 %v2004_v29  ;;  %v2284_v23 = vor.u32 %v2618_v18, %v2283_v17  ;;  %v2211_v24 = vld [vmem:[%s4193_s1 + $0x250] sm:$0xf]  ;;  %v2600_v25 = vld [vmem:[%s4193_s1 + $0x254] sm:$0xf0]  ;;  %v2148_v27 = vor.u32 %v2584_v21, %v2147_v20  ;;  %v2075_v28 = vld [vmem:[%s4193_s1 + $0x140] sm:$0xf] }
  0x16   :  { %v2275_v29 = vld [vmem:[%s4193_s1 + $0x2d0] sm:$0xf]  ;;  %v2616_v30 = vld [vmem:[%s4193_s1 + $0x2d4] sm:$0xf0]  ;;  %v2566_v31 = vld [vmem:[%s4193_s1 + $0x144] sm:$0xf0] }
  0x17   :  { %v2139_v32 = vld [vmem:[%s4193_s1 + $0x1c0] sm:$0xf]  ;;  %v2582_v33 = vld [vmem:[%s4193_s1 + $0x1c4] sm:$0xf0]  ;;  %v2076_v38 = vor.u32 %v2566_v31, %v2075_v28  ;;  %v2520_v41 = vld [vmem:[%s4194_s0 + $0xf8] sm:$0xf0] }
  0x18   :  { %2674 = vmatpush.bf16.msra.mxu2 %v1932_v34  ;;  %1143 = vmatpush.bf16.msra.mxu0 %v1932_v34  ;;  %v2212_v34 = vor.u32 %v2600_v25, %v2211_v24  ;;  %v2203_v36 = vld [vmem:[%s4193_s1 + $0x240] sm:$0xf]  ;;  %v2598_v37 = vld [vmem:[%s4193_s1 + $0x244] sm:$0xf0]  ;;  %v2140_v39 = vor.u32 %v2582_v33, %v2139_v32  ;;  %v2516_v45 = vld [vmem:[%s4194_s0 + $0xdc] sm:$0xf] }
  0x19   :  { %2682 = vmatpush.bf16.msra.mxu3 %v1996_v35  ;;  %1172 = vmatpush.bf16.msra.mxu1 %v1996_v35  ;;  %v2276_v35 = vor.u32 %v2616_v30, %v2275_v29  ;;  %v2267_v43 = vld [vmem:[%s4193_s1 + $0x2c0] sm:$0xf]  ;;  %v2614_v44 = vld [vmem:[%s4193_s1 + $0x2c4] sm:$0xf0]  ;;  %v2564_v47 = vld [vmem:[%s4193_s1 + $0x134] sm:$0xf0]  ;;  %v2204_v53 = vor.u32 %v2598_v37, %v2203_v36 }
  0x1a   :  { %v1881_v46 = vld [vmem:[%s4194_s0 + $0xfc] sm:$0xf0]  ;;  %v2131_v48 = vld [vmem:[%s4193_s1 + $0x1b0] sm:$0xf]  ;;  %v2580_v49 = vld [vmem:[%s4193_s1 + $0x1b4] sm:$0xf0] }
  0x1b   :  { %v1807_v50 = vld [vmem:[%s4194_s0 + $0x48] sm:$0xf]  ;;  %v2502_v51 = vld [vmem:[%s4194_s0 + $0x68] sm:$0xf0]  ;;  %v1809_v55 = vld [vmem:[%s4194_s0 + $0x6c] sm:$0xf0]  ;;  %v2132_v59 = vor.u32 %v2580_v49, %v2131_v48  ;;  %v2997_v6 = vor.u32 %v2516_v45, %v1881_v46 }
  0x1c   :  { %2675 = vmatpush.bf16.msra.mxu2 %v1924_v40  ;;  %1144 = vmatpush.bf16.msra.mxu0 %v1924_v40  ;;  %v1879_v40 = vld [vmem:[%s4194_s0 + $0xd8] sm:$0xf]  ;;  %v2498_v52 = vld [vmem:[%s4194_s0 + $0x4c] sm:$0xf]  ;;  %v2195_v56 = vld [vmem:[%s4193_s1 + $0x230] sm:$0xf]  ;;  %v2986_v0 = vor.u32 %v2502_v51, %v1807_v50 }
  0x1d   :  { %2683 = vmatpush.bf16.msra.mxu3 %v1988_v42  ;;  %1173 = vmatpush.bf16.msra.mxu1 %v1988_v42  ;;  %v2067_v42 = vld [vmem:[%s4193_s1 + $0x130] sm:$0xf]  ;;  %v2596_v57 = vld [vmem:[%s4193_s1 + $0x234] sm:$0xf0]  ;;  %v2059_v60 = vld [vmem:[%s4193_s1 + $0x120] sm:$0xf]  ;;  %v2999_v7 = vor.u32 %v2498_v52, %v1809_v55 }
  0x1e   :  { %v2259_v61 = vld [vmem:[%s4193_s1 + $0x2b0] sm:$0xf]  ;;  %v2562_v1 = vld [vmem:[%s4193_s1 + $0x124] sm:$0xf0]  ;;  %v2123_v2 = vld [vmem:[%s4193_s1 + $0x1a0] sm:$0xf] }
  0x1f   :  { %v2578_v5 = vld [vmem:[%s4193_s1 + $0x1a4] sm:$0xf0]  ;;  %v2187_v12 = vld [vmem:[%s4193_s1 + $0x220] sm:$0xf]  ;;  %v2051_v16 = vld [vmem:[%s4193_s1 + $0x110] sm:$0xf] }
  0x20   :  { %2676 = vmatpush.bf16.msra.mxu2 %v1916_v54  ;;  %1145 = vmatpush.bf16.msra.mxu0 %v1916_v54  ;;  %v2268_v54 = vor.u32 %v2614_v44, %v2267_v43  ;;  %v2594_v13 = vld [vmem:[%s4193_s1 + $0x224] sm:$0xf0]  ;;  %v2251_v17 = vld [vmem:[%s4193_s1 + $0x2a0] sm:$0xf]  ;;  %v2560_v19 = vld [vmem:[%s4193_s1 + $0x114] sm:$0xf0] }
  0x21   :  { %2684 = vmatpush.bf16.msra.mxu3 %v1980_v58  ;;  %1174 = vmatpush.bf16.msra.mxu1 %v1980_v58  ;;  %v2068_v58 = vor.u32 %v2564_v47, %v2067_v42  ;;  %v2610_v18 = vld [vmem:[%s4193_s1 + $0x2a4] sm:$0xf0]  ;;  %v2115_v20 = vld [vmem:[%s4193_s1 + $0x190] sm:$0xf]  ;;  %v2576_v21 = vld [vmem:[%s4193_s1 + $0x194] sm:$0xf0] }
  0x22   :  { %v2179_v24 = vld [vmem:[%s4193_s1 + $0x210] sm:$0xf]  ;;  %v2592_v25 = vld [vmem:[%s4193_s1 + $0x214] sm:$0xf0]  ;;  %v2116_v28 = vor.u32 %v2576_v21, %v2115_v20  ;;  %v2558_v29 = vld [vmem:[%s4193_s1 + $0x104] sm:$0xf0] }
  0x23   :  { %1156 = vmatmul.bf16.vlgmr.msra.gmra.mxu2 %v2852_v3  ;;  %1146 = vmatmul.bf16.vlgmr.msra.gmra.mxu0 %v2854_v4  ;;  %v2243_v30 = vld [vmem:[%s4193_s1 + $0x290] sm:$0xf]  ;;  %v2608_v31 = vld [vmem:[%s4193_s1 + $0x294] sm:$0xf0]  ;;  %v2107_v32 = vld [vmem:[%s4193_s1 + $0x180] sm:$0xf] }
  0x24   :  { %1196 = vmatpush.bf16.msrb.mxu2 %v2100_v62  ;;  %1185 = vmatmul.bf16.vlgmr.msra.gmra.mxu3 %v2865_v8  ;;  %v2612_v62 = vld [vmem:[%s4193_s1 + $0x2b4] sm:$0xf0]  ;;  %v2574_v33 = vld [vmem:[%s4193_s1 + $0x184] sm:$0xf0]  ;;  %v2419_v36 = vld [vmem:[%s4193_s1 + $0x3f0] sm:$0xf] }
  0x25   :  { %1225 = vmatpush.bf16.msrb.mxu3 %v2164_v63  ;;  %1175 = vmatmul.bf16.vlgmr.msra.gmra.mxu1 %v2867_v9  ;;  %v2984_v63 = vor.u32 %v2520_v41, %v1879_v40  ;;  %v2652_v37 = vld [vmem:[%s4193_s1 + $0x3f4] sm:$0xf0]  ;;  %v2171_v40 = vld [vmem:[%s4193_s1 + $0x200] sm:$0xf]  ;;  %v2590_v41 = vld [vmem:[%s4193_s1 + $0x204] sm:$0xf0]  ;;  %v2108_v43 = vor.u32 %v2574_v33, %v2107_v32 }
  0x26   :  { %1254 = vmatpush.bf16.msrb.mxu0 %v2228_v10  ;;  %1283 = vmatpush.bf16.msrb.mxu1 %v2292_v11  ;;  %v2196_v10 = vor.u32 %v2596_v57, %v2195_v56  ;;  %v2260_v11 = vor.u32 %v2612_v62, %v2259_v61  ;;  %v1779_v44 = vld [vmem:[%s4194_s0 + $0x8] sm:$0xf]  ;;  %v2494_v45 = vld [vmem:[%s4194_s0 + $0x28] sm:$0xf0]  ;;  %v2235_v46 = vld [vmem:[%s4193_s1 + $0x280] sm:$0xf]  ;;  %v2420_v52 = vor.u32 %v2652_v37, %v2419_v36 }
  0x27   :  { %v2606_v47 = vld [vmem:[%s4193_s1 + $0x284] sm:$0xf0]  ;;  %v2483_v48 = vld [vmem:[%s4193_s1 + $0x470] sm:$0xf]  ;;  %v2490_v49 = vld [vmem:[%s4194_s0 + $0xc] sm:$0xf] }
  0x28   :  { %1197 = vmatpush.bf16.msrb.mxu2 %v2092_v14  ;;  %v2060_v14 = vor.u32 %v2562_v1, %v2059_v60  ;;  %v1781_v50 = vld [vmem:[%s4194_s0 + $0x2c] sm:$0xf0]  ;;  %v1973_v55 = vld [vmem:[%s4193_s1 + $0x78] sm:$0xf0]  ;;  %v2411_v57 = vld [vmem:[%s4193_s1 + $0x3e0] sm:$0xf]  ;;  %v2236_v60 = vor.u32 %v2606_v47, %v2235_v46 }
  0x29   :  { %1226 = vmatpush.bf16.msrb.mxu3 %v2156_v15  ;;  %v2124_v15 = vor.u32 %v2578_v5, %v2123_v2  ;;  %v1787_v56 = vld [vmem:[%s4194_s0 + $0x10] sm:$0xf]  ;;  %v2495_v61 = vld [vmem:[%s4194_s0 + $0x30] sm:$0xf0]  ;;  %v1789_v1 = vld [vmem:[%s4194_s0 + $0x34] sm:$0xf0] }
  0x2a   :  { %1255 = vmatpush.bf16.msrb.mxu0 %v2220_v22  ;;  %1284 = vmatpush.bf16.msrb.mxu1 %v2284_v23  ;;  %v2188_v22 = vor.u32 %v2594_v13, %v2187_v12  ;;  %v2252_v23 = vor.u32 %v2610_v18, %v2251_v17  ;;  %v2491_v62 = vld [vmem:[%s4194_s0 + $0x14] sm:$0xf]  ;;  %v2347_v2 = vld [vmem:[%s4193_s1 + $0x360] sm:$0xf]  ;;  %v2634_v5 = vld [vmem:[%s4193_s1 + $0x364] sm:$0xf0]  ;;  %v3128_v13 = vor.u32 %v2494_v45, %v1779_v44 }
  0x2b   :  { %v2475_v12 = vld [vmem:[%s4193_s1 + $0x460] sm:$0xf]  ;;  %v1965_v17 = vld [vmem:[%s4193_s1 + $0x68] sm:$0xf0]  ;;  %v3139_v18 = vor.u32 %v2490_v49, %v1781_v50  ;;  %v2403_v20 = vld [vmem:[%s4193_s1 + $0x3d0] sm:$0xf] }
  0x2c   :  { %1198 = vmatpush.bf16.msrb.mxu2 %v2084_v26  ;;  %v2043_v26 = vld [vmem:[%s4193_s1 + $0x100] sm:$0xf]  ;;  %v2648_v21 = vld [vmem:[%s4193_s1 + $0x3d4] sm:$0xf0]  ;;  %v1957_v32 = vld [vmem:[%s4193_s1 + $0x58] sm:$0xf0] }
  0x2d   :  { %1227 = vmatpush.bf16.msrb.mxu3 %v2148_v27  ;;  %v2052_v27 = vor.u32 %v2560_v19, %v2051_v16  ;;  %v2044_v42 = vor.u32 %v2558_v29, %v2043_v26  ;;  %v2537_v16 = vld [vmem:[%s4193_s1 + $0x64] sm:$0xf]  ;;  %v3141_v19 = vor.u32 %v2495_v61, %v1787_v56  ;;  %v2404_v29 = vor.u32 %v2648_v21, %v2403_v20  ;;  %v2395_v33 = vld [vmem:[%s4193_s1 + $0x3c0] sm:$0xf]  ;;  %v2630_v37 = vld [vmem:[%s4193_s1 + $0x344] sm:$0xf0] }
  0x2e   :  { %1256 = vmatpush.bf16.msrb.mxu0 %v2212_v34  ;;  %1285 = vmatpush.bf16.msrb.mxu1 %v2276_v35  ;;  %v2355_v34 = vld [vmem:[%s4193_s1 + $0x370] sm:$0xf]  ;;  %v2636_v35 = vld [vmem:[%s4193_s1 + $0x374] sm:$0xf0]  ;;  %v2331_v36 = vld [vmem:[%s4193_s1 + $0x340] sm:$0xf] }
  0x2f   :  { %v2356_v51 = vor.u32 %v2636_v35, %v2355_v34  ;;  %v2646_v34 = vld [vmem:[%s4193_s1 + $0x3c4] sm:$0xf0]  ;;  %v1949_v44 = vld [vmem:[%s4193_s1 + $0x48] sm:$0xf0]  ;;  %v2387_v45 = vld [vmem:[%s4193_s1 + $0x3b0] sm:$0xf]  ;;  %v2332_v47 = vor.u32 %v2630_v37, %v2331_v36 }
  0x30   :  { %1199 = vmatpush.bf16.msrb.mxu2 %v2076_v38  ;;  %v2180_v38 = vor.u32 %v2592_v25, %v2179_v24  ;;  %v2339_v24 = vld [vmem:[%s4193_s1 + $0x350] sm:$0xf]  ;;  %v2632_v25 = vld [vmem:[%s4193_s1 + $0x354] sm:$0xf0]  ;;  %v2503_v49 = vld [vmem:[%s4194_s0 + $0x70] sm:$0xf0] }
  0x31   :  { %1228 = vmatpush.bf16.msrb.mxu3 %v2140_v39  ;;  %v2244_v39 = vor.u32 %v2608_v31, %v2243_v30  ;;  %v2664_v30 = vld [vmem:[%s4193_s1 + $0x454] sm:$0xf0]  ;;  %v2535_v31 = vld [vmem:[%s4193_s1 + $0x54] sm:$0xf]  ;;  %v2340_v35 = vor.u32 %v2632_v25, %v2339_v24  ;;  %v2323_v50 = vld [vmem:[%s4193_s1 + $0x330] sm:$0xf] }
  0x32   :  { %1257 = vmatpush.bf16.msrb.mxu0 %v2204_v53  ;;  %1286 = vmatpush.bf16.msrb.mxu1 %v2268_v54  ;;  %v2668_v53 = vld [vmem:[%s4193_s1 + $0x474] sm:$0xf0]  ;;  %v2539_v54 = vld [vmem:[%s4193_s1 + $0x74] sm:$0xf]  ;;  %v2379_v61 = vld [vmem:[%s4193_s1 + $0x3a0] sm:$0xf] }
  0x33   :  { %1161 = vmatmul.bf16.gmra.mxu2 %v2984_v63  ;;  %1151 = vmatmul.bf16.gmra.mxu0 %v2986_v0  ;;  %v2644_v46 = vld [vmem:[%s4193_s1 + $0x3b4] sm:$0xf0]  ;;  %v1933_v36 = vld [vmem:[%s4193_s1 + $0x28] sm:$0xf0]  ;;  %v2299_v37 = vld [vmem:[%s4193_s1 + $0x300] sm:$0xf] }
  0x34   :  { %1200 = vmatpush.bf16.msrb.mxu2 %v2068_v58  ;;  %1190 = vmatmul.bf16.gmra.mxu3 %v2997_v6  ;;  %v2650_v58 = vld [vmem:[%s4193_s1 + $0x3e4] sm:$0xf0]  ;;  %v2388_v56 = vor.u32 %v2644_v46, %v2387_v45  ;;  %v2656_v45 = vld [vmem:[%s4193_s1 + $0x414] sm:$0xf0]  ;;  %v2527_v46 = vld [vmem:[%s4193_s1 + $0x14] sm:$0xf] }
  0x35   :  { %1229 = vmatpush.bf16.msrb.mxu3 %v2132_v59  ;;  %1180 = vmatmul.bf16.gmra.mxu1 %v2999_v7  ;;  %v2172_v59 = vor.u32 %v2590_v41, %v2171_v40  ;;  %v2459_v40 = vld [vmem:[%s4193_s1 + $0x440] sm:$0xf]  ;;  %v2396_v41 = vor.u32 %v2646_v34, %v2395_v33 }
  0x36   :  { %1258 = vmatpush.bf16.msrb.mxu0 %v2196_v10  ;;  %1287 = vmatpush.bf16.msrb.mxu1 %v2260_v11  ;;  %v2484_v10 = vor.u32 %v2668_v53, %v2483_v48  ;;  %v1976_v11 = vor.u32 %v2539_v54, %v1973_v55  ;;  %v1815_v48 = vld [vmem:[%s4194_s0 + $0x50] sm:$0xf]  ;;  %v2499_v55 = vld [vmem:[%s4194_s0 + $0x54] sm:$0xf] }
  0x37   :  { %v2451_v54 = vld [vmem:[%s4193_s1 + $0x430] sm:$0xf] }
  0x38   :  { %1201 = vmatpush.bf16.msrb.mxu2 %v2060_v14  ;;  %v2412_v14 = vor.u32 %v2650_v58, %v2411_v57  ;;  %v2660_v57 = vld [vmem:[%s4193_s1 + $0x434] sm:$0xf0]  ;;  %v2531_v58 = vld [vmem:[%s4193_s1 + $0x34] sm:$0xf] }
  0x39   :  { %1230 = vmatpush.bf16.msrb.mxu3 %v2124_v15  ;;  %v2666_v15 = vld [vmem:[%s4193_s1 + $0x464] sm:$0xf0] }
  0x3a   :  { %1259 = vmatpush.bf16.msrb.mxu0 %v2188_v22  ;;  %1288 = vmatpush.bf16.msrb.mxu1 %v2252_v23  ;;  %v3149_v22 = vor.u32 %v2491_v62, %v1789_v1  ;;  %v2348_v23 = vor.u32 %v2634_v5, %v2347_v2  ;;  %v2476_v26 = vor.u32 %v2666_v15, %v2475_v12  ;;  %v2642_v62 = vld [vmem:[%s4193_s1 + $0x3a4] sm:$0xf0]  ;;  %v1823_v1 = vld [vmem:[%s4194_s0 + $0x58] sm:$0xf]  ;;  %v2504_v2 = vld [vmem:[%s4194_s0 + $0x78] sm:$0xf0] }
  0x3b   :  { %v2500_v5 = vld [vmem:[%s4194_s0 + $0x5c] sm:$0xf]  ;;  %v2315_v12 = vld [vmem:[%s4193_s1 + $0x320] sm:$0xf]  ;;  %v2452_v15 = vor.u32 %v2660_v57, %v2451_v54  ;;  %v2380_v20 = vor.u32 %v2642_v62, %v2379_v61 }
  0x3c   :  { %1202 = vmatpush.bf16.msrb.mxu2 %v2052_v27  ;;  %v1968_v27 = vor.u32 %v2537_v16, %v1965_v17  ;;  %v3257_v17 = vor.u32 %v2503_v49, %v1815_v48  ;;  %v2508_v54 = vld [vmem:[%s4194_s0 + $0x9c] sm:$0xf]  ;;  %v1859_v57 = vld [vmem:[%s4194_s0 + $0xa0] sm:$0xf] }
  0x3d   :  { %1231 = vmatpush.bf16.msrb.mxu3 %v2116_v28  ;;  %v2467_v28 = vld [vmem:[%s4193_s1 + $0x450] sm:$0xf] }
  0x3e   :  { %1260 = vmatpush.bf16.msrb.mxu0 %v2180_v38  ;;  %1289 = vmatpush.bf16.msrb.mxu1 %v2244_v39  ;;  %v2468_v38 = vor.u32 %v2664_v30, %v2467_v28  ;;  %v1960_v39 = vor.u32 %v2535_v31, %v1957_v32  ;;  %v2371_v28 = vld [vmem:[%s4193_s1 + $0x390] sm:$0xf]  ;;  %v2640_v30 = vld [vmem:[%s4193_s1 + $0x394] sm:$0xf0]  ;;  %v2443_v31 = vld [vmem:[%s4193_s1 + $0x420] sm:$0xf] }
  0x3f   :  { %v2658_v32 = vld [vmem:[%s4193_s1 + $0x424] sm:$0xf0]  ;;  %v2372_v33 = vor.u32 %v2640_v30, %v2371_v28  ;;  %v2569_v28 = vld [vmem:[%s4193_s1 + $0x164] sm:$0xf]  ;;  %v2587_v30 = vld [vmem:[%s4193_s1 + $0x1f4] sm:$0xf] }
  0x40   :  { %1203 = vmatpush.bf16.msrb.mxu2 %v2044_v42  ;;  %v2662_v42 = vld [vmem:[%s4193_s1 + $0x444] sm:$0xf0]  ;;  %v2444_v34 = vor.u32 %v2658_v32, %v2443_v31  ;;  %v2165_v32 = vld [vmem:[%s4193_s1 + $0x1f8] sm:$0xf0] }
  0x41   :  { %1232 = vmatpush.bf16.msrb.mxu3 %v2108_v43  ;;  %v2533_v43 = vld [vmem:[%s4193_s1 + $0x44] sm:$0xf] }
  0x42   :  { %1261 = vmatpush.bf16.msrb.mxu0 %v2172_v59  ;;  %1290 = vmatpush.bf16.msrb.mxu1 %v2236_v60  ;;  %v1952_v53 = vor.u32 %v2533_v43, %v1949_v44  ;;  %v1941_v59 = vld [vmem:[%s4193_s1 + $0x38] sm:$0xf0]  ;;  %v1817_v60 = vld [vmem:[%s4194_s0 + $0x74] sm:$0xf0] }
  0x43   :  { %1204 = vmatmul.bf16.vlgmr.msrb.gmra.mxu2 %v3128_v13  ;;  %v1944_v16 = vor.u32 %v2531_v58, %v1941_v59  ;;  %v3259_v21 = vor.u32 %v2499_v55, %v1817_v60  ;;  %v2513_v58 = vld [vmem:[%s4194_s0 + $0xc0] sm:$0xf0]  ;;  %v1861_v60 = vld [vmem:[%s4194_s0 + $0xc4] sm:$0xf0] }
  0x44   :  { %1312 = vmatpush.bf16.msra.mxu2 %v2356_v51  ;;  %1233 = vmatmul.bf16.vlgmr.msrb.gmra.mxu3 %v3139_v18  ;;  %v2628_v51 = vld [vmem:[%s4193_s1 + $0x334] sm:$0xf0]  ;;  %v2509_v59 = vld [vmem:[%s4194_s0 + $0xa4] sm:$0xf] }
  0x45   :  { %1341 = vmatpush.bf16.msra.mxu3 %v2420_v52  ;;  %1262 = vmatmul.bf16.vlgmr.msrb.gmra.mxu0 %v3141_v19  ;;  %v2460_v52 = vor.u32 %v2662_v42, %v2459_v40  ;;  %v2363_v40 = vld [vmem:[%s4193_s1 + $0x380] sm:$0xf]  ;;  %v2435_v42 = vld [vmem:[%s4193_s1 + $0x410] sm:$0xf] }
  0x46   :  { %1370 = vmatpush.bf16.msra.mxu0 %v2484_v10  ;;  %1399 = vmatpush.bf16.msra.mxu1 %v1976_v11  ;;  %v2324_v10 = vor.u32 %v2628_v51, %v2323_v50  ;;  %v1825_v11 = vld [vmem:[%s4194_s0 + $0x7c] sm:$0xf0]  ;;  %v2436_v48 = vor.u32 %v2656_v45, %v2435_v42  ;;  %v2654_v51 = vld [vmem:[%s4193_s1 + $0x404] sm:$0xf0]  ;;  %v1897_v45 = vld [vmem:[%s4194_s0 + $0x10c] sm:$0xf0] }
  0x47   :  { %1291 = vmatmul.bf16.vlgmr.msrb.gmra.mxu1 %v3149_v22  ;;  %v3263_v24 = vor.u32 %v2500_v5, %v1825_v11  ;;  %v2427_v50 = vld [vmem:[%s4193_s1 + $0x400] sm:$0xf]  ;;  %v2525_v5 = vld [vmem:[%s4193_s1 + $0x4] sm:$0xf]  ;;  %v1895_v42 = vld [vmem:[%s4194_s0 + $0xe8] sm:$0xf] }
  0x48   :  { %1313 = vmatpush.bf16.msra.mxu2 %v2348_v23  ;;  %v3261_v23 = vor.u32 %v2504_v2, %v1823_v1  ;;  %v2428_v55 = vor.u32 %v2654_v51, %v2427_v50  ;;  %v3351_v1 = vor.u32 %v2513_v58, %v1859_v57  ;;  %v3353_v2 = vor.u32 %v2509_v59, %v1861_v60  ;;  %v2551_v50 = vld [vmem:[%s4193_s1 + $0xd4] sm:$0xf]  ;;  %v2021_v51 = vld [vmem:[%s4193_s1 + $0xd8] sm:$0xf0]  ;;  %v2601_v59 = vld [vmem:[%s4193_s1 + $0x264] sm:$0xf] }
  0x49   :  { %1342 = vmatpush.bf16.msra.mxu3 %v2412_v14  ;;  %v2626_v14 = vld [vmem:[%s4193_s1 + $0x324] sm:$0xf0]  ;;  %v2221_v60 = vld [vmem:[%s4193_s1 + $0x268] sm:$0xf0] }
  0x4a   :  { %1371 = vmatpush.bf16.msra.mxu0 %v2476_v26  ;;  %1400 = vmatpush.bf16.msra.mxu1 %v1968_v27  ;;  %v2316_v25 = vor.u32 %v2626_v14, %v2315_v12  ;;  %v2307_v26 = vld [vmem:[%s4193_s1 + $0x310] sm:$0xf]  ;;  %v2624_v27 = vld [vmem:[%s4193_s1 + $0x314] sm:$0xf0]  ;;  %v2555_v12 = vld [vmem:[%s4193_s1 + $0xf4] sm:$0xf] }
  0x4b   :  { %v2037_v14 = vld [vmem:[%s4193_s1 + $0xf8] sm:$0xf0] }
  0x4c   :  { %1314 = vmatpush.bf16.msra.mxu2 %v2340_v35  ;;  %v2529_v35 = vld [vmem:[%s4193_s1 + $0x24] sm:$0xf] }
  0x4d   :  { %1343 = vmatpush.bf16.msra.mxu3 %v2404_v29  ;;  %v2308_v29 = vor.u32 %v2624_v27, %v2307_v26  ;;  %v2029_v26 = vld [vmem:[%s4193_s1 + $0xe8] sm:$0xf0] }
  0x4e   :  { %1372 = vmatpush.bf16.msra.mxu0 %v2468_v38  ;;  %1401 = vmatpush.bf16.msra.mxu1 %v1960_v39  ;;  %v2622_v38 = vld [vmem:[%s4193_s1 + $0x304] sm:$0xf0]  ;;  %v1936_v39 = vor.u32 %v2529_v35, %v1933_v36  ;;  %v2168_v36 = vor.u32 %v2587_v30, %v2165_v32  ;;  %v1795_v30 = vld [vmem:[%s4194_s0 + $0x18] sm:$0xf]  ;;  %v2492_v32 = vld [vmem:[%s4194_s0 + $0x1c] sm:$0xf] }
  0x4f   :  { %v2300_v43 = vor.u32 %v2622_v38, %v2299_v37  ;;  %v1887_v38 = vld [vmem:[%s4194_s0 + $0xe0] sm:$0xf] }
  0x50   :  { %1315 = vmatpush.bf16.msra.mxu2 %v2332_v47  ;;  %v1925_v47 = vld [vmem:[%s4193_s1 + $0x18] sm:$0xf0] }
  0x51   :  { %1344 = vmatpush.bf16.msra.mxu3 %v2396_v41  ;;  %v2638_v41 = vld [vmem:[%s4193_s1 + $0x384] sm:$0xf0]  ;;  %v1928_v49 = vor.u32 %v2527_v46, %v1925_v47 }
  0x52   :  { %1373 = vmatpush.bf16.msra.mxu0 %v2460_v52  ;;  %1402 = vmatpush.bf16.msra.mxu1 %v1952_v53  ;;  %v2364_v44 = vor.u32 %v2638_v41, %v2363_v40  ;;  %v1851_v52 = vld [vmem:[%s4194_s0 + $0x98] sm:$0xf]  ;;  %v2512_v53 = vld [vmem:[%s4194_s0 + $0xb8] sm:$0xf0]  ;;  %v2517_v40 = vld [vmem:[%s4194_s0 + $0xe4] sm:$0xf] }
  0x53   :  { %1209 = vmatmul.bf16.gmra.mxu2 %v3257_v17  ;;  %v3347_v61 = vor.u32 %v2512_v53, %v1851_v52  ;;  %v1889_v41 = vld [vmem:[%s4194_s0 + $0x104] sm:$0xf0]  ;;  %v2567_v52 = vld [vmem:[%s4193_s1 + $0x154] sm:$0xf]  ;;  %v2024_v53 = vor.u32 %v2551_v50, %v2021_v51 }
  0x54   :  { %1316 = vmatpush.bf16.msra.mxu2 %v2324_v10  ;;  %1238 = vmatmul.bf16.gmra.mxu3 %v3259_v21  ;;  %v1917_v10 = vld [vmem:[%s4193_s1 + $0x8] sm:$0xf0]  ;;  %v3427_v47 = vor.u32 %v2517_v40, %v1889_v41  ;;  %v2005_v40 = vld [vmem:[%s4193_s1 + $0xb8] sm:$0xf0]  ;;  %v2563_v41 = vld [vmem:[%s4193_s1 + $0x134] sm:$0xf] }
  0x55   :  { %1345 = vmatpush.bf16.msra.mxu3 %v2388_v56  ;;  %1267 = vmatmul.bf16.gmra.mxu0 %v3261_v23  ;;  %v1853_v56 = vld [vmem:[%s4194_s0 + $0xbc] sm:$0xf0]  ;;  %v1920_v11 = vor.u32 %v2525_v5, %v1917_v10  ;;  %v2549_v5 = vld [vmem:[%s4193_s1 + $0xc4] sm:$0xf]  ;;  %v2224_v10 = vor.u32 %v2601_v59, %v2221_v60  ;;  %v2579_v59 = vld [vmem:[%s4193_s1 + $0x1b4] sm:$0xf] }
  0x56   :  { %1374 = vmatpush.bf16.msra.mxu0 %v2452_v15  ;;  %1403 = vmatpush.bf16.msra.mxu1 %v1944_v16  ;;  %v3349_v62 = vor.u32 %v2508_v54, %v1853_v56  ;;  %v2571_v15 = vld [vmem:[%s4193_s1 + $0x174] sm:$0xf]  ;;  %v2040_v16 = vor.u32 %v2555_v12, %v2037_v14  ;;  %v2085_v54 = vld [vmem:[%s4193_s1 + $0x158] sm:$0xf0]  ;;  %v2157_v56 = vld [vmem:[%s4193_s1 + $0x1e8] sm:$0xf0] }
  0x57   :  { %1296 = vmatmul.bf16.gmra.mxu1 %v3263_v24  ;;  %v2088_v57 = vor.u32 %v2567_v52, %v2085_v54  ;;  %v2565_v12 = vld [vmem:[%s4193_s1 + $0x144] sm:$0xf]  ;;  %v2077_v14 = vld [vmem:[%s4193_s1 + $0x148] sm:$0xf0]  ;;  %v2133_v60 = vld [vmem:[%s4193_s1 + $0x1b8] sm:$0xf0] }
  0x58   :  { %1317 = vmatpush.bf16.msra.mxu2 %v2316_v25  ;;  %v2553_v25 = vld [vmem:[%s4193_s1 + $0xe4] sm:$0xf]  ;;  %v2205_v52 = vld [vmem:[%s4193_s1 + $0x248] sm:$0xf0] }
  0x59   :  { %1346 = vmatpush.bf16.msra.mxu3 %v2380_v20  ;;  %v2101_v20 = vld [vmem:[%s4193_s1 + $0x178] sm:$0xf0]  ;;  %v2032_v31 = vor.u32 %v2553_v25, %v2029_v26  ;;  %v2599_v26 = vld [vmem:[%s4193_s1 + $0x254] sm:$0xf]  ;;  %v2545_v54 = vld [vmem:[%s4193_s1 + $0xa4] sm:$0xf] }
  0x5a   :  { %1375 = vmatpush.bf16.msra.mxu0 %v2444_v34  ;;  %1404 = vmatpush.bf16.msra.mxu1 %v1936_v39  ;;  %v2104_v27 = vor.u32 %v2571_v15, %v2101_v20  ;;  %v2229_v34 = vld [vmem:[%s4193_s1 + $0x278] sm:$0xf0]  ;;  %v2521_v39 = vld [vmem:[%s4194_s0 + $0x100] sm:$0xf0]  ;;  %v2583_v20 = vld [vmem:[%s4193_s1 + $0x1d4] sm:$0xf] }
  0x5b   :  { %v3425_v46 = vor.u32 %v2521_v39, %v1887_v38  ;;  %v2149_v25 = vld [vmem:[%s4193_s1 + $0x1d8] sm:$0xf0]  ;;  %v2547_v39 = vld [vmem:[%s4193_s1 + $0xb4] sm:$0xf] }
  0x5c   :  { %1318 = vmatpush.bf16.msra.mxu2 %v2308_v29  ;;  %v2093_v29 = vld [vmem:[%s4193_s1 + $0x168] sm:$0xf0] }
  0x5d   :  { %1347 = vmatpush.bf16.msra.mxu3 %v2372_v33  ;;  %v2603_v33 = vld [vmem:[%s4193_s1 + $0x274] sm:$0xf]  ;;  %v2096_v35 = vor.u32 %v2569_v28, %v2093_v29  ;;  %v2213_v28 = vld [vmem:[%s4193_s1 + $0x258] sm:$0xf0] }
  0x5e   :  { %1376 = vmatpush.bf16.msra.mxu0 %v2436_v48  ;;  %1405 = vmatpush.bf16.msra.mxu1 %v1928_v49  ;;  %v2232_v37 = vor.u32 %v2603_v33, %v2229_v34  ;;  %v2216_v29 = vor.u32 %v2599_v26, %v2213_v28  ;;  %v1797_v33 = vld [vmem:[%s4194_s0 + $0x3c] sm:$0xf0]  ;;  %v2595_v28 = vld [vmem:[%s4193_s1 + $0x234] sm:$0xf] }
  0x5f   :  { %v1803_v34 = vld [vmem:[%s4194_s0 + $0x20] sm:$0xf] }
  0x60   :  { %1319 = vmatpush.bf16.msra.mxu2 %v2300_v43  ;;  %v2522_v43 = vld [vmem:[%s4194_s0 + $0x108] sm:$0xf0] }
  0x61   :  { %1348 = vmatpush.bf16.msra.mxu3 %v2364_v44  ;;  %v2518_v44 = vld [vmem:[%s4194_s0 + $0xec] sm:$0xf]  ;;  %v3429_v48 = vor.u32 %v2522_v43, %v1895_v42  ;;  %v2008_v42 = vor.u32 %v2547_v39, %v2005_v40  ;;  %v2069_v43 = vld [vmem:[%s4193_s1 + $0x138] sm:$0xf0]  ;;  %v2577_v39 = vld [vmem:[%s4193_s1 + $0x1a4] sm:$0xf] }
  0x62   :  { %1377 = vmatpush.bf16.msra.mxu0 %v2428_v55  ;;  %1406 = vmatpush.bf16.msra.mxu1 %v1920_v11  ;;  %v3431_v49 = vor.u32 %v2518_v44, %v1897_v45  ;;  %v2585_v55 = vld [vmem:[%s4193_s1 + $0x1e4] sm:$0xf]  ;;  %v2013_v11 = vld [vmem:[%s4193_s1 + $0xc8] sm:$0xf0]  ;;  %v2072_v50 = vor.u32 %v2563_v41, %v2069_v43 }
  0x63   :  { %1214 = vmatmul.bf16.gmra.mxu2 %v3347_v61  ;;  %v2160_v58 = vor.u32 %v2585_v55, %v2157_v56  ;;  %v2016_v15 = vor.u32 %v2549_v5, %v2013_v11  ;;  %v2581_v44 = vld [vmem:[%s4193_s1 + $0x1c4] sm:$0xf]  ;;  %v2141_v45 = vld [vmem:[%s4193_s1 + $0x1c8] sm:$0xf0]  ;;  %v1831_v5 = vld [vmem:[%s4194_s0 + $0x60] sm:$0xf] }
  0x64   :  { %1243 = vmatmul.bf16.gmra.mxu3 %v3349_v62  ;;  %1428 = vmatpush.bf16.msrb.mxu2 %v2040_v16  ;;  %v2080_v16 = vor.u32 %v2565_v12, %v2077_v14  ;;  %v2144_v51 = vor.u32 %v2581_v44, %v2141_v45  ;;  %v1997_v55 = vld [vmem:[%s4193_s1 + $0xa8] sm:$0xf0]  ;;  %v2561_v56 = vld [vmem:[%s4193_s1 + $0x124] sm:$0xf]  ;;  %v2136_v14 = vor.u32 %v2579_v59, %v2133_v60  ;;  %v1869_v60 = vld [vmem:[%s4194_s0 + $0xcc] sm:$0xf0] }
  0x65   :  { %1272 = vmatmul.bf16.gmra.mxu0 %v3351_v1  ;;  %1457 = vmatpush.bf16.msrb.mxu3 %v2104_v27  ;;  %v2152_v27 = vor.u32 %v2583_v20, %v2149_v25  ;;  %v2501_v11 = vld [vmem:[%s4194_s0 + $0x64] sm:$0xf]  ;;  %v2506_v20 = vld [vmem:[%s4194_s0 + $0x88] sm:$0xf0] }
  0x66   :  { %1486 = vmatpush.bf16.msrb.mxu0 %v2168_v36  ;;  %1515 = vmatpush.bf16.msrb.mxu1 %v2232_v37  ;;  %v3505_v37 = vor.u32 %v2492_v32, %v1797_v33  ;;  %v1989_v32 = vld [vmem:[%s4193_s1 + $0x98] sm:$0xf0]  ;;  %v2559_v33 = vld [vmem:[%s4193_s1 + $0x114] sm:$0xf]  ;;  %v2125_v40 = vld [vmem:[%s4193_s1 + $0x1a8] sm:$0xf0] }
  0x67   :  { %1301 = vmatmul.bf16.gmra.mxu1 %v3353_v2  ;;  %v2189_v43 = vld [vmem:[%s4193_s1 + $0x228] sm:$0xf0]  ;;  %v2541_v45 = vld [vmem:[%s4193_s1 + $0x84] sm:$0xf] }
  0x68   :  { %1429 = vmatpush.bf16.msrb.mxu2 %v2032_v31  ;;  %v2496_v31 = vld [vmem:[%s4194_s0 + $0x38] sm:$0xf0] }
  0x69   :  { %1458 = vmatpush.bf16.msrb.mxu3 %v2096_v35  ;;  %v2497_v35 = vld [vmem:[%s4194_s0 + $0x40] sm:$0xf0]  ;;  %v3503_v36 = vor.u32 %v2496_v31, %v1795_v30  ;;  %v2543_v31 = vld [vmem:[%s4193_s1 + $0x94] sm:$0xf] }
  0x6a   :  { %1487 = vmatpush.bf16.msrb.mxu0 %v2160_v58  ;;  %1516 = vmatpush.bf16.msrb.mxu1 %v2224_v10  ;;  %v3507_v38 = vor.u32 %v2497_v35, %v1803_v34  ;;  %v2061_v58 = vld [vmem:[%s4193_s1 + $0x128] sm:$0xf0]  ;;  %v2505_v10 = vld [vmem:[%s4194_s0 + $0x80] sm:$0xf0]  ;;  %v1992_v34 = vor.u32 %v2543_v31, %v1989_v32  ;;  %v2053_v35 = vld [vmem:[%s4193_s1 + $0x118] sm:$0xf0] }
  0x6b   :  { %v2064_v12 = vor.u32 %v2561_v56, %v2061_v58  ;;  %v3573_v25 = vor.u32 %v2505_v10, %v1831_v5  ;;  %v2056_v41 = vor.u32 %v2559_v33, %v2053_v35  ;;  %v2514_v56 = vld [vmem:[%s4194_s0 + $0xc8] sm:$0xf0]  ;;  %v1875_v5 = vld [vmem:[%s4194_s0 + $0xb0] sm:$0xf]  ;;  %v2515_v10 = vld [vmem:[%s4194_s0 + $0xd0] sm:$0xf0] }
  0x6c   :  { %1430 = vmatpush.bf16.msrb.mxu2 %v2024_v53  ;;  %v2173_v35 = vld [vmem:[%s4193_s1 + $0x208] sm:$0xf0] }
  0x6d   :  { %1459 = vmatpush.bf16.msrb.mxu3 %v2088_v57  ;;  %v2000_v57 = vor.u32 %v2545_v54, %v1997_v55  ;;  %v2117_v54 = vld [vmem:[%s4193_s1 + $0x198] sm:$0xf0]  ;;  %v1867_v55 = vld [vmem:[%s4194_s0 + $0xa8] sm:$0xf] }
  0x6e   :  { %1488 = vmatpush.bf16.msrb.mxu0 %v2152_v27  ;;  %1517 = vmatpush.bf16.msrb.mxu1 %v2216_v29  ;;  %v2197_v29 = vld [vmem:[%s4193_s1 + $0x238] sm:$0xf0] }
  0x6f   :  { %v2200_v30 = vor.u32 %v2595_v28, %v2197_v29  ;;  %v3659_v28 = vor.u32 %v2515_v10, %v1875_v5  ;;  %v2573_v29 = vld [vmem:[%s4193_s1 + $0x184] sm:$0xf]  ;;  %v2651_v5 = vld [vmem:[%s4193_s1 + $0x3f4] sm:$0xf]  ;;  %v2421_v10 = vld [vmem:[%s4193_s1 + $0x3f8] sm:$0xf0] }
  0x70   :  { %1431 = vmatpush.bf16.msrb.mxu2 %v2016_v15  ;;  %v1833_v15 = vld [vmem:[%s4194_s0 + $0x84] sm:$0xf0] }
  0x71   :  { %1460 = vmatpush.bf16.msrb.mxu3 %v2080_v16  ;;  %v1839_v16 = vld [vmem:[%s4194_s0 + $0x68] sm:$0xf]  ;;  %v3575_v26 = vor.u32 %v2501_v11, %v1833_v15  ;;  %v2591_v11 = vld [vmem:[%s4193_s1 + $0x214] sm:$0xf] }
  0x72   :  { %1489 = vmatpush.bf16.msrb.mxu0 %v2144_v51  ;;  %v3577_v27 = vor.u32 %v2506_v20, %v1839_v16  ;;  %v2557_v51 = vld [vmem:[%s4193_s1 + $0x104] sm:$0xf] }
  0x73   :  { %1219 = vmatmul.bf16.gmra.mxu2 %v3425_v46 }
  0x74   :  { %1248 = vmatmul.bf16.gmra.mxu3 %v3427_v47  ;;  %1432 = vmatpush.bf16.msrb.mxu2 %v2008_v42  ;;  %v2128_v42 = vor.u32 %v2577_v39, %v2125_v40  ;;  %v2619_v40 = vld [vmem:[%s4193_s1 + $0x2f4] sm:$0xf] }
  0x75   :  { %1277 = vmatmul.bf16.gmra.mxu0 %v3429_v48  ;;  %1461 = vmatpush.bf16.msrb.mxu3 %v2072_v50  ;;  %v1981_v50 = vld [vmem:[%s4193_s1 + $0x88] sm:$0xf0] }
  0x76   :  { %1490 = vmatpush.bf16.msrb.mxu0 %v2136_v14  ;;  %v3655_v14 = vor.u32 %v2514_v56, %v1867_v55  ;;  %v2519_v55 = vld [vmem:[%s4194_s0 + $0xf4] sm:$0xf]  ;;  %v2617_v56 = vld [vmem:[%s4193_s1 + $0x2e4] sm:$0xf] }
  0x77   :  { %1306 = vmatmul.bf16.gmra.mxu1 %v3431_v49 }
  0x78   :  { %1433 = vmatpush.bf16.msrb.mxu2 %v2000_v57  ;;  %v2510_v57 = vld [vmem:[%s4194_s0 + $0xac] sm:$0xf] }
  0x79   :  { %1462 = vmatpush.bf16.msrb.mxu3 %v2064_v12  ;;  %v2181_v12 = vld [vmem:[%s4193_s1 + $0x218] sm:$0xf0]  ;;  %v3657_v20 = vor.u32 %v2510_v57, %v1869_v60  ;;  %v2285_v57 = vld [vmem:[%s4193_s1 + $0x2e8] sm:$0xf0] }
  0x7a   :  { %1491 = vmatpush.bf16.msrb.mxu0 %v2128_v42  ;;  %v2184_v15 = vor.u32 %v2591_v11, %v2181_v12  ;;  %v2635_v42 = vld [vmem:[%s4193_s1 + $0x374] sm:$0xf]  ;;  %v2349_v60 = vld [vmem:[%s4193_s1 + $0x368] sm:$0xf0]  ;;  %v1905_v11 = vld [vmem:[%s4194_s0 + $0x114] sm:$0xf0] }
  0x7b   :  { %v1911_v12 = vld [vmem:[%s4194_s0 + $0xf8] sm:$0xf] }
  0x7c   :  { %1434 = vmatpush.bf16.msrb.mxu2 %v1992_v34  ;;  %v2589_v34 = vld [vmem:[%s4193_s1 + $0x204] sm:$0xf] }
  0x7d   :  { %1463 = vmatpush.bf16.msrb.mxu3 %v2056_v41  ;;  %v2176_v39 = vor.u32 %v2589_v34, %v2173_v35  ;;  %v2293_v41 = vld [vmem:[%s4193_s1 + $0x2f8] sm:$0xf0] }
  0x83   :  { %1320 = vmatmul.bf16.vlgmr.msra.gmra.mxu2 %v3503_v36 }
  0x84   :  { %1349 = vmatmul.bf16.vlgmr.msra.gmra.mxu3 %v3505_v37 }
  0x85   :  { %1378 = vmatmul.bf16.vlgmr.msra.gmra.mxu0 %v3507_v38 }
  0x87   :  { %1407 = vmatmul.bf16.vlgmr.msra.gmra.mxu1 %v2854_v4  ;;  %v2597_v4 = vld [vmem:[%s4193_s1 + $0x244] sm:$0xf] }
  0x88   :  { %v2208_v53 = vor.u32 %v2597_v4, %v2205_v52  ;;  %v1984_v4 = vor.u32 %v2541_v45, %v1981_v50  ;;  %v2045_v52 = vld [vmem:[%s4193_s1 + $0x108] sm:$0xf0] }
  0x89   :  { %v2048_v58 = vor.u32 %v2557_v51, %v2045_v52 }
  0x8a   :  { %1518 = vmatpush.bf16.msrb.mxu1 %v2208_v53  ;;  %v2575_v53 = vld [vmem:[%s4193_s1 + $0x194] sm:$0xf]  ;;  %1435 = vmatpush.bf16.msrb.mxu2 %v1984_v4 }
  0x8b   :  { %v2120_v59 = vor.u32 %v2575_v53, %v2117_v54  ;;  %1464 = vmatpush.bf16.msrb.mxu3 %v2048_v58  ;;  %v2523_v54 = vld [vmem:[%s4194_s0 + $0x110] sm:$0xf0]  ;;  %v2633_v58 = vld [vmem:[%s4193_s1 + $0x364] sm:$0xf] }
  0x8d   :  { %1492 = vmatpush.bf16.msrb.mxu0 %v2120_v59  ;;  %v2288_v59 = vor.u32 %v2617_v56, %v2285_v57 }
  0x8e   :  { %1519 = vmatpush.bf16.msrb.mxu1 %v2200_v30  ;;  %v2109_v30 = vld [vmem:[%s4193_s1 + $0x188] sm:$0xf0] }
  0x8f   :  { %v2112_v32 = vor.u32 %v2573_v29, %v2109_v30  ;;  %v2424_v29 = vor.u32 %v2651_v5, %v2421_v10 }
  0x91   :  { %1493 = vmatpush.bf16.msrb.mxu0 %v2112_v32 }
  0x93   :  { %1325 = vmatmul.bf16.gmra.mxu2 %v3573_v25 }
  0x94   :  { %1354 = vmatmul.bf16.gmra.mxu3 %v3575_v26 }
  0x95   :  { %1383 = vmatmul.bf16.gmra.mxu0 %v3577_v27 }
  0x96   :  { %1602 = vmatpush.bf16.msra.mxu0 %v2424_v29  ;;  %v2269_v29 = vld [vmem:[%s4193_s1 + $0x2c8] sm:$0xf0] }
  0x97   :  { %1412 = vmatmul.bf16.gmra.mxu1 %v2986_v0  ;;  %v2593_v0 = vld [vmem:[%s4193_s1 + $0x224] sm:$0xf] }
  0x98   :  { %v2192_v44 = vor.u32 %v2593_v0, %v2189_v43  ;;  %v2296_v0 = vor.u32 %v2619_v40, %v2293_v41  ;;  %v2357_v43 = vld [vmem:[%s4193_s1 + $0x378] sm:$0xf0] }
  0x99   :  { %v2360_v45 = vor.u32 %v2635_v42, %v2357_v43  ;;  %v2485_v43 = vld [vmem:[%s4193_s1 + $0x478] sm:$0xf0] }
  0x9a   :  { %1520 = vmatpush.bf16.msrb.mxu1 %v2192_v44  ;;  %1544 = vmatpush.bf16.msra.mxu2 %v2296_v0  ;;  %v2667_v0 = vld [vmem:[%s4193_s1 + $0x474] sm:$0xf] }
  0x9b   :  { %1573 = vmatpush.bf16.msra.mxu3 %v2360_v45  ;;  %v2615_v45 = vld [vmem:[%s4193_s1 + $0x2d4] sm:$0xf] }
  0x9e   :  { %1521 = vmatpush.bf16.msrb.mxu1 %v2184_v15  ;;  %v2524_v15 = vld [vmem:[%s4194_s0 + $0x118] sm:$0xf0]  ;;  %1545 = vmatpush.bf16.msra.mxu2 %v2288_v59 }
  0x9f   :  { %v3737_v40 = vor.u32 %v2524_v15, %v1911_v12  ;;  %v2477_v12 = vld [vmem:[%s4193_s1 + $0x468] sm:$0xf0]  ;;  %v2613_v15 = vld [vmem:[%s4193_s1 + $0x2c4] sm:$0xf] }
  0xa0   :  { %v1147_v16 = vpop.f32.mrf.mxu0 }
  0xa2   :  { %v1176_v31 = vpop.f32.mrf.mxu1  ;;  %1522 = vmatpush.bf16.msrb.mxu1 %v2176_v39  ;;  %v3735_v39 = vor.u32 %v2519_v55, %v1905_v11  ;;  %v2413_v55 = vld [vmem:[%s4193_s1 + $0x3e8] sm:$0xf0]  ;;  %v2665_v11 = vld [vmem:[%s4193_s1 + $0x464] sm:$0xf] }
  0xa3   :  { %v3667_v33 = vadd.f32 %v1176_v31, %v1147_v16  ;;  %1330 = vmatmul.bf16.gmra.mxu2 %v3655_v14  ;;  %v2352_v16 = vor.u32 %v2633_v58, %v2349_v60 }
  0xa4   :  { %1359 = vmatmul.bf16.gmra.mxu3 %v3657_v20 }
  0xa5   :  { %1388 = vmatmul.bf16.gmra.mxu0 %v3659_v28  ;;  %1574 = vmatpush.bf16.msra.mxu3 %v2352_v16  ;;  %v2480_v16 = vor.u32 %v2665_v11, %v2477_v12 }
  0xa6   :  { %v1157_v44 = vpop.f32.mrf.mxu2 }
  0xa7   :  { %1417 = vmatmul.bf16.gmra.mxu1 %v2852_v3  ;;  %v1186_v50 = vpop.f32.mrf.mxu3  ;;  %v1903_v3 = vld [vmem:[%s4194_s0 + $0xf0] sm:$0xf] }
  0xa8   :  { %v3691_v51 = vadd.f32 %v1186_v50, %v1157_v44  ;;  %v1149_v4 = vpop.f32.mrf.mxu0  ;;  %v3731_v32 = vor.u32 %v2523_v54, %v1903_v3  ;;  %v2488_v44 = vor.u32 %v2667_v0, %v2485_v43  ;;  %v2277_v50 = vld [vmem:[%s4193_s1 + $0x2d8] sm:$0xf0]  ;;  %v2649_v54 = vld [vmem:[%s4193_s1 + $0x3e4] sm:$0xf]  ;;  %v2647_v0 = vld [vmem:[%s4193_s1 + $0x3d4] sm:$0xf] }
  0xa9   :  { %v2341_v3 = vld [vmem:[%s4193_s1 + $0x358] sm:$0xf0]  ;;  %v2416_v58 = vor.u32 %v2649_v54, %v2413_v55  ;;  %v2663_v54 = vld [vmem:[%s4193_s1 + $0x454] sm:$0xf] }
  0xaa   :  { %v1178_v52 = vpop.f32.mrf.mxu1  ;;  %1631 = vmatpush.bf16.msra.mxu1 %v2488_v44  ;;  %v2405_v43 = vld [vmem:[%s4193_s1 + $0x3d8] sm:$0xf0] }
  0xab   :  { %v3693_v53 = vadd.f32 %v1178_v52, %v1149_v4  ;;  %v2631_v4 = vld [vmem:[%s4193_s1 + $0x354] sm:$0xf]  ;;  %v2280_v52 = vor.u32 %v2615_v45, %v2277_v50  ;;  %1603 = vmatpush.bf16.msra.mxu0 %v2416_v58  ;;  %v2408_v45 = vor.u32 %v2647_v0, %v2405_v43  ;;  %v2469_v55 = vld [vmem:[%s4193_s1 + $0x458] sm:$0xf0]  ;;  %v2625_v0 = vld [vmem:[%s4193_s1 + $0x324] sm:$0xf] }
  0xac   :  { %v2344_v57 = vor.u32 %v2631_v4, %v2341_v3  ;;  %v2627_v58 = vld [vmem:[%s4193_s1 + $0x334] sm:$0xf]  ;;  %v2317_v43 = vld [vmem:[%s4193_s1 + $0x328] sm:$0xf0] }
  0xad   :  { %1546 = vmatpush.bf16.msra.mxu2 %v2280_v52 }
  0xae   :  { %v1159_v30 = vpop.f32.mrf.mxu2  ;;  %1575 = vmatpush.bf16.msra.mxu3 %v2344_v57  ;;  %1632 = vmatpush.bf16.msra.mxu1 %v2480_v16  ;;  %v2611_v57 = vld [vmem:[%s4193_s1 + $0x2b4] sm:$0xf] }
  0xaf   :  { %v1188_v31 = vpop.f32.mrf.mxu3  ;;  %1604 = vmatpush.bf16.msra.mxu0 %v2408_v45  ;;  %v2320_v45 = vor.u32 %v2625_v0, %v2317_v43  ;;  %v2657_v43 = vld [vmem:[%s4193_s1 + $0x424] sm:$0xf] }
  0xb0   :  { %v3733_v34 = vadd.f32 %v1188_v31, %v1159_v30  ;;  %v1152_v35 = vpop.f32.mrf.mxu0  ;;  %v2629_v30 = vld [vmem:[%s4193_s1 + $0x344] sm:$0xf]  ;;  %v2333_v31 = vld [vmem:[%s4193_s1 + $0x348] sm:$0xf0] }
  0xb2   :  { %v1181_v41 = vpop.f32.mrf.mxu1 }
  0xb3   :  { %v3739_v42 = vadd.f32 %v1181_v41, %v1152_v35  ;;  %1335 = vmatmul.bf16.gmra.mxu2 %v3731_v32  ;;  %v2272_v35 = vor.u32 %v2613_v15, %v2269_v29  ;;  %v2336_v41 = vor.u32 %v2629_v30, %v2333_v31  ;;  %v2661_v29 = vld [vmem:[%s4193_s1 + $0x444] sm:$0xf]  ;;  %v2461_v30 = vld [vmem:[%s4193_s1 + $0x448] sm:$0xf0] }
  0xb4   :  { %1364 = vmatmul.bf16.gmra.mxu3 %v3735_v39  ;;  %v2609_v31 = vld [vmem:[%s4193_s1 + $0x2a4] sm:$0xf] }
  0xb5   :  { %1393 = vmatmul.bf16.gmra.mxu0 %v3737_v40  ;;  %1547 = vmatpush.bf16.msra.mxu2 %v2272_v35  ;;  %v2464_v35 = vor.u32 %v2661_v29, %v2461_v30  ;;  %v2381_v29 = vld [vmem:[%s4193_s1 + $0x3a8] sm:$0xf0] }
  0xb6   :  { %v1162_v56 = vpop.f32.mrf.mxu2  ;;  %1576 = vmatpush.bf16.msra.mxu3 %v2336_v41  ;;  %v2253_v41 = vld [vmem:[%s4193_s1 + $0x2a8] sm:$0xf0] }
  0xb7   :  { %1422 = vmatmul.bf16.gmra.mxu1 %v2984_v63  ;;  %v1191_v59 = vpop.f32.mrf.mxu3 }
  0xb8   :  { %v3769_v63 = vadd.f32 %v1191_v59, %v1162_v56  ;;  %v1154_v60 = vpop.f32.mrf.mxu0  ;;  %v2472_v56 = vor.u32 %v2663_v54, %v2469_v55  ;;  %v2389_v54 = vld [vmem:[%s4193_s1 + $0x3b8] sm:$0xf0] }
  0xba   :  { %v1183_v5 = vpop.f32.mrf.mxu1  ;;  %1633 = vmatpush.bf16.msra.mxu1 %v2472_v56 }
  0xbb   :  { %v3771_v10 = vadd.f32 %v1183_v5, %v1154_v60  ;;  %v2397_v60 = vld [vmem:[%s4193_s1 + $0x3c8] sm:$0xf0] }
  0xbe   :  { %v1164_v44 = vpop.f32.mrf.mxu2  ;;  %1634 = vmatpush.bf16.msra.mxu1 %v2464_v35 }
  0xbf   :  { %v1193_v50 = vpop.f32.mrf.mxu3 }
  0xc0   :  { %v3797_v4 = vadd.f32 %v1193_v50, %v1164_v44  ;;  %v2256_v44 = vor.u32 %v2609_v31, %v2253_v41  ;;  %v2643_v50 = vld [vmem:[%s4193_s1 + $0x3b4] sm:$0xf] }
  0xc1   :  { %v2392_v56 = vor.u32 %v2643_v50, %v2389_v54  ;;  %v2605_v50 = vld [vmem:[%s4193_s1 + $0x284] sm:$0xf]  ;;  %v2237_v54 = vld [vmem:[%s4193_s1 + $0x288] sm:$0xf0] }
  0xc2   :  { %v3799_v52 = vpop.f32.mrf.mxu0 }
  0xc3   :  { %1436 = vmatmul.bf16.vlgmr.msrb.gmra.mxu2 %v2867_v9  ;;  %v2261_v9 = vld [vmem:[%s4193_s1 + $0x2b8] sm:$0xf0] }
  0xc4   :  { %v3801_v3 = vpop.f32.mrf.mxu1  ;;  %1465 = vmatmul.bf16.vlgmr.msrb.gmra.mxu3 %v3128_v13  ;;  %v2264_v59 = vor.u32 %v2611_v57, %v2261_v9  ;;  %v2325_v13 = vld [vmem:[%s4193_s1 + $0x338] sm:$0xf0] }
  0xc5   :  { %1494 = vmatmul.bf16.vlgmr.msrb.gmra.mxu0 %v3139_v18  ;;  %v2645_v18 = vld [vmem:[%s4193_s1 + $0x3c4] sm:$0xf]  ;;  %v2328_v11 = vor.u32 %v2627_v58, %v2325_v13  ;;  %v2453_v13 = vld [vmem:[%s4193_s1 + $0x438] sm:$0xf0] }
  0xc6   :  { %v3831_v5 = vpop.f32.mrf.mxu2  ;;  %v2400_v12 = vor.u32 %v2645_v18, %v2397_v60  ;;  %1548 = vmatpush.bf16.msra.mxu2 %v2264_v59  ;;  %v2659_v59 = vld [vmem:[%s4193_s1 + $0x434] sm:$0xf] }
  0xc7   :  { %1523 = vmatmul.bf16.vlgmr.msrb.gmra.mxu1 %v3141_v19  ;;  %v3833_v15 = vpop.f32.mrf.mxu3  ;;  %1577 = vmatpush.bf16.msra.mxu3 %v2328_v11  ;;  %v2456_v18 = vor.u32 %v2659_v59, %v2453_v13  ;;  %v2607_v60 = vld [vmem:[%s4193_s1 + $0x294] sm:$0xf]  ;;  %v2240_v59 = vor.u32 %v2605_v50, %v2237_v54  ;;  %v2301_v13 = vld [vmem:[%s4193_s1 + $0x308] sm:$0xf0]  ;;  %v2653_v54 = vld [vmem:[%s4193_s1 + $0x404] sm:$0xf] }
  0xc8   :  { %1605 = vmatpush.bf16.msra.mxu0 %v2400_v12  ;;  %v2623_v11 = vld [vmem:[%s4193_s1 + $0x314] sm:$0xf] }
  0xc9   :  { %1635 = vmatpush.bf16.msra.mxu1 %v2456_v18  ;;  %v2639_v18 = vld [vmem:[%s4193_s1 + $0x394] sm:$0xf] }
  0xca   :  { %v3835_v19 = vpop.f32.mrf.mxu0  ;;  %1549 = vmatpush.bf16.msra.mxu2 %v2256_v44  ;;  %v2445_v44 = vld [vmem:[%s4193_s1 + $0x428] sm:$0xf0] }
  0xcb   :  { %1578 = vmatpush.bf16.msra.mxu3 %v2320_v45  ;;  %v2448_v45 = vor.u32 %v2657_v43, %v2445_v44  ;;  %v2365_v43 = vld [vmem:[%s4193_s1 + $0x388] sm:$0xf0] }
  0xcc   :  { %v3837_v16 = vpop.f32.mrf.mxu1  ;;  %1606 = vmatpush.bf16.msra.mxu0 %v2392_v56  ;;  %v2621_v56 = vld [vmem:[%s4193_s1 + $0x304] sm:$0xf] }
  0xcd   :  { %1636 = vmatpush.bf16.msra.mxu1 %v2448_v45 }
  0xce   :  { %v3863_v55 = vpop.f32.mrf.mxu2 }
  0xcf   :  { %v3865_v57 = vpop.f32.mrf.mxu3 }
  0xd2   :  { %v3867_v9 = vpop.f32.mrf.mxu0 }
  0xd3   :  { %1441 = vmatmul.bf16.gmra.mxu2 %v2999_v7  ;;  %v2245_v7 = vld [vmem:[%s4193_s1 + $0x298] sm:$0xf0] }
  0xd4   :  { %v3869_v58 = vpop.f32.mrf.mxu1  ;;  %1470 = vmatmul.bf16.gmra.mxu3 %v3257_v17  ;;  %v2248_v12 = vor.u32 %v2607_v60, %v2245_v7  ;;  %v2309_v17 = vld [vmem:[%s4193_s1 + $0x318] sm:$0xf0]  ;;  %v2304_v7 = vor.u32 %v2621_v56, %v2301_v13  ;;  %v2429_v56 = vld [vmem:[%s4193_s1 + $0x408] sm:$0xf0] }
  0xd5   :  { %1499 = vmatmul.bf16.gmra.mxu0 %v3259_v21  ;;  %v2641_v21 = vld [vmem:[%s4193_s1 + $0x3a4] sm:$0xf]  ;;  %v2312_v31 = vor.u32 %v2623_v11, %v2309_v17  ;;  %v2373_v60 = vld [vmem:[%s4193_s1 + $0x398] sm:$0xf0]  ;;  %v2655_v17 = vld [vmem:[%s4193_s1 + $0x414] sm:$0xf] }
  0xd6   :  { %v3899_v30 = vpop.f32.mrf.mxu2  ;;  %v2384_v35 = vor.u32 %v2641_v21, %v2381_v29  ;;  %1550 = vmatpush.bf16.msra.mxu2 %v2248_v12  ;;  %v2376_v11 = vor.u32 %v2639_v18, %v2373_v60  ;;  %v2437_v21 = vld [vmem:[%s4193_s1 + $0x418] sm:$0xf0] }
  0xd7   :  { %1528 = vmatmul.bf16.gmra.mxu1 %v3261_v23  ;;  %v3901_v41 = vpop.f32.mrf.mxu3  ;;  %1579 = vmatpush.bf16.msra.mxu3 %v2312_v31  ;;  %v2440_v31 = vor.u32 %v2655_v17, %v2437_v21  ;;  %v1206_v21 = vadd.f32 %v3831_v5, %v3667_v33 }
  0xd8   :  { %1607 = vmatpush.bf16.msra.mxu0 %v2384_v35  ;;  %v2637_v35 = vld [vmem:[%s4193_s1 + $0x384] sm:$0xf] }
  0xd9   :  { %1637 = vmatpush.bf16.msra.mxu1 %v2440_v31  ;;  %v2368_v45 = vor.u32 %v2637_v35, %v2365_v43  ;;  %v1235_v43 = vadd.f32 %v3833_v15, %v1206_v21 }
  0xda   :  { %v3903_v23 = vpop.f32.mrf.mxu0  ;;  %1551 = vmatpush.bf16.msra.mxu2 %v2240_v59  ;;  %v2432_v59 = vor.u32 %v2653_v54, %v2429_v56 }
  0xdb   :  { %1580 = vmatpush.bf16.msra.mxu3 %v2304_v7 }
  0xdc   :  { %v3905_v0 = vpop.f32.mrf.mxu1  ;;  %1608 = vmatpush.bf16.msra.mxu0 %v2376_v11 }
  0xdd   :  { %1638 = vmatpush.bf16.msra.mxu1 %v2432_v59 }
  0xde   :  { %v3931_v12 = vpop.f32.mrf.mxu2 }
  0xdf   :  { %v3939_v29 = vpop.f32.mrf.mxu3 }
  0xe0   :  { %1609 = vmatpush.bf16.msra.mxu0 %v2368_v45 }
  0xe2   :  { %v3947_v44 = vpop.f32.mrf.mxu0 }
  0xe3   :  { %1446 = vmatmul.bf16.gmra.mxu2 %v2865_v8 }
  0xe4   :  { %v3949_v50 = vpop.f32.mrf.mxu1  ;;  %1475 = vmatmul.bf16.gmra.mxu3 %v3347_v61 }
  0xe5   :  { %1504 = vmatmul.bf16.gmra.mxu0 %v3349_v62 }
  0xe6   :  { %v3961_v13 = vpop.f32.mrf.mxu2 }
  0xe7   :  { %1533 = vmatmul.bf16.gmra.mxu1 %v3351_v1  ;;  %v3963_v18 = vpop.f32.mrf.mxu3 }
  0xea   :  { %v3965_v60 = vpop.f32.mrf.mxu0 }
  0xec   :  { %v3967_v7 = vpop.f32.mrf.mxu1 }
  0xee   :  { %v3969_v11 = vpop.f32.mrf.mxu2 }
  0xef   :  { %v3971_v8 = vpop.f32.mrf.mxu3 }
  0xf2   :  { %v3973_v17 = vpop.f32.mrf.mxu0 }
  0xf3   :  { %1451 = vmatmul.bf16.gmra.mxu2 %v2997_v6 }
  0xf4   :  { %v3975_v61 = vpop.f32.mrf.mxu1  ;;  %1480 = vmatmul.bf16.gmra.mxu3 %v3425_v46 }
  0xf5   :  { %1509 = vmatmul.bf16.gmra.mxu0 %v3427_v47  ;;  %v1264_v47 = vadd.f32 %v3799_v52, %v1235_v43 }
  0xf6   :  { %v3981_v62 = vpop.f32.mrf.mxu2 }
  0xf7   :  { %1538 = vmatmul.bf16.gmra.mxu1 %v3429_v48  ;;  %v3983_v1 = vpop.f32.mrf.mxu3  ;;  %v1208_v48 = vadd.f32 %v3863_v55, %v3693_v53  ;;  %v1293_v5 = vadd.f32 %v3801_v3, %v1264_v47  ;;  %v4010_v53 = vld [vmem:[%s4195_s2] sm:$0x3] }
  0xf9   :  { %v1237_v33 = vadd.f32 %v3865_v57, %v1208_v48  ;;  %v4016_v57 = vperm.slane %v4010_v53, 0 }
  0xfa   :  { %v3987_v31 = vpop.f32.mrf.mxu0 }
  0xfc   :  { %v3989_v35 = vpop.f32.mrf.mxu1 }
  0xfe   :  { %v3992_v6 = vpop.f32.mrf.mxu2 }
  0xff   :  { %v3994_v46 = vpop.f32.mrf.mxu3 }
 0x102   :  { %v1379_v45 = vpop.f32.mrf.mxu0 }
 0x103   :  { %1552 = vmatmul.bf16.vlgmr.msra.gmra.mxu2 %v3149_v22  ;;  %v1266_v22 = vadd.f32 %v3835_v19, %v1237_v33 }
 0x104   :  { %v3999_v54 = vpop.f32.mrf.mxu1  ;;  %1581 = vmatmul.bf16.vlgmr.msra.gmra.mxu3 %v3503_v36  ;;  %v1211_v36 = vadd.f32 %v3899_v30, %v3739_v42  ;;  %v1213_v30 = vadd.f32 %v3931_v12, %v3771_v10 }
 0x105   :  { %1610 = vmatmul.bf16.vlgmr.msra.gmra.mxu0 %v3505_v37  ;;  %v1295_v43 = vadd.f32 %v3837_v16, %v1266_v22 }
 0x106   :  { %v1321_v15 = vpop.f32.mrf.mxu2  ;;  %v1240_v59 = vadd.f32 %v3901_v41, %v1211_v36  ;;  %v1242_v16 = vadd.f32 %v3939_v29, %v1213_v30 }
 0x107   :  { %1639 = vmatmul.bf16.vlgmr.msra.gmra.mxu1 %v3507_v38  ;;  %v1322_v52 = vadd.f32 %v1321_v15, %v1293_v5  ;;  %v1350_v55 = vpop.f32.mrf.mxu3 }
 0x108   :  { %v1269_v42 = vadd.f32 %v3867_v9, %v1240_v59  ;;  %v1271_v36 = vadd.f32 %v3903_v23, %v1242_v16 }
 0x109   :  { %v1351_v37 = vadd.f32 %v1350_v55, %v1322_v52 }
 0x10a   :  { %v1381_v3 = vpop.f32.mrf.mxu0  ;;  %v1298_v10 = vadd.f32 %v3869_v58, %v1269_v42 }
 0x10b   :  { %v1380_v38 = vadd.f32 %v1379_v45, %v1351_v37 }
 0x10c   :  { %v4018_v56 = vpop.f32.mrf.mxu1 }
 0x10d   :  { %v1717_v21 = vadd.f32 %v4016_v57, %v1380_v38 }
 0x10e   :  { %v1323_v47 = vpop.f32.mrf.mxu2 }
 0x10f   :  { %v1733_v48 = vmax.f32 %v1717_v21, 0.0  ;;  %v1324_v19 = vadd.f32 %v1323_v47, %v1295_v43  ;;  %v1352_v33 = vpop.f32.mrf.mxu3 }
 0x111   :  { %1749 = vst [vmem:[%s4196_s3] sm:$0xff] %v1733_v48  ;;  %v1353_v45 = vadd.f32 %v1352_v33, %v1324_v19 }
 0x112   :  { %v1384_v5 = vpop.f32.mrf.mxu0 }
 0x113   :  { %v1382_v15 = vadd.f32 %v1381_v3, %v1353_v45  ;;  %1557 = vmatmul.bf16.gmra.mxu2 %v3263_v24  ;;  %v1216_v24 = vadd.f32 %v3961_v13, %v3691_v51  ;;  %v1300_v3 = vadd.f32 %v3905_v0, %v1271_v36  ;;  %v1218_v13 = vadd.f32 %v3969_v11, %v3733_v34 }
 0x114   :  { %v4029_v41 = vpop.f32.mrf.mxu1  ;;  %1586 = vmatmul.bf16.gmra.mxu3 %v3573_v25 }
 0x115   :  { %1615 = vmatmul.bf16.gmra.mxu0 %v3575_v26  ;;  %v1719_v9 = vadd.f32 %v4016_v57, %v1382_v15  ;;  %v1247_v0 = vadd.f32 %v3971_v8, %v1218_v13 }
 0x116   :  { %v1326_v12 = vpop.f32.mrf.mxu2 }
 0x117   :  { %1644 = vmatmul.bf16.gmra.mxu1 %v3577_v27  ;;  %v1735_v52 = vmax.f32 %v1719_v9, 0.0  ;;  %v1327_v55 = vadd.f32 %v1326_v12, %v1298_v10  ;;  %v1355_v22 = vpop.f32.mrf.mxu3  ;;  %v1245_v27 = vadd.f32 %v3963_v18, %v1216_v24  ;;  %v1276_v30 = vadd.f32 %v3965_v60, %v1247_v0 }
 0x119   :  { %1751 = vst [vmem:[%s4196_s3 + $0x10] sm:$0xff] %v1735_v52  ;;  %v1356_v25 = vadd.f32 %v1355_v22, %v1327_v55  ;;  %v1274_v51 = vadd.f32 %v3947_v44, %v1245_v27 }
 0x11a   :  { %v1386_v26 = vpop.f32.mrf.mxu0 }
 0x11b   :  { %v1385_v58 = vadd.f32 %v1384_v5, %v1356_v25  ;;  %v1303_v34 = vadd.f32 %v3949_v50, %v1274_v51  ;;  %v1305_v5 = vadd.f32 %v3967_v7, %v1276_v30 }
 0x11c   :  { %v4044_v29 = vpop.f32.mrf.mxu1 }
 0x11d   :  { %v1721_v37 = vadd.f32 %v4016_v57, %v1385_v58 }
 0x11e   :  { %v1328_v38 = vpop.f32.mrf.mxu2 }
 0x11f   :  { %v1737_v23 = vmax.f32 %v1721_v37, 0.0  ;;  %v1329_v59 = vadd.f32 %v1328_v38, %v1300_v3  ;;  %v1357_v21 = vpop.f32.mrf.mxu3 }
 0x121   :  { %1753 = vst [vmem:[%s4196_s3 + $0x20] sm:$0xff] %v1737_v23  ;;  %v1358_v43 = vadd.f32 %v1357_v21, %v1329_v59 }
 0x122   :  { %v1389_v47 = vpop.f32.mrf.mxu0 }
 0x123   :  { %v1387_v48 = vadd.f32 %v1386_v26, %v1358_v43  ;;  %1562 = vmatmul.bf16.gmra.mxu2 %v3353_v2  ;;  %v1221_v2 = vadd.f32 %v3981_v62, %v3769_v63  ;;  %v1223_v62 = vadd.f32 %v3992_v6, %v3797_v4 }
 0x124   :  { %v4055_v18 = vpop.f32.mrf.mxu1  ;;  %1591 = vmatmul.bf16.gmra.mxu3 %v3655_v14 }
 0x125   :  { %1620 = vmatmul.bf16.gmra.mxu0 %v3657_v20  ;;  %v1723_v44 = vadd.f32 %v4016_v57, %v1387_v48  ;;  %v1252_v7 = vadd.f32 %v3994_v46, %v1223_v62 }
 0x126   :  { %v1331_v11 = vpop.f32.mrf.mxu2 }
 0x127   :  { %1649 = vmatmul.bf16.gmra.mxu1 %v3659_v28  ;;  %v1739_v19 = vmax.f32 %v1723_v44, 0.0  ;;  %v1332_v33 = vadd.f32 %v1331_v11, %v1303_v34  ;;  %v1360_v42 = vpop.f32.mrf.mxu3  ;;  %v1250_v28 = vadd.f32 %v3983_v1, %v1221_v2  ;;  %v1281_v24 = vadd.f32 %v3987_v31, %v1252_v7 }
 0x129   :  { %1755 = vst [vmem:[%s4196_s3 + $0x30] sm:$0xff] %v1739_v19  ;;  %v1361_v14 = vadd.f32 %v1360_v42, %v1332_v33  ;;  %v1279_v63 = vadd.f32 %v3973_v17, %v1250_v28 }
 0x12a   :  { %v1391_v20 = vpop.f32.mrf.mxu0 }
 0x12b   :  { %v1390_v50 = vadd.f32 %v1389_v47, %v1361_v14  ;;  %v1308_v4 = vadd.f32 %v3975_v61, %v1279_v63  ;;  %v1310_v61 = vadd.f32 %v3989_v35, %v1281_v24 }
 0x12c   :  { %v4070_v8 = vpop.f32.mrf.mxu1 }
 0x12d   :  { %v1725_v45 = vadd.f32 %v4016_v57, %v1390_v50 }
 0x12e   :  { %v1333_v15 = vpop.f32.mrf.mxu2 }
 0x12f   :  { %v1741_v60 = vmax.f32 %v1725_v45, 0.0  ;;  %v1334_v16 = vadd.f32 %v1333_v15, %v1305_v5  ;;  %v1362_v9 = vpop.f32.mrf.mxu3 }
 0x131   :  { %1757 = vst [vmem:[%s4196_s3 + $0x40] sm:$0xff] %v1741_v60  ;;  %v1363_v10 = vadd.f32 %v1362_v9, %v1334_v16 }
 0x132   :  { %v1394_v12 = vpop.f32.mrf.mxu0 }
 0x133   :  { %v1392_v52 = vadd.f32 %v1391_v20, %v1363_v10  ;;  %1567 = vmatmul.bf16.gmra.mxu2 %v3431_v49 }
 0x134   :  { %v4081_v1 = vpop.f32.mrf.mxu1  ;;  %1596 = vmatmul.bf16.gmra.mxu3 %v3731_v32 }
 0x135   :  { %1625 = vmatmul.bf16.gmra.mxu0 %v3735_v39  ;;  %v1727_v17 = vadd.f32 %v4016_v57, %v1392_v52 }
 0x136   :  { %v1336_v6 = vpop.f32.mrf.mxu2 }
 0x137   :  { %1654 = vmatmul.bf16.gmra.mxu1 %v3737_v40  ;;  %v1743_v55 = vmax.f32 %v1727_v17, 0.0  ;;  %v1337_v22 = vadd.f32 %v1336_v6, %v1308_v4  ;;  %v1365_v36 = vpop.f32.mrf.mxu3 }
 0x139   :  { %1759 = vst [vmem:[%s4196_s3 + $0x50] sm:$0xff] %v1743_v55  ;;  %v1366_v49 = vadd.f32 %v1365_v36, %v1337_v22 }
 0x13a   :  { %v1396_v32 = vpop.f32.mrf.mxu0 }
 0x13b   :  { %v1395_v46 = vadd.f32 %v1394_v12, %v1366_v49 }
 0x13c   :  { %v4094_v39 = vpop.f32.mrf.mxu1 }
 0x13d   :  { %v1729_v25 = vadd.f32 %v4016_v57, %v1395_v46 }
 0x13e   :  { %v1338_v40 = vpop.f32.mrf.mxu2 }
 0x13f   :  { %v1745_v26 = vmax.f32 %v1729_v25, 0.0  ;;  %v1339_v58 = vadd.f32 %v1338_v40, %v1310_v61  ;;  %v1367_v27 = vpop.f32.mrf.mxu3 }
 0x141   :  { %1761 = vst [vmem:[%s4196_s3 + $0x60] sm:$0xff] %v1745_v26  ;;  %v1368_v31 = vadd.f32 %v1367_v27, %v1339_v58  ;;  %v4139_v26 = vperm.slane %v4010_v53, 1 }
 0x142   :  { %v1495_v37 = vpop.f32.mrf.mxu0 }
 0x143   :  { %v1397_v38 = vadd.f32 %v1396_v32, %v1368_v31 }
 0x144   :  { %v1524_v3 = vpop.f32.mrf.mxu1 }
 0x145   :  { %v1731_v23 = vadd.f32 %v4016_v57, %v1397_v38 }
 0x146   :  { %v1437_v59 = vpop.f32.mrf.mxu2 }
 0x147   :  { %v1747_v21 = vmax.f32 %v1731_v23, 0.0  ;;  %v1466_v51 = vpop.f32.mrf.mxu3  ;;  %v1438_v9 = vadd.f32 %v1437_v59, %v3999_v54 }
 0x149   :  { %1763 = vst [vmem:[%s4196_s3 + $0x70] sm:$0xff] %v1747_v21  ;;  %v1467_v10 = vadd.f32 %v1466_v51, %v1438_v9 }
 0x14a   :  { %v1497_v35 = vpop.f32.mrf.mxu0 }
 0x14b   :  { %v1496_v7 = vadd.f32 %v1495_v37, %v1467_v10 }
 0x14c   :  { %v1526_v13 = vpop.f32.mrf.mxu1 }
 0x14d   :  { %v1525_v22 = vadd.f32 %v1524_v3, %v1496_v7 }
 0x14e   :  { %v1439_v43 = vpop.f32.mrf.mxu2 }
 0x14f   :  { %v1468_v47 = vpop.f32.mrf.mxu3  ;;  %v1440_v17 = vadd.f32 %v1439_v43, %v4018_v56 }
 0x151   :  { %v1469_v55 = vadd.f32 %v1468_v47, %v1440_v17 }
 0x152   :  { %v1500_v48 = vpop.f32.mrf.mxu0 }
 0x153   :  { %v1498_v54 = vadd.f32 %v1497_v35, %v1469_v55 }
 0x154   :  { %v1529_v0 = vpop.f32.mrf.mxu1 }
 0x155   :  { %v1527_v56 = vadd.f32 %v1526_v13, %v1498_v54 }
 0x156   :  { %v1442_v44 = vpop.f32.mrf.mxu2 }
 0x157   :  { %v1471_v34 = vpop.f32.mrf.mxu3  ;;  %v1443_v32 = vadd.f32 %v1442_v44, %v4029_v41 }
 0x159   :  { %v1472_v58 = vadd.f32 %v1471_v34, %v1443_v32 }
 0x15a   :  { %v1502_v11 = vpop.f32.mrf.mxu0 }
 0x15b   :  { %v1501_v23 = vadd.f32 %v1500_v48, %v1472_v58 }
 0x15c   :  { %v4105_v19 = vpop.f32.mrf.mxu1 }
 0x15d   :  { %v1530_v13 = vadd.f32 %v1529_v0, %v1501_v23 }
 0x15e   :  { %v1444_v33 = vpop.f32.mrf.mxu2 }
 0x15f   :  { %v1473_v57 = vpop.f32.mrf.mxu3  ;;  %v1445_v59 = vadd.f32 %v1444_v33, %v4044_v29 }
 0x161   :  { %v1474_v43 = vadd.f32 %v1473_v57, %v1445_v59 }
 0x162   :  { %v4107_v42 = vpop.f32.mrf.mxu0 }
 0x163   :  { %v1503_v48 = vadd.f32 %v1502_v11, %v1474_v43 }
 0x164   :  { %v4109_v30 = vpop.f32.mrf.mxu1 }
 0x165   :  { %v1532_v0 = vadd.f32 %v4105_v19, %v1503_v48 }
 0x166   :  { %v1447_v2 = vpop.f32.mrf.mxu2 }
 0x167   :  { %v1476_v14 = vpop.f32.mrf.mxu3  ;;  %v1448_v29 = vadd.f32 %v1447_v2, %v4055_v18 }
 0x169   :  { %v1477_v57 = vadd.f32 %v1476_v14, %v1448_v29 }
 0x16a   :  { %v4111_v20 = vpop.f32.mrf.mxu0 }
 0x16b   :  { %v1506_v18 = vadd.f32 %v4107_v42, %v1477_v57 }
 0x16c   :  { %v4113_v50 = vpop.f32.mrf.mxu1 }
 0x16e   :  { %v4115_v28 = vpop.f32.mrf.mxu2 }
 0x16f   :  { %v4117_v45 = vpop.f32.mrf.mxu3  ;;  %v1450_v2 = vadd.f32 %v4115_v28, %v4070_v8 }
 0x171   :  { %v1479_v19 = vadd.f32 %v4117_v45, %v1450_v2 }
 0x172   :  { %v4119_v5 = vpop.f32.mrf.mxu0 }
 0x173   :  { %v1508_v8 = vadd.f32 %v4111_v20, %v1479_v19 }
 0x174   :  { %v4121_v15 = vpop.f32.mrf.mxu1 }
 0x176   :  { %v4123_v60 = vpop.f32.mrf.mxu2 }
 0x177   :  { %v4125_v16 = vpop.f32.mrf.mxu3  ;;  %v1453_v28 = vadd.f32 %v4123_v60, %v4081_v1 }
 0x17a   :  { %v4128_v63 = vpop.f32.mrf.mxu0 }
 0x17c   :  { %v4130_v62 = vpop.f32.mrf.mxu1 }
 0x17e   :  { %v4132_v12 = vpop.f32.mrf.mxu2 }
 0x17f   :  { %v4134_v52 = vpop.f32.mrf.mxu3  ;;  %v1455_v60 = vadd.f32 %v4132_v12, %v4094_v39 }
 0x182   :  { %v1611_v4 = vpop.f32.mrf.mxu0 }
 0x184   :  { %v1640_v6 = vpop.f32.mrf.mxu1 }
 0x186   :  { %v1553_v36 = vpop.f32.mrf.mxu2 }
 0x187   :  { %v1554_v24 = vadd.f32 %v1553_v36, %v1525_v22  ;;  %v1582_v49 = vpop.f32.mrf.mxu3 }
 0x189   :  { %v1583_v46 = vadd.f32 %v1582_v49, %v1554_v24 }
 0x18a   :  { %v1613_v25 = vpop.f32.mrf.mxu0 }
 0x18b   :  { %v1612_v40 = vadd.f32 %v1611_v4, %v1583_v46 }
 0x18c   :  { %v1642_v61 = vpop.f32.mrf.mxu1 }
 0x18d   :  { %v1641_v27 = vadd.f32 %v1640_v6, %v1612_v40 }
 0x18e   :  { %v1555_v31 = vpop.f32.mrf.mxu2 }
 0x18f   :  { %v1718_v37 = vadd.f32 %v4139_v26, %v1641_v27  ;;  %v1556_v3 = vadd.f32 %v1555_v31, %v1527_v56  ;;  %v1584_v38 = vpop.f32.mrf.mxu3 }
 0x191   :  { %v1734_v21 = vmax.f32 %v1718_v37, 0.0  ;;  %v1585_v41 = vadd.f32 %v1584_v38, %v1556_v3  ;;  %v1537_v3 = vadd.f32 %v4113_v50, %v1508_v8  ;;  %v1484_v50 = vadd.f32 %v4134_v52, %v1455_v60 }
 0x192   :  { %v1616_v51 = vpop.f32.mrf.mxu0 }
 0x193   :  { %1750 = vst [vmem:[%s4196_s3 + $0x8] sm:$0xff] %v1734_v21  ;;  %v1614_v53 = vadd.f32 %v1613_v25, %v1585_v41  ;;  %v1535_v25 = vadd.f32 %v4109_v30, %v1506_v18  ;;  %v1482_v30 = vadd.f32 %v4125_v16, %v1453_v28  ;;  %v1513_v39 = vadd.f32 %v4128_v63, %v1484_v50 }
 0x194   :  { %v1645_v35 = vpop.f32.mrf.mxu1 }
 0x195   :  { %v1643_v47 = vadd.f32 %v1642_v61, %v1614_v53  ;;  %v1511_v1 = vadd.f32 %v4119_v5, %v1482_v30  ;;  %v1542_v29 = vadd.f32 %v4130_v62, %v1513_v39 }
 0x196   :  { %v1558_v44 = vpop.f32.mrf.mxu2 }
 0x197   :  { %v1720_v34 = vadd.f32 %v4139_v26, %v1643_v47  ;;  %v1559_v9 = vadd.f32 %v1558_v44, %v1530_v13  ;;  %v1587_v10 = vpop.f32.mrf.mxu3  ;;  %v1540_v43 = vadd.f32 %v4121_v15, %v1511_v1 }
 0x199   :  { %v1736_v33 = vmax.f32 %v1720_v34, 0.0  ;;  %v1588_v7 = vadd.f32 %v1587_v10, %v1559_v9 }
 0x19a   :  { %v1618_v17 = vpop.f32.mrf.mxu0 }
 0x19b   :  { %1752 = vst [vmem:[%s4196_s3 + $0x18] sm:$0xff] %v1736_v33  ;;  %v1617_v4 = vadd.f32 %v1616_v51, %v1588_v7 }
 0x19c   :  { %v1647_v6 = vpop.f32.mrf.mxu1 }
 0x19d   :  { %v1646_v55 = vadd.f32 %v1645_v35, %v1617_v4 }
 0x19e   :  { %v1560_v22 = vpop.f32.mrf.mxu2 }
 0x19f   :  { %v1722_v36 = vadd.f32 %v4139_v26, %v1646_v55  ;;  %v1561_v24 = vadd.f32 %v1560_v22, %v1532_v0  ;;  %v1589_v11 = vpop.f32.mrf.mxu3 }
 0x1a1   :  { %v1738_v49 = vmax.f32 %v1722_v36, 0.0  ;;  %v1590_v54 = vadd.f32 %v1589_v11, %v1561_v24 }
 0x1a2   :  { %v1621_v32 = vpop.f32.mrf.mxu0 }
 0x1a3   :  { %1754 = vst [vmem:[%s4196_s3 + $0x28] sm:$0xff] %v1738_v49  ;;  %v1619_v14 = vadd.f32 %v1618_v17, %v1590_v54 }
 0x1a4   :  { %v1650_v61 = vpop.f32.mrf.mxu1 }
 0x1a5   :  { %v1648_v46 = vadd.f32 %v1647_v6, %v1619_v14 }
 0x1a6   :  { %v1563_v40 = vpop.f32.mrf.mxu2 }
 0x1a7   :  { %v1724_v42 = vadd.f32 %v4139_v26, %v1648_v46  ;;  %v1564_v58 = vadd.f32 %v1563_v40, %v1535_v25  ;;  %v1592_v27 = vpop.f32.mrf.mxu3 }
 0x1a9   :  { %v1740_v56 = vmax.f32 %v1724_v42, 0.0  ;;  %v1593_v31 = vadd.f32 %v1592_v27, %v1564_v58 }
 0x1aa   :  { %v1623_v38 = vpop.f32.mrf.mxu0 }
 0x1ab   :  { %1756 = vst [vmem:[%s4196_s3 + $0x38] sm:$0xff] %v1740_v56  ;;  %v1622_v45 = vadd.f32 %v1621_v32, %v1593_v31 }
 0x1ac   :  { %v1652_v41 = vpop.f32.mrf.mxu1 }
 0x1ad   :  { %v1651_v37 = vadd.f32 %v1650_v61, %v1622_v45 }
 0x1ae   :  { %v1565_v23 = vpop.f32.mrf.mxu2 }
 0x1af   :  { %v1726_v59 = vadd.f32 %v4139_v26, %v1651_v37  ;;  %v1566_v20 = vadd.f32 %v1565_v23, %v1537_v3  ;;  %v1594_v21 = vpop.f32.mrf.mxu3 }
 0x1b1   :  { %v1742_v51 = vmax.f32 %v1726_v59, 0.0  ;;  %v1595_v35 = vadd.f32 %v1594_v21, %v1566_v20 }
 0x1b2   :  { %v1626_v34 = vpop.f32.mrf.mxu0 }
 0x1b3   :  { %1758 = vst [vmem:[%s4196_s3 + $0x48] sm:$0xff] %v1742_v51  ;;  %v1624_v16 = vadd.f32 %v1623_v38, %v1595_v35 }
 0x1b4   :  { %v1655_v10 = vpop.f32.mrf.mxu1 }
 0x1b5   :  { %v1653_v53 = vadd.f32 %v1652_v41, %v1624_v16 }
 0x1b6   :  { %v1568_v47 = vpop.f32.mrf.mxu2 }
 0x1b7   :  { %v1728_v13 = vadd.f32 %v4139_v26, %v1653_v53  ;;  %v1569_v44 = vadd.f32 %v1568_v47, %v1540_v43  ;;  %v1597_v5 = vpop.f32.mrf.mxu3 }
 0x1b9   :  { %v1744_v12 = vmax.f32 %v1728_v13, 0.0  ;;  %v1598_v9 = vadd.f32 %v1597_v5, %v1569_v44 }
 0x1ba   :  { %v1628_v57 = vpop.f32.mrf.mxu0 }
 0x1bb   :  { %1760 = vst [vmem:[%s4196_s3 + $0x58] sm:$0xff] %v1744_v12  ;;  %v1627_v48 = vadd.f32 %v1626_v34, %v1598_v9 }
 0x1bc   :  { %v1657_v55 = vpop.f32.mrf.mxu1 }
 0x1bd   :  { %v1656_v52 = vadd.f32 %v1655_v10, %v1627_v48 }
 0x1be   :  { %v1570_v15 = vpop.f32.mrf.mxu2 }
 0x1bf   :  { %v1730_v33 = vadd.f32 %v4139_v26, %v1656_v52  ;;  %v1571_v7 = vadd.f32 %v1570_v15, %v1542_v29  ;;  %v1599_v17 = vpop.f32.mrf.mxu3 }
 0x1c1   :  { %v1746_v4 = vmax.f32 %v1730_v33, 0.0  ;;  %v1600_v6 = vadd.f32 %v1599_v17, %v1571_v7 }
 0x1c3   :  { %1762 = vst [vmem:[%s4196_s3 + $0x68] sm:$0xff] %v1746_v4  ;;  %v1629_v63 = vadd.f32 %v1628_v57, %v1600_v6 }
 0x1c5   :  { %v1658_v0 = vadd.f32 %v1657_v55, %v1629_v63 }
 0x1c7   :  { %v1732_v22 = vadd.f32 %v4139_v26, %v1658_v0 }
 0x1c9   :  { %v1748_v36 = vmax.f32 %v1732_v22, 0.0 }
 0x1cb   :  { %1764 = vst [vmem:[%s4196_s3 + $0x78] sm:$0xff] %v1748_v36 }

// kernel: tps_forward.11
= control target key start
LH: loop header
LB: loop body
LE: loop exit
PB: predicated region body
PF: predicated region fallthrough
CT: control target
= control target key end

     0   :  { %s6810_s12 = smov 0   ;;  %s6812_s13 = smov 0   ;;  %s8303_s0 = inlined_call_operand.vmem [shape: bf16[16,2304], index: 0, kind: input, shape index: {}]   ;;  %s8304_s1 = inlined_call_operand.vmem [shape: bf16[2304,512], index: 1, kind: input, shape index: {}]   ;;  %s8305_s2 = inlined_call_operand.vmem [shape: f32[1,512], index: 2, kind: input, shape index: {}]   ;;  %s8306_s3 = inlined_call_operand.vmem [shape: f32[16,512], index: 3, kind: output, shape index: {}]  }
   0x1   :  { %s6814_s14 = smov 0   ;;  %s6816_s15 = smov 0  }
   0x2   :  { %s6818_s16 = smov 0  }
   0x3 LB: > { %s28_s17 = sadd.s32 1, %s6784_s15  ;;  %s5161_s18 = sadd.s32 4294967295, %s6788_s16   ;;  %s6788_s16 = sphi %s6818_s16, %s13_s16   ;;  %s6784_s15 = sphi %s6816_s15, %s8311_s15   ;;  %s6780_s14 = sphi %s6814_s14, %s8310_s14   ;;  %s6776_s13 = sphi %s6812_s13, %s8309_s13   ;;  %s6772_s12 = sphi %s6810_s12, %s8308_s12  }
   0x4   : > { %p30_p0 = scmp.ge.s32.totalorder %s28_s17, 2  ;;  %p76_p1 = scmp.ne.s32.totalorder %s6776_s13, %s6772_s12 }
   0x5   : > { %p77_p2 = scmp.eq.s32.totalorder %s6788_s16, 0  ;;  %p134_p4 = scmp.eq.s32.totalorder %s5161_s18, 1 }
   0x6   : > { %s8313_s17 = smov (%p30_p0, %s28_s17), 0  ;;  %s69_s20 = sadd.s32 1, %s6776_s13 }
   0x7   : > { %p78_p3 = por %p77_p2, %p76_p1  ;;  %s65_s19 = ssub.s32 %s6784_s15, %s8313_s17 }
   0x8   : > { %p67_p5 = scmp.eq.s32.totalorder %s65_s19, 0  ;;  %p6845_p6 = por %p134_p4, %p76_p1 }
   0x9   : > { %p5165_p7 = scmp.ge.s32.totalorder %s6788_s16, 2 }
   0xa   : > { %s6850_s22 = scalar_select %p67_p5, %s6776_s13, %s69_s20  }
   0xb   : > { %171 = sbr.rel (%p5165_p7) target bundleno = 308 (0x134), region = 20 }
  0x10   : > { %174 = sbr.rel (!%p78_p3) target bundleno = 308 (0x134), region = 24  ;;  %s176_s23 = sand.u32 (%p78_p3), 1, %s6776_s13  }
  0x11   : > { %s6400_s24 = sshll.u32 (%p78_p3), %s6784_s15, 3  ;;  %s6708_s25 = smul.u32 (%p78_p3), 2304, %s176_s23 }
  0x12   : > { %s6858_s28 = scalar_lea.vmem (%p78_p3), %s8304_s1, %s6400_s24 }
  0x13   : > { %v788_v0 = vld [vmem:[%s6858_s28] sm:$0xff] (%p78_p3)  ;;  %v790_v1 = vld [vmem:[%s6858_s28 + $0x10] sm:$0xff] (%p78_p3)  ;;  %s6863_s29 = scalar_lea.vmem (%p78_p3), [#allocation3], %s6708_s25 }
  0x14   : > { %v792_v2 = vld [vmem:[%s6858_s28 + $0x20] sm:$0xff] (%p78_p3)  ;;  %789 = vst [vmem:[%s6863_s29] sm:$0xff] (%p78_p3), %v788_v0  ;;  %v794_v3 = vld [vmem:[%s6858_s28 + $0x30] sm:$0xff] (%p78_p3) }
  0x15   : > { %791 = vst [vmem:[%s6863_s29 + $0x8] sm:$0xff] %v790_v1  ;;  %v796_v4 = vld [vmem:[%s6858_s28 + $0x40] sm:$0xff]  ;;  %v798_v5 = vld [vmem:[%s6858_s28 + $0x50] sm:$0xff] }
  0x16   : > { %793 = vst [vmem:[%s6863_s29 + $0x10] sm:$0xff] %v792_v2  ;;  %v800_v6 = vld [vmem:[%s6858_s28 + $0x60] sm:$0xff]  ;;  %v802_v7 = vld [vmem:[%s6858_s28 + $0x70] sm:$0xff] }
  0x17   : > { %795 = vst [vmem:[%s6863_s29 + $0x18] sm:$0xff] %v794_v3  ;;  %v804_v8 = vld [vmem:[%s6858_s28 + $0x80] sm:$0xff]  ;;  %v806_v9 = vld [vmem:[%s6858_s28 + $0x90] sm:$0xff] }
  0x18   : > { %797 = vst [vmem:[%s6863_s29 + $0x20] sm:$0xff] %v796_v4  ;;  %v808_v10 = vld [vmem:[%s6858_s28 + $0xa0] sm:$0xff]  ;;  %v810_v11 = vld [vmem:[%s6858_s28 + $0xb0] sm:$0xff] }
  0x19   : > { %799 = vst [vmem:[%s6863_s29 + $0x28] sm:$0xff] %v798_v5  ;;  %v812_v12 = vld [vmem:[%s6858_s28 + $0xc0] sm:$0xff]  ;;  %v814_v13 = vld [vmem:[%s6858_s28 + $0xd0] sm:$0xff] }
  0x1a   : > { %801 = vst [vmem:[%s6863_s29 + $0x30] sm:$0xff] %v800_v6  ;;  %v816_v14 = vld [vmem:[%s6858_s28 + $0xe0] sm:$0xff]  ;;  %v818_v15 = vld [vmem:[%s6858_s28 + $0xf0] sm:$0xff] }
  0x1b   : > { %803 = vst [vmem:[%s6863_s29 + $0x38] sm:$0xff] %v802_v7  ;;  %v820_v16 = vld [vmem:[%s6858_s28 + $0x100] sm:$0xff]  ;;  %v822_v17 = vld [vmem:[%s6858_s28 + $0x110] sm:$0xff] }
  0x1c   : > { %805 = vst [vmem:[%s6863_s29 + $0x40] sm:$0xff] %v804_v8  ;;  %v824_v18 = vld [vmem:[%s6858_s28 + $0x120] sm:$0xff]  ;;  %v826_v19 = vld [vmem:[%s6858_s28 + $0x130] sm:$0xff] }
  0x1d   : > { %807 = vst [vmem:[%s6863_s29 + $0x48] sm:$0xff] %v806_v9  ;;  %v828_v20 = vld [vmem:[%s6858_s28 + $0x140] sm:$0xff]  ;;  %v830_v21 = vld [vmem:[%s6858_s28 + $0x150] sm:$0xff] }
  0x1e   : > { %809 = vst [vmem:[%s6863_s29 + $0x50] sm:$0xff] %v808_v10  ;;  %v832_v22 = vld [vmem:[%s6858_s28 + $0x160] sm:$0xff]  ;;  %v834_v23 = vld [vmem:[%s6858_s28 + $0x170] sm:$0xff] }
  0x1f   : > { %811 = vst [vmem:[%s6863_s29 + $0x58] sm:$0xff] %v810_v11  ;;  %v836_v24 = vld [vmem:[%s6858_s28 + $0x180] sm:$0xff]  ;;  %v838_v25 = vld [vmem:[%s6858_s28 + $0x190] sm:$0xff] }
  0x20   : > { %813 = vst [vmem:[%s6863_s29 + $0x60] sm:$0xff] %v812_v12  ;;  %v840_v26 = vld [vmem:[%s6858_s28 + $0x1a0] sm:$0xff]  ;;  %v842_v27 = vld [vmem:[%s6858_s28 + $0x1b0] sm:$0xff] }
  0x21   : > { %815 = vst [vmem:[%s6863_s29 + $0x68] sm:$0xff] %v814_v13  ;;  %v844_v28 = vld [vmem:[%s6858_s28 + $0x1c0] sm:$0xff]  ;;  %v846_v29 = vld [vmem:[%s6858_s28 + $0x1d0] sm:$0xff] }
  0x22   : > { %817 = vst [vmem:[%s6863_s29 + $0x70] sm:$0xff] %v816_v14  ;;  %v848_v30 = vld [vmem:[%s6858_s28 + $0x1e0] sm:$0xff]  ;;  %v850_v31 = vld [vmem:[%s6858_s28 + $0x1f0] sm:$0xff] }
  0x23   : > { %819 = vst [vmem:[%s6863_s29 + $0x78] sm:$0xff] %v818_v15  ;;  %v852_v32 = vld [vmem:[%s6858_s28 + $0x200] sm:$0xff]  ;;  %v854_v33 = vld [vmem:[%s6858_s28 + $0x210] sm:$0xff] }
  0x24   : > { %821 = vst [vmem:[%s6863_s29 + $0x80] sm:$0xff] %v820_v16  ;;  %v856_v34 = vld [vmem:[%s6858_s28 + $0x220] sm:$0xff]  ;;  %v858_v35 = vld [vmem:[%s6858_s28 + $0x230] sm:$0xff] }
  0x25   : > { %823 = vst [vmem:[%s6863_s29 + $0x88] sm:$0xff] %v822_v17  ;;  %v860_v36 = vld [vmem:[%s6858_s28 + $0x240] sm:$0xff]  ;;  %v862_v37 = vld [vmem:[%s6858_s28 + $0x250] sm:$0xff] }
  0x26   : > { %825 = vst [vmem:[%s6863_s29 + $0x90] sm:$0xff] %v824_v18  ;;  %v864_v38 = vld [vmem:[%s6858_s28 + $0x260] sm:$0xff]  ;;  %v866_v39 = vld [vmem:[%s6858_s28 + $0x270] sm:$0xff] }
  0x27   : > { %827 = vst [vmem:[%s6863_s29 + $0x98] sm:$0xff] %v826_v19  ;;  %v868_v40 = vld [vmem:[%s6858_s28 + $0x280] sm:$0xff]  ;;  %v870_v41 = vld [vmem:[%s6858_s28 + $0x290] sm:$0xff] }
  0x28   : > { %829 = vst [vmem:[%s6863_s29 + $0xa0] sm:$0xff] %v828_v20  ;;  %v872_v42 = vld [vmem:[%s6858_s28 + $0x2a0] sm:$0xff]  ;;  %v874_v43 = vld [vmem:[%s6858_s28 + $0x2b0] sm:$0xff] }
  0x29   : > { %831 = vst [vmem:[%s6863_s29 + $0xa8] sm:$0xff] %v830_v21  ;;  %v876_v44 = vld [vmem:[%s6858_s28 + $0x2c0] sm:$0xff]  ;;  %v878_v45 = vld [vmem:[%s6858_s28 + $0x2d0] sm:$0xff] }
  0x2a   : > { %833 = vst [vmem:[%s6863_s29 + $0xb0] sm:$0xff] %v832_v22  ;;  %v880_v46 = vld [vmem:[%s6858_s28 + $0x2e0] sm:$0xff]  ;;  %v882_v47 = vld [vmem:[%s6858_s28 + $0x2f0] sm:$0xff] }
  0x2b   : > { %835 = vst [vmem:[%s6863_s29 + $0xb8] sm:$0xff] %v834_v23  ;;  %v884_v48 = vld [vmem:[%s6858_s28 + $0x300] sm:$0xff]  ;;  %v886_v49 = vld [vmem:[%s6858_s28 + $0x310] sm:$0xff] }
  0x2c   : > { %837 = vst [vmem:[%s6863_s29 + $0xc0] sm:$0xff] %v836_v24  ;;  %v888_v50 = vld [vmem:[%s6858_s28 + $0x320] sm:$0xff]  ;;  %v890_v51 = vld [vmem:[%s6858_s28 + $0x330] sm:$0xff] }
  0x2d   : > { %839 = vst [vmem:[%s6863_s29 + $0xc8] sm:$0xff] %v838_v25  ;;  %v892_v52 = vld [vmem:[%s6858_s28 + $0x340] sm:$0xff]  ;;  %v894_v53 = vld [vmem:[%s6858_s28 + $0x350] sm:$0xff] }
  0x2e   : > { %841 = vst [vmem:[%s6863_s29 + $0xd0] sm:$0xff] %v840_v26  ;;  %v896_v54 = vld [vmem:[%s6858_s28 + $0x360] sm:$0xff]  ;;  %v898_v55 = vld [vmem:[%s6858_s28 + $0x370] sm:$0xff] }
  0x2f   : > { %843 = vst [vmem:[%s6863_s29 + $0xd8] sm:$0xff] %v842_v27  ;;  %v900_v56 = vld [vmem:[%s6858_s28 + $0x380] sm:$0xff]  ;;  %v902_v57 = vld [vmem:[%s6858_s28 + $0x390] sm:$0xff] }
  0x30   : > { %845 = vst [vmem:[%s6863_s29 + $0xe0] sm:$0xff] %v844_v28  ;;  %v904_v58 = vld [vmem:[%s6858_s28 + $0x3a0] sm:$0xff]  ;;  %v906_v59 = vld [vmem:[%s6858_s28 + $0x3b0] sm:$0xff] }
  0x31   : > { %847 = vst [vmem:[%s6863_s29 + $0xe8] sm:$0xff] %v846_v29  ;;  %v908_v60 = vld [vmem:[%s6858_s28 + $0x3c0] sm:$0xff]  ;;  %v910_v61 = vld [vmem:[%s6858_s28 + $0x3d0] sm:$0xff] }
  0x32   : > { %849 = vst [vmem:[%s6863_s29 + $0xf0] sm:$0xff] %v848_v30  ;;  %v912_v62 = vld [vmem:[%s6858_s28 + $0x3e0] sm:$0xff]  ;;  %v914_v63 = vld [vmem:[%s6858_s28 + $0x3f0] sm:$0xff] }
  0x33   : > { %851 = vst [vmem:[%s6863_s29 + $0xf8] sm:$0xff] %v850_v31  ;;  %v916_v0 = vld [vmem:[%s6858_s28 + $0x400] sm:$0xff]  ;;  %v918_v1 = vld [vmem:[%s6858_s28 + $0x410] sm:$0xff] }
  0x34   : > { %853 = vst [vmem:[%s6863_s29 + $0x100] sm:$0xff] %v852_v32  ;;  %v920_v2 = vld [vmem:[%s6858_s28 + $0x420] sm:$0xff]  ;;  %v922_v3 = vld [vmem:[%s6858_s28 + $0x430] sm:$0xff] }
  0x35   : > { %855 = vst [vmem:[%s6863_s29 + $0x108] sm:$0xff] %v854_v33  ;;  %v924_v4 = vld [vmem:[%s6858_s28 + $0x440] sm:$0xff]  ;;  %v926_v5 = vld [vmem:[%s6858_s28 + $0x450] sm:$0xff] }
  0x36   : > { %857 = vst [vmem:[%s6863_s29 + $0x110] sm:$0xff] %v856_v34  ;;  %v928_v6 = vld [vmem:[%s6858_s28 + $0x460] sm:$0xff]  ;;  %v930_v7 = vld [vmem:[%s6858_s28 + $0x470] sm:$0xff] }
  0x37   : > { %859 = vst [vmem:[%s6863_s29 + $0x118] sm:$0xff] %v858_v35  ;;  %v932_v8 = vld [vmem:[%s6858_s28 + $0x480] sm:$0xff]  ;;  %v934_v9 = vld [vmem:[%s6858_s28 + $0x490] sm:$0xff] }
  0x38   : > { %861 = vst [vmem:[%s6863_s29 + $0x120] sm:$0xff] %v860_v36  ;;  %v936_v10 = vld [vmem:[%s6858_s28 + $0x4a0] sm:$0xff]  ;;  %v938_v11 = vld [vmem:[%s6858_s28 + $0x4b0] sm:$0xff] }
  0x39   : > { %863 = vst [vmem:[%s6863_s29 + $0x128] sm:$0xff] %v862_v37  ;;  %v940_v12 = vld [vmem:[%s6858_s28 + $0x4c0] sm:$0xff]  ;;  %v942_v13 = vld [vmem:[%s6858_s28 + $0x4d0] sm:$0xff] }
  0x3a   : > { %865 = vst [vmem:[%s6863_s29 + $0x130] sm:$0xff] %v864_v38  ;;  %v944_v14 = vld [vmem:[%s6858_s28 + $0x4e0] sm:$0xff]  ;;  %v946_v15 = vld [vmem:[%s6858_s28 + $0x4f0] sm:$0xff] }
  0x3b   : > { %867 = vst [vmem:[%s6863_s29 + $0x138] sm:$0xff] %v866_v39  ;;  %v948_v16 = vld [vmem:[%s6858_s28 + $0x500] sm:$0xff]  ;;  %v950_v17 = vld [vmem:[%s6858_s28 + $0x510] sm:$0xff] }
  0x3c   : > { %869 = vst [vmem:[%s6863_s29 + $0x140] sm:$0xff] %v868_v40  ;;  %v952_v18 = vld [vmem:[%s6858_s28 + $0x520] sm:$0xff]  ;;  %v954_v19 = vld [vmem:[%s6858_s28 + $0x530] sm:$0xff] }
  0x3d   : > { %871 = vst [vmem:[%s6863_s29 + $0x148] sm:$0xff] %v870_v41  ;;  %v956_v20 = vld [vmem:[%s6858_s28 + $0x540] sm:$0xff]  ;;  %v958_v21 = vld [vmem:[%s6858_s28 + $0x550] sm:$0xff] }
  0x3e   : > { %873 = vst [vmem:[%s6863_s29 + $0x150] sm:$0xff] %v872_v42  ;;  %v960_v22 = vld [vmem:[%s6858_s28 + $0x560] sm:$0xff]  ;;  %v962_v23 = vld [vmem:[%s6858_s28 + $0x570] sm:$0xff] }
  0x3f   : > { %875 = vst [vmem:[%s6863_s29 + $0x158] sm:$0xff] %v874_v43  ;;  %v964_v24 = vld [vmem:[%s6858_s28 + $0x580] sm:$0xff]  ;;  %v966_v25 = vld [vmem:[%s6858_s28 + $0x590] sm:$0xff] }
  0x40   : > { %877 = vst [vmem:[%s6863_s29 + $0x160] sm:$0xff] %v876_v44  ;;  %v968_v26 = vld [vmem:[%s6858_s28 + $0x5a0] sm:$0xff]  ;;  %v970_v27 = vld [vmem:[%s6858_s28 + $0x5b0] sm:$0xff] }
  0x41   : > { %879 = vst [vmem:[%s6863_s29 + $0x168] sm:$0xff] %v878_v45  ;;  %v972_v28 = vld [vmem:[%s6858_s28 + $0x5c0] sm:$0xff]  ;;  %v974_v29 = vld [vmem:[%s6858_s28 + $0x5d0] sm:$0xff] }
  0x42   : > { %881 = vst [vmem:[%s6863_s29 + $0x170] sm:$0xff] %v880_v46  ;;  %v976_v30 = vld [vmem:[%s6858_s28 + $0x5e0] sm:$0xff]  ;;  %v978_v31 = vld [vmem:[%s6858_s28 + $0x5f0] sm:$0xff] }
  0x43   : > { %883 = vst [vmem:[%s6863_s29 + $0x178] sm:$0xff] %v882_v47  ;;  %v980_v32 = vld [vmem:[%s6858_s28 + $0x600] sm:$0xff]  ;;  %v982_v33 = vld [vmem:[%s6858_s28 + $0x610] sm:$0xff] }
  0x44   : > { %885 = vst [vmem:[%s6863_s29 + $0x180] sm:$0xff] %v884_v48  ;;  %v984_v34 = vld [vmem:[%s6858_s28 + $0x620] sm:$0xff]  ;;  %v986_v35 = vld [vmem:[%s6858_s28 + $0x630] sm:$0xff] }
  0x45   : > { %887 = vst [vmem:[%s6863_s29 + $0x188] sm:$0xff] %v886_v49  ;;  %v988_v36 = vld [vmem:[%s6858_s28 + $0x640] sm:$0xff]  ;;  %v990_v37 = vld [vmem:[%s6858_s28 + $0x650] sm:$0xff] }
  0x46   : > { %889 = vst [vmem:[%s6863_s29 + $0x190] sm:$0xff] %v888_v50  ;;  %v992_v38 = vld [vmem:[%s6858_s28 + $0x660] sm:$0xff]  ;;  %v994_v39 = vld [vmem:[%s6858_s28 + $0x670] sm:$0xff] }
  0x47   : > { %891 = vst [vmem:[%s6863_s29 + $0x198] sm:$0xff] %v890_v51  ;;  %v996_v40 = vld [vmem:[%s6858_s28 + $0x680] sm:$0xff]  ;;  %v998_v41 = vld [vmem:[%s6858_s28 + $0x690] sm:$0xff] }
  0x48   : > { %893 = vst [vmem:[%s6863_s29 + $0x1a0] sm:$0xff] %v892_v52  ;;  %v1000_v42 = vld [vmem:[%s6858_s28 + $0x6a0] sm:$0xff]  ;;  %v1002_v43 = vld [vmem:[%s6858_s28 + $0x6b0] sm:$0xff] }
  0x49   : > { %895 = vst [vmem:[%s6863_s29 + $0x1a8] sm:$0xff] %v894_v53  ;;  %v1004_v44 = vld [vmem:[%s6858_s28 + $0x6c0] sm:$0xff]  ;;  %v1006_v45 = vld [vmem:[%s6858_s28 + $0x6d0] sm:$0xff] }
  0x4a   : > { %897 = vst [vmem:[%s6863_s29 + $0x1b0] sm:$0xff] %v896_v54  ;;  %v1008_v46 = vld [vmem:[%s6858_s28 + $0x6e0] sm:$0xff]  ;;  %v1010_v47 = vld [vmem:[%s6858_s28 + $0x6f0] sm:$0xff] }
  0x4b   : > { %899 = vst [vmem:[%s6863_s29 + $0x1b8] sm:$0xff] %v898_v55  ;;  %v1012_v48 = vld [vmem:[%s6858_s28 + $0x700] sm:$0xff]  ;;  %v1014_v49 = vld [vmem:[%s6858_s28 + $0x710] sm:$0xff] }
  0x4c   : > { %901 = vst [vmem:[%s6863_s29 + $0x1c0] sm:$0xff] %v900_v56  ;;  %v1016_v50 = vld [vmem:[%s6858_s28 + $0x720] sm:$0xff]  ;;  %v1018_v51 = vld [vmem:[%s6858_s28 + $0x730] sm:$0xff] }
  0x4d   : > { %903 = vst [vmem:[%s6863_s29 + $0x1c8] sm:$0xff] %v902_v57  ;;  %v1020_v52 = vld [vmem:[%s6858_s28 + $0x740] sm:$0xff]  ;;  %v1022_v53 = vld [vmem:[%s6858_s28 + $0x750] sm:$0xff] }
  0x4e   : > { %905 = vst [vmem:[%s6863_s29 + $0x1d0] sm:$0xff] %v904_v58  ;;  %v1024_v54 = vld [vmem:[%s6858_s28 + $0x760] sm:$0xff]  ;;  %v1026_v55 = vld [vmem:[%s6858_s28 + $0x770] sm:$0xff] }
  0x4f   : > { %907 = vst [vmem:[%s6863_s29 + $0x1d8] sm:$0xff] %v906_v59  ;;  %v1028_v56 = vld [vmem:[%s6858_s28 + $0x780] sm:$0xff]  ;;  %v1030_v57 = vld [vmem:[%s6858_s28 + $0x790] sm:$0xff] }
  0x50   : > { %909 = vst [vmem:[%s6863_s29 + $0x1e0] sm:$0xff] %v908_v60  ;;  %v1032_v58 = vld [vmem:[%s6858_s28 + $0x7a0] sm:$0xff]  ;;  %v1034_v59 = vld [vmem:[%s6858_s28 + $0x7b0] sm:$0xff] }
  0x51   : > { %911 = vst [vmem:[%s6863_s29 + $0x1e8] sm:$0xff] %v910_v61  ;;  %v1036_v60 = vld [vmem:[%s6858_s28 + $0x7c0] sm:$0xff]  ;;  %v1038_v61 = vld [vmem:[%s6858_s28 + $0x7d0] sm:$0xff] }
  0x52   : > { %913 = vst [vmem:[%s6863_s29 + $0x1f0] sm:$0xff] %v912_v62  ;;  %v1040_v62 = vld [vmem:[%s6858_s28 + $0x7e0] sm:$0xff] }
  0x53   : > { %915 = vst [vmem:[%s6863_s29 + $0x1f8] sm:$0xff] %v914_v63  ;;  %v1042_v63 = vld [vmem:[%s6858_s28 + $0x7f0] sm:$0xff] }
  0x54   : > { %917 = vst [vmem:[%s6863_s29 + $0x200] sm:$0xff] %v916_v0  ;;  %v1044_v0 = vld [vmem:[%s6858_s28 + $0x800] sm:$0xff] }
  0x55   : > { %919 = vst [vmem:[%s6863_s29 + $0x208] sm:$0xff] %v918_v1  ;;  %v1046_v1 = vld [vmem:[%s6858_s28 + $0x810] sm:$0xff] }
  0x56   : > { %921 = vst [vmem:[%s6863_s29 + $0x210] sm:$0xff] %v920_v2  ;;  %v1048_v2 = vld [vmem:[%s6858_s28 + $0x820] sm:$0xff] }
  0x57   : > { %923 = vst [vmem:[%s6863_s29 + $0x218] sm:$0xff] %v922_v3  ;;  %v1050_v3 = vld [vmem:[%s6858_s28 + $0x830] sm:$0xff] }
  0x58   : > { %925 = vst [vmem:[%s6863_s29 + $0x220] sm:$0xff] %v924_v4  ;;  %v1052_v4 = vld [vmem:[%s6858_s28 + $0x840] sm:$0xff] }
  0x59   : > { %927 = vst [vmem:[%s6863_s29 + $0x228] sm:$0xff] %v926_v5  ;;  %v1054_v5 = vld [vmem:[%s6858_s28 + $0x850] sm:$0xff] }
  0x5a   : > { %929 = vst [vmem:[%s6863_s29 + $0x230] sm:$0xff] %v928_v6  ;;  %v1056_v6 = vld [vmem:[%s6858_s28 + $0x860] sm:$0xff] }
  0x5b   : > { %931 = vst [vmem:[%s6863_s29 + $0x238] sm:$0xff] %v930_v7  ;;  %v1058_v7 = vld [vmem:[%s6858_s28 + $0x870] sm:$0xff] }
  0x5c   : > { %933 = vst [vmem:[%s6863_s29 + $0x240] sm:$0xff] %v932_v8  ;;  %v1060_v8 = vld [vmem:[%s6858_s28 + $0x880] sm:$0xff] }
  0x5d   : > { %935 = vst [vmem:[%s6863_s29 + $0x248] sm:$0xff] %v934_v9  ;;  %v1062_v9 = vld [vmem:[%s6858_s28 + $0x890] sm:$0xff] }
  0x5e   : > { %937 = vst [vmem:[%s6863_s29 + $0x250] sm:$0xff] %v936_v10  ;;  %v1064_v10 = vld [vmem:[%s6858_s28 + $0x8a0] sm:$0xff] }
  0x5f   : > { %939 = vst [vmem:[%s6863_s29 + $0x258] sm:$0xff] %v938_v11  ;;  %v1066_v11 = vld [vmem:[%s6858_s28 + $0x8b0] sm:$0xff] }
  0x60   : > { %941 = vst [vmem:[%s6863_s29 + $0x260] sm:$0xff] %v940_v12  ;;  %v1068_v12 = vld [vmem:[%s6858_s28 + $0x8c0] sm:$0xff] }
  0x61   : > { %943 = vst [vmem:[%s6863_s29 + $0x268] sm:$0xff] %v942_v13  ;;  %v1070_v13 = vld [vmem:[%s6858_s28 + $0x8d0] sm:$0xff] }
  0x62   : > { %945 = vst [vmem:[%s6863_s29 + $0x270] sm:$0xff] %v944_v14  ;;  %v1072_v14 = vld [vmem:[%s6858_s28 + $0x8e0] sm:$0xff] }
  0x63   : > { %947 = vst [vmem:[%s6863_s29 + $0x278] sm:$0xff] %v946_v15  ;;  %v1074_v15 = vld [vmem:[%s6858_s28 + $0x8f0] sm:$0xff] }
  0x64   : > { %949 = vst [vmem:[%s6863_s29 + $0x280] sm:$0xff] %v948_v16  ;;  %v1076_v16 = vld [vmem:[%s6858_s28 + $0x900] sm:$0xff] }
  0x65   : > { %951 = vst [vmem:[%s6863_s29 + $0x288] sm:$0xff] %v950_v17  ;;  %v1078_v17 = vld [vmem:[%s6858_s28 + $0x910] sm:$0xff] }
  0x66   : > { %953 = vst [vmem:[%s6863_s29 + $0x290] sm:$0xff] %v952_v18  ;;  %v1080_v18 = vld [vmem:[%s6858_s28 + $0x920] sm:$0xff] }
  0x67   : > { %955 = vst [vmem:[%s6863_s29 + $0x298] sm:$0xff] %v954_v19  ;;  %v1082_v19 = vld [vmem:[%s6858_s28 + $0x930] sm:$0xff] }
  0x68   : > { %957 = vst [vmem:[%s6863_s29 + $0x2a0] sm:$0xff] %v956_v20  ;;  %v1084_v20 = vld [vmem:[%s6858_s28 + $0x940] sm:$0xff] }
  0x69   : > { %959 = vst [vmem:[%s6863_s29 + $0x2a8] sm:$0xff] %v958_v21  ;;  %v1086_v21 = vld [vmem:[%s6858_s28 + $0x950] sm:$0xff] }
  0x6a   : > { %961 = vst [vmem:[%s6863_s29 + $0x2b0] sm:$0xff] %v960_v22  ;;  %v1088_v22 = vld [vmem:[%s6858_s28 + $0x960] sm:$0xff] }
  0x6b   : > { %963 = vst [vmem:[%s6863_s29 + $0x2b8] sm:$0xff] %v962_v23  ;;  %v1090_v23 = vld [vmem:[%s6858_s28 + $0x970] sm:$0xff] }
  0x6c   : > { %965 = vst [vmem:[%s6863_s29 + $0x2c0] sm:$0xff] %v964_v24  ;;  %v1092_v24 = vld [vmem:[%s6858_s28 + $0x980] sm:$0xff] }
  0x6d   : > { %967 = vst [vmem:[%s6863_s29 + $0x2c8] sm:$0xff] %v966_v25  ;;  %v1094_v25 = vld [vmem:[%s6858_s28 + $0x990] sm:$0xff] }
  0x6e   : > { %969 = vst [vmem:[%s6863_s29 + $0x2d0] sm:$0xff] %v968_v26  ;;  %v1096_v26 = vld [vmem:[%s6858_s28 + $0x9a0] sm:$0xff] }
  0x6f   : > { %971 = vst [vmem:[%s6863_s29 + $0x2d8] sm:$0xff] %v970_v27  ;;  %v1098_v27 = vld [vmem:[%s6858_s28 + $0x9b0] sm:$0xff] }
  0x70   : > { %973 = vst [vmem:[%s6863_s29 + $0x2e0] sm:$0xff] %v972_v28  ;;  %v1100_v28 = vld [vmem:[%s6858_s28 + $0x9c0] sm:$0xff] }
  0x71   : > { %975 = vst [vmem:[%s6863_s29 + $0x2e8] sm:$0xff] %v974_v29  ;;  %v1102_v29 = vld [vmem:[%s6858_s28 + $0x9d0] sm:$0xff] }
  0x72   : > { %977 = vst [vmem:[%s6863_s29 + $0x2f0] sm:$0xff] %v976_v30  ;;  %v1104_v30 = vld [vmem:[%s6858_s28 + $0x9e0] sm:$0xff] }
  0x73   : > { %979 = vst [vmem:[%s6863_s29 + $0x2f8] sm:$0xff] %v978_v31  ;;  %v1106_v31 = vld [vmem:[%s6858_s28 + $0x9f0] sm:$0xff] }
  0x74   : > { %981 = vst [vmem:[%s6863_s29 + $0x300] sm:$0xff] %v980_v32  ;;  %v1108_v32 = vld [vmem:[%s6858_s28 + $0xa00] sm:$0xff] }
  0x75   : > { %983 = vst [vmem:[%s6863_s29 + $0x308] sm:$0xff] %v982_v33  ;;  %v1110_v33 = vld [vmem:[%s6858_s28 + $0xa10] sm:$0xff] }
  0x76   : > { %985 = vst [vmem:[%s6863_s29 + $0x310] sm:$0xff] %v984_v34  ;;  %v1112_v34 = vld [vmem:[%s6858_s28 + $0xa20] sm:$0xff] }
  0x77   : > { %987 = vst [vmem:[%s6863_s29 + $0x318] sm:$0xff] %v986_v35  ;;  %v1114_v35 = vld [vmem:[%s6858_s28 + $0xa30] sm:$0xff] }
  0x78   : > { %989 = vst [vmem:[%s6863_s29 + $0x320] sm:$0xff] %v988_v36  ;;  %v1116_v36 = vld [vmem:[%s6858_s28 + $0xa40] sm:$0xff] }
  0x79   : > { %991 = vst [vmem:[%s6863_s29 + $0x328] sm:$0xff] %v990_v37  ;;  %v1118_v37 = vld [vmem:[%s6858_s28 + $0xa50] sm:$0xff] }
  0x7a   : > { %993 = vst [vmem:[%s6863_s29 + $0x330] sm:$0xff] %v992_v38  ;;  %v1120_v38 = vld [vmem:[%s6858_s28 + $0xa60] sm:$0xff] }
  0x7b   : > { %995 = vst [vmem:[%s6863_s29 + $0x338] sm:$0xff] %v994_v39  ;;  %v1122_v39 = vld [vmem:[%s6858_s28 + $0xa70] sm:$0xff] }
  0x7c   : > { %997 = vst [vmem:[%s6863_s29 + $0x340] sm:$0xff] %v996_v40  ;;  %v1124_v40 = vld [vmem:[%s6858_s28 + $0xa80] sm:$0xff] }
  0x7d   : > { %999 = vst [vmem:[%s6863_s29 + $0x348] sm:$0xff] %v998_v41  ;;  %v1126_v41 = vld [vmem:[%s6858_s28 + $0xa90] sm:$0xff] }
  0x7e   : > { %1001 = vst [vmem:[%s6863_s29 + $0x350] sm:$0xff] %v1000_v42  ;;  %v1128_v42 = vld [vmem:[%s6858_s28 + $0xaa0] sm:$0xff] }
  0x7f   : > { %1003 = vst [vmem:[%s6863_s29 + $0x358] sm:$0xff] %v1002_v43  ;;  %v1130_v43 = vld [vmem:[%s6858_s28 + $0xab0] sm:$0xff] }
  0x80   : > { %1005 = vst [vmem:[%s6863_s29 + $0x360] sm:$0xff] %v1004_v44  ;;  %v1132_v44 = vld [vmem:[%s6858_s28 + $0xac0] sm:$0xff] }
  0x81   : > { %1007 = vst [vmem:[%s6863_s29 + $0x368] sm:$0xff] %v1006_v45  ;;  %v1134_v45 = vld [vmem:[%s6858_s28 + $0xad0] sm:$0xff] }
  0x82   : > { %1009 = vst [vmem:[%s6863_s29 + $0x370] sm:$0xff] %v1008_v46  ;;  %v1136_v46 = vld [vmem:[%s6858_s28 + $0xae0] sm:$0xff] }
  0x83   : > { %1011 = vst [vmem:[%s6863_s29 + $0x378] sm:$0xff] %v1010_v47  ;;  %v1138_v47 = vld [vmem:[%s6858_s28 + $0xaf0] sm:$0xff] }
  0x84   : > { %1013 = vst [vmem:[%s6863_s29 + $0x380] sm:$0xff] %v1012_v48  ;;  %v1140_v48 = vld [vmem:[%s6858_s28 + $0xb00] sm:$0xff] }
  0x85   : > { %1015 = vst [vmem:[%s6863_s29 + $0x388] sm:$0xff] %v1014_v49  ;;  %v1142_v49 = vld [vmem:[%s6858_s28 + $0xb10] sm:$0xff] }
  0x86   : > { %1017 = vst [vmem:[%s6863_s29 + $0x390] sm:$0xff] %v1016_v50  ;;  %v1144_v50 = vld [vmem:[%s6858_s28 + $0xb20] sm:$0xff] }
  0x87   : > { %1019 = vst [vmem:[%s6863_s29 + $0x398] sm:$0xff] %v1018_v51  ;;  %v1146_v51 = vld [vmem:[%s6858_s28 + $0xb30] sm:$0xff] }
  0x88   : > { %1021 = vst [vmem:[%s6863_s29 + $0x3a0] sm:$0xff] %v1020_v52  ;;  %v1148_v52 = vld [vmem:[%s6858_s28 + $0xb40] sm:$0xff] }
  0x89   : > { %1023 = vst [vmem:[%s6863_s29 + $0x3a8] sm:$0xff] %v1022_v53  ;;  %v1150_v53 = vld [vmem:[%s6858_s28 + $0xb50] sm:$0xff] }
  0x8a   : > { %1025 = vst [vmem:[%s6863_s29 + $0x3b0] sm:$0xff] %v1024_v54  ;;  %v1152_v54 = vld [vmem:[%s6858_s28 + $0xb60] sm:$0xff] }
  0x8b   : > { %1027 = vst [vmem:[%s6863_s29 + $0x3b8] sm:$0xff] %v1026_v55  ;;  %v1154_v55 = vld [vmem:[%s6858_s28 + $0xb70] sm:$0xff] }
  0x8c   : > { %1029 = vst [vmem:[%s6863_s29 + $0x3c0] sm:$0xff] %v1028_v56  ;;  %v1156_v56 = vld [vmem:[%s6858_s28 + $0xb80] sm:$0xff] }
  0x8d   : > { %1031 = vst [vmem:[%s6863_s29 + $0x3c8] sm:$0xff] %v1030_v57  ;;  %v1158_v57 = vld [vmem:[%s6858_s28 + $0xb90] sm:$0xff] }
  0x8e   : > { %1033 = vst [vmem:[%s6863_s29 + $0x3d0] sm:$0xff] %v1032_v58  ;;  %v1160_v58 = vld [vmem:[%s6858_s28 + $0xba0] sm:$0xff] }
  0x8f   : > { %1035 = vst [vmem:[%s6863_s29 + $0x3d8] sm:$0xff] %v1034_v59  ;;  %v1162_v59 = vld [vmem:[%s6858_s28 + $0xbb0] sm:$0xff] }
  0x90   : > { %1037 = vst [vmem:[%s6863_s29 + $0x3e0] sm:$0xff] %v1036_v60  ;;  %v1164_v60 = vld [vmem:[%s6858_s28 + $0xbc0] sm:$0xff] }
  0x91   : > { %1039 = vst [vmem:[%s6863_s29 + $0x3e8] sm:$0xff] %v1038_v61  ;;  %v1166_v61 = vld [vmem:[%s6858_s28 + $0xbd0] sm:$0xff] }
  0x92   : > { %1041 = vst [vmem:[%s6863_s29 + $0x3f0] sm:$0xff] %v1040_v62  ;;  %v1168_v62 = vld [vmem:[%s6858_s28 + $0xbe0] sm:$0xff] }
  0x93   : > { %1043 = vst [vmem:[%s6863_s29 + $0x3f8] sm:$0xff] %v1042_v63  ;;  %v1170_v63 = vld [vmem:[%s6858_s28 + $0xbf0] sm:$0xff] }
  0x94   : > { %1045 = vst [vmem:[%s6863_s29 + $0x400] sm:$0xff] %v1044_v0  ;;  %v1172_v0 = vld [vmem:[%s6858_s28 + $0xc00] sm:$0xff] }
  0x95   : > { %1047 = vst [vmem:[%s6863_s29 + $0x408] sm:$0xff] %v1046_v1  ;;  %v1174_v1 = vld [vmem:[%s6858_s28 + $0xc10] sm:$0xff] }
  0x96   : > { %1049 = vst [vmem:[%s6863_s29 + $0x410] sm:$0xff] %v1048_v2  ;;  %v1176_v2 = vld [vmem:[%s6858_s28 + $0xc20] sm:$0xff] }
  0x97   : > { %1051 = vst [vmem:[%s6863_s29 + $0x418] sm:$0xff] %v1050_v3  ;;  %v1178_v3 = vld [vmem:[%s6858_s28 + $0xc30] sm:$0xff] }
  0x98   : > { %1053 = vst [vmem:[%s6863_s29 + $0x420] sm:$0xff] %v1052_v4  ;;  %v1180_v4 = vld [vmem:[%s6858_s28 + $0xc40] sm:$0xff] }
  0x99   : > { %1055 = vst [vmem:[%s6863_s29 + $0x428] sm:$0xff] %v1054_v5  ;;  %v1182_v5 = vld [vmem:[%s6858_s28 + $0xc50] sm:$0xff] }
  0x9a   : > { %1057 = vst [vmem:[%s6863_s29 + $0x430] sm:$0xff] %v1056_v6  ;;  %v1184_v6 = vld [vmem:[%s6858_s28 + $0xc60] sm:$0xff] }
  0x9b   : > { %1059 = vst [vmem:[%s6863_s29 + $0x438] sm:$0xff] %v1058_v7  ;;  %v1186_v7 = vld [vmem:[%s6858_s28 + $0xc70] sm:$0xff] }
  0x9c   : > { %1061 = vst [vmem:[%s6863_s29 + $0x440] sm:$0xff] %v1060_v8  ;;  %v1188_v8 = vld [vmem:[%s6858_s28 + $0xc80] sm:$0xff] }
  0x9d   : > { %1063 = vst [vmem:[%s6863_s29 + $0x448] sm:$0xff] %v1062_v9  ;;  %v1190_v9 = vld [vmem:[%s6858_s28 + $0xc90] sm:$0xff] }
  0x9e   : > { %1065 = vst [vmem:[%s6863_s29 + $0x450] sm:$0xff] %v1064_v10  ;;  %v1192_v10 = vld [vmem:[%s6858_s28 + $0xca0] sm:$0xff] }
  0x9f   : > { %1067 = vst [vmem:[%s6863_s29 + $0x458] sm:$0xff] %v1066_v11  ;;  %v1194_v11 = vld [vmem:[%s6858_s28 + $0xcb0] sm:$0xff] }
  0xa0   : > { %1069 = vst [vmem:[%s6863_s29 + $0x460] sm:$0xff] %v1068_v12  ;;  %v1196_v12 = vld [vmem:[%s6858_s28 + $0xcc0] sm:$0xff] }
  0xa1   : > { %1071 = vst [vmem:[%s6863_s29 + $0x468] sm:$0xff] %v1070_v13  ;;  %v1198_v13 = vld [vmem:[%s6858_s28 + $0xcd0] sm:$0xff] }
  0xa2   : > { %1073 = vst [vmem:[%s6863_s29 + $0x470] sm:$0xff] %v1072_v14  ;;  %v1200_v14 = vld [vmem:[%s6858_s28 + $0xce0] sm:$0xff] }
  0xa3   : > { %1075 = vst [vmem:[%s6863_s29 + $0x478] sm:$0xff] %v1074_v15  ;;  %v1202_v15 = vld [vmem:[%s6858_s28 + $0xcf0] sm:$0xff] }
  0xa4   : > { %1077 = vst [vmem:[%s6863_s29 + $0x480] sm:$0xff] %v1076_v16  ;;  %v1204_v16 = vld [vmem:[%s6858_s28 + $0xd00] sm:$0xff] }
  0xa5   : > { %1079 = vst [vmem:[%s6863_s29 + $0x488] sm:$0xff] %v1078_v17  ;;  %v1206_v17 = vld [vmem:[%s6858_s28 + $0xd10] sm:$0xff] }
  0xa6   : > { %1081 = vst [vmem:[%s6863_s29 + $0x490] sm:$0xff] %v1080_v18  ;;  %v1208_v18 = vld [vmem:[%s6858_s28 + $0xd20] sm:$0xff] }
  0xa7   : > { %1083 = vst [vmem:[%s6863_s29 + $0x498] sm:$0xff] %v1082_v19  ;;  %v1210_v19 = vld [vmem:[%s6858_s28 + $0xd30] sm:$0xff] }
  0xa8   : > { %1085 = vst [vmem:[%s6863_s29 + $0x4a0] sm:$0xff] %v1084_v20  ;;  %v1212_v20 = vld [vmem:[%s6858_s28 + $0xd40] sm:$0xff] }
  0xa9   : > { %1087 = vst [vmem:[%s6863_s29 + $0x4a8] sm:$0xff] %v1086_v21  ;;  %v1214_v21 = vld [vmem:[%s6858_s28 + $0xd50] sm:$0xff] }
  0xaa   : > { %1089 = vst [vmem:[%s6863_s29 + $0x4b0] sm:$0xff] %v1088_v22  ;;  %v1216_v22 = vld [vmem:[%s6858_s28 + $0xd60] sm:$0xff] }
  0xab   : > { %1091 = vst [vmem:[%s6863_s29 + $0x4b8] sm:$0xff] %v1090_v23  ;;  %v1218_v23 = vld [vmem:[%s6858_s28 + $0xd70] sm:$0xff] }
  0xac   : > { %1093 = vst [vmem:[%s6863_s29 + $0x4c0] sm:$0xff] %v1092_v24  ;;  %v1220_v24 = vld [vmem:[%s6858_s28 + $0xd80] sm:$0xff] }
  0xad   : > { %1095 = vst [vmem:[%s6863_s29 + $0x4c8] sm:$0xff] %v1094_v25  ;;  %v1222_v25 = vld [vmem:[%s6858_s28 + $0xd90] sm:$0xff] }
  0xae   : > { %1097 = vst [vmem:[%s6863_s29 + $0x4d0] sm:$0xff] %v1096_v26  ;;  %v1224_v26 = vld [vmem:[%s6858_s28 + $0xda0] sm:$0xff] }
  0xaf   : > { %1099 = vst [vmem:[%s6863_s29 + $0x4d8] sm:$0xff] %v1098_v27  ;;  %v1226_v27 = vld [vmem:[%s6858_s28 + $0xdb0] sm:$0xff] }
  0xb0   : > { %1101 = vst [vmem:[%s6863_s29 + $0x4e0] sm:$0xff] %v1100_v28  ;;  %v1228_v28 = vld [vmem:[%s6858_s28 + $0xdc0] sm:$0xff] }
  0xb1   : > { %1103 = vst [vmem:[%s6863_s29 + $0x4e8] sm:$0xff] %v1102_v29  ;;  %v1230_v29 = vld [vmem:[%s6858_s28 + $0xdd0] sm:$0xff] }
  0xb2   : > { %1105 = vst [vmem:[%s6863_s29 + $0x4f0] sm:$0xff] %v1104_v30  ;;  %v1232_v30 = vld [vmem:[%s6858_s28 + $0xde0] sm:$0xff] }
  0xb3   : > { %1107 = vst [vmem:[%s6863_s29 + $0x4f8] sm:$0xff] %v1106_v31  ;;  %v1234_v31 = vld [vmem:[%s6858_s28 + $0xdf0] sm:$0xff] }
  0xb4   : > { %1109 = vst [vmem:[%s6863_s29 + $0x500] sm:$0xff] %v1108_v32  ;;  %v1236_v32 = vld [vmem:[%s6858_s28 + $0xe00] sm:$0xff] }
  0xb5   : > { %1111 = vst [vmem:[%s6863_s29 + $0x508] sm:$0xff] %v1110_v33  ;;  %v1238_v33 = vld [vmem:[%s6858_s28 + $0xe10] sm:$0xff] }
  0xb6   : > { %1113 = vst [vmem:[%s6863_s29 + $0x510] sm:$0xff] %v1112_v34  ;;  %v1240_v34 = vld [vmem:[%s6858_s28 + $0xe20] sm:$0xff] }
  0xb7   : > { %1115 = vst [vmem:[%s6863_s29 + $0x518] sm:$0xff] %v1114_v35  ;;  %v1242_v35 = vld [vmem:[%s6858_s28 + $0xe30] sm:$0xff] }
  0xb8   : > { %1117 = vst [vmem:[%s6863_s29 + $0x520] sm:$0xff] %v1116_v36  ;;  %v1244_v36 = vld [vmem:[%s6858_s28 + $0xe40] sm:$0xff] }
  0xb9   : > { %1119 = vst [vmem:[%s6863_s29 + $0x528] sm:$0xff] %v1118_v37  ;;  %v1246_v37 = vld [vmem:[%s6858_s28 + $0xe50] sm:$0xff] }
  0xba   : > { %1121 = vst [vmem:[%s6863_s29 + $0x530] sm:$0xff] %v1120_v38  ;;  %v1248_v38 = vld [vmem:[%s6858_s28 + $0xe60] sm:$0xff] }
  0xbb   : > { %1123 = vst [vmem:[%s6863_s29 + $0x538] sm:$0xff] %v1122_v39  ;;  %v1250_v39 = vld [vmem:[%s6858_s28 + $0xe70] sm:$0xff] }
  0xbc   : > { %1125 = vst [vmem:[%s6863_s29 + $0x540] sm:$0xff] %v1124_v40  ;;  %v1252_v40 = vld [vmem:[%s6858_s28 + $0xe80] sm:$0xff] }
  0xbd   : > { %1127 = vst [vmem:[%s6863_s29 + $0x548] sm:$0xff] %v1126_v41  ;;  %v1254_v41 = vld [vmem:[%s6858_s28 + $0xe90] sm:$0xff] }
  0xbe   : > { %1129 = vst [vmem:[%s6863_s29 + $0x550] sm:$0xff] %v1128_v42  ;;  %v1256_v42 = vld [vmem:[%s6858_s28 + $0xea0] sm:$0xff] }
  0xbf   : > { %1131 = vst [vmem:[%s6863_s29 + $0x558] sm:$0xff] %v1130_v43  ;;  %v1258_v43 = vld [vmem:[%s6858_s28 + $0xeb0] sm:$0xff] }
  0xc0   : > { %1133 = vst [vmem:[%s6863_s29 + $0x560] sm:$0xff] %v1132_v44  ;;  %v1260_v44 = vld [vmem:[%s6858_s28 + $0xec0] sm:$0xff] }
  0xc1   : > { %1135 = vst [vmem:[%s6863_s29 + $0x568] sm:$0xff] %v1134_v45  ;;  %v1262_v45 = vld [vmem:[%s6858_s28 + $0xed0] sm:$0xff] }
  0xc2   : > { %1137 = vst [vmem:[%s6863_s29 + $0x570] sm:$0xff] %v1136_v46  ;;  %v1264_v46 = vld [vmem:[%s6858_s28 + $0xee0] sm:$0xff] }
  0xc3   : > { %1139 = vst [vmem:[%s6863_s29 + $0x578] sm:$0xff] %v1138_v47  ;;  %v1266_v47 = vld [vmem:[%s6858_s28 + $0xef0] sm:$0xff] }
  0xc4   : > { %1141 = vst [vmem:[%s6863_s29 + $0x580] sm:$0xff] %v1140_v48  ;;  %v1268_v48 = vld [vmem:[%s6858_s28 + $0xf00] sm:$0xff] }
  0xc5   : > { %1143 = vst [vmem:[%s6863_s29 + $0x588] sm:$0xff] %v1142_v49  ;;  %v1270_v49 = vld [vmem:[%s6858_s28 + $0xf10] sm:$0xff] }
  0xc6   : > { %1145 = vst [vmem:[%s6863_s29 + $0x590] sm:$0xff] %v1144_v50  ;;  %v1272_v50 = vld [vmem:[%s6858_s28 + $0xf20] sm:$0xff] }
  0xc7   : > { %1147 = vst [vmem:[%s6863_s29 + $0x598] sm:$0xff] %v1146_v51  ;;  %v1274_v51 = vld [vmem:[%s6858_s28 + $0xf30] sm:$0xff] }
  0xc8   : > { %1149 = vst [vmem:[%s6863_s29 + $0x5a0] sm:$0xff] %v1148_v52  ;;  %v1276_v52 = vld [vmem:[%s6858_s28 + $0xf40] sm:$0xff] }
  0xc9   : > { %1151 = vst [vmem:[%s6863_s29 + $0x5a8] sm:$0xff] %v1150_v53  ;;  %v1278_v53 = vld [vmem:[%s6858_s28 + $0xf50] sm:$0xff] }
  0xca   : > { %1153 = vst [vmem:[%s6863_s29 + $0x5b0] sm:$0xff] %v1152_v54  ;;  %v1280_v54 = vld [vmem:[%s6858_s28 + $0xf60] sm:$0xff] }
  0xcb   : > { %1155 = vst [vmem:[%s6863_s29 + $0x5b8] sm:$0xff] %v1154_v55  ;;  %v1282_v55 = vld [vmem:[%s6858_s28 + $0xf70] sm:$0xff] }
  0xcc   : > { %1157 = vst [vmem:[%s6863_s29 + $0x5c0] sm:$0xff] %v1156_v56  ;;  %v1284_v56 = vld [vmem:[%s6858_s28 + $0xf80] sm:$0xff] }
  0xcd   : > { %1159 = vst [vmem:[%s6863_s29 + $0x5c8] sm:$0xff] %v1158_v57  ;;  %v1286_v57 = vld [vmem:[%s6858_s28 + $0xf90] sm:$0xff] }
  0xce   : > { %1161 = vst [vmem:[%s6863_s29 + $0x5d0] sm:$0xff] %v1160_v58  ;;  %v1288_v58 = vld [vmem:[%s6858_s28 + $0xfa0] sm:$0xff] }
  0xcf   : > { %1163 = vst [vmem:[%s6863_s29 + $0x5d8] sm:$0xff] %v1162_v59  ;;  %v1290_v59 = vld [vmem:[%s6858_s28 + $0xfb0] sm:$0xff] }
  0xd0   : > { %1165 = vst [vmem:[%s6863_s29 + $0x5e0] sm:$0xff] %v1164_v60  ;;  %v1292_v60 = vld [vmem:[%s6858_s28 + $0xfc0] sm:$0xff] }
  0xd1   : > { %1167 = vst [vmem:[%s6863_s29 + $0x5e8] sm:$0xff] %v1166_v61  ;;  %v1294_v61 = vld [vmem:[%s6858_s28 + $0xfd0] sm:$0xff] }
  0xd2   : > { %1169 = vst [vmem:[%s6863_s29 + $0x5f0] sm:$0xff] %v1168_v62  ;;  %v1296_v62 = vld [vmem:[%s6858_s28 + $0xfe0] sm:$0xff] }
  0xd3   : > { %1171 = vst [vmem:[%s6863_s29 + $0x5f8] sm:$0xff] %v1170_v63  ;;  %v1298_v63 = vld [vmem:[%s6858_s28 + $0xff0] sm:$0xff] }
  0xd4   : > { %1173 = vst [vmem:[%s6863_s29 + $0x600] sm:$0xff] %v1172_v0  ;;  %v1300_v0 = vld [vmem:[%s6858_s28 + $0x1000] sm:$0xff] }
  0xd5   : > { %1175 = vst [vmem:[%s6863_s29 + $0x608] sm:$0xff] %v1174_v1  ;;  %v1302_v1 = vld [vmem:[%s6858_s28 + $0x1010] sm:$0xff] }
  0xd6   : > { %1177 = vst [vmem:[%s6863_s29 + $0x610] sm:$0xff] %v1176_v2  ;;  %v1304_v2 = vld [vmem:[%s6858_s28 + $0x1020] sm:$0xff] }
  0xd7   : > { %1179 = vst [vmem:[%s6863_s29 + $0x618] sm:$0xff] %v1178_v3  ;;  %v1306_v3 = vld [vmem:[%s6858_s28 + $0x1030] sm:$0xff] }
  0xd8   : > { %1181 = vst [vmem:[%s6863_s29 + $0x620] sm:$0xff] %v1180_v4  ;;  %v1308_v4 = vld [vmem:[%s6858_s28 + $0x1040] sm:$0xff] }
  0xd9   : > { %1183 = vst [vmem:[%s6863_s29 + $0x628] sm:$0xff] %v1182_v5  ;;  %v1310_v5 = vld [vmem:[%s6858_s28 + $0x1050] sm:$0xff] }
  0xda   : > { %1185 = vst [vmem:[%s6863_s29 + $0x630] sm:$0xff] %v1184_v6  ;;  %v1312_v6 = vld [vmem:[%s6858_s28 + $0x1060] sm:$0xff] }
  0xdb   : > { %1187 = vst [vmem:[%s6863_s29 + $0x638] sm:$0xff] %v1186_v7  ;;  %v1314_v7 = vld [vmem:[%s6858_s28 + $0x1070] sm:$0xff] }
  0xdc   : > { %1189 = vst [vmem:[%s6863_s29 + $0x640] sm:$0xff] %v1188_v8  ;;  %v1316_v8 = vld [vmem:[%s6858_s28 + $0x1080] sm:$0xff] }
  0xdd   : > { %1191 = vst [vmem:[%s6863_s29 + $0x648] sm:$0xff] %v1190_v9  ;;  %v1318_v9 = vld [vmem:[%s6858_s28 + $0x1090] sm:$0xff] }
  0xde   : > { %1193 = vst [vmem:[%s6863_s29 + $0x650] sm:$0xff] %v1192_v10  ;;  %v1320_v10 = vld [vmem:[%s6858_s28 + $0x10a0] sm:$0xff] }
  0xdf   : > { %1195 = vst [vmem:[%s6863_s29 + $0x658] sm:$0xff] %v1194_v11  ;;  %v1322_v11 = vld [vmem:[%s6858_s28 + $0x10b0] sm:$0xff] }
  0xe0   : > { %1197 = vst [vmem:[%s6863_s29 + $0x660] sm:$0xff] %v1196_v12  ;;  %v1324_v12 = vld [vmem:[%s6858_s28 + $0x10c0] sm:$0xff] }
  0xe1   : > { %1199 = vst [vmem:[%s6863_s29 + $0x668] sm:$0xff] %v1198_v13  ;;  %v1326_v13 = vld [vmem:[%s6858_s28 + $0x10d0] sm:$0xff] }
  0xe2   : > { %1201 = vst [vmem:[%s6863_s29 + $0x670] sm:$0xff] %v1200_v14  ;;  %v1328_v14 = vld [vmem:[%s6858_s28 + $0x10e0] sm:$0xff] }
  0xe3   : > { %1203 = vst [vmem:[%s6863_s29 + $0x678] sm:$0xff] %v1202_v15  ;;  %v1330_v15 = vld [vmem:[%s6858_s28 + $0x10f0] sm:$0xff] }
  0xe4   : > { %1205 = vst [vmem:[%s6863_s29 + $0x680] sm:$0xff] %v1204_v16  ;;  %v1332_v16 = vld [vmem:[%s6858_s28 + $0x1100] sm:$0xff] }
  0xe5   : > { %1207 = vst [vmem:[%s6863_s29 + $0x688] sm:$0xff] %v1206_v17  ;;  %v1334_v17 = vld [vmem:[%s6858_s28 + $0x1110] sm:$0xff] }
  0xe6   : > { %1209 = vst [vmem:[%s6863_s29 + $0x690] sm:$0xff] %v1208_v18  ;;  %v1336_v18 = vld [vmem:[%s6858_s28 + $0x1120] sm:$0xff] }
  0xe7   : > { %1211 = vst [vmem:[%s6863_s29 + $0x698] sm:$0xff] %v1210_v19  ;;  %v1338_v19 = vld [vmem:[%s6858_s28 + $0x1130] sm:$0xff] }
  0xe8   : > { %1213 = vst [vmem:[%s6863_s29 + $0x6a0] sm:$0xff] %v1212_v20  ;;  %v1340_v20 = vld [vmem:[%s6858_s28 + $0x1140] sm:$0xff] }
  0xe9   : > { %1215 = vst [vmem:[%s6863_s29 + $0x6a8] sm:$0xff] %v1214_v21  ;;  %v1342_v21 = vld [vmem:[%s6858_s28 + $0x1150] sm:$0xff] }
  0xea   : > { %1217 = vst [vmem:[%s6863_s29 + $0x6b0] sm:$0xff] %v1216_v22  ;;  %v1344_v22 = vld [vmem:[%s6858_s28 + $0x1160] sm:$0xff] }
  0xeb   : > { %1219 = vst [vmem:[%s6863_s29 + $0x6b8] sm:$0xff] %v1218_v23  ;;  %v1346_v23 = vld [vmem:[%s6858_s28 + $0x1170] sm:$0xff] }
  0xec   : > { %1221 = vst [vmem:[%s6863_s29 + $0x6c0] sm:$0xff] %v1220_v24  ;;  %v1348_v24 = vld [vmem:[%s6858_s28 + $0x1180] sm:$0xff] }
  0xed   : > { %1223 = vst [vmem:[%s6863_s29 + $0x6c8] sm:$0xff] %v1222_v25  ;;  %v1350_v25 = vld [vmem:[%s6858_s28 + $0x1190] sm:$0xff] }
  0xee   : > { %1225 = vst [vmem:[%s6863_s29 + $0x6d0] sm:$0xff] %v1224_v26  ;;  %v1352_v26 = vld [vmem:[%s6858_s28 + $0x11a0] sm:$0xff] }
  0xef   : > { %1227 = vst [vmem:[%s6863_s29 + $0x6d8] sm:$0xff] %v1226_v27  ;;  %v1354_v27 = vld [vmem:[%s6858_s28 + $0x11b0] sm:$0xff] }
  0xf0   : > { %1229 = vst [vmem:[%s6863_s29 + $0x6e0] sm:$0xff] %v1228_v28  ;;  %v1356_v28 = vld [vmem:[%s6858_s28 + $0x11c0] sm:$0xff] }
  0xf1   : > { %1231 = vst [vmem:[%s6863_s29 + $0x6e8] sm:$0xff] %v1230_v29  ;;  %v1358_v29 = vld [vmem:[%s6858_s28 + $0x11d0] sm:$0xff] }
  0xf2   : > { %1233 = vst [vmem:[%s6863_s29 + $0x6f0] sm:$0xff] %v1232_v30  ;;  %v1360_v30 = vld [vmem:[%s6858_s28 + $0x11e0] sm:$0xff] }
  0xf3   : > { %1235 = vst [vmem:[%s6863_s29 + $0x6f8] sm:$0xff] %v1234_v31  ;;  %v1362_v31 = vld [vmem:[%s6858_s28 + $0x11f0] sm:$0xff] }
  0xf4   : > { %1237 = vst [vmem:[%s6863_s29 + $0x700] sm:$0xff] %v1236_v32 }
  0xf5   : > { %1239 = vst [vmem:[%s6863_s29 + $0x708] sm:$0xff] %v1238_v33 }
  0xf6   : > { %1241 = vst [vmem:[%s6863_s29 + $0x710] sm:$0xff] %v1240_v34 }
  0xf7   : > { %1243 = vst [vmem:[%s6863_s29 + $0x718] sm:$0xff] %v1242_v35 }
  0xf8   : > { %1245 = vst [vmem:[%s6863_s29 + $0x720] sm:$0xff] %v1244_v36 }
  0xf9   : > { %1247 = vst [vmem:[%s6863_s29 + $0x728] sm:$0xff] %v1246_v37 }
  0xfa   : > { %1249 = vst [vmem:[%s6863_s29 + $0x730] sm:$0xff] %v1248_v38 }
  0xfb   : > { %1251 = vst [vmem:[%s6863_s29 + $0x738] sm:$0xff] %v1250_v39 }
  0xfc   : > { %1253 = vst [vmem:[%s6863_s29 + $0x740] sm:$0xff] %v1252_v40 }
  0xfd   : > { %1255 = vst [vmem:[%s6863_s29 + $0x748] sm:$0xff] %v1254_v41 }
  0xfe   : > { %1257 = vst [vmem:[%s6863_s29 + $0x750] sm:$0xff] %v1256_v42 }
  0xff   : > { %1259 = vst [vmem:[%s6863_s29 + $0x758] sm:$0xff] %v1258_v43 }
 0x100   : > { %1261 = vst [vmem:[%s6863_s29 + $0x760] sm:$0xff] %v1260_v44 }
 0x101   : > { %1263 = vst [vmem:[%s6863_s29 + $0x768] sm:$0xff] %v1262_v45 }
 0x102   : > { %1265 = vst [vmem:[%s6863_s29 + $0x770] sm:$0xff] %v1264_v46 }
 0x103   : > { %1267 = vst [vmem:[%s6863_s29 + $0x778] sm:$0xff] %v1266_v47 }
 0x104   : > { %1269 = vst [vmem:[%s6863_s29 + $0x780] sm:$0xff] %v1268_v48 }
 0x105   : > { %1271 = vst [vmem:[%s6863_s29 + $0x788] sm:$0xff] %v1270_v49 }
 0x106   : > { %1273 = vst [vmem:[%s6863_s29 + $0x790] sm:$0xff] %v1272_v50 }
 0x107   : > { %1275 = vst [vmem:[%s6863_s29 + $0x798] sm:$0xff] %v1274_v51 }
 0x108   : > { %1277 = vst [vmem:[%s6863_s29 + $0x7a0] sm:$0xff] %v1276_v52 }
 0x109   : > { %1279 = vst [vmem:[%s6863_s29 + $0x7a8] sm:$0xff] %v1278_v53 }
 0x10a   : > { %1281 = vst [vmem:[%s6863_s29 + $0x7b0] sm:$0xff] %v1280_v54 }
 0x10b   : > { %1283 = vst [vmem:[%s6863_s29 + $0x7b8] sm:$0xff] %v1282_v55 }
 0x10c   : > { %1285 = vst [vmem:[%s6863_s29 + $0x7c0] sm:$0xff] %v1284_v56 }
 0x10d   : > { %1287 = vst [vmem:[%s6863_s29 + $0x7c8] sm:$0xff] %v1286_v57 }
 0x10e   : > { %1289 = vst [vmem:[%s6863_s29 + $0x7d0] sm:$0xff] %v1288_v58 }
 0x10f   : > { %1291 = vst [vmem:[%s6863_s29 + $0x7d8] sm:$0xff] %v1290_v59 }
 0x110   : > { %1293 = vst [vmem:[%s6863_s29 + $0x7e0] sm:$0xff] %v1292_v60 }
 0x111   : > { %1295 = vst [vmem:[%s6863_s29 + $0x7e8] sm:$0xff] %v1294_v61 }
 0x112   : > { %1297 = vst [vmem:[%s6863_s29 + $0x7f0] sm:$0xff] %v1296_v62 }
 0x113   : > { %1299 = vst [vmem:[%s6863_s29 + $0x7f8] sm:$0xff] %v1298_v63 }
 0x114   : > { %1301 = vst [vmem:[%s6863_s29 + $0x800] sm:$0xff] %v1300_v0 }
 0x115   : > { %1303 = vst [vmem:[%s6863_s29 + $0x808] sm:$0xff] %v1302_v1 }
 0x116   : > { %1305 = vst [vmem:[%s6863_s29 + $0x810] sm:$0xff] %v1304_v2 }
 0x117   : > { %1307 = vst [vmem:[%s6863_s29 + $0x818] sm:$0xff] %v1306_v3 }
 0x118   : > { %1309 = vst [vmem:[%s6863_s29 + $0x820] sm:$0xff] %v1308_v4 }
 0x119   : > { %1311 = vst [vmem:[%s6863_s29 + $0x828] sm:$0xff] %v1310_v5 }
 0x11a   : > { %1313 = vst [vmem:[%s6863_s29 + $0x830] sm:$0xff] %v1312_v6 }
 0x11b   : > { %1315 = vst [vmem:[%s6863_s29 + $0x838] sm:$0xff] %v1314_v7 }
 0x11c   : > { %1317 = vst [vmem:[%s6863_s29 + $0x840] sm:$0xff] %v1316_v8 }
 0x11d   : > { %1319 = vst [vmem:[%s6863_s29 + $0x848] sm:$0xff] %v1318_v9 }
 0x11e   : > { %1321 = vst [vmem:[%s6863_s29 + $0x850] sm:$0xff] %v1320_v10 }
 0x11f   : > { %1323 = vst [vmem:[%s6863_s29 + $0x858] sm:$0xff] %v1322_v11 }
 0x120   : > { %1325 = vst [vmem:[%s6863_s29 + $0x860] sm:$0xff] %v1324_v12 }
 0x121   : > { %1327 = vst [vmem:[%s6863_s29 + $0x868] sm:$0xff] %v1326_v13 }
 0x122   : > { %1329 = vst [vmem:[%s6863_s29 + $0x870] sm:$0xff] %v1328_v14 }
 0x123   : > { %1331 = vst [vmem:[%s6863_s29 + $0x878] sm:$0xff] %v1330_v15 }
 0x124   : > { %1333 = vst [vmem:[%s6863_s29 + $0x880] sm:$0xff] %v1332_v16 }
 0x125   : > { %1335 = vst [vmem:[%s6863_s29 + $0x888] sm:$0xff] %v1334_v17 }
 0x126   : > { %1337 = vst [vmem:[%s6863_s29 + $0x890] sm:$0xff] %v1336_v18 }
 0x127   : > { %1339 = vst [vmem:[%s6863_s29 + $0x898] sm:$0xff] %v1338_v19 }
 0x128   : > { %1341 = vst [vmem:[%s6863_s29 + $0x8a0] sm:$0xff] %v1340_v20 }
 0x129   : > { %1343 = vst [vmem:[%s6863_s29 + $0x8a8] sm:$0xff] %v1342_v21 }
 0x12a   : > { %1345 = vst [vmem:[%s6863_s29 + $0x8b0] sm:$0xff] %v1344_v22 }
 0x12b   : > { %1347 = vst [vmem:[%s6863_s29 + $0x8b8] sm:$0xff] %v1346_v23 }
 0x12c   : > { %1349 = vst [vmem:[%s6863_s29 + $0x8c0] sm:$0xff] %v1348_v24 }
 0x12d   : > { %1351 = vst [vmem:[%s6863_s29 + $0x8c8] sm:$0xff] %v1350_v25 }
 0x12e   : > { %1353 = vst [vmem:[%s6863_s29 + $0x8d0] sm:$0xff] %v1352_v26 }
 0x12f   : > { %1355 = vst [vmem:[%s6863_s29 + $0x8d8] sm:$0xff] %v1354_v27 }
 0x130   : > { %1357 = vst [vmem:[%s6863_s29 + $0x8e0] sm:$0xff] %v1356_v28 }
 0x131   : > { %1359 = vst [vmem:[%s6863_s29 + $0x8e8] sm:$0xff] %v1358_v29 }
 0x132   : > { %1361 = vst [vmem:[%s6863_s29 + $0x8f0] sm:$0xff] %v1360_v30 }
 0x133   : > { %1363 = vst [vmem:[%s6863_s29 + $0x8f8] sm:$0xff] %v1362_v31 }
 0x134 PF: > { %p5168_p8 = scmp.ge.s32.totalorder %s6788_s16, 1  ;;  %p2563_p9 = scmp.lt.s32.totalorder %s6788_s16, 3 }
 0x136   : > { %p2564_p10 = pnand %p5168_p8, %p2563_p9 }
 0x137   : > { %s2570_s30 = sand.u32 (!%p2564_p10), 1, %s6772_s12   ;;  %s5170_s10 = sshll.u32 (!%p2564_p10), %s6780_s14, 1 }
 0x138   : > { %2567 = sbr.rel (%p2564_p10) target bundleno = 766 (0x2fe), region = 80  ;;  %p2621_p11 = scmp.lt.s32.totalorder (!%p2564_p10), %s5170_s10, 3 }
 0x139   : > { %s6709_s4 = smul.u32 (!%p2564_p10), 2304, %s2570_s30  ;;  %s5169_s19 = sshll.u32 (!%p2564_p10), %s2570_s30, 5 }
 0x13a   : > { %s8271_s20 = scalar_lea.vmem (!%p2564_p10), [#allocation4], %s5169_s19 }
 0x13b   : > { %s7443_s5 = scalar_lea.vmem (!%p2564_p10), [#allocation3], %s6709_s4 }
 0x13d   : > { %v5301_v32 = vld [vmem:[%s7443_s5 + $0x70] sm:$0xf]  ;;  %v6434_v33 = vld [vmem:[%s7443_s5 + $0x74] sm:$0xf0]  ;;  %v5293_v43 = vld [vmem:[%s7443_s5 + $0x60] sm:$0xf] }
 0x13e   : > { %v5365_v34 = vld [vmem:[%s7443_s5 + $0xf0] sm:$0xf]  ;;  %v5302_v35 = vor.u32 %v6434_v33, %v5301_v32  ;;  %v6450_v36 = vld [vmem:[%s7443_s5 + $0xf4] sm:$0xf0]  ;;  %v6432_v45 = vld [vmem:[%s7443_s5 + $0x64] sm:$0xf0] }
 0x13f   : > { %v5429_v37 = vld [vmem:[%s7443_s5 + $0x170] sm:$0xf]  ;;  %v6466_v38 = vld [vmem:[%s7443_s5 + $0x174] sm:$0xf0]  ;;  %v5366_v39 = vor.u32 %v6450_v36, %v5365_v34  ;;  %v5357_v46 = vld [vmem:[%s7443_s5 + $0xe0] sm:$0xf]  ;;  %v5294_v48 = vor.u32 %v6432_v45, %v5293_v43 }
 0x140   : > { %v5430_v40 = vor.u32 %v6466_v38, %v5429_v37  ;;  %v5493_v41 = vld [vmem:[%s7443_s5 + $0x1f0] sm:$0xf]  ;;  %v6482_v42 = vld [vmem:[%s7443_s5 + $0x1f4] sm:$0xf0]  ;;  %4475 = vmatpush.bf16.msra.mxu0 %v5302_v35  ;;  %v6448_v47 = vld [vmem:[%s7443_s5 + $0xe4] sm:$0xf0] }
 0x141   : > { %v5494_v44 = vor.u32 %v6482_v42, %v5493_v41  ;;  %4489 = vmatpush.bf16.msra.mxu1 %v5366_v39  ;;  %v5358_v49 = vor.u32 %v6448_v47, %v5357_v46  ;;  %v5421_v50 = vld [vmem:[%s7443_s5 + $0x160] sm:$0xf]  ;;  %v6464_v51 = vld [vmem:[%s7443_s5 + $0x164] sm:$0xf0]  ;;  %v5285_v55 = vld [vmem:[%s7443_s5 + $0x50] sm:$0xf] }
 0x142   : > { %4503 = vmatpush.bf16.msra.mxu2 %v5430_v40  ;;  %v5485_v52 = vld [vmem:[%s7443_s5 + $0x1e0] sm:$0xf]  ;;  %v5422_v53 = vor.u32 %v6464_v51, %v5421_v50  ;;  %v6480_v54 = vld [vmem:[%s7443_s5 + $0x1e4] sm:$0xf0]  ;;  %v6430_v56 = vld [vmem:[%s7443_s5 + $0x54] sm:$0xf0] }
 0x143   : > { %4517 = vmatpush.bf16.msra.mxu3 %v5494_v44  ;;  %v5486_v57 = vor.u32 %v6480_v54, %v5485_v52  ;;  %v5349_v58 = vld [vmem:[%s7443_s5 + $0xd0] sm:$0xf]  ;;  %v6446_v59 = vld [vmem:[%s7443_s5 + $0xd4] sm:$0xf0]  ;;  %v5286_v61 = vor.u32 %v6430_v56, %v5285_v55  ;;  %v5277_v3 = vld [vmem:[%s7443_s5 + $0x40] sm:$0xf] }
 0x144   : > { %v5413_v60 = vld [vmem:[%s7443_s5 + $0x150] sm:$0xf]  ;;  %4476 = vmatpush.bf16.msra.mxu0 %v5294_v48  ;;  %v6462_v62 = vld [vmem:[%s7443_s5 + $0x154] sm:$0xf0]  ;;  %v5350_v1 = vor.u32 %v6446_v59, %v5349_v58  ;;  %v6428_v4 = vld [vmem:[%s7443_s5 + $0x44] sm:$0xf0] }
 0x145   : > { %v5477_v63 = vld [vmem:[%s7443_s5 + $0x1d0] sm:$0xf]  ;;  %v6478_v0 = vld [vmem:[%s7443_s5 + $0x1d4] sm:$0xf0]  ;;  %4490 = vmatpush.bf16.msra.mxu1 %v5358_v49  ;;  %v5414_v2 = vor.u32 %v6462_v62, %v5413_v60  ;;  %v5341_v5 = vld [vmem:[%s7443_s5 + $0xc0] sm:$0xf]  ;;  %v5278_v12 = vor.u32 %v6428_v4, %v5277_v3 }
 0x146   : > { %4504 = vmatpush.bf16.msra.mxu2 %v5422_v53  ;;  %v5478_v6 = vor.u32 %v6478_v0, %v5477_v63  ;;  %v6444_v7 = vld [vmem:[%s7443_s5 + $0xc4] sm:$0xf0]  ;;  %v5405_v8 = vld [vmem:[%s7443_s5 + $0x140] sm:$0xf]  ;;  %v5269_v15 = vld [vmem:[%s7443_s5 + $0x30] sm:$0xf] }
 0x147   : > { %4518 = vmatpush.bf16.msra.mxu3 %v5486_v57  ;;  %v6460_v9 = vld [vmem:[%s7443_s5 + $0x144] sm:$0xf0]  ;;  %v5469_v10 = vld [vmem:[%s7443_s5 + $0x1c0] sm:$0xf]  ;;  %v5342_v13 = vor.u32 %v6444_v7, %v5341_v5  ;;  %v6426_v16 = vld [vmem:[%s7443_s5 + $0x34] sm:$0xf0] }
 0x148   : > { %v6476_v11 = vld [vmem:[%s7443_s5 + $0x1c4] sm:$0xf0]  ;;  %4477 = vmatpush.bf16.msra.mxu0 %v5286_v61  ;;  %v5406_v14 = vor.u32 %v6460_v9, %v5405_v8  ;;  %v5333_v17 = vld [vmem:[%s7443_s5 + $0xb0] sm:$0xf]  ;;  %v6442_v19 = vld [vmem:[%s7443_s5 + $0xb4] sm:$0xf0]  ;;  %v5270_v24 = vor.u32 %v6426_v16, %v5269_v15 }
 0x149   : > { %4491 = vmatpush.bf16.msra.mxu1 %v5350_v1  ;;  %v5470_v18 = vor.u32 %v6476_v11, %v5469_v10  ;;  %v5397_v20 = vld [vmem:[%s7443_s5 + $0x130] sm:$0xf]  ;;  %v6458_v21 = vld [vmem:[%s7443_s5 + $0x134] sm:$0xf0]  ;;  %v5334_v25 = vor.u32 %v6442_v19, %v5333_v17  ;;  %v5261_v27 = vld [vmem:[%s7443_s5 + $0x20] sm:$0xf] }
 0x14a   : > { %4505 = vmatpush.bf16.msra.mxu2 %v5414_v2  ;;  %v5461_v22 = vld [vmem:[%s7443_s5 + $0x1b0] sm:$0xf]  ;;  %v6474_v23 = vld [vmem:[%s7443_s5 + $0x1b4] sm:$0xf0]  ;;  %v5398_v26 = vor.u32 %v6458_v21, %v5397_v20  ;;  %v6424_v28 = vld [vmem:[%s7443_s5 + $0x24] sm:$0xf0] }
 0x14b   : > { %4519 = vmatpush.bf16.msra.mxu3 %v5478_v6  ;;  %v5325_v29 = vld [vmem:[%s7443_s5 + $0xa0] sm:$0xf]  ;;  %v5462_v30 = vor.u32 %v6474_v23, %v5461_v22  ;;  %v6440_v31 = vld [vmem:[%s7443_s5 + $0xa4] sm:$0xf0]  ;;  %v5262_v36 = vor.u32 %v6424_v28, %v5261_v27  ;;  %v5253_v39 = vld [vmem:[%s7443_s5 + $0x10] sm:$0xf] }
 0x14c   : > { %4478 = vmatpush.bf16.msra.mxu0 %v5278_v12  ;;  %v5389_v32 = vld [vmem:[%s7443_s5 + $0x120] sm:$0xf]  ;;  %v6456_v33 = vld [vmem:[%s7443_s5 + $0x124] sm:$0xf0]  ;;  %v5326_v37 = vor.u32 %v6440_v31, %v5325_v29  ;;  %v6422_v40 = vld [vmem:[%s7443_s5 + $0x14] sm:$0xf0] }
 0x14d   : > { %4492 = vmatpush.bf16.msra.mxu1 %v5342_v13  ;;  %v5453_v34 = vld [vmem:[%s7443_s5 + $0x1a0] sm:$0xf]  ;;  %v6472_v35 = vld [vmem:[%s7443_s5 + $0x1a4] sm:$0xf0]  ;;  %v5390_v38 = vor.u32 %v6456_v33, %v5389_v32  ;;  %v5317_v41 = vld [vmem:[%s7443_s5 + $0x90] sm:$0xf]  ;;  %v5254_v48 = vor.u32 %v6422_v40, %v5253_v39 }
 0x14e   : > { %4506 = vmatpush.bf16.msra.mxu2 %v5406_v14  ;;  %v5454_v42 = vor.u32 %v6472_v35, %v5453_v34  ;;  %v6438_v43 = vld [vmem:[%s7443_s5 + $0x94] sm:$0xf0]  ;;  %v5381_v44 = vld [vmem:[%s7443_s5 + $0x110] sm:$0xf]  ;;  %v5245_v49 = vld [vmem:[%s7443_s5] sm:$0xf] }
 0x14f   : > { %4520 = vmatpush.bf16.msra.mxu3 %v5470_v18  ;;  %v6454_v45 = vld [vmem:[%s7443_s5 + $0x114] sm:$0xf0]  ;;  %v5445_v46 = vld [vmem:[%s7443_s5 + $0x190] sm:$0xf]  ;;  %v6420_v50 = vld [vmem:[%s7443_s5 + $0x4] sm:$0xf0]  ;;  %v5318_v51 = vor.u32 %v6438_v43, %v5317_v41 }
 0x150   : > { %4479 = vmatpush.bf16.msra.mxu0 %v5270_v24  ;;  %v6470_v47 = vld [vmem:[%s7443_s5 + $0x194] sm:$0xf0]  ;;  %v5382_v52 = vor.u32 %v6454_v45, %v5381_v44  ;;  %v5309_v53 = vld [vmem:[%s7443_s5 + $0x80] sm:$0xf]  ;;  %v6436_v54 = vld [vmem:[%s7443_s5 + $0x84] sm:$0xf0]  ;;  %v5246_v63 = vor.u32 %v6420_v50, %v5245_v49 }
 0x151   : > { %4493 = vmatpush.bf16.msra.mxu1 %v5334_v25  ;;  %v5373_v55 = vld [vmem:[%s7443_s5 + $0x100] sm:$0xf]  ;;  %v5446_v56 = vor.u32 %v6470_v47, %v5445_v46  ;;  %v6452_v57 = vld [vmem:[%s7443_s5 + $0x104] sm:$0xf0]  ;;  %v5557_v60 = vld [vmem:[%s7443_s5 + $0x270] sm:$0xf]  ;;  %v5310_v3 = vor.u32 %v6436_v54, %v5309_v53 }
 0x152   : > { %4507 = vmatpush.bf16.msra.mxu2 %v5398_v26  ;;  %v5437_v58 = vld [vmem:[%s7443_s5 + $0x180] sm:$0xf]  ;;  %v6468_v59 = vld [vmem:[%s7443_s5 + $0x184] sm:$0xf0]  ;;  %v6498_v61 = vld [vmem:[%s7443_s5 + $0x274] sm:$0xf0]  ;;  %v5374_v4 = vor.u32 %v6452_v57, %v5373_v55 }
 0x153   : > { %4521 = vmatpush.bf16.msra.mxu3 %v5462_v30  ;;  %v5621_v62 = vld [vmem:[%s7443_s5 + $0x2f0] sm:$0xf]  ;;  %v6514_v0 = vld [vmem:[%s7443_s5 + $0x2f4] sm:$0xf0]  ;;  %v5438_v7 = vor.u32 %v6468_v59, %v5437_v58  ;;  %v5558_v8 = vor.u32 %v6498_v61, %v5557_v60  ;;  %v5549_v9 = vld [vmem:[%s7443_s5 + $0x260] sm:$0xf] }
 0x154   : > { %4480 = vmatpush.bf16.msra.mxu0 %v5262_v36  ;;  %v5685_v1 = vld [vmem:[%s7443_s5 + $0x370] sm:$0xf]  ;;  %v6530_v2 = vld [vmem:[%s7443_s5 + $0x374] sm:$0xf0]  ;;  %v6496_v10 = vld [vmem:[%s7443_s5 + $0x264] sm:$0xf0]  ;;  %v5622_v11 = vor.u32 %v6514_v0, %v5621_v62 }
 0x155   : > { %4494 = vmatpush.bf16.msra.mxu1 %v5326_v37  ;;  %v5749_v5 = vld [vmem:[%s7443_s5 + $0x3f0] sm:$0xf]  ;;  %v6546_v6 = vld [vmem:[%s7443_s5 + $0x3f4] sm:$0xf0]  ;;  %v5686_v12 = vor.u32 %v6530_v2, %v5685_v1  ;;  %v5613_v13 = vld [vmem:[%s7443_s5 + $0x2e0] sm:$0xf]  ;;  %v5550_v23 = vor.u32 %v6496_v10, %v5549_v9 }
 0x156   : > { %4508 = vmatpush.bf16.msra.mxu2 %v5390_v38  ;;  %v6512_v14 = vld [vmem:[%s7443_s5 + $0x2e4] sm:$0xf0]  ;;  %v5677_v15 = vld [vmem:[%s7443_s5 + $0x360] sm:$0xf]  ;;  %v5750_v16 = vor.u32 %v6546_v6, %v5749_v5  ;;  %v5541_v24 = vld [vmem:[%s7443_s5 + $0x250] sm:$0xf] }
 0x157   : > { %4522 = vmatpush.bf16.msra.mxu3 %v5454_v42  ;;  %v6528_v17 = vld [vmem:[%s7443_s5 + $0x364] sm:$0xf0]  ;;  %v5741_v18 = vld [vmem:[%s7443_s5 + $0x3e0] sm:$0xf]  ;;  %v6494_v25 = vld [vmem:[%s7443_s5 + $0x254] sm:$0xf0]  ;;  %v5614_v28 = vor.u32 %v6512_v14, %v5613_v13 }
 0x158   : > { %4481 = vmatpush.bf16.msra.mxu0 %v5254_v48  ;;  %v6544_v19 = vld [vmem:[%s7443_s5 + $0x3e4] sm:$0xf0]  ;;  %v5173_v20 = vld [vmem:[%s8303_s0] sm:$0xf]  ;;  %v6411_v27 = vld [vmem:[%s8303_s0 + $0x4c] sm:$0xf0]  ;;  %v5678_v29 = vor.u32 %v6528_v17, %v5677_v15  ;;  %v5542_v41 = vor.u32 %v6494_v25, %v5541_v24 }
 0x159   : > { %4495 = vmatpush.bf16.msra.mxu1 %v5318_v51  ;;  %v6410_v21 = vld [vmem:[%s8303_s0 + $0x44] sm:$0xf0]  ;;  %v5605_v30 = vld [vmem:[%s7443_s5 + $0x2d0] sm:$0xf]  ;;  %v6510_v31 = vld [vmem:[%s7443_s5 + $0x2d4] sm:$0xf0]  ;;  %v5742_v34 = vor.u32 %v6544_v19, %v5741_v18 }
 0x15a   : > { %4509 = vmatpush.bf16.msra.mxu2 %v5382_v52  ;;  %v5181_v22 = vld [vmem:[%s8303_s0 + $0x8] sm:$0xf]  ;;  %v7536_v26 = vor.u32 %v6410_v21, %v5173_v20  ;;  %v5669_v32 = vld [vmem:[%s7443_s5 + $0x350] sm:$0xf]  ;;  %v6526_v35 = vld [vmem:[%s7443_s5 + $0x354] sm:$0xf0]  ;;  %v5606_v44 = vor.u32 %v6510_v31, %v5605_v30 }
 0x15b   : > { %4523 = vmatpush.bf16.msra.mxu3 %v5446_v56  ;;  %v7544_v33 = vor.u32 %v6411_v27, %v5181_v22  ;;  %v5733_v36 = vld [vmem:[%s7443_s5 + $0x3d0] sm:$0xf]  ;;  %v6542_v37 = vld [vmem:[%s7443_s5 + $0x3d4] sm:$0xf0]  ;;  %v6401_v38 = vld [vmem:[%s8303_s0 + $0x4] sm:$0xf]  ;;  %v5670_v45 = vor.u32 %v6526_v35, %v5669_v32 }
 0x15c   : > { %4482 = vmatpush.bf16.msra.mxu0 %v5246_v63  ;;  %v5175_v39 = vld [vmem:[%s8303_s0 + $0x48] sm:$0xf0]  ;;  %v5183_v43 = vld [vmem:[%s8303_s0 + $0x50] sm:$0xf0]  ;;  %v5533_v46 = vld [vmem:[%s7443_s5 + $0x240] sm:$0xf]  ;;  %v5734_v50 = vor.u32 %v6542_v37, %v5733_v36 }
 0x15d   : > { %4496 = vmatpush.bf16.msra.mxu1 %v5310_v3  ;;  %v6402_v40 = vld [vmem:[%s8303_s0 + $0xc] sm:$0xf]  ;;  %v7560_v42 = vor.u32 %v6401_v38, %v5175_v39  ;;  %v6492_v47 = vld [vmem:[%s7443_s5 + $0x244] sm:$0xf0]  ;;  %v5597_v48 = vld [vmem:[%s7443_s5 + $0x2c0] sm:$0xf] }
 0x15e   : > { %4510 = vmatpush.bf16.msra.mxu2 %v5374_v4  ;;  %v7568_v49 = vor.u32 %v6402_v40, %v5183_v43  ;;  %v6508_v51 = vld [vmem:[%s7443_s5 + $0x2c4] sm:$0xf0]  ;;  %v5661_v52 = vld [vmem:[%s7443_s5 + $0x340] sm:$0xf]  ;;  %v5534_v56 = vor.u32 %v6492_v47, %v5533_v46  ;;  %v5525_v59 = vld [vmem:[%s7443_s5 + $0x230] sm:$0xf] }
 0x15f   : > { %4524 = vmatpush.bf16.msra.mxu3 %v5438_v7  ;;  %4483 = vmatmul.bf16.vlgmr.msra.gmra.mxu0 %v7536_v26  ;;  %v6524_v53 = vld [vmem:[%s7443_s5 + $0x344] sm:$0xf0]  ;;  %v5725_v54 = vld [vmem:[%s7443_s5 + $0x3c0] sm:$0xf]  ;;  %v5598_v57 = vor.u32 %v6508_v51, %v5597_v48  ;;  %v6490_v60 = vld [vmem:[%s7443_s5 + $0x234] sm:$0xf0] }
 0x160   : > { %4531 = vmatpush.bf16.msrb.mxu0 %v5558_v8  ;;  %4497 = vmatmul.bf16.vlgmr.msra.gmra.mxu1 %v7560_v42  ;;  %v6540_v55 = vld [vmem:[%s7443_s5 + $0x3c4] sm:$0xf0]  ;;  %v5662_v58 = vor.u32 %v6524_v53, %v5661_v52  ;;  %v5589_v61 = vld [vmem:[%s7443_s5 + $0x2b0] sm:$0xf]  ;;  %v6506_v63 = vld [vmem:[%s7443_s5 + $0x2b4] sm:$0xf0]  ;;  %v5526_v4 = vor.u32 %v6490_v60, %v5525_v59 }
 0x161   : > { %4545 = vmatpush.bf16.msrb.mxu1 %v5622_v11  ;;  %4511 = vmatmul.bf16.vlgmr.msra.gmra.mxu2 %v7544_v33  ;;  %v5726_v62 = vor.u32 %v6540_v55, %v5725_v54  ;;  %v5653_v0 = vld [vmem:[%s7443_s5 + $0x330] sm:$0xf]  ;;  %v6522_v1 = vld [vmem:[%s7443_s5 + $0x334] sm:$0xf0]  ;;  %v5590_v5 = vor.u32 %v6506_v63, %v5589_v61  ;;  %v5517_v7 = vld [vmem:[%s7443_s5 + $0x220] sm:$0xf] }
 0x162   : > { %4559 = vmatpush.bf16.msrb.mxu2 %v5686_v12  ;;  %4525 = vmatmul.bf16.vlgmr.msra.gmra.mxu3 %v7568_v49  ;;  %v5717_v2 = vld [vmem:[%s7443_s5 + $0x3b0] sm:$0xf]  ;;  %v6538_v3 = vld [vmem:[%s7443_s5 + $0x3b4] sm:$0xf0]  ;;  %v5654_v6 = vor.u32 %v6522_v1, %v5653_v0  ;;  %v6488_v8 = vld [vmem:[%s7443_s5 + $0x224] sm:$0xf0] }
 0x163   : > { %4573 = vmatpush.bf16.msrb.mxu3 %v5750_v16  ;;  %v5581_v9 = vld [vmem:[%s7443_s5 + $0x2a0] sm:$0xf]  ;;  %v5718_v10 = vor.u32 %v6538_v3, %v5717_v2  ;;  %v6504_v11 = vld [vmem:[%s7443_s5 + $0x2a4] sm:$0xf0]  ;;  %v5518_v16 = vor.u32 %v6488_v8, %v5517_v7  ;;  %v5509_v17 = vld [vmem:[%s7443_s5 + $0x210] sm:$0xf] }
 0x164   : > { %4532 = vmatpush.bf16.msrb.mxu0 %v5550_v23  ;;  %v5645_v12 = vld [vmem:[%s7443_s5 + $0x320] sm:$0xf]  ;;  %v6520_v13 = vld [vmem:[%s7443_s5 + $0x324] sm:$0xf0]  ;;  %v5582_v18 = vor.u32 %v6504_v11, %v5581_v9  ;;  %v6486_v20 = vld [vmem:[%s7443_s5 + $0x214] sm:$0xf0] }
 0x165   : > { %4546 = vmatpush.bf16.msrb.mxu1 %v5614_v28  ;;  %v5709_v14 = vld [vmem:[%s7443_s5 + $0x3a0] sm:$0xf]  ;;  %v6536_v15 = vld [vmem:[%s7443_s5 + $0x3a4] sm:$0xf0]  ;;  %v5646_v19 = vor.u32 %v6520_v13, %v5645_v12  ;;  %v5573_v21 = vld [vmem:[%s7443_s5 + $0x290] sm:$0xf]  ;;  %v5510_v31 = vor.u32 %v6486_v20, %v5509_v17 }
 0x166   : > { %4560 = vmatpush.bf16.msrb.mxu2 %v5678_v29  ;;  %v6502_v22 = vld [vmem:[%s7443_s5 + $0x294] sm:$0xf0]  ;;  %v5710_v23 = vor.u32 %v6536_v15, %v5709_v14  ;;  %v5637_v24 = vld [vmem:[%s7443_s5 + $0x310] sm:$0xf]  ;;  %v5501_v29 = vld [vmem:[%s7443_s5 + $0x200] sm:$0xf] }
 0x167   : > { %4574 = vmatpush.bf16.msrb.mxu3 %v5742_v34  ;;  %v6518_v25 = vld [vmem:[%s7443_s5 + $0x314] sm:$0xf0]  ;;  %v5701_v27 = vld [vmem:[%s7443_s5 + $0x390] sm:$0xf]  ;;  %v6484_v30 = vld [vmem:[%s7443_s5 + $0x204] sm:$0xf0]  ;;  %v5574_v37 = vor.u32 %v6502_v22, %v5573_v21 }
 0x168   : > { %4533 = vmatpush.bf16.msrb.mxu0 %v5542_v41  ;;  %v6534_v28 = vld [vmem:[%s7443_s5 + $0x394] sm:$0xf0]  ;;  %v5565_v32 = vld [vmem:[%s7443_s5 + $0x280] sm:$0xf]  ;;  %v6500_v34 = vld [vmem:[%s7443_s5 + $0x284] sm:$0xf0]  ;;  %v5638_v38 = vor.u32 %v6518_v25, %v5637_v24  ;;  %v5502_v51 = vor.u32 %v6484_v30, %v5501_v29 }
 0x169   : > { %4547 = vmatpush.bf16.msrb.mxu1 %v5606_v44  ;;  %v5629_v35 = vld [vmem:[%s7443_s5 + $0x300] sm:$0xf]  ;;  %v6516_v36 = vld [vmem:[%s7443_s5 + $0x304] sm:$0xf0]  ;;  %v5813_v41 = vld [vmem:[%s7443_s5 + $0x470] sm:$0xf]  ;;  %v5702_v43 = vor.u32 %v6534_v28, %v5701_v27  ;;  %v5566_v55 = vor.u32 %v6500_v34, %v5565_v32 }
 0x16a   : > { %4561 = vmatpush.bf16.msrb.mxu2 %v5670_v45  ;;  %v5693_v39 = vld [vmem:[%s7443_s5 + $0x380] sm:$0xf]  ;;  %v6532_v40 = vld [vmem:[%s7443_s5 + $0x384] sm:$0xf0]  ;;  %v6562_v44 = vld [vmem:[%s7443_s5 + $0x474] sm:$0xf0] }
 0x16b   : > { %4575 = vmatpush.bf16.msrb.mxu3 %v5734_v50  ;;  %v5877_v45 = vld [vmem:[%s7443_s5 + $0x4f0] sm:$0xf]  ;;  %v6578_v46 = vld [vmem:[%s7443_s5 + $0x4f4] sm:$0xf0]  ;;  %v6403_v59 = vld [vmem:[%s8303_s0 + $0x14] sm:$0xf]  ;;  %v5694_v60 = vor.u32 %v6532_v40, %v5693_v39  ;;  %v5814_v61 = vor.u32 %v6562_v44, %v5813_v41 }
 0x16c   : > { %4534 = vmatpush.bf16.msrb.mxu0 %v5534_v56  ;;  %v5941_v47 = vld [vmem:[%s7443_s5 + $0x570] sm:$0xf]  ;;  %v6594_v48 = vld [vmem:[%s7443_s5 + $0x574] sm:$0xf0]  ;;  %v5630_v56 = vor.u32 %v6516_v36, %v5629_v35  ;;  %v6404_v63 = vld [vmem:[%s8303_s0 + $0x1c] sm:$0xf]  ;;  %v5878_v1 = vor.u32 %v6578_v46, %v5877_v45 }
 0x16d   : > { %4548 = vmatpush.bf16.msrb.mxu1 %v5598_v57  ;;  %v6005_v50 = vld [vmem:[%s7443_s5 + $0x5f0] sm:$0xf]  ;;  %v6610_v52 = vld [vmem:[%s7443_s5 + $0x5f4] sm:$0xf0]  ;;  %v5199_v0 = vld [vmem:[%s8303_s0 + $0x60] sm:$0xf0]  ;;  %v5942_v2 = vor.u32 %v6594_v48, %v5941_v47 }
 0x16e   : > { %4562 = vmatpush.bf16.msrb.mxu2 %v5662_v58  ;;  %v5189_v53 = vld [vmem:[%s8303_s0 + $0x10] sm:$0xf]  ;;  %v6412_v54 = vld [vmem:[%s8303_s0 + $0x54] sm:$0xf0]  ;;  %v6413_v58 = vld [vmem:[%s8303_s0 + $0x5c] sm:$0xf0]  ;;  %v7655_v15 = vor.u32 %v6404_v63, %v5199_v0 }
 0x16f   : > { %4576 = vmatpush.bf16.msrb.mxu3 %v5726_v62  ;;  %v5197_v57 = vld [vmem:[%s8303_s0 + $0x18] sm:$0xf]  ;;  %v5191_v62 = vld [vmem:[%s8303_s0 + $0x58] sm:$0xf0]  ;;  %v5805_v3 = vld [vmem:[%s7443_s5 + $0x460] sm:$0xf]  ;;  %v7644_v7 = vor.u32 %v6412_v54, %v5189_v53 }
 0x170   : > { %4535 = vmatpush.bf16.msrb.mxu0 %v5526_v4  ;;  %v6560_v4 = vld [vmem:[%s7443_s5 + $0x464] sm:$0xf0]  ;;  %v5933_v9 = vld [vmem:[%s7443_s5 + $0x560] sm:$0xf]  ;;  %v7649_v11 = vor.u32 %v6413_v58, %v5197_v57  ;;  %v7651_v12 = vor.u32 %v6403_v59, %v5191_v62  ;;  %v6558_v20 = vld [vmem:[%s7443_s5 + $0x454] sm:$0xf0] }
 0x171   : > { %4549 = vmatpush.bf16.msrb.mxu1 %v5590_v5  ;;  %v5869_v5 = vld [vmem:[%s7443_s5 + $0x4e0] sm:$0xf]  ;;  %v6576_v8 = vld [vmem:[%s7443_s5 + $0x4e4] sm:$0xf0]  ;;  %v5861_v21 = vld [vmem:[%s7443_s5 + $0x4d0] sm:$0xf] }
 0x172   : > { %4563 = vmatpush.bf16.msrb.mxu2 %v5654_v6  ;;  %v6006_v6 = vor.u32 %v6610_v52, %v6005_v50  ;;  %v5997_v13 = vld [vmem:[%s7443_s5 + $0x5e0] sm:$0xf]  ;;  %v6608_v14 = vld [vmem:[%s7443_s5 + $0x5e4] sm:$0xf0]  ;;  %v5870_v17 = vor.u32 %v6576_v8, %v5869_v5  ;;  %v5925_v24 = vld [vmem:[%s7443_s5 + $0x550] sm:$0xf] }
 0x173   : > { %4577 = vmatpush.bf16.msrb.mxu3 %v5718_v10  ;;  %v6592_v10 = vld [vmem:[%s7443_s5 + $0x564] sm:$0xf0]  ;;  %v5998_v22 = vor.u32 %v6608_v14, %v5997_v13  ;;  %v6590_v25 = vld [vmem:[%s7443_s5 + $0x554] sm:$0xf0]  ;;  %v5989_v27 = vld [vmem:[%s7443_s5 + $0x5d0] sm:$0xf] }
 0x174   : > { %4536 = vmatpush.bf16.msrb.mxu0 %v5518_v16  ;;  %v5806_v16 = vor.u32 %v6560_v4, %v5805_v3  ;;  %v6606_v28 = vld [vmem:[%s7443_s5 + $0x5d4] sm:$0xf0]  ;;  %v5789_v32 = vld [vmem:[%s7443_s5 + $0x440] sm:$0xf]  ;;  %v6556_v34 = vld [vmem:[%s7443_s5 + $0x444] sm:$0xf0] }
 0x175   : > { %4550 = vmatpush.bf16.msrb.mxu1 %v5582_v18  ;;  %v5934_v18 = vor.u32 %v6592_v10, %v5933_v9  ;;  %v5853_v35 = vld [vmem:[%s7443_s5 + $0x4c0] sm:$0xf]  ;;  %v5990_v36 = vor.u32 %v6606_v28, %v5989_v27  ;;  %v6588_v39 = vld [vmem:[%s7443_s5 + $0x544] sm:$0xf0]  ;;  %v5781_v46 = vld [vmem:[%s7443_s5 + $0x430] sm:$0xf] }
 0x176   : > { %4564 = vmatpush.bf16.msrb.mxu2 %v5646_v19  ;;  %v5797_v19 = vld [vmem:[%s7443_s5 + $0x450] sm:$0xf]  ;;  %v5981_v40 = vld [vmem:[%s7443_s5 + $0x5c0] sm:$0xf]  ;;  %v6604_v41 = vld [vmem:[%s7443_s5 + $0x5c4] sm:$0xf0] }
 0x177   : > { %4578 = vmatpush.bf16.msrb.mxu3 %v5710_v23  ;;  %v6574_v23 = vld [vmem:[%s7443_s5 + $0x4d4] sm:$0xf0]  ;;  %v5798_v29 = vor.u32 %v6558_v20, %v5797_v19  ;;  %v5845_v48 = vld [vmem:[%s7443_s5 + $0x4b0] sm:$0xf]  ;;  %v5982_v50 = vor.u32 %v6604_v41, %v5981_v40  ;;  %v5773_v59 = vld [vmem:[%s7443_s5 + $0x420] sm:$0xf] }
 0x178   : > { %4537 = vmatpush.bf16.msrb.mxu0 %v5510_v31  ;;  %v5862_v30 = vor.u32 %v6574_v23, %v5861_v21  ;;  %v5926_v31 = vor.u32 %v6590_v25, %v5925_v24  ;;  %v6554_v47 = vld [vmem:[%s7443_s5 + $0x434] sm:$0xf0]  ;;  %v5909_v52 = vld [vmem:[%s7443_s5 + $0x530] sm:$0xf]  ;;  %v6568_v63 = vld [vmem:[%s7443_s5 + $0x4a4] sm:$0xf0] }
 0x179   : > { %4551 = vmatpush.bf16.msrb.mxu1 %v5574_v37  ;;  %v6572_v37 = vld [vmem:[%s7443_s5 + $0x4c4] sm:$0xf0]  ;;  %v6586_v53 = vld [vmem:[%s7443_s5 + $0x534] sm:$0xf0]  ;;  %v5973_v54 = vld [vmem:[%s7443_s5 + $0x5b0] sm:$0xf] }
 0x17a   : > { %4565 = vmatpush.bf16.msrb.mxu2 %v5638_v38  ;;  %v5917_v38 = vld [vmem:[%s7443_s5 + $0x540] sm:$0xf]  ;;  %v5854_v44 = vor.u32 %v6572_v37, %v5853_v35  ;;  %v5910_v58 = vor.u32 %v6586_v53, %v5909_v52  ;;  %v6600_v3 = vld [vmem:[%s7443_s5 + $0x5a4] sm:$0xf0]  ;;  %v5765_v5 = vld [vmem:[%s7443_s5 + $0x410] sm:$0xf] }
 0x17b   : > { %4579 = vmatpush.bf16.msrb.mxu3 %v5702_v43  ;;  %v5790_v43 = vor.u32 %v6556_v34, %v5789_v32  ;;  %v5918_v45 = vor.u32 %v6588_v39, %v5917_v38  ;;  %v5901_v0 = vld [vmem:[%s7443_s5 + $0x520] sm:$0xf]  ;;  %v6550_v9 = vld [vmem:[%s7443_s5 + $0x414] sm:$0xf0]  ;;  %v5829_v10 = vld [vmem:[%s7443_s5 + $0x490] sm:$0xf] }
 0x17c   : > { %4538 = vmatpush.bf16.msrb.mxu0 %v5502_v51  ;;  %v6570_v51 = vld [vmem:[%s7443_s5 + $0x4b4] sm:$0xf0]  ;;  %v5757_v20 = vld [vmem:[%s7443_s5 + $0x400] sm:$0xf]  ;;  %v6548_v21 = vld [vmem:[%s7443_s5 + $0x404] sm:$0xf0] }
 0x17d   : > { %4552 = vmatpush.bf16.msrb.mxu1 %v5566_v55  ;;  %v6602_v55 = vld [vmem:[%s7443_s5 + $0x5b4] sm:$0xf0]  ;;  %v5846_v57 = vor.u32 %v6570_v51, %v5845_v48  ;;  %v5821_v23 = vld [vmem:[%s7443_s5 + $0x480] sm:$0xf]  ;;  %v6564_v24 = vld [vmem:[%s7443_s5 + $0x484] sm:$0xf0]  ;;  %v5758_v41 = vor.u32 %v6548_v21, %v5757_v20 }
 0x17e   : > { %4566 = vmatpush.bf16.msrb.mxu2 %v5630_v56  ;;  %v5782_v56 = vor.u32 %v6554_v47, %v5781_v46  ;;  %v5974_v62 = vor.u32 %v6602_v55, %v5973_v54  ;;  %v6566_v13 = vld [vmem:[%s7443_s5 + $0x494] sm:$0xf0]  ;;  %v5885_v25 = vld [vmem:[%s7443_s5 + $0x500] sm:$0xf]  ;;  %v6580_v27 = vld [vmem:[%s7443_s5 + $0x504] sm:$0xf0]  ;;  %v5822_v46 = vor.u32 %v6564_v24, %v5821_v23 }
 0x17f   : > { %4580 = vmatpush.bf16.msrb.mxu3 %v5694_v60  ;;  %4539 = vmatmul.bf16.vlgmr.msrb.gmra.mxu0 %v7644_v7  ;;  %v6552_v60 = vld [vmem:[%s7443_s5 + $0x424] sm:$0xf0]  ;;  %v6598_v19 = vld [vmem:[%s7443_s5 + $0x594] sm:$0xf0]  ;;  %v5830_v28 = vor.u32 %v6566_v13, %v5829_v10  ;;  %v6069_v32 = vld [vmem:[%s7443_s5 + $0x670] sm:$0xf]  ;;  %v5886_v47 = vor.u32 %v6580_v27, %v5885_v25 }
 0x180   : > { %4587 = vmatpush.bf16.msra.mxu0 %v5814_v61  ;;  %4553 = vmatmul.bf16.vlgmr.msrb.gmra.mxu1 %v7651_v12  ;;  %v5837_v61 = vld [vmem:[%s7443_s5 + $0x4a0] sm:$0xf]  ;;  %v5774_v4 = vor.u32 %v6552_v60, %v5773_v59  ;;  %v6626_v35 = vld [vmem:[%s7443_s5 + $0x674] sm:$0xf0]  ;;  %v6197_v38 = vld [vmem:[%s7443_s5 + $0x770] sm:$0xf] }
 0x181   : > { %4601 = vmatpush.bf16.msra.mxu1 %v5878_v1  ;;  %4567 = vmatmul.bf16.vlgmr.msrb.gmra.mxu2 %v7649_v11  ;;  %v6584_v1 = vld [vmem:[%s7443_s5 + $0x524] sm:$0xf0]  ;;  %v6642_v37 = vld [vmem:[%s7443_s5 + $0x6f4] sm:$0xf0]  ;;  %v6261_v40 = vld [vmem:[%s7443_s5 + $0x7f0] sm:$0xf]  ;;  %v6070_v53 = vor.u32 %v6626_v35, %v6069_v32 }
 0x182   : > { %4615 = vmatpush.bf16.msra.mxu2 %v5942_v2  ;;  %4581 = vmatmul.bf16.vlgmr.msrb.gmra.mxu3 %v7655_v15  ;;  %v5965_v2 = vld [vmem:[%s7443_s5 + $0x5a0] sm:$0xf]  ;;  %v5902_v8 = vor.u32 %v6584_v1, %v5901_v0  ;;  %v6658_v39 = vld [vmem:[%s7443_s5 + $0x774] sm:$0xf0]  ;;  %v5213_v48 = vld [vmem:[%s8303_s0 + $0x28] sm:$0xf] }
 0x183   : > { %4629 = vmatpush.bf16.msra.mxu3 %v6006_v6  ;;  %v5838_v6 = vor.u32 %v6568_v63, %v5837_v61  ;;  %v5966_v14 = vor.u32 %v6600_v3, %v5965_v2  ;;  %v6405_v51 = vld [vmem:[%s8303_s0 + $0x24] sm:$0xf]  ;;  %v5207_v54 = vld [vmem:[%s8303_s0 + $0x68] sm:$0xf0]  ;;  %v6061_v59 = vld [vmem:[%s7443_s5 + $0x660] sm:$0xf] }
 0x184   : > { %4588 = vmatpush.bf16.msra.mxu0 %v5806_v16  ;;  %v5893_v16 = vld [vmem:[%s7443_s5 + $0x510] sm:$0xf]  ;;  %v6406_v55 = vld [vmem:[%s8303_s0 + $0x2c] sm:$0xf]  ;;  %v6624_v60 = vld [vmem:[%s7443_s5 + $0x664] sm:$0xf0] }
 0x185   : > { %4602 = vmatpush.bf16.msra.mxu1 %v5870_v17  ;;  %v6582_v17 = vld [vmem:[%s7443_s5 + $0x514] sm:$0xf0]  ;;  %v6125_v61 = vld [vmem:[%s7443_s5 + $0x6e0] sm:$0xf]  ;;  %v6640_v0 = vld [vmem:[%s7443_s5 + $0x6e4] sm:$0xf0] }
 0x186   : > { %4616 = vmatpush.bf16.msra.mxu2 %v5934_v18  ;;  %v5957_v18 = vld [vmem:[%s7443_s5 + $0x590] sm:$0xf]  ;;  %v6189_v1 = vld [vmem:[%s7443_s5 + $0x760] sm:$0xf]  ;;  %v6656_v2 = vld [vmem:[%s7443_s5 + $0x764] sm:$0xf0]  ;;  %v6126_v10 = vor.u32 %v6640_v0, %v6125_v61 }
 0x187   : > { %4630 = vmatpush.bf16.msra.mxu3 %v5998_v22  ;;  %v5766_v22 = vor.u32 %v6550_v9, %v5765_v5  ;;  %v5958_v34 = vor.u32 %v6598_v19, %v5957_v18  ;;  %v6253_v5 = vld [vmem:[%s7443_s5 + $0x7e0] sm:$0xf]  ;;  %v6062_v9 = vor.u32 %v6624_v60, %v6061_v59  ;;  %v6190_v13 = vor.u32 %v6656_v2, %v6189_v1  ;;  %v6638_v19 = vld [vmem:[%s7443_s5 + $0x6d4] sm:$0xf0]  ;;  %v6181_v20 = vld [vmem:[%s7443_s5 + $0x750] sm:$0xf] }
 0x188   : > { %4589 = vmatpush.bf16.msra.mxu0 %v5798_v29  ;;  %v5894_v29 = vor.u32 %v6582_v17, %v5893_v16  ;;  %v6622_v16 = vld [vmem:[%s7443_s5 + $0x654] sm:$0xf0]  ;;  %v6117_v17 = vld [vmem:[%s7443_s5 + $0x6d0] sm:$0xf]  ;;  %v6636_v32 = vld [vmem:[%s7443_s5 + $0x6c4] sm:$0xf0] }
 0x189   : > { %4603 = vmatpush.bf16.msra.mxu1 %v5862_v30  ;;  %v5949_v30 = vld [vmem:[%s7443_s5 + $0x580] sm:$0xf]  ;;  %v6654_v21 = vld [vmem:[%s7443_s5 + $0x754] sm:$0xf0]  ;;  %v6118_v25 = vor.u32 %v6638_v19, %v6117_v17  ;;  %v6652_v35 = vld [vmem:[%s7443_s5 + $0x744] sm:$0xf0] }
 0x18a   : > { %4617 = vmatpush.bf16.msra.mxu2 %v5926_v31  ;;  %v6596_v31 = vld [vmem:[%s7443_s5 + $0x584] sm:$0xf0]  ;;  %v6670_v23 = vld [vmem:[%s7443_s5 + $0x7d4] sm:$0xf0]  ;;  %v6182_v27 = vor.u32 %v6654_v21, %v6181_v20  ;;  %v6157_v60 = vld [vmem:[%s7443_s5 + $0x720] sm:$0xf] }
 0x18b   : > { %4631 = vmatpush.bf16.msra.mxu3 %v5990_v36  ;;  %v6133_v36 = vld [vmem:[%s7443_s5 + $0x6f0] sm:$0xf]  ;;  %v5950_v52 = vor.u32 %v6596_v31, %v5949_v30  ;;  %v6109_v30 = vld [vmem:[%s7443_s5 + $0x6c0] sm:$0xf]  ;;  %v6632_v59 = vld [vmem:[%s7443_s5 + $0x6a4] sm:$0xf0] }
 0x18c   : > { %4590 = vmatpush.bf16.msra.mxu0 %v5790_v43  ;;  %v6674_v43 = vld [vmem:[%s7443_s5 + $0x7f4] sm:$0xf0]  ;;  %v6648_v61 = vld [vmem:[%s7443_s5 + $0x724] sm:$0xf0]  ;;  %v6021_v2 = vld [vmem:[%s7443_s5 + $0x610] sm:$0xf] }
 0x18d   : > { %4604 = vmatpush.bf16.msra.mxu1 %v5854_v44  ;;  %v5205_v44 = vld [vmem:[%s8303_s0 + $0x20] sm:$0xf]  ;;  %v6664_v0 = vld [vmem:[%s7443_s5 + $0x7a4] sm:$0xf0]  ;;  %v6646_v17 = vld [vmem:[%s7443_s5 + $0x714] sm:$0xf0] }
 0x18e   : > { %4618 = vmatpush.bf16.msra.mxu2 %v5918_v45  ;;  %v6414_v45 = vld [vmem:[%s8303_s0 + $0x64] sm:$0xf0]  ;;  %v6662_v19 = vld [vmem:[%s7443_s5 + $0x794] sm:$0xf0]  ;;  %v6013_v20 = vld [vmem:[%s7443_s5 + $0x600] sm:$0xf] }
 0x18f   : > { %4632 = vmatpush.bf16.msra.mxu3 %v5982_v50  ;;  %v6415_v50 = vld [vmem:[%s8303_s0 + $0x6c] sm:$0xf0]  ;;  %v7744_v63 = vor.u32 %v6414_v45, %v5205_v44  ;;  %v6612_v21 = vld [vmem:[%s7443_s5 + $0x604] sm:$0xf0]  ;;  %s8315_s10 = smov (!%p2621_p11, %s5170_s10), 3  ;;  %s6707_s12 = sshll.u32 (%p6845_p6), %s6780_s14, 4 }
 0x190   : > { %4591 = vmatpush.bf16.msra.mxu0 %v5782_v56  ;;  %v5215_v56 = vld [vmem:[%s8303_s0 + $0x70] sm:$0xf0]  ;;  %v7749_v3 = vor.u32 %v6415_v50, %v5213_v48  ;;  %v6101_v44 = vld [vmem:[%s7443_s5 + $0x6b0] sm:$0xf]  ;;  %v6650_v48 = vld [vmem:[%s7443_s5 + $0x734] sm:$0xf0]  ;;  %s2623_s18 = scalar_lea.vmem %s8305_s2, %s8315_s10  ;;  %s5024_s24 = scalar_lea.vmem (%p6845_p6), %s8306_s3, %s6707_s12 }
 0x191   : > { %4605 = vmatpush.bf16.msra.mxu1 %v5846_v57  ;;  %v6134_v57 = vor.u32 %v6642_v37, %v6133_v36  ;;  %v6237_v36 = vld [vmem:[%s7443_s5 + $0x7c0] sm:$0xf]  ;;  %v6668_v37 = vld [vmem:[%s7443_s5 + $0x7c4] sm:$0xf0]  ;;  %v6229_v50 = vld [vmem:[%s7443_s5 + $0x7b0] sm:$0xf] }
 0x192   : > { %4619 = vmatpush.bf16.msra.mxu2 %v5910_v58  ;;  %v6198_v58 = vor.u32 %v6658_v39, %v6197_v38  ;;  %v6110_v39 = vor.u32 %v6636_v32, %v6109_v30  ;;  %v6238_v45 = vor.u32 %v6668_v37, %v6237_v36  ;;  %v6205_v30 = vld [vmem:[%s7443_s5 + $0x780] sm:$0xf]  ;;  %v6325_v32 = vld [vmem:[%s7443_s5 + $0x870] sm:$0xf]  ;;  %v6706_v37 = vld [vmem:[%s7443_s5 + $0x8f4] sm:$0xf0] }
 0x193   : > { %4633 = vmatpush.bf16.msra.mxu3 %v5974_v62  ;;  %v6262_v62 = vor.u32 %v6674_v43, %v6261_v40  ;;  %v6618_v43 = vld [vmem:[%s7443_s5 + $0x634] sm:$0xf0]  ;;  %v6389_v36 = vld [vmem:[%s7443_s5 + $0x8f0] sm:$0xf] }
 0x194   : > { %4592 = vmatpush.bf16.msra.mxu0 %v5774_v4  ;;  %v7751_v4 = vor.u32 %v6405_v51, %v5207_v54  ;;  %v6666_v51 = vld [vmem:[%s7443_s5 + $0x7b4] sm:$0xf0] }
 0x195   : > { %4606 = vmatpush.bf16.msra.mxu1 %v5838_v6  ;;  %v6672_v6 = vld [vmem:[%s7443_s5 + $0x7e4] sm:$0xf0] }
 0x196   : > { %4620 = vmatpush.bf16.msra.mxu2 %v5902_v8  ;;  %v7755_v8 = vor.u32 %v6406_v55, %v5215_v56  ;;  %v6254_v18 = vor.u32 %v6672_v6, %v6253_v5  ;;  %v6029_v55 = vld [vmem:[%s7443_s5 + $0x620] sm:$0xf]  ;;  %v6616_v56 = vld [vmem:[%s7443_s5 + $0x624] sm:$0xf0]  ;;  %v6158_v6 = vor.u32 %v6648_v61, %v6157_v60 }
 0x197   : > { %4634 = vmatpush.bf16.msra.mxu3 %v5966_v14  ;;  %v6053_v14 = vld [vmem:[%s7443_s5 + $0x650] sm:$0xf]  ;;  %v6030_v1 = vor.u32 %v6616_v56, %v6029_v55  ;;  %v6408_v55 = vld [vmem:[%s8303_s0 + $0x3c] sm:$0xf]  ;;  %v5231_v56 = vld [vmem:[%s8303_s0 + $0x80] sm:$0xf0] }
 0x198   : > { %4593 = vmatpush.bf16.msra.mxu0 %v5766_v22  ;;  %v6245_v22 = vld [vmem:[%s7443_s5 + $0x7d0] sm:$0xf]  ;;  %v6054_v24 = vor.u32 %v6622_v16, %v6053_v14  ;;  %v6688_v60 = vld [vmem:[%s7443_s5 + $0x864] sm:$0xf0]  ;;  %v6381_v61 = vld [vmem:[%s7443_s5 + $0x8e0] sm:$0xf] }
 0x199   : > { %4607 = vmatpush.bf16.msra.mxu1 %v5830_v28  ;;  %v6045_v28 = vld [vmem:[%s7443_s5 + $0x640] sm:$0xf]  ;;  %v6246_v31 = vor.u32 %v6670_v23, %v6245_v22  ;;  %v6149_v16 = vld [vmem:[%s7443_s5 + $0x710] sm:$0xf] }
 0x19a   : > { %4621 = vmatpush.bf16.msra.mxu2 %v5894_v29  ;;  %v6620_v29 = vld [vmem:[%s7443_s5 + $0x644] sm:$0xf0]  ;;  %v6077_v23 = vld [vmem:[%s7443_s5 + $0x680] sm:$0xf] }
 0x19b   : > { %4635 = vmatpush.bf16.msra.mxu3 %v5958_v34  ;;  %v6173_v34 = vld [vmem:[%s7443_s5 + $0x740] sm:$0xf]  ;;  %v6046_v38 = vor.u32 %v6620_v29, %v6045_v28  ;;  %v6150_v29 = vor.u32 %v6646_v17, %v6149_v16 }
 0x19c   : > { %4594 = vmatpush.bf16.msra.mxu0 %v5758_v41  ;;  %v6174_v40 = vor.u32 %v6652_v35, %v6173_v34  ;;  %v6037_v41 = vld [vmem:[%s7443_s5 + $0x630] sm:$0xf]  ;;  %v6690_v35 = vld [vmem:[%s7443_s5 + $0x874] sm:$0xf0] }
 0x19d   : > { %4608 = vmatpush.bf16.msra.mxu1 %v5822_v46  ;;  %v6634_v46 = vld [vmem:[%s7443_s5 + $0x6b4] sm:$0xf0] }
 0x19e   : > { %4622 = vmatpush.bf16.msra.mxu2 %v5886_v47  ;;  %v6165_v47 = vld [vmem:[%s7443_s5 + $0x730] sm:$0xf] }
 0x19f   : > { %4636 = vmatpush.bf16.msra.mxu3 %v5950_v52  ;;  %4595 = vmatmul.bf16.vlgmr.msra.gmra.mxu0 %v7744_v63  ;;  %v6038_v52 = vor.u32 %v6618_v43, %v6037_v41  ;;  %v6166_v54 = vor.u32 %v6650_v48, %v6165_v47  ;;  %v6014_v41 = vor.u32 %v6612_v21, %v6013_v20  ;;  %v5367_v43 = vld [vmem:[%s7443_s5 + $0xf8] sm:$0xf0]  ;;  %v5229_v48 = vld [vmem:[%s8303_s0 + $0x38] sm:$0xf]  ;;  %v6373_v21 = vld [vmem:[%s7443_s5 + $0x8d0] sm:$0xf] }
 0x1a0   : > { %4643 = vmatpush.bf16.msrb.mxu0 %v6070_v53  ;;  %4609 = vmatmul.bf16.vlgmr.msra.gmra.mxu1 %v7751_v4  ;;  %v6102_v53 = vor.u32 %v6634_v46, %v6101_v44  ;;  %v5221_v44 = vld [vmem:[%s8303_s0 + $0x30] sm:$0xf]  ;;  %v6686_v20 = vld [vmem:[%s7443_s5 + $0x854] sm:$0xf0] }
 0x1a1   : > { %4657 = vmatpush.bf16.msrb.mxu1 %v6134_v57  ;;  %4623 = vmatmul.bf16.vlgmr.msra.gmra.mxu2 %v7749_v3  ;;  %v6093_v57 = vld [vmem:[%s7443_s5 + $0x6a0] sm:$0xf] }
 0x1a2   : > { %4671 = vmatpush.bf16.msrb.mxu2 %v6198_v58  ;;  %4637 = vmatmul.bf16.vlgmr.msra.gmra.mxu3 %v7755_v8  ;;  %v6230_v58 = vor.u32 %v6666_v51, %v6229_v50  ;;  %v6094_v5 = vor.u32 %v6632_v59, %v6093_v57  ;;  %v6417_v50 = vld [vmem:[%s8303_s0 + $0x7c] sm:$0xf0]  ;;  %v6407_v51 = vld [vmem:[%s8303_s0 + $0x34] sm:$0xf]  ;;  %v6390_v57 = vor.u32 %v6706_v37, %v6389_v36  ;;  %v6700_v37 = vld [vmem:[%s7443_s5 + $0x8c4] sm:$0xf0] }
 0x1a3   : > { %4685 = vmatpush.bf16.msrb.mxu3 %v6262_v62  ;;  %v6221_v62 = vld [vmem:[%s7443_s5 + $0x7a0] sm:$0xf] }
 0x1a4   : > { %4644 = vmatpush.bf16.msrb.mxu0 %v6062_v9  ;;  %v6614_v9 = vld [vmem:[%s7443_s5 + $0x614] sm:$0xf0]  ;;  %v6222_v14 = vor.u32 %v6664_v0, %v6221_v62  ;;  %v6317_v59 = vld [vmem:[%s7443_s5 + $0x860] sm:$0xf] }
 0x1a5   : > { %4658 = vmatpush.bf16.msrb.mxu1 %v6126_v10  ;;  %v6085_v10 = vld [vmem:[%s7443_s5 + $0x690] sm:$0xf]  ;;  %v6022_v22 = vor.u32 %v6614_v9, %v6021_v2  ;;  %v6431_v2 = vld [vmem:[%s7443_s5 + $0x64] sm:$0xf]  ;;  %v6318_v16 = vor.u32 %v6688_v60, %v6317_v59  ;;  %v6285_v59 = vld [vmem:[%s7443_s5 + $0x820] sm:$0xf] }
 0x1a6   : > { %4672 = vmatpush.bf16.msrb.mxu2 %v6190_v13  ;;  %v6630_v13 = vld [vmem:[%s7443_s5 + $0x694] sm:$0xf0]  ;;  %v6680_v60 = vld [vmem:[%s7443_s5 + $0x824] sm:$0xf0] }
 0x1a7   : > { %4686 = vmatpush.bf16.msrb.mxu3 %v6254_v18  ;;  %v6213_v18 = vld [vmem:[%s7443_s5 + $0x790] sm:$0xf]  ;;  %v6086_v28 = vor.u32 %v6630_v13, %v6085_v10  ;;  %v6447_v10 = vld [vmem:[%s7443_s5 + $0xe4] sm:$0xf]  ;;  %v5359_v13 = vld [vmem:[%s7443_s5 + $0xe8] sm:$0xf0] }
 0x1a8   : > { %4645 = vmatpush.bf16.msrb.mxu0 %v6054_v24  ;;  %v6628_v24 = vld [vmem:[%s7443_s5 + $0x684] sm:$0xf0]  ;;  %v6214_v34 = vor.u32 %v6662_v19, %v6213_v18  ;;  %v6309_v19 = vld [vmem:[%s7443_s5 + $0x850] sm:$0xf] }
 0x1a9   : > { %4659 = vmatpush.bf16.msrb.mxu1 %v6118_v25  ;;  %v6141_v25 = vld [vmem:[%s7443_s5 + $0x700] sm:$0xf]  ;;  %v6078_v46 = vor.u32 %v6628_v24, %v6077_v23  ;;  %v6702_v23 = vld [vmem:[%s7443_s5 + $0x8d4] sm:$0xf0]  ;;  %v6429_v24 = vld [vmem:[%s7443_s5 + $0x54] sm:$0xf] }
 0x1aa   : > { %4673 = vmatpush.bf16.msrb.mxu2 %v6182_v27  ;;  %v6644_v27 = vld [vmem:[%s7443_s5 + $0x704] sm:$0xf0] }
 0x1ab   : > { %4687 = vmatpush.bf16.msrb.mxu3 %v6246_v31  ;;  %v6660_v31 = vld [vmem:[%s7443_s5 + $0x784] sm:$0xf0]  ;;  %v6142_v47 = vor.u32 %v6644_v27, %v6141_v25  ;;  %v5287_v25 = vld [vmem:[%s7443_s5 + $0x58] sm:$0xf0]  ;;  %v6445_v27 = vld [vmem:[%s7443_s5 + $0xd4] sm:$0xf] }
 0x1ac   : > { %4646 = vmatpush.bf16.msrb.mxu0 %v6046_v38  ;;  %v6433_v38 = vld [vmem:[%s7443_s5 + $0x74] sm:$0xf] }
 0x1ad   : > { %4660 = vmatpush.bf16.msrb.mxu1 %v6110_v39  ;;  %v5303_v39 = vld [vmem:[%s7443_s5 + $0x78] sm:$0xf0] }
 0x1ae   : > { %4674 = vmatpush.bf16.msrb.mxu2 %v6174_v40  ;;  %v6449_v40 = vld [vmem:[%s7443_s5 + $0xf4] sm:$0xf] }
 0x1af   : > { %4688 = vmatpush.bf16.msrb.mxu3 %v6238_v45  ;;  %v6416_v45 = vld [vmem:[%s8303_s0 + $0x74] sm:$0xf0]  ;;  %v5370_v62 = vor.u32 %v6449_v40, %v5367_v43  ;;  %v6443_v40 = vld [vmem:[%s7443_s5 + $0xc4] sm:$0xf] }
 0x1b0   : > { %4647 = vmatpush.bf16.msrb.mxu0 %v6038_v52  ;;  %v6206_v52 = vor.u32 %v6660_v31, %v6205_v30  ;;  %v7844_v0 = vor.u32 %v6416_v45, %v5221_v44  ;;  %v6374_v30 = vor.u32 %v6702_v23, %v6373_v21  ;;  %v5290_v31 = vor.u32 %v6429_v24, %v5287_v25  ;;  %v6341_v21 = vld [vmem:[%s7443_s5 + $0x890] sm:$0xf]  ;;  %v6694_v23 = vld [vmem:[%s7443_s5 + $0x894] sm:$0xf0]  ;;  %v6421_v24 = vld [vmem:[%s7443_s5 + $0x14] sm:$0xf] }
 0x1b1   : > { %4661 = vmatpush.bf16.msrb.mxu1 %v6102_v53  ;;  %v6326_v53 = vor.u32 %v6690_v35, %v6325_v32  ;;  %v6301_v32 = vld [vmem:[%s7443_s5 + $0x840] sm:$0xf]  ;;  %v5255_v25 = vld [vmem:[%s7443_s5 + $0x18] sm:$0xf0] }
 0x1b2   : > { %4675 = vmatpush.bf16.msrb.mxu2 %v6166_v54  ;;  %v5223_v54 = vld [vmem:[%s8303_s0 + $0x78] sm:$0xf0]  ;;  %v6365_v35 = vld [vmem:[%s7443_s5 + $0x8c0] sm:$0xf] }
 0x1b3   : > { %4689 = vmatpush.bf16.msrb.mxu3 %v6230_v58  ;;  %v5306_v58 = vor.u32 %v6433_v38, %v5303_v39  ;;  %v7851_v9 = vor.u32 %v6407_v51, %v5223_v54  ;;  %v6427_v38 = vld [vmem:[%s7443_s5 + $0x44] sm:$0xf]  ;;  %v5279_v39 = vld [vmem:[%s7443_s5 + $0x48] sm:$0xf0]  ;;  %v6366_v44 = vor.u32 %v6700_v37, %v6365_v35  ;;  %v6698_v51 = vld [vmem:[%s7443_s5 + $0x8b4] sm:$0xf0]  ;;  %v5258_v35 = vor.u32 %v6421_v24, %v5255_v25 }
 0x1b4   : > { %4648 = vmatpush.bf16.msrb.mxu0 %v6030_v1  ;;  %v6704_v1 = vld [vmem:[%s7443_s5 + $0x8e4] sm:$0xf0]  ;;  %v5282_v45 = vor.u32 %v6427_v38, %v5279_v39  ;;  %v6441_v54 = vld [vmem:[%s7443_s5 + $0xb4] sm:$0xf]  ;;  %v6419_v37 = vld [vmem:[%s7443_s5 + $0x4] sm:$0xf] }
 0x1b5   : > { %4662 = vmatpush.bf16.msrb.mxu1 %v6094_v5  ;;  %v5295_v5 = vld [vmem:[%s7443_s5 + $0x68] sm:$0xf0]  ;;  %v6382_v17 = vor.u32 %v6704_v1, %v6381_v61  ;;  %v6349_v61 = vld [vmem:[%s7443_s5 + $0x8a0] sm:$0xf]  ;;  %v6696_v1 = vld [vmem:[%s7443_s5 + $0x8a4] sm:$0xf0] }
 0x1b6   : > { %4676 = vmatpush.bf16.msrb.mxu2 %v6158_v6  ;;  %v7849_v6 = vor.u32 %v6417_v50, %v5229_v48  ;;  %v5298_v18 = vor.u32 %v6431_v2, %v5295_v5  ;;  %v6357_v48 = vld [vmem:[%s7443_s5 + $0x8b0] sm:$0xf]  ;;  %v6423_v2 = vld [vmem:[%s7443_s5 + $0x24] sm:$0xf]  ;;  %v5263_v5 = vld [vmem:[%s7443_s5 + $0x28] sm:$0xf0] }
 0x1b7   : > { %4690 = vmatpush.bf16.msrb.mxu3 %v6222_v14  ;;  %v7855_v14 = vor.u32 %v6408_v55, %v5231_v56  ;;  %v5335_v55 = vld [vmem:[%s7443_s5 + $0xb8] sm:$0xf0]  ;;  %v5247_v38 = vld [vmem:[%s7443_s5 + $0x8] sm:$0xf0]  ;;  %v6461_v25 = vld [vmem:[%s7443_s5 + $0x154] sm:$0xf] }
 0x1b8   : > { %4649 = vmatpush.bf16.msrb.mxu0 %v6022_v22  ;;  %v5362_v22 = vor.u32 %v6447_v10, %v5359_v13  ;;  %v6439_v10 = vld [vmem:[%s7443_s5 + $0xa4] sm:$0xf]  ;;  %v5327_v13 = vld [vmem:[%s7443_s5 + $0xa8] sm:$0xf0] }
 0x1b9   : > { %4663 = vmatpush.bf16.msrb.mxu1 %v6086_v28  ;;  %v5351_v28 = vld [vmem:[%s7443_s5 + $0xd8] sm:$0xf0] }
 0x1ba   : > { %4677 = vmatpush.bf16.msrb.mxu2 %v6150_v29  ;;  %v6310_v29 = vor.u32 %v6686_v20, %v6309_v19  ;;  %v5354_v36 = vor.u32 %v6445_v27, %v5351_v28  ;;  %v6277_v19 = vld [vmem:[%s7443_s5 + $0x810] sm:$0xf]  ;;  %v6678_v20 = vld [vmem:[%s7443_s5 + $0x814] sm:$0xf0]  ;;  %v6437_v27 = vld [vmem:[%s7443_s5 + $0x94] sm:$0xf] }
 0x1bb   : > { %4691 = vmatpush.bf16.msrb.mxu3 %v6214_v34  ;;  %v6684_v34 = vld [vmem:[%s7443_s5 + $0x844] sm:$0xf0]  ;;  %v5319_v28 = vld [vmem:[%s7443_s5 + $0x98] sm:$0xf0] }
 0x1bc   : > { %4650 = vmatpush.bf16.msrb.mxu0 %v6014_v41  ;;  %v5343_v41 = vld [vmem:[%s7443_s5 + $0xc8] sm:$0xf0]  ;;  %v6302_v43 = vor.u32 %v6684_v34, %v6301_v32  ;;  %v6333_v32 = vld [vmem:[%s7443_s5 + $0x880] sm:$0xf]  ;;  %v6342_v34 = vor.u32 %v6694_v23, %v6341_v21  ;;  %v5322_v39 = vor.u32 %v6437_v27, %v5319_v28  ;;  %v5415_v27 = vld [vmem:[%s7443_s5 + $0x158] sm:$0xf0] }
 0x1bd   : > { %4664 = vmatpush.bf16.msrb.mxu1 %v6078_v46  ;;  %v6293_v46 = vld [vmem:[%s7443_s5 + $0x830] sm:$0xf]  ;;  %v5346_v50 = vor.u32 %v6443_v40, %v5343_v41  ;;  %v6435_v40 = vld [vmem:[%s7443_s5 + $0x84] sm:$0xf]  ;;  %v5311_v41 = vld [vmem:[%s7443_s5 + $0x88] sm:$0xf0] }
 0x1be   : > { %4678 = vmatpush.bf16.msrb.mxu2 %v6142_v47  ;;  %v6682_v47 = vld [vmem:[%s7443_s5 + $0x834] sm:$0xf0]  ;;  %v5615_v21 = vld [vmem:[%s7443_s5 + $0x2e8] sm:$0xf0]  ;;  %v6477_v28 = vld [vmem:[%s7443_s5 + $0x1d4] sm:$0xf] }
 0x1bf   : > { %4692 = vmatpush.bf16.msrb.mxu3 %v6206_v52  ;;  %4651 = vmatmul.bf16.vlgmr.msrb.gmra.mxu0 %v7844_v0  ;;  %v6425_v52 = vld [vmem:[%s7443_s5 + $0x34] sm:$0xf]  ;;  %v6294_v56 = vor.u32 %v6682_v47, %v6293_v46  ;;  %v5495_v46 = vld [vmem:[%s7443_s5 + $0x1f8] sm:$0xf0] }
 0x1c0   : > { %4699 = vmatpush.bf16.msra.mxu0 %v6326_v53  ;;  %4665 = vmatmul.bf16.vlgmr.msrb.gmra.mxu1 %v7851_v9  ;;  %v5271_v53 = vld [vmem:[%s7443_s5 + $0x38] sm:$0xf0] }
 0x1c1   : > { %4713 = vmatpush.bf16.msra.mxu1 %v6390_v57  ;;  %4679 = vmatmul.bf16.vlgmr.msrb.gmra.mxu2 %v7849_v6  ;;  %v6358_v57 = vor.u32 %v6698_v51, %v6357_v48  ;;  %v6497_v48 = vld [vmem:[%s7443_s5 + $0x274] sm:$0xf] }
 0x1c2   : > { %4727 = vmatpush.bf16.msra.mxu2 %v5306_v58  ;;  %4693 = vmatmul.bf16.vlgmr.msrb.gmra.mxu3 %v7855_v14  ;;  %v5274_v58 = vor.u32 %v6425_v52, %v5271_v53  ;;  %v6513_v51 = vld [vmem:[%s7443_s5 + $0x2f4] sm:$0xf]  ;;  %v5250_v53 = vor.u32 %v6419_v37, %v5247_v38 }
 0x1c3   : > { %4741 = vmatpush.bf16.msra.mxu3 %v5370_v62  ;;  %v5338_v62 = vor.u32 %v6441_v54, %v5335_v55  ;;  %v5623_v54 = vld [vmem:[%s7443_s5 + $0x2f8] sm:$0xf0]  ;;  %v5237_v55 = vld [vmem:[%s8303_s0 + $0x40] sm:$0xf] }
 0x1c4   : > { %4700 = vmatpush.bf16.msra.mxu0 %v6318_v16  ;;  %v6286_v16 = vor.u32 %v6680_v60, %v6285_v59  ;;  %v6409_v59 = vld [vmem:[%s8303_s0 + $0x44] sm:$0xf]  ;;  %v5239_v60 = vld [vmem:[%s8303_s0 + $0x88] sm:$0xf0] }
 0x1c5   : > { %4714 = vmatpush.bf16.msra.mxu1 %v6382_v17  ;;  %v6350_v17 = vor.u32 %v6696_v1, %v6349_v61  ;;  %v6463_v1 = vld [vmem:[%s7443_s5 + $0x164] sm:$0xf] }
 0x1c6   : > { %4728 = vmatpush.bf16.msra.mxu2 %v5298_v18  ;;  %v5266_v18 = vor.u32 %v6423_v2, %v5263_v5  ;;  %v5423_v2 = vld [vmem:[%s7443_s5 + $0x168] sm:$0xf0]  ;;  %v6479_v5 = vld [vmem:[%s7443_s5 + $0x1e4] sm:$0xf] }
 0x1c7   : > { %4742 = vmatpush.bf16.msra.mxu3 %v5362_v22  ;;  %v5330_v22 = vor.u32 %v6439_v10, %v5327_v13  ;;  %v5626_v10 = vor.u32 %v6513_v51, %v5623_v54  ;;  %v6457_v51 = vld [vmem:[%s7443_s5 + $0x134] sm:$0xf] }
 0x1c8   : > { %4701 = vmatpush.bf16.msra.mxu0 %v6310_v29  ;;  %v6278_v29 = vor.u32 %v6678_v20, %v6277_v19  ;;  %v7937_v19 = vor.u32 %v6409_v59, %v5239_v60  ;;  %v6511_v20 = vld [vmem:[%s7443_s5 + $0x2e4] sm:$0xf]  ;;  %v5591_v59 = vld [vmem:[%s7443_s5 + $0x2b8] sm:$0xf0] }
 0x1c9   : > { %4715 = vmatpush.bf16.msra.mxu1 %v6374_v30  ;;  %v6269_v30 = vld [vmem:[%s7443_s5 + $0x800] sm:$0xf] }
 0x1ca   : > { %4729 = vmatpush.bf16.msra.mxu2 %v5290_v31  ;;  %v6676_v31 = vld [vmem:[%s7443_s5 + $0x804] sm:$0xf0] }
 0x1cb   : > { %4743 = vmatpush.bf16.msra.mxu3 %v5354_v36  ;;  %v6692_v36 = vld [vmem:[%s7443_s5 + $0x884] sm:$0xf0]  ;;  %v6270_v47 = vor.u32 %v6676_v31, %v6269_v30  ;;  %v5479_v30 = vld [vmem:[%s7443_s5 + $0x1d8] sm:$0xf0]  ;;  %v6493_v31 = vld [vmem:[%s7443_s5 + $0x254] sm:$0xf] }
 0x1cc   : > { %4702 = vmatpush.bf16.msra.mxu0 %v6302_v43  ;;  %v6465_v43 = vld [vmem:[%s7443_s5 + $0x174] sm:$0xf]  ;;  %v6334_v52 = vor.u32 %v6692_v36, %v6333_v32  ;;  %v5543_v32 = vld [vmem:[%s7443_s5 + $0x258] sm:$0xf0]  ;;  %v5418_v36 = vor.u32 %v6461_v25, %v5415_v27  ;;  %v5482_v37 = vor.u32 %v6477_v28, %v5479_v30 }
 0x1cd   : > { %4716 = vmatpush.bf16.msra.mxu1 %v6366_v44  ;;  %v5431_v44 = vld [vmem:[%s7443_s5 + $0x178] sm:$0xf0]  ;;  %v5546_v38 = vor.u32 %v6493_v31, %v5543_v32  ;;  %v6453_v25 = vld [vmem:[%s7443_s5 + $0x114] sm:$0xf] }
 0x1ce   : > { %4730 = vmatpush.bf16.msra.mxu2 %v5282_v45  ;;  %v6481_v45 = vld [vmem:[%s7443_s5 + $0x1f4] sm:$0xf]  ;;  %v5383_v27 = vld [vmem:[%s7443_s5 + $0x118] sm:$0xf0] }
 0x1cf   : > { %4744 = vmatpush.bf16.msra.mxu3 %v5346_v50  ;;  %v5559_v50 = vld [vmem:[%s7443_s5 + $0x278] sm:$0xf0]  ;;  %v5498_v61 = vor.u32 %v6481_v45, %v5495_v46  ;;  %v5535_v45 = vld [vmem:[%s7443_s5 + $0x248] sm:$0xf0]  ;;  %v6507_v46 = vld [vmem:[%s7443_s5 + $0x2c4] sm:$0xf] }
 0x1d0   : > { %4703 = vmatpush.bf16.msra.mxu0 %v6294_v56  ;;  %v6418_v56 = vld [vmem:[%s8303_s0 + $0x84] sm:$0xf0]  ;;  %v6469_v28 = vld [vmem:[%s7443_s5 + $0x194] sm:$0xf]  ;;  %v5447_v30 = vld [vmem:[%s7443_s5 + $0x198] sm:$0xf0] }
 0x1d1   : > { %4717 = vmatpush.bf16.msra.mxu1 %v6358_v57  ;;  %v5314_v57 = vor.u32 %v6435_v40, %v5311_v41  ;;  %v7932_v13 = vor.u32 %v6418_v56, %v5237_v55  ;;  %v5407_v40 = vld [vmem:[%s7443_s5 + $0x148] sm:$0xf0]  ;;  %v6475_v41 = vld [vmem:[%s7443_s5 + $0x1c4] sm:$0xf]  ;;  %v5463_v55 = vld [vmem:[%s7443_s5 + $0x1b8] sm:$0xf0] }
 0x1d2   : > { %4731 = vmatpush.bf16.msra.mxu2 %v5274_v58  ;;  %v5434_v58 = vor.u32 %v6465_v43, %v5431_v44  ;;  %v5471_v44 = vld [vmem:[%s7443_s5 + $0x1c8] sm:$0xf0]  ;;  %v6489_v56 = vld [vmem:[%s7443_s5 + $0x234] sm:$0xf]  ;;  %v5511_v32 = vld [vmem:[%s7443_s5 + $0x218] sm:$0xf0] }
 0x1d3   : > { %4745 = vmatpush.bf16.msra.mxu3 %v5338_v62  ;;  %v5562_v62 = vor.u32 %v6497_v48, %v5559_v50  ;;  %v5474_v48 = vor.u32 %v6475_v41, %v5471_v44  ;;  %v6485_v31 = vld [vmem:[%s7443_s5 + $0x214] sm:$0xf]  ;;  %v6467_v41 = vld [vmem:[%s7443_s5 + $0x184] sm:$0xf] }
 0x1d4   : > { %4704 = vmatpush.bf16.msra.mxu0 %v6286_v16  ;;  %v5487_v16 = vld [vmem:[%s7443_s5 + $0x1e8] sm:$0xf0]  ;;  %v6483_v44 = vld [vmem:[%s7443_s5 + $0x204] sm:$0xf] }
 0x1d5   : > { %4718 = vmatpush.bf16.msra.mxu1 %v6350_v17  ;;  %v6495_v17 = vld [vmem:[%s7443_s5 + $0x264] sm:$0xf]  ;;  %v5490_v23 = vor.u32 %v6479_v5, %v5487_v16  ;;  %v5455_v16 = vld [vmem:[%s7443_s5 + $0x1a8] sm:$0xf0] }
 0x1d6   : > { %4732 = vmatpush.bf16.msra.mxu2 %v5266_v18  ;;  %v5551_v18 = vld [vmem:[%s7443_s5 + $0x268] sm:$0xf0]  ;;  %v6471_v5 = vld [vmem:[%s7443_s5 + $0x1a4] sm:$0xf] }
 0x1d7   : > { %4746 = vmatpush.bf16.msra.mxu3 %v5330_v22  ;;  %v5426_v22 = vor.u32 %v6463_v1, %v5423_v2  ;;  %v5554_v24 = vor.u32 %v6495_v17, %v5551_v18  ;;  %v6455_v1 = vld [vmem:[%s7443_s5 + $0x124] sm:$0xf]  ;;  %v5391_v2 = vld [vmem:[%s7443_s5 + $0x128] sm:$0xf0] }
 0x1d8   : > { %4705 = vmatpush.bf16.msra.mxu0 %v6278_v29  ;;  %v5618_v29 = vor.u32 %v6511_v20, %v5615_v21  ;;  %v6487_v17 = vld [vmem:[%s7443_s5 + $0x224] sm:$0xf]  ;;  %v5519_v18 = vld [vmem:[%s7443_s5 + $0x228] sm:$0xf0] }
 0x1d9   : > { %4719 = vmatpush.bf16.msra.mxu1 %v6342_v34  ;;  %v6509_v34 = vld [vmem:[%s7443_s5 + $0x2d4] sm:$0xf]  ;;  %v6503_v20 = vld [vmem:[%s7443_s5 + $0x2a4] sm:$0xf]  ;;  %v5583_v21 = vld [vmem:[%s7443_s5 + $0x2a8] sm:$0xf0] }
 0x1da   : > { %4733 = vmatpush.bf16.msra.mxu2 %v5258_v35  ;;  %v5607_v35 = vld [vmem:[%s7443_s5 + $0x2d8] sm:$0xf0] }
 0x1db   : > { %4747 = vmatpush.bf16.msra.mxu3 %v5322_v39  ;;  %v6459_v39 = vld [vmem:[%s7443_s5 + $0x144] sm:$0xf]  ;;  %v5610_v43 = vor.u32 %v6509_v34, %v5607_v35  ;;  %v6501_v34 = vld [vmem:[%s7443_s5 + $0x294] sm:$0xf]  ;;  %v5575_v35 = vld [vmem:[%s7443_s5 + $0x298] sm:$0xf0] }
 0x1dc   : > { %4706 = vmatpush.bf16.msra.mxu0 %v6270_v47  ;;  %v5410_v47 = vor.u32 %v6459_v39, %v5407_v40  ;;  %v5450_v39 = vor.u32 %v6469_v28, %v5447_v30  ;;  %v5514_v40 = vor.u32 %v6485_v31, %v5511_v32  ;;  %v6541_v28 = vld [vmem:[%s7443_s5 + $0x3d4] sm:$0xf]  ;;  %v5735_v30 = vld [vmem:[%s7443_s5 + $0x3d8] sm:$0xf0] }
 0x1dd   : > { %4720 = vmatpush.bf16.msra.mxu1 %v6334_v52  ;;  %v5399_v52 = vld [vmem:[%s7443_s5 + $0x138] sm:$0xf0]  ;;  %v6557_v31 = vld [vmem:[%s7443_s5 + $0x454] sm:$0xf] }
 0x1de   : > { %4734 = vmatpush.bf16.msra.mxu2 %v5250_v53  ;;  %v6473_v53 = vld [vmem:[%s7443_s5 + $0x1b4] sm:$0xf]  ;;  %v5402_v60 = vor.u32 %v6457_v51, %v5399_v52  ;;  %v5751_v52 = vld [vmem:[%s7443_s5 + $0x3f8] sm:$0xf0] }
 0x1df   : > { %4748 = vmatpush.bf16.msra.mxu3 %v5314_v57  ;;  %4707 = vmatmul.bf16.vlgmr.msra.gmra.mxu0 %v7932_v13  ;;  %v5527_v57 = vld [vmem:[%s7443_s5 + $0x238] sm:$0xf0] }
 0x1e0   : > { %4755 = vmatpush.bf16.msrb.mxu0 %v5434_v58  ;;  %4721 = vmatmul.bf16.vlgmr.msra.gmra.mxu1 %v7937_v19  ;;  %v6505_v58 = vld [vmem:[%s7443_s5 + $0x2b4] sm:$0xf]  ;;  %v5799_v32 = vld [vmem:[%s7443_s5 + $0x458] sm:$0xf0] }
 0x1e1   : > { %4769 = vmatpush.bf16.msrb.mxu1 %v5498_v61  ;;  %4735 = vmatmul.bf16.vlgmr.msra.gmra.mxu2 %v7536_v26  ;;  %v6491_v26 = vld [vmem:[%s7443_s5 + $0x244] sm:$0xf]  ;;  %v5466_v61 = vor.u32 %v6473_v53, %v5463_v55  ;;  %v6561_v53 = vld [vmem:[%s7443_s5 + $0x474] sm:$0xf] }
 0x1e2   : > { %4783 = vmatpush.bf16.msrb.mxu2 %v5562_v62  ;;  %4749 = vmatmul.bf16.vlgmr.msra.gmra.mxu3 %v7560_v42  ;;  %v5599_v42 = vld [vmem:[%s7443_s5 + $0x2c8] sm:$0xf0]  ;;  %v5538_v50 = vor.u32 %v6491_v26, %v5535_v45  ;;  %v5530_v62 = vor.u32 %v6489_v56, %v5527_v57  ;;  %v5578_v26 = vor.u32 %v6501_v34, %v5575_v35  ;;  %v6577_v57 = vld [vmem:[%s7443_s5 + $0x4f4] sm:$0xf]  ;;  %v5863_v35 = vld [vmem:[%s7443_s5 + $0x4d8] sm:$0xf0] }
 0x1e3   : > { %4797 = vmatpush.bf16.msrb.mxu3 %v5626_v10  ;;  %v5602_v54 = vor.u32 %v6507_v46, %v5599_v42  ;;  %v5594_v10 = vor.u32 %v6505_v58, %v5591_v59  ;;  %v5503_v45 = vld [vmem:[%s7443_s5 + $0x208] sm:$0xf0]  ;;  %v6499_v46 = vld [vmem:[%s7443_s5 + $0x284] sm:$0xf]  ;;  %v5879_v58 = vld [vmem:[%s7443_s5 + $0x4f8] sm:$0xf0] }
 0x1e4   : > { %4756 = vmatpush.bf16.msrb.mxu0 %v5426_v22  ;;  %v5394_v22 = vor.u32 %v6455_v1, %v5391_v2  ;;  %v5567_v42 = vld [vmem:[%s7443_s5 + $0x288] sm:$0xf0]  ;;  %v5506_v56 = vor.u32 %v6483_v44, %v5503_v45  ;;  %v6527_v1 = vld [vmem:[%s7443_s5 + $0x364] sm:$0xf]  ;;  %v6573_v34 = vld [vmem:[%s7443_s5 + $0x4d4] sm:$0xf] }
 0x1e5   : > { %4770 = vmatpush.bf16.msrb.mxu1 %v5490_v23  ;;  %v5458_v23 = vor.u32 %v6471_v5, %v5455_v16  ;;  %v5570_v59 = vor.u32 %v6499_v46, %v5567_v42  ;;  %v5679_v2 = vld [vmem:[%s7443_s5 + $0x368] sm:$0xf0]  ;;  %v6543_v5 = vld [vmem:[%s7443_s5 + $0x3e4] sm:$0xf]  ;;  %v6521_v42 = vld [vmem:[%s7443_s5 + $0x334] sm:$0xf] }
 0x1e6   : > { %4784 = vmatpush.bf16.msrb.mxu2 %v5554_v24  ;;  %v5522_v24 = vor.u32 %v6487_v17, %v5519_v18  ;;  %v5743_v16 = vld [vmem:[%s7443_s5 + $0x3e8] sm:$0xf0]  ;;  %v6559_v17 = vld [vmem:[%s7443_s5 + $0x464] sm:$0xf] }
 0x1e7   : > { %4798 = vmatpush.bf16.msrb.mxu3 %v5618_v29  ;;  %v5586_v29 = vor.u32 %v6503_v20, %v5583_v21  ;;  %v5807_v18 = vld [vmem:[%s7443_s5 + $0x468] sm:$0xf0]  ;;  %v6575_v20 = vld [vmem:[%s7443_s5 + $0x4e4] sm:$0xf] }
 0x1e8   : > { %4757 = vmatpush.bf16.msrb.mxu0 %v5418_v36  ;;  %v5386_v36 = vor.u32 %v6453_v25, %v5383_v27  ;;  %v5871_v21 = vld [vmem:[%s7443_s5 + $0x4e8] sm:$0xf0]  ;;  %v6525_v25 = vld [vmem:[%s7443_s5 + $0x354] sm:$0xf]  ;;  %v5671_v27 = vld [vmem:[%s7443_s5 + $0x358] sm:$0xf0] }
 0x1e9   : > { %4771 = vmatpush.bf16.msrb.mxu1 %v5482_v37  ;;  %v6451_v37 = vld [vmem:[%s7443_s5 + $0x104] sm:$0xf]  ;;  %v5855_v44 = vld [vmem:[%s7443_s5 + $0x4c8] sm:$0xf0] }
 0x1ea   : > { %4785 = vmatpush.bf16.msrb.mxu2 %v5546_v38  ;;  %v5375_v38 = vld [vmem:[%s7443_s5 + $0x108] sm:$0xf0] }
 0x1eb   : > { %4799 = vmatpush.bf16.msrb.mxu3 %v5610_v43  ;;  %v5439_v43 = vld [vmem:[%s7443_s5 + $0x188] sm:$0xf0]  ;;  %v5378_v51 = vor.u32 %v6451_v37, %v5375_v38  ;;  %v5802_v37 = vor.u32 %v6557_v31, %v5799_v32  ;;  %v6523_v38 = vld [vmem:[%s7443_s5 + $0x344] sm:$0xf] }
 0x1ec   : > { %4758 = vmatpush.bf16.msrb.mxu0 %v5410_v47  ;;  %v6529_v47 = vld [vmem:[%s7443_s5 + $0x374] sm:$0xf]  ;;  %v5442_v55 = vor.u32 %v6467_v41, %v5439_v43  ;;  %v6555_v41 = vld [vmem:[%s7443_s5 + $0x444] sm:$0xf] }
 0x1ed   : > { %4772 = vmatpush.bf16.msrb.mxu1 %v5474_v48  ;;  %v5687_v48 = vld [vmem:[%s7443_s5 + $0x378] sm:$0xf0]  ;;  %v6571_v43 = vld [vmem:[%s7443_s5 + $0x4c4] sm:$0xf] }
 0x1ee   : > { %4786 = vmatpush.bf16.msrb.mxu2 %v5538_v50  ;;  %v6545_v50 = vld [vmem:[%s7443_s5 + $0x3f4] sm:$0xf]  ;;  %v6515_v32 = vld [vmem:[%s7443_s5 + $0x304] sm:$0xf] }
 0x1ef   : > { %4800 = vmatpush.bf16.msrb.mxu3 %v5602_v54  ;;  %v5815_v54 = vld [vmem:[%s7443_s5 + $0x478] sm:$0xf0] }
 0x1f0   : > { %4759 = vmatpush.bf16.msrb.mxu0 %v5402_v60  ;;  %v5690_v60 = vor.u32 %v6529_v47, %v5687_v48  ;;  %v5655_v47 = vld [vmem:[%s7443_s5 + $0x338] sm:$0xf0]  ;;  %v6537_v48 = vld [vmem:[%s7443_s5 + $0x3b4] sm:$0xf] }
 0x1f1   : > { %4773 = vmatpush.bf16.msrb.mxu1 %v5466_v61  ;;  %v5754_v61 = vor.u32 %v6545_v50, %v5751_v52  ;;  %v5858_v50 = vor.u32 %v6571_v43, %v5855_v44  ;;  %v6553_v52 = vld [vmem:[%s7443_s5 + $0x434] sm:$0xf]  ;;  %v5943_v43 = vld [vmem:[%s7443_s5 + $0x578] sm:$0xf0] }
 0x1f2   : > { %4787 = vmatpush.bf16.msrb.mxu2 %v5530_v62  ;;  %v5818_v62 = vor.u32 %v6561_v53, %v5815_v54  ;;  %v5783_v53 = vld [vmem:[%s7443_s5 + $0x438] sm:$0xf0]  ;;  %v6569_v54 = vld [vmem:[%s7443_s5 + $0x4b4] sm:$0xf] }
 0x1f3   : > { %4801 = vmatpush.bf16.msrb.mxu3 %v5594_v10  ;;  %v5882_v10 = vor.u32 %v6577_v57, %v5879_v58  ;;  %v5786_v58 = vor.u32 %v6553_v52, %v5783_v53  ;;  %v6609_v44 = vld [vmem:[%s7443_s5 + $0x5f4] sm:$0xf]  ;;  %v6135_v52 = vld [vmem:[%s7443_s5 + $0x6f8] sm:$0xf0] }
 0x1f4   : > { %4760 = vmatpush.bf16.msrb.mxu0 %v5394_v22  ;;  %v5682_v22 = vor.u32 %v6527_v1, %v5679_v2  ;;  %v5711_v1 = vld [vmem:[%s7443_s5 + $0x3a8] sm:$0xf0]  ;;  %v6551_v2 = vld [vmem:[%s7443_s5 + $0x424] sm:$0xf] }
 0x1f5   : > { %4774 = vmatpush.bf16.msrb.mxu1 %v5458_v23  ;;  %v5746_v23 = vor.u32 %v6543_v5, %v5743_v16  ;;  %v5775_v5 = vld [vmem:[%s7443_s5 + $0x428] sm:$0xf0] }
 0x1f6   : > { %4788 = vmatpush.bf16.msrb.mxu2 %v5522_v24  ;;  %v5810_v24 = vor.u32 %v6559_v17, %v5807_v18  ;;  %v5839_v16 = vld [vmem:[%s7443_s5 + $0x4a8] sm:$0xf0] }
 0x1f7   : > { %4802 = vmatpush.bf16.msrb.mxu3 %v5586_v29  ;;  %v5874_v29 = vor.u32 %v6575_v20, %v5871_v21  ;;  %v5778_v20 = vor.u32 %v6551_v2, %v5775_v5  ;;  %v6517_v21 = vld [vmem:[%s7443_s5 + $0x314] sm:$0xf]  ;;  %v6639_v2 = vld [vmem:[%s7443_s5 + $0x6e4] sm:$0xf]  ;;  %v6127_v5 = vld [vmem:[%s7443_s5 + $0x6e8] sm:$0xf0] }
 0x1f8   : > { %4761 = vmatpush.bf16.msrb.mxu0 %v5386_v36  ;;  %v5738_v36 = vor.u32 %v6541_v28, %v5735_v30  ;;  %v5767_v28 = vld [vmem:[%s7443_s5 + $0x418] sm:$0xf0] }
 0x1f9   : > { %4775 = vmatpush.bf16.msrb.mxu1 %v5450_v39  ;;  %v6539_v39 = vld [vmem:[%s7443_s5 + $0x3c4] sm:$0xf]  ;;  %v5831_v30 = vld [vmem:[%s7443_s5 + $0x498] sm:$0xf0] }
 0x1fa   : > { %4789 = vmatpush.bf16.msrb.mxu2 %v5514_v40  ;;  %v5727_v40 = vld [vmem:[%s7443_s5 + $0x3c8] sm:$0xf0] }
 0x1fb   : > { %4803 = vmatpush.bf16.msrb.mxu3 %v5578_v26  ;;  %v5730_v45 = vor.u32 %v6539_v39, %v5727_v40  ;;  %v5759_v39 = vld [vmem:[%s7443_s5 + $0x408] sm:$0xf0] }
 0x1fc   : > { %4762 = vmatpush.bf16.msrb.mxu0 %v5378_v51  ;;  %v5719_v51 = vld [vmem:[%s7443_s5 + $0x3b8] sm:$0xf0]  ;;  %v5823_v40 = vld [vmem:[%s7443_s5 + $0x488] sm:$0xf0] }
 0x1fd   : > { %4776 = vmatpush.bf16.msrb.mxu1 %v5442_v55  ;;  %v5847_v55 = vld [vmem:[%s7443_s5 + $0x4b8] sm:$0xf0]  ;;  %v5722_v57 = vor.u32 %v6537_v48, %v5719_v51  ;;  %v6641_v51 = vld [vmem:[%s7443_s5 + $0x6f4] sm:$0xf] }
 0x1fe   : > { %4790 = vmatpush.bf16.msrb.mxu2 %v5506_v56  ;;  %v5658_v56 = vor.u32 %v6521_v42, %v5655_v47  ;;  %v6625_v42 = vld [vmem:[%s7443_s5 + $0x674] sm:$0xf]  ;;  %v6071_v47 = vld [vmem:[%s7443_s5 + $0x678] sm:$0xf0] }
 0x1ff   : > { %4804 = vmatpush.bf16.msrb.mxu3 %v5570_v59  ;;  %4763 = vmatmul.bf16.vlgmr.msrb.gmra.mxu0 %v7544_v33  ;;  %v5674_v33 = vor.u32 %v6525_v25, %v5671_v27  ;;  %v6519_v59 = vld [vmem:[%s7443_s5 + $0x324] sm:$0xf]  ;;  %v5703_v25 = vld [vmem:[%s7443_s5 + $0x398] sm:$0xf0]  ;;  %v6549_v27 = vld [vmem:[%s7443_s5 + $0x414] sm:$0xf] }
 0x200   : > { %4811 = vmatpush.bf16.msra.mxu0 %v5690_v60  ;;  %4777 = vmatmul.bf16.vlgmr.msrb.gmra.mxu1 %v7568_v49  ;;  %v5866_v49 = vor.u32 %v6573_v34, %v5863_v35  ;;  %v5647_v60 = vld [vmem:[%s7443_s5 + $0x328] sm:$0xf0] }
 0x201   : > { %4825 = vmatpush.bf16.msra.mxu1 %v5754_v61  ;;  %4791 = vmatmul.bf16.vlgmr.msrb.gmra.mxu2 %v7644_v7  ;;  %v5663_v7 = vld [vmem:[%s7443_s5 + $0x348] sm:$0xf0]  ;;  %v6535_v61 = vld [vmem:[%s7443_s5 + $0x3a4] sm:$0xf]  ;;  %v5650_v17 = vor.u32 %v6519_v59, %v5647_v60  ;;  %v6138_v60 = vor.u32 %v6641_v51, %v6135_v52  ;;  %v6633_v51 = vld [vmem:[%s7443_s5 + $0x6b4] sm:$0xf] }
 0x202   : > { %4839 = vmatpush.bf16.msra.mxu2 %v5818_v62  ;;  %4805 = vmatmul.bf16.vlgmr.msrb.gmra.mxu3 %v7651_v12  ;;  %v5791_v12 = vld [vmem:[%s7443_s5 + $0x448] sm:$0xf0]  ;;  %v5666_v26 = vor.u32 %v6523_v38, %v5663_v7  ;;  %v5850_v62 = vor.u32 %v6569_v54, %v5847_v55  ;;  %v5714_v18 = vor.u32 %v6535_v61, %v5711_v1  ;;  %v6547_v38 = vld [vmem:[%s7443_s5 + $0x404] sm:$0xf]  ;;  %v6103_v52 = vld [vmem:[%s7443_s5 + $0x6b8] sm:$0xf0] }
 0x203   : > { %4853 = vmatpush.bf16.msra.mxu3 %v5882_v10  ;;  %v5794_v46 = vor.u32 %v6555_v41, %v5791_v12  ;;  %v6567_v10 = vld [vmem:[%s7443_s5 + $0x4a4] sm:$0xf]  ;;  %v5631_v34 = vld [vmem:[%s7443_s5 + $0x308] sm:$0xf0]  ;;  %v8061_v41 = vpop.f32.mrf.mxu0  ;;  %v6593_v12 = vld [vmem:[%s7443_s5 + $0x574] sm:$0xf] }
 0x204   : > { %4812 = vmatpush.bf16.msra.mxu0 %v5682_v22  ;;  %v5639_v22 = vld [vmem:[%s7443_s5 + $0x318] sm:$0xf0]  ;;  %v5946_v54 = vor.u32 %v6593_v12, %v5943_v43  ;;  %v6607_v59 = vld [vmem:[%s7443_s5 + $0x5e4] sm:$0xf]  ;;  %v5999_v61 = vld [vmem:[%s7443_s5 + $0x5e8] sm:$0xf0] }
 0x205   : > { %4826 = vmatpush.bf16.msra.mxu1 %v5746_v23  ;;  %v6533_v23 = vld [vmem:[%s7443_s5 + $0x394] sm:$0xf]  ;;  %v5642_v31 = vor.u32 %v6517_v21, %v5639_v22  ;;  %v6063_v1 = vld [vmem:[%s7443_s5 + $0x668] sm:$0xf0]  ;;  %v5927_v21 = vld [vmem:[%s7443_s5 + $0x558] sm:$0xf0] }
 0x206   : > { %4840 = vmatpush.bf16.msra.mxu2 %v5810_v24  ;;  %v5842_v24 = vor.u32 %v6567_v10, %v5839_v16  ;;  %v5706_v35 = vor.u32 %v6533_v23, %v5703_v25  ;;  %v8081_v16 = vpop.f32.mrf.mxu2  ;;  %v6605_v22 = vld [vmem:[%s7443_s5 + $0x5d4] sm:$0xf]  ;;  %v6130_v23 = vor.u32 %v6639_v2, %v6127_v5  ;;  %v6031_v2 = vld [vmem:[%s7443_s5 + $0x628] sm:$0xf0] }
 0x207   : > { %4854 = vmatpush.bf16.msra.mxu3 %v5874_v29  ;;  %v6565_v29 = vld [vmem:[%s7443_s5 + $0x494] sm:$0xf] }
 0x208   : > { %4813 = vmatpush.bf16.msra.mxu0 %v5674_v33  ;;  %v5770_v33 = vor.u32 %v6549_v27, %v5767_v28  ;;  %v5834_v7 = vor.u32 %v6565_v29, %v5831_v30  ;;  %v6621_v25 = vld [vmem:[%s7443_s5 + $0x654] sm:$0xf]  ;;  %v6055_v27 = vld [vmem:[%s7443_s5 + $0x658] sm:$0xf0] }
 0x209   : > { %4827 = vmatpush.bf16.msra.mxu1 %v5738_v36  ;;  %v6531_v36 = vld [vmem:[%s7443_s5 + $0x384] sm:$0xf]  ;;  %v6637_v29 = vld [vmem:[%s7443_s5 + $0x6d4] sm:$0xf]  ;;  %v6119_v30 = vld [vmem:[%s7443_s5 + $0x6d8] sm:$0xf0] }
 0x20a   : > { %4841 = vmatpush.bf16.msra.mxu2 %v5802_v37  ;;  %v5695_v37 = vld [vmem:[%s7443_s5 + $0x388] sm:$0xf0]  ;;  %v6585_v43 = vld [vmem:[%s7443_s5 + $0x534] sm:$0xf] }
 0x20b   : > { %4855 = vmatpush.bf16.msra.mxu3 %v5866_v49  ;;  %v6563_v49 = vld [vmem:[%s7443_s5 + $0x484] sm:$0xf]  ;;  %v5698_v48 = vor.u32 %v6531_v36, %v5695_v37  ;;  %v8090_v28 = vpop.f32.mrf.mxu0  ;;  %v6122_v36 = vor.u32 %v6637_v29, %v6119_v30  ;;  %v5983_v37 = vld [vmem:[%s7443_s5 + $0x5c8] sm:$0xf0]  ;;  %v5959_v29 = vld [vmem:[%s7443_s5 + $0x598] sm:$0xf0] }
 0x20c   : > { %4814 = vmatpush.bf16.msra.mxu0 %v5666_v26  ;;  %v8066_v26 = vpop.f32.mrf.mxu1  ;;  %v5826_v53 = vor.u32 %v6563_v49, %v5823_v40  ;;  %v6613_v30 = vld [vmem:[%s7443_s5 + $0x614] sm:$0xf] }
 0x20d   : > { %4828 = vmatpush.bf16.msra.mxu1 %v5730_v45  ;;  %v5634_v45 = vor.u32 %v6515_v32, %v5631_v34  ;;  %v8099_v32 = vpop.f32.mrf.mxu3  ;;  %v6058_v34 = vor.u32 %v6621_v25, %v6055_v27  ;;  %v4499_v25 = vadd.f32 %v8066_v26, %v8061_v41 }
 0x20e   : > { %4842 = vmatpush.bf16.msra.mxu2 %v5794_v46  ;;  %v6007_v46 = vld [vmem:[%s7443_s5 + $0x5f8] sm:$0xf0] }
 0x20f   : > { %4856 = vmatpush.bf16.msra.mxu3 %v5858_v50  ;;  %v5762_v50 = vor.u32 %v6547_v38, %v5759_v39  ;;  %v6010_v55 = vor.u32 %v6609_v44, %v6007_v46  ;;  %v6047_v38 = vld [vmem:[%s7443_s5 + $0x648] sm:$0xf0]  ;;  %v5911_v44 = vld [vmem:[%s7443_s5 + $0x538] sm:$0xf0] }
 0x210   : > { %4815 = vmatpush.bf16.msra.mxu0 %v5658_v56  ;;  %v6074_v56 = vor.u32 %v6625_v42, %v6071_v47  ;;  %v6111_v39 = vld [vmem:[%s7443_s5 + $0x6c8] sm:$0xf0]  ;;  %v5975_v42 = vld [vmem:[%s7443_s5 + $0x5b8] sm:$0xf0]  ;;  %v6617_v47 = vld [vmem:[%s7443_s5 + $0x634] sm:$0xf] }
 0x211   : > { %4829 = vmatpush.bf16.msra.mxu1 %v5722_v57  ;;  %v6591_v57 = vld [vmem:[%s7443_s5 + $0x564] sm:$0xf] }
 0x212   : > { %4843 = vmatpush.bf16.msra.mxu2 %v5786_v58  ;;  %v5935_v58 = vld [vmem:[%s7443_s5 + $0x568] sm:$0xf0] }
 0x213   : > { %4857 = vmatpush.bf16.msra.mxu3 %v5850_v62  ;;  %v6623_v62 = vld [vmem:[%s7443_s5 + $0x664] sm:$0xf]  ;;  %v5938_v10 = vor.u32 %v6591_v57, %v5935_v58  ;;  %v5903_v58 = vld [vmem:[%s7443_s5 + $0x528] sm:$0xf0] }
 0x214   : > { %4816 = vmatpush.bf16.msra.mxu0 %v5650_v17  ;;  %v6002_v17 = vor.u32 %v6607_v59, %v5999_v61  ;;  %v6583_v57 = vld [vmem:[%s7443_s5 + $0x524] sm:$0xf]  ;;  %v6106_v61 = vor.u32 %v6633_v51, %v6103_v52  ;;  %v6689_v51 = vld [vmem:[%s7443_s5 + $0x874] sm:$0xf] }
 0x215   : > { %4830 = vmatpush.bf16.msra.mxu1 %v5714_v18  ;;  %v6066_v18 = vor.u32 %v6623_v62, %v6063_v1  ;;  %v6599_v59 = vld [vmem:[%s7443_s5 + $0x5a4] sm:$0xf]  ;;  %v5967_v62 = vld [vmem:[%s7443_s5 + $0x5a8] sm:$0xf0]  ;;  %v8129_v5 = vpop.f32.mrf.mxu3 }
 0x216   : > { %4844 = vmatpush.bf16.msra.mxu2 %v5778_v20  ;;  %v6589_v20 = vld [vmem:[%s7443_s5 + $0x554] sm:$0xf]  ;;  %v6615_v1 = vld [vmem:[%s7443_s5 + $0x624] sm:$0xf] }
 0x217   : > { %4858 = vmatpush.bf16.msra.mxu3 %v5842_v24  ;;  %v5991_v24 = vld [vmem:[%s7443_s5 + $0x5d8] sm:$0xf0] }
 0x218   : > { %4817 = vmatpush.bf16.msra.mxu0 %v5642_v31  ;;  %v8096_v31 = vpop.f32.mrf.mxu1 }
 0x219   : > { %4831 = vmatpush.bf16.msra.mxu1 %v5706_v35  ;;  %v5919_v35 = vld [vmem:[%s7443_s5 + $0x548] sm:$0xf0] }
 0x21a   : > { %4845 = vmatpush.bf16.msra.mxu2 %v5770_v33  ;;  %v6603_v33 = vld [vmem:[%s7443_s5 + $0x5c4] sm:$0xf] }
 0x21b   : > { %4859 = vmatpush.bf16.msra.mxu3 %v5834_v7  ;;  %v6635_v7 = vld [vmem:[%s7443_s5 + $0x6c4] sm:$0xf]  ;;  %v5986_v40 = vor.u32 %v6603_v33, %v5983_v37  ;;  %v5887_v33 = vld [vmem:[%s7443_s5 + $0x508] sm:$0xf0] }
 0x21c   : > { %4818 = vmatpush.bf16.msra.mxu0 %v5634_v45  ;;  %v6601_v45 = vld [vmem:[%s7443_s5 + $0x5b4] sm:$0xf]  ;;  %v6114_v46 = vor.u32 %v6635_v7, %v6111_v39  ;;  %v6595_v37 = vld [vmem:[%s7443_s5 + $0x584] sm:$0xf]  ;;  %v4513_v7 = vadd.f32 %v8081_v16, %v4499_v25  ;;  %v6327_v16 = vld [vmem:[%s7443_s5 + $0x878] sm:$0xf0] }
 0x21d   : > { %4832 = vmatpush.bf16.msra.mxu1 %v5698_v48  ;;  %v6039_v48 = vld [vmem:[%s7443_s5 + $0x638] sm:$0xf0]  ;;  %v8164_v52 = vpop.f32.mrf.mxu3 }
 0x21e   : > { %4846 = vmatpush.bf16.msra.mxu2 %v5762_v50  ;;  %v8115_v50 = vpop.f32.mrf.mxu2 }
 0x21f   : > { %4860 = vmatpush.bf16.msra.mxu3 %v5826_v53  ;;  %4819 = vmatmul.bf16.vlgmr.msra.gmra.mxu0 %v7649_v11  ;;  %v5930_v11 = vor.u32 %v6589_v20, %v5927_v21  ;;  %v5914_v53 = vor.u32 %v6585_v43, %v5911_v44  ;;  %v5970_v20 = vor.u32 %v6599_v59, %v5967_v62  ;;  %v6657_v44 = vld [vmem:[%s7443_s5 + $0x774] sm:$0xf] }
 0x220   : > { %4867 = vmatpush.bf16.msrb.mxu0 %v5946_v54  ;;  %4833 = vmatmul.bf16.vlgmr.msra.gmra.mxu1 %v7655_v15  ;;  %v6587_v15 = vld [vmem:[%s7443_s5 + $0x544] sm:$0xf]  ;;  %v8119_v54 = vpop.f32.mrf.mxu0  ;;  %v6034_v21 = vor.u32 %v6615_v1, %v6031_v2  ;;  %v6330_v1 = vor.u32 %v6689_v51, %v6327_v16 }
 0x221   : > { %4881 = vmatpush.bf16.msrb.mxu1 %v6010_v55  ;;  %4847 = vmatmul.bf16.vlgmr.msra.gmra.mxu2 %v7744_v63  ;;  %v5994_v63 = vor.u32 %v6605_v22, %v5991_v24  ;;  %v5922_v49 = vor.u32 %v6587_v15, %v5919_v35  ;;  %v5978_v55 = vor.u32 %v6601_v45, %v5975_v42  ;;  %v6581_v22 = vld [vmem:[%s7443_s5 + $0x514] sm:$0xf]  ;;  %v6579_v35 = vld [vmem:[%s7443_s5 + $0x504] sm:$0xf]  ;;  %v6199_v45 = vld [vmem:[%s7443_s5 + $0x778] sm:$0xf0] }
 0x222   : > { %4895 = vmatpush.bf16.msrb.mxu2 %v6074_v56  ;;  %4861 = vmatmul.bf16.vlgmr.msra.gmra.mxu3 %v7751_v4  ;;  %v6619_v4 = vld [vmem:[%s7443_s5 + $0x644] sm:$0xf]  ;;  %v6042_v56 = vor.u32 %v6617_v47, %v6039_v48  ;;  %v6597_v24 = vld [vmem:[%s7443_s5 + $0x594] sm:$0xf]  ;;  %v5890_v47 = vor.u32 %v6579_v35, %v5887_v33  ;;  %v6263_v48 = vld [vmem:[%s7443_s5 + $0x7f8] sm:$0xf0] }
 0x223   : > { %4909 = vmatpush.bf16.msrb.mxu3 %v6138_v60  ;;  %v6050_v12 = vor.u32 %v6619_v4, %v6047_v38  ;;  %v8124_v60 = vpop.f32.mrf.mxu1  ;;  %v5962_v41 = vor.u32 %v6597_v24, %v5959_v29  ;;  %v5951_v4 = vld [vmem:[%s7443_s5 + $0x588] sm:$0xf0]  ;;  %v6611_v38 = vld [vmem:[%s7443_s5 + $0x604] sm:$0xf]  ;;  %v4501_v24 = vadd.f32 %v8096_v31, %v8090_v28  ;;  %v6183_v28 = vld [vmem:[%s7443_s5 + $0x758] sm:$0xf0] }
 0x224   : > { %4868 = vmatpush.bf16.msrb.mxu0 %v5938_v10  ;;  %v6631_v10 = vld [vmem:[%s7443_s5 + $0x6a4] sm:$0xf]  ;;  %v6669_v31 = vld [vmem:[%s7443_s5 + $0x7d4] sm:$0xf]  ;;  %v6247_v35 = vld [vmem:[%s7443_s5 + $0x7d8] sm:$0xf0] }
 0x225   : > { %4882 = vmatpush.bf16.msrb.mxu1 %v6002_v17  ;;  %v6095_v17 = vld [vmem:[%s7443_s5 + $0x6a8] sm:$0xf0]  ;;  %v6655_v2 = vld [vmem:[%s7443_s5 + $0x764] sm:$0xf]  ;;  %v6685_v33 = vld [vmem:[%s7443_s5 + $0x854] sm:$0xf] }
 0x226   : > { %4896 = vmatpush.bf16.msrb.mxu2 %v6066_v18  ;;  %v5906_v18 = vor.u32 %v6583_v57, %v5903_v58  ;;  %v6098_v27 = vor.u32 %v6631_v10, %v6095_v17  ;;  %v6391_v57 = vld [vmem:[%s7443_s5 + $0x8f8] sm:$0xf0]  ;;  %v4527_v58 = vadd.f32 %v8099_v32, %v4513_v7  ;;  %v6191_v10 = vld [vmem:[%s7443_s5 + $0x768] sm:$0xf0]  ;;  %v6671_v17 = vld [vmem:[%s7443_s5 + $0x7e4] sm:$0xf]  ;;  %v8200_v7 = vpop.f32.mrf.mxu3 }
 0x227   : > { %4910 = vmatpush.bf16.msrb.mxu3 %v6130_v23  ;;  %v5895_v23 = vld [vmem:[%s7443_s5 + $0x518] sm:$0xf0]  ;;  %v6703_v32 = vld [vmem:[%s7443_s5 + $0x8e4] sm:$0xf] }
 0x228   : > { %4869 = vmatpush.bf16.msrb.mxu0 %v5930_v11  ;;  %v6023_v11 = vld [vmem:[%s7443_s5 + $0x618] sm:$0xf0]  ;;  %v5898_v15 = vor.u32 %v6581_v22, %v5895_v23  ;;  %v8154_v43 = vpop.f32.mrf.mxu0  ;;  %v6319_v22 = vld [vmem:[%s7443_s5 + $0x868] sm:$0xf0]  ;;  %v4541_v25 = vadd.f32 %v8119_v54, %v4527_v58 }
 0x229   : > { %4883 = vmatpush.bf16.msrb.mxu1 %v5994_v63  ;;  %v6629_v63 = vld [vmem:[%s7443_s5 + $0x694] sm:$0xf]  ;;  %v6026_v26 = vor.u32 %v6613_v30, %v6023_v11  ;;  %v6383_v23 = vld [vmem:[%s7443_s5 + $0x8e8] sm:$0xf0] }
 0x22a   : > { %4897 = vmatpush.bf16.msrb.mxu2 %v6058_v34  ;;  %v6087_v34 = vld [vmem:[%s7443_s5 + $0x698] sm:$0xf0] }
 0x22b   : > { %4911 = vmatpush.bf16.msrb.mxu3 %v6122_v36  ;;  %v8145_v36 = vpop.f32.mrf.mxu2  ;;  %v6090_v39 = vor.u32 %v6629_v63, %v6087_v34  ;;  %v8159_v42 = vpop.f32.mrf.mxu1  ;;  %v6653_v34 = vld [vmem:[%s7443_s5 + $0x754] sm:$0xf] }
 0x22c   : > { %4870 = vmatpush.bf16.msrb.mxu0 %v5922_v49  ;;  %v6015_v49 = vld [vmem:[%s7443_s5 + $0x608] sm:$0xf0] }
 0x22d   : > { %4884 = vmatpush.bf16.msrb.mxu1 %v5986_v40  ;;  %v6627_v40 = vld [vmem:[%s7443_s5 + $0x684] sm:$0xf] }
 0x22e   : > { %4898 = vmatpush.bf16.msrb.mxu2 %v6050_v12  ;;  %v6079_v12 = vld [vmem:[%s7443_s5 + $0x688] sm:$0xf0] }
 0x22f   : > { %4912 = vmatpush.bf16.msrb.mxu3 %v6114_v46  ;;  %v6673_v46 = vld [vmem:[%s7443_s5 + $0x7f4] sm:$0xf]  ;;  %v6082_v59 = vor.u32 %v6627_v40, %v6079_v12  ;;  %v6667_v40 = vld [vmem:[%s7443_s5 + $0x7c4] sm:$0xf]  ;;  %v6303_v12 = vld [vmem:[%s7443_s5 + $0x848] sm:$0xf0] }
 0x230   : > { %4871 = vmatpush.bf16.msrb.mxu0 %v5914_v53  ;;  %v5954_v53 = vor.u32 %v6595_v37, %v5951_v4  ;;  %v6266_v62 = vor.u32 %v6673_v46, %v6263_v48  ;;  %v8182_v30 = vpop.f32.mrf.mxu0  ;;  %v6375_v37 = vld [vmem:[%s7443_s5 + $0x8d8] sm:$0xf0]  ;;  %v4515_v4 = vadd.f32 %v8115_v50, %v4501_v24 }
 0x231   : > { %4885 = vmatpush.bf16.msrb.mxu1 %v5978_v55  ;;  %v6018_v55 = vor.u32 %v6611_v38, %v6015_v49  ;;  %v4555_v38 = vadd.f32 %v8124_v60, %v4541_v25  ;;  %v6175_v49 = vld [vmem:[%s7443_s5 + $0x748] sm:$0xf0] }
 0x232   : > { %4899 = vmatpush.bf16.msrb.mxu2 %v6042_v56  ;;  %v6705_v56 = vld [vmem:[%s7443_s5 + $0x8f4] sm:$0xf]  ;;  %v6239_v60 = vld [vmem:[%s7443_s5 + $0x7c8] sm:$0xf0]  ;;  %v4529_v46 = vadd.f32 %v8129_v5, %v4515_v4  ;;  %v6215_v4 = vld [vmem:[%s7443_s5 + $0x798] sm:$0xf0] }
 0x233   : > { %4913 = vmatpush.bf16.msrb.mxu3 %v6106_v61  ;;  %v6202_v61 = vor.u32 %v6657_v44, %v6199_v45  ;;  %v8180_v29 = vpop.f32.mrf.mxu2  ;;  %v8187_v54 = vpop.f32.mrf.mxu1  ;;  %v6699_v44 = vld [vmem:[%s7443_s5 + $0x8c4] sm:$0xf]  ;;  %v6367_v45 = vld [vmem:[%s7443_s5 + $0x8c8] sm:$0xf0]  ;;  %v6242_v16 = vor.u32 %v6667_v40, %v6239_v60 }
 0x234   : > { %4872 = vmatpush.bf16.msrb.mxu0 %v5906_v18  ;;  %v6394_v18 = vor.u32 %v6705_v56, %v6391_v57  ;;  %v6167_v56 = vld [vmem:[%s7443_s5 + $0x738] sm:$0xf0]  ;;  %v6665_v57 = vld [vmem:[%s7443_s5 + $0x7b4] sm:$0xf]  ;;  %v4543_v58 = vadd.f32 %v8154_v43, %v4529_v46  ;;  %v6370_v5 = vor.u32 %v6699_v44, %v6367_v45  ;;  %v6143_v44 = vld [vmem:[%s7443_s5 + $0x708] sm:$0xf0] }
 0x235   : > { %4886 = vmatpush.bf16.msrb.mxu1 %v5970_v20  ;;  %v6255_v20 = vld [vmem:[%s7443_s5 + $0x7e8] sm:$0xf0]  ;;  %v6659_v45 = vld [vmem:[%s7443_s5 + $0x784] sm:$0xf] }
 0x236   : > { %4900 = vmatpush.bf16.msrb.mxu2 %v6034_v21  ;;  %v6687_v21 = vld [vmem:[%s7443_s5 + $0x864] sm:$0xf]  ;;  %v6258_v11 = vor.u32 %v6671_v17, %v6255_v20  ;;  %v4557_v24 = vadd.f32 %v8159_v42, %v4543_v58 }
 0x237   : > { %4914 = vmatpush.bf16.msrb.mxu3 %v6098_v27  ;;  %v6194_v27 = vor.u32 %v6655_v2, %v6191_v10  ;;  %v6322_v63 = vor.u32 %v6687_v21, %v6319_v22  ;;  %v6359_v2 = vld [vmem:[%s7443_s5 + $0x8b8] sm:$0xf0]  ;;  %v6647_v22 = vld [vmem:[%s7443_s5 + $0x724] sm:$0xf] }
 0x238   : > { %4873 = vmatpush.bf16.msrb.mxu0 %v5898_v15  ;;  %v6386_v15 = vor.u32 %v6703_v32, %v6383_v23  ;;  %v6159_v32 = vld [vmem:[%s7443_s5 + $0x728] sm:$0xf0]  ;;  %v6663_v23 = vld [vmem:[%s7443_s5 + $0x7a4] sm:$0xf] }
 0x239   : > { %4887 = vmatpush.bf16.msrb.mxu1 %v5962_v41  ;;  %v6311_v41 = vld [vmem:[%s7443_s5 + $0x858] sm:$0xf0] }
 0x23a   : > { %4901 = vmatpush.bf16.msrb.mxu2 %v6026_v26  ;;  %v6701_v26 = vld [vmem:[%s7443_s5 + $0x8d4] sm:$0xf] }
 0x23b   : > { %4915 = vmatpush.bf16.msrb.mxu3 %v6090_v39  ;;  %v6651_v39 = vld [vmem:[%s7443_s5 + $0x744] sm:$0xf]  ;;  %v6378_v50 = vor.u32 %v6701_v26, %v6375_v37  ;;  %v4624_v51 = vpop.f32.mrf.mxu2  ;;  %v8222_v17 = vpop.f32.mrf.mxu1 }
 0x23c   : > { %4874 = vmatpush.bf16.msrb.mxu0 %v5890_v47  ;;  %v4569_v47 = vadd.f32 %v8145_v36, %v4555_v38  ;;  %v6178_v48 = vor.u32 %v6651_v39, %v6175_v49  ;;  %v6681_v36 = vld [vmem:[%s7443_s5 + $0x834] sm:$0xf]  ;;  %v6343_v39 = vld [vmem:[%s7443_s5 + $0x898] sm:$0xf0] }
 0x23d   : > { %4888 = vmatpush.bf16.msrb.mxu1 %v5954_v53  ;;  %v6677_v38 = vld [vmem:[%s7443_s5 + $0x814] sm:$0xf] }
 0x23e   : > { %4902 = vmatpush.bf16.msrb.mxu2 %v6018_v55  ;;  %v6649_v55 = vld [vmem:[%s7443_s5 + $0x734] sm:$0xf]  ;;  %v4583_v10 = vadd.f32 %v8164_v52, %v4569_v47  ;;  %v6207_v47 = vld [vmem:[%s7443_s5 + $0x788] sm:$0xf0] }
 0x23f   : > { %4916 = vmatpush.bf16.msrb.mxu3 %v6082_v59  ;;  %4875 = vmatmul.bf16.vlgmr.msrb.gmra.mxu0 %v7749_v3  ;;  %v6186_v3 = vor.u32 %v6653_v34, %v6183_v28  ;;  %v6231_v59 = vld [vmem:[%s7443_s5 + $0x7b8] sm:$0xf0]  ;;  %v6170_v43 = vor.u32 %v6649_v55, %v6167_v56  ;;  %v6695_v34 = vld [vmem:[%s7443_s5 + $0x8a4] sm:$0xf]  ;;  %v6351_v28 = vld [vmem:[%s7443_s5 + $0x8a8] sm:$0xf0]  ;;  %v6210_v58 = vor.u32 %v6659_v45, %v6207_v47 }
 0x240   : > { %4923 = vmatpush.bf16.msra.mxu0 %v6202_v61  ;;  %4889 = vmatmul.bf16.vlgmr.msrb.gmra.mxu1 %v7755_v8  ;;  %v6250_v8 = vor.u32 %v6669_v31, %v6247_v35  ;;  %v6295_v61 = vld [vmem:[%s7443_s5 + $0x838] sm:$0xf0]  ;;  %v6234_v20 = vor.u32 %v6665_v57, %v6231_v59  ;;  %v4597_v52 = vadd.f32 %v8182_v30, %v4583_v10  ;;  %v6645_v35 = vld [vmem:[%s7443_s5 + $0x714] sm:$0xf]  ;;  %v6335_v55 = vld [vmem:[%s7443_s5 + $0x888] sm:$0xf0] }
 0x241   : > { %4937 = vmatpush.bf16.msra.mxu1 %v6266_v62  ;;  %4903 = vmatmul.bf16.vlgmr.msrb.gmra.mxu2 %v7844_v0  ;;  %v6314_v0 = vor.u32 %v6685_v33, %v6311_v41  ;;  %v4598_v62 = vpop.f32.mrf.mxu0  ;;  %v6298_v21 = vor.u32 %v6681_v36, %v6295_v61  ;;  %v4571_v31 = vadd.f32 %v8180_v29, %v4557_v24  ;;  %v6151_v33 = vld [vmem:[%s7443_s5 + $0x718] sm:$0xf0]  ;;  %v6661_v41 = vld [vmem:[%s7443_s5 + $0x794] sm:$0xf] }
 0x242   : > { %4951 = vmatpush.bf16.msra.mxu2 %v6330_v1  ;;  %4917 = vmatmul.bf16.vlgmr.msrb.gmra.mxu3 %v7851_v9  ;;  %v6683_v9 = vld [vmem:[%s7443_s5 + $0x844] sm:$0xf]  ;;  %v6697_v1 = vld [vmem:[%s7443_s5 + $0x8b4] sm:$0xf]  ;;  %v4611_v26 = vadd.f32 %v8187_v54, %v4597_v52  ;;  %v6354_v37 = vor.u32 %v6695_v34, %v6351_v28  ;;  %v6279_v29 = vld [vmem:[%s7443_s5 + $0x818] sm:$0xf0]  ;;  %v6154_v54 = vor.u32 %v6645_v35, %v6151_v33 }
 0x243   : > { %4965 = vmatpush.bf16.msra.mxu3 %v6394_v18  ;;  %v6306_v53 = vor.u32 %v6683_v9, %v6303_v12  ;;  %v4638_v18 = vpop.f32.mrf.mxu3  ;;  %v6362_v25 = vor.u32 %v6697_v1, %v6359_v2  ;;  %v4585_v49 = vadd.f32 %v8200_v7, %v4571_v31  ;;  %v6218_v60 = vor.u32 %v6661_v41, %v6215_v4  ;;  %v6643_v12 = vld [vmem:[%s7443_s5 + $0x704] sm:$0xf] }
 0x244   : > { %4924 = vmatpush.bf16.msra.mxu0 %v6194_v27  ;;  %v6223_v27 = vld [vmem:[%s7443_s5 + $0x7a8] sm:$0xf0]  ;;  %v4625_v40 = vadd.f32 %v4624_v51, %v4611_v26  ;;  %v6282_v9 = vor.u32 %v6677_v38, %v6279_v29  ;;  %v6146_v57 = vor.u32 %v6643_v12, %v6143_v44 }
 0x245   : > { %4938 = vmatpush.bf16.msra.mxu1 %v6258_v11  ;;  %v6679_v11 = vld [vmem:[%s7443_s5 + $0x824] sm:$0xf]  ;;  %v6226_v42 = vor.u32 %v6663_v23, %v6223_v27  ;;  %v4599_v46 = vadd.f32 %v4598_v62, %v4585_v49  ;;  %v6271_v51 = vld [vmem:[%s7443_s5 + $0x808] sm:$0xf0] }
 0x246   : > { %4952 = vmatpush.bf16.msra.mxu2 %v6322_v63  ;;  %v6287_v63 = vld [vmem:[%s7443_s5 + $0x828] sm:$0xf0]  ;;  %v4639_v56 = vadd.f32 %v4638_v18, %v4625_v40 }
 0x247   : > { %4966 = vmatpush.bf16.msra.mxu3 %v6386_v15  ;;  %v6162_v15 = vor.u32 %v6647_v22, %v6159_v32  ;;  %v6290_v30 = vor.u32 %v6679_v11, %v6287_v63  ;;  %v4613_v59 = vadd.f32 %v8222_v17, %v4599_v46  ;;  %v8266_v22 = vld [vmem:[%s2623_s18] sm:$0x3] }
 0x248   : > { %4925 = vmatpush.bf16.msra.mxu0 %v6186_v3  ;;  %v4626_v3 = vpop.f32.mrf.mxu2  ;;  %v4996_v27 = vperm.slane %v8266_v22, 0 }
 0x249   : > { %4939 = vmatpush.bf16.msra.mxu1 %v6250_v8  ;;  %v4652_v8 = vpop.f32.mrf.mxu0  ;;  %v4627_v1 = vadd.f32 %v4626_v3, %v4613_v59 }
 0x24a   : > { %4953 = vmatpush.bf16.msra.mxu2 %v6314_v0  ;;  %v6693_v0 = vld [vmem:[%s7443_s5 + $0x894] sm:$0xf]  ;;  %v4653_v36 = vadd.f32 %v4652_v8, %v4639_v56 }
 0x24b   : > { %4967 = vmatpush.bf16.msra.mxu3 %v6378_v50  ;;  %v4666_v50 = vpop.f32.mrf.mxu1  ;;  %v6346_v7 = vor.u32 %v6693_v0, %v6343_v39 }
 0x24c   : > { %4926 = vmatpush.bf16.msra.mxu0 %v6178_v48  ;;  %v6675_v48 = vld [vmem:[%s7443_s5 + $0x804] sm:$0xf]  ;;  %v4667_v10 = vadd.f32 %v4666_v50, %v4653_v36 }
 0x24d   : > { %4940 = vmatpush.bf16.msra.mxu1 %v6242_v16  ;;  %v4640_v16 = vpop.f32.mrf.mxu3 }
 0x24e   : > { %4954 = vmatpush.bf16.msra.mxu2 %v6306_v53  ;;  %v6691_v53 = vld [vmem:[%s7443_s5 + $0x884] sm:$0xf] }
 0x24f   : > { %4968 = vmatpush.bf16.msra.mxu3 %v6370_v5  ;;  %v6274_v5 = vor.u32 %v6675_v48, %v6271_v51  ;;  %v6338_v61 = vor.u32 %v6691_v53, %v6335_v55 }
 0x250   : > { %4927 = vmatpush.bf16.msra.mxu0 %v6170_v43  ;;  %v4680_v62 = vpop.f32.mrf.mxu2 }
 0x251   : > { %4941 = vmatpush.bf16.msra.mxu1 %v6234_v20  ;;  %v4654_v2 = vpop.f32.mrf.mxu0  ;;  %v4641_v20 = vadd.f32 %v4640_v16, %v4627_v1  ;;  %v4681_v17 = vadd.f32 %v4680_v62, %v4667_v10 }
 0x252   : > { %4955 = vmatpush.bf16.msra.mxu2 %v6298_v21 }
 0x253   : > { %4969 = vmatpush.bf16.msra.mxu3 %v6362_v25  ;;  %v4668_v43 = vpop.f32.mrf.mxu1  ;;  %v4655_v21 = vadd.f32 %v4654_v2, %v4641_v20 }
 0x254   : > { %4928 = vmatpush.bf16.msra.mxu0 %v6162_v15 }
 0x255   : > { %4942 = vmatpush.bf16.msra.mxu1 %v6226_v42  ;;  %v4694_v18 = vpop.f32.mrf.mxu3 }
 0x256   : > { %4956 = vmatpush.bf16.msra.mxu2 %v6290_v30  ;;  %v4695_v32 = vadd.f32 %v4694_v18, %v4681_v17 }
 0x257   : > { %4970 = vmatpush.bf16.msra.mxu3 %v6354_v37 }
 0x258   : > { %4929 = vmatpush.bf16.msra.mxu0 %v6154_v54  ;;  %v4682_v23 = vpop.f32.mrf.mxu2 }
 0x259   : > { %4943 = vmatpush.bf16.msra.mxu1 %v6218_v60 }
 0x25a   : > { %4957 = vmatpush.bf16.msra.mxu2 %v6282_v9 }
 0x25b   : > { %4971 = vmatpush.bf16.msra.mxu3 %v6346_v7 }
 0x25c   : > { %4930 = vmatpush.bf16.msra.mxu0 %v6146_v57  ;;  %v4708_v24 = vpop.f32.mrf.mxu0 }
 0x25d   : > { %4944 = vmatpush.bf16.msra.mxu1 %v6210_v58  ;;  %v4709_v52 = vadd.f32 %v4708_v24, %v4695_v32  ;;  %v4722_v25 = vpop.f32.mrf.mxu1  ;;  %v4696_v11 = vpop.f32.mrf.mxu3 }
 0x25e   : > { %4958 = vmatpush.bf16.msra.mxu2 %v6274_v5 }
 0x25f   : > { %4972 = vmatpush.bf16.msra.mxu3 %v6338_v61  ;;  %4931 = vmatmul.bf16.vlgmr.msra.gmra.mxu0 %v7849_v6  ;;  %v4669_v6 = vadd.f32 %v4668_v43, %v4655_v21 }
 0x260   : > { %4945 = vmatmul.bf16.vlgmr.msra.gmra.mxu1 %v7855_v14 }
 0x261   : > { %4959 = vmatmul.bf16.vlgmr.msra.gmra.mxu2 %v7932_v13  ;;  %v4683_v14 = vadd.f32 %v4682_v23, %v4669_v6  ;;  %v4723_v13 = vadd.f32 %v4722_v25, %v4709_v52 }
 0x262   : > { %4973 = vmatmul.bf16.vlgmr.msra.gmra.mxu3 %v7937_v19 }
 0x263   : > { %v5000_v63 = vadd.f32 %v4996_v27, %v4723_v13  ;;  %v4697_v34 = vadd.f32 %v4696_v11, %v4683_v14 }
 0x264   : > { %v4710_v19 = vpop.f32.mrf.mxu0  ;;  %v4736_v33 = vpop.f32.mrf.mxu2 }
 0x265   : > { %v5004_v28 = vmax.f32 %v5000_v63, 0.0  ;;  %v4711_v31 = vadd.f32 %v4710_v19, %v4697_v34  ;;  %v4724_v15 = vpop.f32.mrf.mxu1  ;;  %v4750_v41 = vpop.f32.mrf.mxu3 }
 0x266   : > { %v4751_v39 = vadd.f32 %v4750_v41, %v4736_v33 }
 0x267   : > { %5008 = vst [vmem:[%s8271_s20] sm:$0xff] %v5004_v28  ;;  %v4725_v42 = vadd.f32 %v4724_v15, %v4711_v31 }
 0x269   : > { %v5002_v30 = vadd.f32 %v4996_v27, %v4725_v42 }
 0x26b   : > { %v5006_v35 = vmax.f32 %v5002_v30, 0.0  ;;  %v4997_v30 = vperm.slane %v8266_v22, 1 }
 0x26c   : > { %v4738_v26 = vpop.f32.mrf.mxu2 }
 0x26d   : > { %5010 = vst [vmem:[%s8271_s20 + $0x10] sm:$0xff] %v5006_v35  ;;  %v4752_v37 = vpop.f32.mrf.mxu3 }
 0x26e   : > { %v4753_v44 = vadd.f32 %v4752_v37, %v4738_v26  ;;  %v5037_v22 = vld [vmem:[%s8271_s20] sm:$0xff] (%p6845_p6) }
 0x26f   : > { %5038 = vst [vmem:[%s5024_s24] sm:$0xff] (%p6845_p6), %v5037_v22 }
 0x27c   : > { %v4764_v4 = vpop.f32.mrf.mxu0 }
 0x27d   : > { %v4778_v38 = vpop.f32.mrf.mxu1  ;;  %v4765_v40 = vadd.f32 %v4764_v4, %v4751_v39 }
 0x27f   : > { %v4779_v9 = vadd.f32 %v4778_v38, %v4765_v40 }
 0x284   : > { %v4792_v29 = vpop.f32.mrf.mxu2  ;;  %v4766_v8 = vpop.f32.mrf.mxu0 }
 0x285   : > { %v4806_v3 = vpop.f32.mrf.mxu3  ;;  %v4780_v0 = vpop.f32.mrf.mxu1  ;;  %v4793_v45 = vadd.f32 %v4792_v29, %v4779_v9  ;;  %v4767_v7 = vadd.f32 %v4766_v8, %v4753_v44 }
 0x287   : > { %v4807_v48 = vadd.f32 %v4806_v3, %v4793_v45  ;;  %v4781_v16 = vadd.f32 %v4780_v0, %v4767_v7 }
 0x28c   : > { %v4794_v49 = vpop.f32.mrf.mxu2 }
 0x28d   : > { %v4808_v50 = vpop.f32.mrf.mxu3  ;;  %v4795_v55 = vadd.f32 %v4794_v49, %v4781_v16 }
 0x28f   : > { %v4809_v59 = vadd.f32 %v4808_v50, %v4795_v55  ;;  %v5041_v50 = vld [vmem:[%s8271_s20 + $0x10] sm:$0xff] (%p6845_p6) }
 0x290   : > { %5042 = vst [vmem:[%s5024_s24 + $0x20] sm:$0xff] (%p6845_p6), %v5041_v50 }
 0x29c   : > { %v4820_v54 = vpop.f32.mrf.mxu0 }
 0x29d   : > { %v4834_v60 = vpop.f32.mrf.mxu1  ;;  %v4821_v53 = vadd.f32 %v4820_v54, %v4807_v48 }
 0x29f   : > { %v4835_v57 = vadd.f32 %v4834_v60, %v4821_v53 }
 0x2a4   : > { %v4848_v12 = vpop.f32.mrf.mxu2  ;;  %v4822_v47 = vpop.f32.mrf.mxu0 }
 0x2a5   : > { %v4862_v46 = vpop.f32.mrf.mxu3  ;;  %v4836_v51 = vpop.f32.mrf.mxu1  ;;  %v4849_v36 = vadd.f32 %v4848_v12, %v4835_v57  ;;  %v4823_v62 = vadd.f32 %v4822_v47, %v4809_v59 }
 0x2a7   : > { %v4863_v1 = vadd.f32 %v4862_v46, %v4849_v36  ;;  %v4837_v10 = vadd.f32 %v4836_v51, %v4823_v62 }
 0x2ac   : > { %v4850_v56 = vpop.f32.mrf.mxu2 }
 0x2ad   : > { %v4864_v58 = vpop.f32.mrf.mxu3  ;;  %v4851_v20 = vadd.f32 %v4850_v56, %v4837_v10 }
 0x2af   : > { %v4865_v23 = vadd.f32 %v4864_v58, %v4851_v20 }
 0x2bc   : > { %v4876_v5 = vpop.f32.mrf.mxu0 }
 0x2bd   : > { %v4890_v61 = vpop.f32.mrf.mxu1  ;;  %v4877_v43 = vadd.f32 %v4876_v5, %v4863_v1 }
 0x2bf   : > { %v4891_v21 = vadd.f32 %v4890_v61, %v4877_v43 }
 0x2c4   : > { %v4904_v2 = vpop.f32.mrf.mxu2  ;;  %v4878_v17 = vpop.f32.mrf.mxu0 }
 0x2c5   : > { %v4918_v18 = vpop.f32.mrf.mxu3  ;;  %v4892_v32 = vpop.f32.mrf.mxu1  ;;  %v4905_v24 = vadd.f32 %v4904_v2, %v4891_v21  ;;  %v4879_v6 = vadd.f32 %v4878_v17, %v4865_v23 }
 0x2c7   : > { %v4919_v25 = vadd.f32 %v4918_v18, %v4905_v24  ;;  %v4893_v13 = vadd.f32 %v4892_v32, %v4879_v6 }
 0x2cc   : > { %v4906_v52 = vpop.f32.mrf.mxu2 }
 0x2cd   : > { %v4920_v27 = vpop.f32.mrf.mxu3  ;;  %v4907_v34 = vadd.f32 %v4906_v52, %v4893_v13 }
 0x2cf   : > { %v4921_v31 = vadd.f32 %v4920_v27, %v4907_v34 }
 0x2dc   : > { %v4932_v14 = vpop.f32.mrf.mxu0 }
 0x2dd   : > { %v4933_v11 = vadd.f32 %v4932_v14, %v4919_v25  ;;  %v4946_v63 = vpop.f32.mrf.mxu1 }
 0x2df   : > { %v4947_v28 = vadd.f32 %v4946_v63, %v4933_v11 }
 0x2e4   : > { %v4960_v19 = vpop.f32.mrf.mxu2  ;;  %v4934_v35 = vpop.f32.mrf.mxu0 }
 0x2e5   : > { %v4961_v15 = vadd.f32 %v4960_v19, %v4947_v28  ;;  %v4974_v42 = vpop.f32.mrf.mxu3  ;;  %v4935_v41 = vadd.f32 %v4934_v35, %v4921_v31  ;;  %v4948_v37 = vpop.f32.mrf.mxu1 }
 0x2e7   : > { %v4975_v33 = vadd.f32 %v4974_v42, %v4961_v15  ;;  %v4949_v38 = vadd.f32 %v4948_v37, %v4935_v41 }
 0x2e9   : > { %v5001_v26 = vadd.f32 %v4997_v30, %v4975_v33 }
 0x2eb   : > { %v5005_v4 = vmax.f32 %v5001_v26, 0.0 }
 0x2ec   : > { %v4962_v29 = vpop.f32.mrf.mxu2 }
 0x2ed   : > { %5009 = vst [vmem:[%s8271_s20 + $0x8] sm:$0xff] %v5005_v4  ;;  %v4963_v3 = vadd.f32 %v4962_v29, %v4949_v38  ;;  %v4976_v8 = vpop.f32.mrf.mxu3 }
 0x2ef   : > { %v4977_v0 = vadd.f32 %v4976_v8, %v4963_v3 }
 0x2f1   : > { %v5003_v39 = vadd.f32 %v4997_v30, %v4977_v0  ;;  %5018 = sbr.rel (!%p6845_p6) target bundleno = 766 (0x2fe), region = 96 }
 0x2f3   : > { %v5007_v49 = vmax.f32 %v5003_v39, 0.0 }
 0x2f4   : > { %v5039_v40 = vld [vmem:[%s8271_s20 + $0x8] sm:$0xff] (%p6845_p6) }
 0x2f5   : > { %5011 = vst [vmem:[%s8271_s20 + $0x18] sm:$0xff] %v5007_v49 }
 0x2f6   : > { %5040 = vst [vmem:[%s5024_s24 + $0x8] sm:$0xff] %v5039_v40 }
 0x2fc   : > { %v5043_v54 = vld [vmem:[%s8271_s20 + $0x18] sm:$0xff] }
 0x2fd   : > { %5044 = vst [vmem:[%s5024_s24 + $0x28] sm:$0xff] %v5043_v54 }
 0x2fe PF: > { %s13_s16 = sadd.s32 1, %s6788_s16   ;;  %s8308_s12 = smov %s6776_s13 }
 0x2ff   : > { %p10_p12 = scmp.ge.s32.totalorder %s13_s16, 4   ;;  %s8309_s13 = smov %s6850_s22 }
 0x300   : > { %s8310_s14 = smov %s6784_s15  ;;  %s8311_s15 = smov %s8313_s17 }
 0x301   :  { %12 = sbr.rel (!%p10_p12) target bundleno = 3 (0x3), region = 162 }

// kernel: tps_forward.12
= control target key start
LH: loop header
LB: loop body
LE: loop exit
PB: predicated region body
PF: predicated region fallthrough
CT: control target
= control target key end

     0   :  { %s1306_s1 = inlined_call_operand.vmem [shape: bf16[512,256], index: 1, kind: input, shape index: {}]   ;;  %s1307_s0 = inlined_call_operand.vmem [shape: bf16[8,512], index: 0, kind: input, shape index: {}]   ;;  %s1308_s2 = inlined_call_operand.vmem [shape: f32[1,256], index: 2, kind: input, shape index: {}]   ;;  %s1309_s3 = inlined_call_operand.vmem [shape: f32[8,256], index: 3, kind: output, shape index: {}]  }
   0x1   :  { %v609_v0 = vld [vmem:[%s1306_s1 + $0x70] sm:$0xf]  ;;  %v822_v1 = vld [vmem:[%s1306_s1 + $0x74] sm:$0xf0]  ;;  %v601_v11 = vld [vmem:[%s1306_s1 + $0x60] sm:$0xf] }
   0x2   :  { %v673_v2 = vld [vmem:[%s1306_s1 + $0xf0] sm:$0xf]  ;;  %v610_v3 = vor.u32 %v822_v1, %v609_v0  ;;  %v838_v4 = vld [vmem:[%s1306_s1 + $0xf4] sm:$0xf0]  ;;  %v820_v13 = vld [vmem:[%s1306_s1 + $0x64] sm:$0xf0] }
   0x3   :  { %v737_v5 = vld [vmem:[%s1306_s1 + $0x170] sm:$0xf]  ;;  %v854_v6 = vld [vmem:[%s1306_s1 + $0x174] sm:$0xf0]  ;;  %v674_v7 = vor.u32 %v838_v4, %v673_v2  ;;  %v665_v14 = vld [vmem:[%s1306_s1 + $0xe0] sm:$0xf]  ;;  %v602_v16 = vor.u32 %v820_v13, %v601_v11 }
   0x4   :  { %v738_v8 = vor.u32 %v854_v6, %v737_v5  ;;  %v801_v9 = vld [vmem:[%s1306_s1 + $0x1f0] sm:$0xf]  ;;  %v870_v10 = vld [vmem:[%s1306_s1 + $0x1f4] sm:$0xf0]  ;;  %422 = vmatpush.bf16.msra.mxu0 %v610_v3  ;;  %v836_v15 = vld [vmem:[%s1306_s1 + $0xe4] sm:$0xf0] }
   0x5   :  { %v802_v12 = vor.u32 %v870_v10, %v801_v9  ;;  %435 = vmatpush.bf16.msra.mxu1 %v674_v7  ;;  %v666_v17 = vor.u32 %v836_v15, %v665_v14  ;;  %v729_v18 = vld [vmem:[%s1306_s1 + $0x160] sm:$0xf]  ;;  %v852_v19 = vld [vmem:[%s1306_s1 + $0x164] sm:$0xf0]  ;;  %v593_v23 = vld [vmem:[%s1306_s1 + $0x50] sm:$0xf] }
   0x6   :  { %448 = vmatpush.bf16.msra.mxu2 %v738_v8  ;;  %v793_v20 = vld [vmem:[%s1306_s1 + $0x1e0] sm:$0xf]  ;;  %v730_v21 = vor.u32 %v852_v19, %v729_v18  ;;  %v868_v22 = vld [vmem:[%s1306_s1 + $0x1e4] sm:$0xf0]  ;;  %v818_v24 = vld [vmem:[%s1306_s1 + $0x54] sm:$0xf0] }
   0x7   :  { %461 = vmatpush.bf16.msra.mxu3 %v802_v12  ;;  %v794_v25 = vor.u32 %v868_v22, %v793_v20  ;;  %v657_v26 = vld [vmem:[%s1306_s1 + $0xd0] sm:$0xf]  ;;  %v834_v27 = vld [vmem:[%s1306_s1 + $0xd4] sm:$0xf0]  ;;  %v594_v29 = vor.u32 %v818_v24, %v593_v23  ;;  %v585_v35 = vld [vmem:[%s1306_s1 + $0x40] sm:$0xf] }
   0x8   :  { %v721_v28 = vld [vmem:[%s1306_s1 + $0x150] sm:$0xf]  ;;  %423 = vmatpush.bf16.msra.mxu0 %v602_v16  ;;  %v850_v30 = vld [vmem:[%s1306_s1 + $0x154] sm:$0xf0]  ;;  %v658_v33 = vor.u32 %v834_v27, %v657_v26  ;;  %v816_v36 = vld [vmem:[%s1306_s1 + $0x44] sm:$0xf0] }
   0x9   :  { %v785_v31 = vld [vmem:[%s1306_s1 + $0x1d0] sm:$0xf]  ;;  %v866_v32 = vld [vmem:[%s1306_s1 + $0x1d4] sm:$0xf0]  ;;  %436 = vmatpush.bf16.msra.mxu1 %v666_v17  ;;  %v722_v34 = vor.u32 %v850_v30, %v721_v28  ;;  %v649_v37 = vld [vmem:[%s1306_s1 + $0xc0] sm:$0xf]  ;;  %v586_v44 = vor.u32 %v816_v36, %v585_v35 }
   0xa   :  { %449 = vmatpush.bf16.msra.mxu2 %v730_v21  ;;  %v786_v38 = vor.u32 %v866_v32, %v785_v31  ;;  %v832_v39 = vld [vmem:[%s1306_s1 + $0xc4] sm:$0xf0]  ;;  %v713_v40 = vld [vmem:[%s1306_s1 + $0x140] sm:$0xf]  ;;  %v577_v47 = vld [vmem:[%s1306_s1 + $0x30] sm:$0xf] }
   0xb   :  { %462 = vmatpush.bf16.msra.mxu3 %v794_v25  ;;  %v848_v41 = vld [vmem:[%s1306_s1 + $0x144] sm:$0xf0]  ;;  %v777_v42 = vld [vmem:[%s1306_s1 + $0x1c0] sm:$0xf]  ;;  %v650_v45 = vor.u32 %v832_v39, %v649_v37  ;;  %v814_v48 = vld [vmem:[%s1306_s1 + $0x34] sm:$0xf0] }
   0xc   :  { %v864_v43 = vld [vmem:[%s1306_s1 + $0x1c4] sm:$0xf0]  ;;  %424 = vmatpush.bf16.msra.mxu0 %v594_v29  ;;  %v714_v46 = vor.u32 %v848_v41, %v713_v40  ;;  %v641_v49 = vld [vmem:[%s1306_s1 + $0xb0] sm:$0xf]  ;;  %v830_v51 = vld [vmem:[%s1306_s1 + $0xb4] sm:$0xf0]  ;;  %v578_v56 = vor.u32 %v814_v48, %v577_v47 }
   0xd   :  { %437 = vmatpush.bf16.msra.mxu1 %v658_v33  ;;  %v778_v50 = vor.u32 %v864_v43, %v777_v42  ;;  %v705_v52 = vld [vmem:[%s1306_s1 + $0x130] sm:$0xf]  ;;  %v846_v53 = vld [vmem:[%s1306_s1 + $0x134] sm:$0xf0]  ;;  %v642_v57 = vor.u32 %v830_v51, %v641_v49  ;;  %v569_v59 = vld [vmem:[%s1306_s1 + $0x20] sm:$0xf] }
   0xe   :  { %450 = vmatpush.bf16.msra.mxu2 %v722_v34  ;;  %v769_v54 = vld [vmem:[%s1306_s1 + $0x1b0] sm:$0xf]  ;;  %v862_v55 = vld [vmem:[%s1306_s1 + $0x1b4] sm:$0xf0]  ;;  %v706_v58 = vor.u32 %v846_v53, %v705_v52  ;;  %v812_v60 = vld [vmem:[%s1306_s1 + $0x24] sm:$0xf0] }
   0xf   :  { %463 = vmatpush.bf16.msra.mxu3 %v786_v38  ;;  %v633_v61 = vld [vmem:[%s1306_s1 + $0xa0] sm:$0xf]  ;;  %v770_v62 = vor.u32 %v862_v55, %v769_v54  ;;  %v828_v63 = vld [vmem:[%s1306_s1 + $0xa4] sm:$0xf0]  ;;  %v570_v4 = vor.u32 %v812_v60, %v569_v59  ;;  %v561_v7 = vld [vmem:[%s1306_s1 + $0x10] sm:$0xf] }
  0x10   :  { %425 = vmatpush.bf16.msra.mxu0 %v586_v44  ;;  %v697_v0 = vld [vmem:[%s1306_s1 + $0x120] sm:$0xf]  ;;  %v844_v1 = vld [vmem:[%s1306_s1 + $0x124] sm:$0xf0]  ;;  %v634_v5 = vor.u32 %v828_v63, %v633_v61  ;;  %v810_v8 = vld [vmem:[%s1306_s1 + $0x14] sm:$0xf0] }
  0x11   :  { %438 = vmatpush.bf16.msra.mxu1 %v650_v45  ;;  %v761_v2 = vld [vmem:[%s1306_s1 + $0x1a0] sm:$0xf]  ;;  %v860_v3 = vld [vmem:[%s1306_s1 + $0x1a4] sm:$0xf0]  ;;  %v698_v6 = vor.u32 %v844_v1, %v697_v0  ;;  %v625_v9 = vld [vmem:[%s1306_s1 + $0x90] sm:$0xf]  ;;  %v562_v16 = vor.u32 %v810_v8, %v561_v7 }
  0x12   :  { %451 = vmatpush.bf16.msra.mxu2 %v714_v46  ;;  %v762_v10 = vor.u32 %v860_v3, %v761_v2  ;;  %v826_v11 = vld [vmem:[%s1306_s1 + $0x94] sm:$0xf0]  ;;  %v689_v12 = vld [vmem:[%s1306_s1 + $0x110] sm:$0xf]  ;;  %v553_v17 = vld [vmem:[%s1306_s1] sm:$0xf] }
  0x13   :  { %464 = vmatpush.bf16.msra.mxu3 %v778_v50  ;;  %v842_v13 = vld [vmem:[%s1306_s1 + $0x114] sm:$0xf0]  ;;  %v753_v14 = vld [vmem:[%s1306_s1 + $0x190] sm:$0xf]  ;;  %v808_v18 = vld [vmem:[%s1306_s1 + $0x4] sm:$0xf0]  ;;  %v626_v20 = vor.u32 %v826_v11, %v625_v9 }
  0x14   :  { %426 = vmatpush.bf16.msra.mxu0 %v578_v56  ;;  %v858_v15 = vld [vmem:[%s1306_s1 + $0x194] sm:$0xf0]  ;;  %v617_v19 = vld [vmem:[%s1306_s1 + $0x80] sm:$0xf]  ;;  %v690_v21 = vor.u32 %v842_v13, %v689_v12  ;;  %v824_v22 = vld [vmem:[%s1306_s1 + $0x84] sm:$0xf0]  ;;  %v554_v32 = vor.u32 %v808_v18, %v553_v17 }
  0x15   :  { %439 = vmatpush.bf16.msra.mxu1 %v642_v57  ;;  %v681_v23 = vld [vmem:[%s1306_s1 + $0x100] sm:$0xf]  ;;  %v840_v24 = vld [vmem:[%s1306_s1 + $0x104] sm:$0xf0]  ;;  %v754_v25 = vor.u32 %v858_v15, %v753_v14  ;;  %v821_v28 = vld [vmem:[%s1306_s1 + $0x74] sm:$0xf]  ;;  %v618_v37 = vor.u32 %v824_v22, %v617_v19 }
  0x16   :  { %452 = vmatpush.bf16.msra.mxu2 %v706_v58  ;;  %v745_v26 = vld [vmem:[%s1306_s1 + $0x180] sm:$0xf]  ;;  %v856_v27 = vld [vmem:[%s1306_s1 + $0x184] sm:$0xf0]  ;;  %v611_v29 = vld [vmem:[%s1306_s1 + $0x78] sm:$0xf0]  ;;  %v682_v38 = vor.u32 %v840_v24, %v681_v23 }
  0x17   :  { %465 = vmatpush.bf16.msra.mxu3 %v770_v62  ;;  %v837_v30 = vld [vmem:[%s1306_s1 + $0xf4] sm:$0xf]  ;;  %v23_v31 = vld [vmem:[%s1307_s0 + $0x8] sm:$0xff]  ;;  %v675_v33 = vld [vmem:[%s1306_s1 + $0xf8] sm:$0xf0]  ;;  %v746_v42 = vor.u32 %v856_v27, %v745_v26  ;;  %v614_v43 = vor.u32 %v821_v28, %v611_v29 }
  0x18   :  { %427 = vmatpush.bf16.msra.mxu0 %v570_v4  ;;  %v853_v34 = vld [vmem:[%s1306_s1 + $0x174] sm:$0xf]  ;;  %v739_v35 = vld [vmem:[%s1306_s1 + $0x178] sm:$0xf0]  ;;  %v92_v36 = vunpack.c.l.b16 %v23_v31  ;;  %v93_v41 = vunpack.c.h.b16 %v23_v31  ;;  %v22_v44 = vld [vmem:[%s1307_s0] sm:$0xff]  ;;  %v678_v45 = vor.u32 %v837_v30, %v675_v33 }
  0x19   :  { %440 = vmatpush.bf16.msra.mxu1 %v634_v5  ;;  %v869_v39 = vld [vmem:[%s1306_s1 + $0x1f4] sm:$0xf]  ;;  %v803_v40 = vld [vmem:[%s1306_s1 + $0x1f8] sm:$0xf0]  ;;  %v742_v46 = vor.u32 %v853_v34, %v739_v35  ;;  %v819_v47 = vld [vmem:[%s1306_s1 + $0x64] sm:$0xf]  ;;  %v90_v50 = vunpack.c.l.b16 %v22_v44  ;;  %v91_v51 = vunpack.c.h.b16 %v22_v44 }
  0x1a   :  { %453 = vmatpush.bf16.msra.mxu2 %v698_v6  ;;  %v603_v48 = vld [vmem:[%s1306_s1 + $0x68] sm:$0xf0]  ;;  %v835_v49 = vld [vmem:[%s1306_s1 + $0xe4] sm:$0xf]  ;;  %v806_v52 = vor.u32 %v869_v39, %v803_v40  ;;  %v1131_v56 = vpack.c.b16 %v92_v36, %v92_v36  ;;  %v1139_v59 = vpack.c.b16 %v93_v41, %v93_v41  ;;  %v817_v1 = vld [vmem:[%s1306_s1 + $0x54] sm:$0xf] }
  0x1b   :  { %466 = vmatpush.bf16.msra.mxu3 %v762_v10  ;;  %v667_v53 = vld [vmem:[%s1306_s1 + $0xe8] sm:$0xf0]  ;;  %v851_v54 = vld [vmem:[%s1306_s1 + $0x164] sm:$0xf]  ;;  %v1141_v60 = vpack.c.b16 %v90_v50, %v90_v50  ;;  %v606_v61 = vor.u32 %v819_v47, %v603_v48  ;;  %v1143_v62 = vpack.c.b16 %v91_v51, %v91_v51  ;;  %v595_v2 = vld [vmem:[%s1306_s1 + $0x58] sm:$0xf0] }
  0x1c   :  { %428 = vmatpush.bf16.msra.mxu0 %v562_v16  ;;  %v731_v55 = vld [vmem:[%s1306_s1 + $0x168] sm:$0xf0]  ;;  %v867_v57 = vld [vmem:[%s1306_s1 + $0x1e4] sm:$0xf]  ;;  %v670_v63 = vor.u32 %v835_v49, %v667_v53  ;;  %v833_v3 = vld [vmem:[%s1306_s1 + $0xd4] sm:$0xf]  ;;  %v598_v10 = vor.u32 %v817_v1, %v595_v2 }
  0x1d   :  { %441 = vmatpush.bf16.msra.mxu1 %v626_v20  ;;  %v795_v58 = vld [vmem:[%s1306_s1 + $0x1e8] sm:$0xf0]  ;;  %v734_v0 = vor.u32 %v851_v54, %v731_v55  ;;  %v659_v5 = vld [vmem:[%s1306_s1 + $0xd8] sm:$0xf0]  ;;  %v849_v6 = vld [vmem:[%s1306_s1 + $0x154] sm:$0xf] }
  0x1e   :  { %454 = vmatpush.bf16.msra.mxu2 %v690_v21  ;;  %v798_v4 = vor.u32 %v867_v57, %v795_v58  ;;  %v723_v7 = vld [vmem:[%s1306_s1 + $0x158] sm:$0xf0]  ;;  %v865_v8 = vld [vmem:[%s1306_s1 + $0x1d4] sm:$0xf]  ;;  %v662_v11 = vor.u32 %v833_v3, %v659_v5  ;;  %v815_v13 = vld [vmem:[%s1306_s1 + $0x44] sm:$0xf] }
  0x1f   :  { %467 = vmatpush.bf16.msra.mxu3 %v754_v25  ;;  %v787_v9 = vld [vmem:[%s1306_s1 + $0x1d8] sm:$0xf0]  ;;  %v726_v12 = vor.u32 %v849_v6, %v723_v7  ;;  %v587_v14 = vld [vmem:[%s1306_s1 + $0x48] sm:$0xf0]  ;;  %v831_v15 = vld [vmem:[%s1306_s1 + $0xc4] sm:$0xf] }
  0x20   :  { %429 = vmatpush.bf16.msra.mxu0 %v554_v32  ;;  %v790_v16 = vor.u32 %v865_v8, %v787_v9  ;;  %v651_v17 = vld [vmem:[%s1306_s1 + $0xc8] sm:$0xf0]  ;;  %v847_v18 = vld [vmem:[%s1306_s1 + $0x144] sm:$0xf]  ;;  %v590_v22 = vor.u32 %v815_v13, %v587_v14  ;;  %v813_v25 = vld [vmem:[%s1306_s1 + $0x34] sm:$0xf] }
  0x21   :  { %442 = vmatpush.bf16.msra.mxu1 %v618_v37  ;;  %v715_v19 = vld [vmem:[%s1306_s1 + $0x148] sm:$0xf0]  ;;  %v863_v20 = vld [vmem:[%s1306_s1 + $0x1c4] sm:$0xf]  ;;  %v654_v23 = vor.u32 %v831_v15, %v651_v17  ;;  %v579_v26 = vld [vmem:[%s1306_s1 + $0x38] sm:$0xf0] }
  0x22   :  { %455 = vmatpush.bf16.msra.mxu2 %v682_v38  ;;  %v779_v21 = vld [vmem:[%s1306_s1 + $0x1c8] sm:$0xf0]  ;;  %v718_v24 = vor.u32 %v847_v18, %v715_v19  ;;  %v829_v27 = vld [vmem:[%s1306_s1 + $0xb4] sm:$0xf]  ;;  %v643_v29 = vld [vmem:[%s1306_s1 + $0xb8] sm:$0xf0]  ;;  %v582_v34 = vor.u32 %v813_v25, %v579_v26 }
  0x23   :  { %468 = vmatpush.bf16.msra.mxu3 %v746_v42  ;;  %430 = vmatmul.bf16.vlgmr.msra.gmra.mxu0 %v1141_v60  ;;  %v782_v28 = vor.u32 %v863_v20, %v779_v21  ;;  %v845_v30 = vld [vmem:[%s1306_s1 + $0x134] sm:$0xf]  ;;  %v707_v31 = vld [vmem:[%s1306_s1 + $0x138] sm:$0xf0]  ;;  %v646_v35 = vor.u32 %v829_v27, %v643_v29  ;;  %v811_v37 = vld [vmem:[%s1306_s1 + $0x24] sm:$0xf] }
  0x24   :  { %474 = vmatpush.bf16.msrb.mxu0 %v614_v43  ;;  %443 = vmatmul.bf16.vlgmr.msra.gmra.mxu1 %v1143_v62  ;;  %v861_v32 = vld [vmem:[%s1306_s1 + $0x1b4] sm:$0xf]  ;;  %v771_v33 = vld [vmem:[%s1306_s1 + $0x1b8] sm:$0xf0]  ;;  %v710_v36 = vor.u32 %v845_v30, %v707_v31  ;;  %v571_v38 = vld [vmem:[%s1306_s1 + $0x28] sm:$0xf0] }
  0x25   :  { %487 = vmatpush.bf16.msrb.mxu1 %v678_v45  ;;  %456 = vmatmul.bf16.vlgmr.msra.gmra.mxu2 %v1131_v56  ;;  %v827_v39 = vld [vmem:[%s1306_s1 + $0xa4] sm:$0xf]  ;;  %v774_v40 = vor.u32 %v861_v32, %v771_v33  ;;  %v635_v41 = vld [vmem:[%s1306_s1 + $0xa8] sm:$0xf0]  ;;  %v809_v49 = vld [vmem:[%s1306_s1 + $0x14] sm:$0xf] }
  0x26   :  { %500 = vmatpush.bf16.msrb.mxu2 %v742_v46  ;;  %469 = vmatmul.bf16.vlgmr.msra.gmra.mxu3 %v1139_v59  ;;  %v843_v42 = vld [vmem:[%s1306_s1 + $0x124] sm:$0xf]  ;;  %v699_v43 = vld [vmem:[%s1306_s1 + $0x128] sm:$0xf0]  ;;  %v574_v46 = vor.u32 %v811_v37, %v571_v38  ;;  %v638_v47 = vor.u32 %v827_v39, %v635_v41  ;;  %v563_v50 = vld [vmem:[%s1306_s1 + $0x18] sm:$0xf0] }
  0x27   :  { %513 = vmatpush.bf16.msrb.mxu3 %v806_v52  ;;  %v859_v44 = vld [vmem:[%s1306_s1 + $0x1a4] sm:$0xf]  ;;  %v763_v45 = vld [vmem:[%s1306_s1 + $0x1a8] sm:$0xf0]  ;;  %v702_v48 = vor.u32 %v843_v42, %v699_v43  ;;  %v825_v51 = vld [vmem:[%s1306_s1 + $0x94] sm:$0xf] }
  0x28   :  { %475 = vmatpush.bf16.msrb.mxu0 %v606_v61  ;;  %v766_v52 = vor.u32 %v859_v44, %v763_v45  ;;  %v627_v53 = vld [vmem:[%s1306_s1 + $0x98] sm:$0xf0]  ;;  %v841_v54 = vld [vmem:[%s1306_s1 + $0x114] sm:$0xf]  ;;  %v566_v61 = vor.u32 %v809_v49, %v563_v50  ;;  %v807_v1 = vld [vmem:[%s1306_s1 + $0x4] sm:$0xf] }
  0x29   :  { %488 = vmatpush.bf16.msrb.mxu1 %v670_v63  ;;  %v691_v55 = vld [vmem:[%s1306_s1 + $0x118] sm:$0xf0]  ;;  %v857_v57 = vld [vmem:[%s1306_s1 + $0x194] sm:$0xf]  ;;  %v630_v63 = vor.u32 %v825_v51, %v627_v53  ;;  %v555_v2 = vld [vmem:[%s1306_s1 + $0x8] sm:$0xf0] }
  0x2a   :  { %501 = vmatpush.bf16.msrb.mxu2 %v734_v0  ;;  %v755_v58 = vld [vmem:[%s1306_s1 + $0x198] sm:$0xf0]  ;;  %v694_v0 = vor.u32 %v841_v54, %v691_v55  ;;  %v823_v3 = vld [vmem:[%s1306_s1 + $0x84] sm:$0xf]  ;;  %v619_v5 = vld [vmem:[%s1306_s1 + $0x88] sm:$0xf0] }
  0x2b   :  { %514 = vmatpush.bf16.msrb.mxu3 %v798_v4  ;;  %v758_v4 = vor.u32 %v857_v57, %v755_v58  ;;  %v839_v6 = vld [vmem:[%s1306_s1 + $0x104] sm:$0xf]  ;;  %v683_v7 = vld [vmem:[%s1306_s1 + $0x108] sm:$0xf0]  ;;  %v535_v17 = vld [vmem:[%s1308_s2] sm:$0x3] }
  0x2c   :  { %476 = vmatpush.bf16.msrb.mxu0 %v598_v10  ;;  %v855_v8 = vld [vmem:[%s1306_s1 + $0x184] sm:$0xf]  ;;  %v747_v9 = vld [vmem:[%s1306_s1 + $0x188] sm:$0xf0]  ;;  %v558_v10 = vor.u32 %v807_v1, %v555_v2  ;;  %v537_v21 = vperm.slane %v535_v17, 0  ;;  %v538_v31 = vperm.slane %v535_v17, 1 }
  0x2d   :  { %489 = vmatpush.bf16.msrb.mxu1 %v662_v11  ;;  %v622_v11 = vor.u32 %v823_v3, %v619_v5  ;;  %v750_v13 = vor.u32 %v855_v8, %v747_v9 }
  0x2e   :  { %502 = vmatpush.bf16.msrb.mxu2 %v726_v12  ;;  %v686_v12 = vor.u32 %v839_v6, %v683_v7 }
  0x2f   :  { %515 = vmatpush.bf16.msrb.mxu3 %v790_v16 }
  0x30   :  { %477 = vmatpush.bf16.msrb.mxu0 %v590_v22 }
  0x31   :  { %490 = vmatpush.bf16.msrb.mxu1 %v654_v23 }
  0x32   :  { %503 = vmatpush.bf16.msrb.mxu2 %v718_v24 }
  0x33   :  { %516 = vmatpush.bf16.msrb.mxu3 %v782_v28 }
  0x34   :  { %478 = vmatpush.bf16.msrb.mxu0 %v582_v34 }
  0x35   :  { %491 = vmatpush.bf16.msrb.mxu1 %v646_v35 }
  0x36   :  { %504 = vmatpush.bf16.msrb.mxu2 %v710_v36 }
  0x37   :  { %517 = vmatpush.bf16.msrb.mxu3 %v774_v40 }
  0x38   :  { %479 = vmatpush.bf16.msrb.mxu0 %v574_v46 }
  0x39   :  { %492 = vmatpush.bf16.msrb.mxu1 %v638_v47 }
  0x3a   :  { %505 = vmatpush.bf16.msrb.mxu2 %v702_v48 }
  0x3b   :  { %518 = vmatpush.bf16.msrb.mxu3 %v766_v52 }
  0x3c   :  { %480 = vmatpush.bf16.msrb.mxu0 %v566_v61 }
  0x3d   :  { %493 = vmatpush.bf16.msrb.mxu1 %v630_v63 }
  0x3e   :  { %506 = vmatpush.bf16.msrb.mxu2 %v694_v0 }
  0x3f   :  { %519 = vmatpush.bf16.msrb.mxu3 %v758_v4 }
  0x40   :  { %481 = vmatpush.bf16.msrb.mxu0 %v558_v10 }
  0x41   :  { %494 = vmatpush.bf16.msrb.mxu1 %v622_v11 }
  0x42   :  { %507 = vmatpush.bf16.msrb.mxu2 %v686_v12 }
  0x43   :  { %520 = vmatpush.bf16.msrb.mxu3 %v750_v13  ;;  %482 = vmatmul.bf16.vlgmr.msrb.gmra.mxu0 %v1141_v60 }
  0x44   :  { %495 = vmatmul.bf16.vlgmr.msrb.gmra.mxu1 %v1143_v62 }
  0x45   :  { %508 = vmatmul.bf16.vlgmr.msrb.gmra.mxu2 %v1131_v56 }
  0x46   :  { %521 = vmatmul.bf16.vlgmr.msrb.gmra.mxu3 %v1139_v59 }
  0xa0   :  { %v431_v14 = vpop.f32.mrf.mxu0 }
  0xa1   :  { %v444_v15 = vpop.f32.mrf.mxu1 }
  0xa2   :  { %v445_v16 = vadd.f32 %v444_v15, %v431_v14 }
  0xa8   :  { %v457_v18 = vpop.f32.mrf.mxu2  ;;  %v433_v23 = vpop.f32.mrf.mxu0 }
  0xa9   :  { %v458_v19 = vadd.f32 %v457_v18, %v445_v16  ;;  %v470_v20 = vpop.f32.mrf.mxu3  ;;  %v446_v60 = vpop.f32.mrf.mxu1 }
  0xab   :  { %v471_v22 = vadd.f32 %v470_v20, %v458_v19 }
  0xad   :  { %v541_v24 = vadd.f32 %v537_v21, %v471_v22 }
  0xaf   :  { %v543_v62 = vmax.f32 %v541_v24, 0.0 }
  0xb0   :  { %v459_v25 = vpop.f32.mrf.mxu2 }
  0xb1   :  { %545 = vst [vmem:[%s1309_s3] sm:$0xff] %v543_v62  ;;  %v472_v56 = vpop.f32.mrf.mxu3 }
  0xc0   :  { %v483_v59 = vpop.f32.mrf.mxu0 }
  0xc1   :  { %v496_v26 = vpop.f32.mrf.mxu1 }
  0xc2   :  { %v497_v27 = vadd.f32 %v496_v26, %v483_v59 }
  0xc8   :  { %v509_v28 = vpop.f32.mrf.mxu2  ;;  %v485_v32 = vpop.f32.mrf.mxu0 }
  0xc9   :  { %v510_v29 = vadd.f32 %v509_v28, %v497_v27  ;;  %v522_v30 = vpop.f32.mrf.mxu3  ;;  %v498_v33 = vpop.f32.mrf.mxu1 }
  0xcb   :  { %v523_v34 = vadd.f32 %v522_v30, %v510_v29 }
  0xcd   :  { %v542_v35 = vadd.f32 %v538_v31, %v523_v34 }
  0xcf   :  { %v544_v36 = vmax.f32 %v542_v35, 0.0 }
  0xd0   :  { %v511_v37 = vpop.f32.mrf.mxu2 }
  0xd1   :  { %546 = vst [vmem:[%s1309_s3 + $0x8] sm:$0xff] %v544_v36  ;;  %v524_v38 = vpop.f32.mrf.mxu3 }

// kernel: tps_forward.13
= control target key start
LH: loop header
LB: loop body
LE: loop exit
PB: predicated region body
PF: predicated region fallthrough
CT: control target
= control target key end

     0   :  { %s356_s1 = inlined_call_operand.vmem [shape: bf16[256,128], index: 1, kind: input, shape index: {}]   ;;  %s357_s0 = inlined_call_operand.vmem [shape: bf16[8,256], index: 0, kind: input, shape index: {}]   ;;  %s358_s2 = inlined_call_operand.vmem [shape: f32[1,128], index: 2, kind: input, shape index: {}]   ;;  %s359_s3 = inlined_call_operand.vmem [shape: f32[8,128], index: 3, kind: output, shape index: {}]  }
   0x1   :  { %v269_v0 = vld [vmem:[%s356_s1 + $0x38] sm:$0xff]  ;;  %v268_v2 = vld [vmem:[%s356_s1 + $0x30] sm:$0xff]  ;;  %v267_v4 = vld [vmem:[%s356_s1 + $0x28] sm:$0xff] }
   0x2   :  { %v277_v1 = vld [vmem:[%s356_s1 + $0x78] sm:$0xff]  ;;  %156 = vmatpush.bf16.msra.mxu0 %v269_v0  ;;  %v276_v3 = vld [vmem:[%s356_s1 + $0x70] sm:$0xff]  ;;  %v275_v5 = vld [vmem:[%s356_s1 + $0x68] sm:$0xff] }
   0x3   :  { %169 = vmatpush.bf16.msra.mxu1 %v277_v1  ;;  %v266_v6 = vld [vmem:[%s356_s1 + $0x20] sm:$0xff]  ;;  %v265_v8 = vld [vmem:[%s356_s1 + $0x18] sm:$0xff]  ;;  %v264_v10 = vld [vmem:[%s356_s1 + $0x10] sm:$0xff] }
   0x4   :  { %v274_v7 = vld [vmem:[%s356_s1 + $0x60] sm:$0xff]  ;;  %v273_v9 = vld [vmem:[%s356_s1 + $0x58] sm:$0xff]  ;;  %v272_v11 = vld [vmem:[%s356_s1 + $0x50] sm:$0xff] }
   0x5   :  { %v263_v12 = vld [vmem:[%s356_s1 + $0x8] sm:$0xff]  ;;  %v20_v14 = vld [vmem:[%s357_s0] sm:$0xff] }
   0x6   :  { %157 = vmatpush.bf16.msra.mxu0 %v268_v2  ;;  %v271_v13 = vld [vmem:[%s356_s1 + $0x48] sm:$0xff]  ;;  %v54_v15 = vunpack.c.l.b16 %v20_v14  ;;  %v55_v16 = vunpack.c.h.b16 %v20_v14  ;;  %v262_v17 = vld [vmem:[%s356_s1] sm:$0xff] }
   0x7   :  { %170 = vmatpush.bf16.msra.mxu1 %v276_v3  ;;  %v270_v18 = vld [vmem:[%s356_s1 + $0x40] sm:$0xff] }
   0x8   :  { %v56_v19 = vpack.c.b16 %v54_v15, %v54_v15  ;;  %v57_v20 = vpack.c.b16 %v55_v16, %v55_v16  ;;  %v278_v21 = vld [vmem:[%s358_s2] ss:$0 sm:$0xff] }
   0xa   :  { %158 = vmatpush.bf16.msra.mxu0 %v267_v4 }
   0xb   :  { %171 = vmatpush.bf16.msra.mxu1 %v275_v5 }
   0xe   :  { %159 = vmatpush.bf16.msra.mxu0 %v266_v6 }
   0xf   :  { %172 = vmatpush.bf16.msra.mxu1 %v274_v7 }
  0x12   :  { %160 = vmatpush.bf16.msra.mxu0 %v265_v8 }
  0x13   :  { %173 = vmatpush.bf16.msra.mxu1 %v273_v9 }
  0x16   :  { %161 = vmatpush.bf16.msra.mxu0 %v264_v10 }
  0x17   :  { %174 = vmatpush.bf16.msra.mxu1 %v272_v11 }
  0x1a   :  { %162 = vmatpush.bf16.msra.mxu0 %v263_v12 }
  0x1b   :  { %175 = vmatpush.bf16.msra.mxu1 %v271_v13 }
  0x1e   :  { %163 = vmatpush.bf16.msra.mxu0 %v262_v17 }
  0x1f   :  { %176 = vmatpush.bf16.msra.mxu1 %v270_v18 }
  0x21   :  { %164 = vmatmul.bf16.vlgmr.msra.gmra.mxu0 %v56_v19 }
  0x22   :  { %177 = vmatmul.bf16.vlgmr.msra.gmra.mxu1 %v57_v20 }
  0x9e   :  { %v165_v22 = vpop.f32.mrf.mxu0 }
  0x9f   :  { %v178_v23 = vpop.f32.mrf.mxu1 }
  0xa0   :  { %v179_v24 = vadd.f32 %v178_v23, %v165_v22 }
  0xa2   :  { %v192_v25 = vadd.f32 %v278_v21, %v179_v24 }
  0xa4   :  { %193 = vst [vmem:[%s359_s3] sm:$0xff] %v192_v25 }
  0xa6   :  { %v167_v26 = vpop.f32.mrf.mxu0 }
  0xa7   :  { %v180_v27 = vpop.f32.mrf.mxu1 }

// kernel: tps_forward.14
= control target key start
LH: loop header
LB: loop body
LE: loop exit
PB: predicated region body
PF: predicated region fallthrough
CT: control target
= control target key end

     0   :  { %s610_s12 = smov 0   ;;  %s612_s13 = smov 0   ;;  %s681_s0 = inlined_call_operand.vmem [shape: f32[8,23], index: 0, kind: input, shape index: {}]   ;;  %s682_s1 = inlined_call_operand.vmem [shape: f32[23,512], index: 1, kind: input, shape index: {}]   ;;  %s683_s2 = inlined_call_operand.vmem [shape: f32[1,512], index: 2, kind: input, shape index: {}]   ;;  %s684_s3 = inlined_call_operand.vmem [shape: f32[8,512], index: 3, kind: output, shape index: {}]  }
   0x1   :  { %s614_s14 = smov 0   ;;  %s616_s15 = smov 0  }
   0x2   :  { %s618_s16 = smov 0  }
   0x3 LB: > { %s28_s17 = sadd.s32 1, %s584_s15  ;;  %p76_p1 = scmp.ne.s32.totalorder %s576_s13, %s572_s12  ;;  %s588_s16 = sphi %s618_s16, %s13_s16   ;;  %s584_s15 = sphi %s616_s15, %s688_s15   ;;  %s580_s14 = sphi %s614_s14, %s687_s14   ;;  %s576_s13 = sphi %s612_s13, %s686_s13   ;;  %s572_s12 = sphi %s610_s12, %s685_s12  }
   0x4   : > { %p30_p0 = scmp.ge.s32.totalorder %s28_s17, 2  ;;  %p77_p2 = scmp.eq.s32.totalorder %s588_s16, 0 }
   0x5   : > { %s69_s19 = sadd.s32 1, %s576_s13  ;;  %p494_p5 = scmp.ge.s32.totalorder %s588_s16, 2 }
   0x6   : > { %s690_s17 = smov (%p30_p0, %s28_s17), 0  ;;  %p78_p3 = por %p77_p2, %p76_p1 }
   0x7   : > { %s65_s18 = ssub.s32 %s584_s15, %s690_s17  ;;  %166 = sbr.rel (%p494_p5) target bundleno = 22 (0x16), region = 20 }
   0x8   : > { %p67_p4 = scmp.eq.s32.totalorder %s65_s18, 0 }
   0xa   : > { %s645_s20 = scalar_select %p67_p4, %s576_s13, %s69_s19  }
   0xc   : > { %169 = sbr.rel (!%p78_p3) target bundleno = 22 (0x16), region = 24  ;;  %s171_s21 = sand.u32 (%p78_p3), 1, %s576_s13  }
   0xd   : > { %s507_s22 = sshll.u32 (%p78_p3), %s584_s15, 4  ;;  %s508_s23 = smul.u32 (%p78_p3), 48, %s171_s21 }
   0xe   : > { %s179_s26 = scalar_lea.vmem (%p78_p3), %s682_s1, %s507_s22 }
   0xf   : > { %v192_v0 = vld [vmem:[%s179_s26] sm:$0xff] (%p78_p3)  ;;  %v194_v1 = vld [vmem:[%s179_s26 + $0x8] sm:$0xff] (%p78_p3)  ;;  %s173_s27 = scalar_lea.vmem (%p78_p3), [#allocation3], %s508_s23 }
  0x10   : > { %v196_v2 = vld [vmem:[%s179_s26 + $0x20] sm:$0xff] (%p78_p3)  ;;  %193 = vst [vmem:[%s173_s27] sm:$0xff] (%p78_p3), %v192_v0  ;;  %v198_v3 = vld [vmem:[%s179_s26 + $0x28] sm:$0xff] (%p78_p3) }
  0x11   : > { %195 = vst [vmem:[%s173_s27 + $0x8] sm:$0xff] %v194_v1  ;;  %v200_v4 = vld [vmem:[%s179_s26 + $0x40] sm:$0xff]  ;;  %v202_v5 = vld [vmem:[%s179_s26 + $0x48] sm:$0xff] }
  0x12   : > { %197 = vst [vmem:[%s173_s27 + $0x10] sm:$0xff] %v196_v2 }
  0x13   : > { %199 = vst [vmem:[%s173_s27 + $0x18] sm:$0xff] %v198_v3 }
  0x14   : > { %201 = vst [vmem:[%s173_s27 + $0x20] sm:$0xff] %v200_v4 }
  0x15   : > { %203 = vst [vmem:[%s173_s27 + $0x28] sm:$0xff] %v202_v5 }
  0x16 PF: > { %p497_p6 = scmp.ge.s32.totalorder %s588_s16, 1  ;;  %p216_p7 = scmp.lt.s32.totalorder %s588_s16, 3 }
  0x18   : > { %p217_p8 = pnand %p497_p6, %p216_p7 }
  0x19   : > { %s223_s28 = sand.u32 (!%p217_p8), 1, %s572_s12   ;;  %s498_s6 = sshll.u32 (!%p217_p8), %s580_s14, 1 }
  0x1a   : > { %220 = sbr.rel (%p217_p8) target bundleno = 167 (0xa7), region = 51  ;;  %p271_p9 = scmp.lt.s32.totalorder (!%p217_p8), %s498_s6, 3 }
  0x1b   : > { %s509_s29 = smul.u32 (!%p217_p8), 48, %s223_s28 }
  0x1d   : > { %s225_s30 = scalar_lea.vmem (!%p217_p8), [#allocation3], %s509_s29 }
  0x1f   : > { %vm304_vm0 = vcmask 1046528   ;;  %v298_v6 = vld [vmem:[%s225_s30 + $0x20] sm:$0x7f]  ;;  %v299_v7 = vld [vmem:[%s225_s30 + $0x28] sm:$0x7f]  ;;  %v296_v8 = vld [vmem:[%s225_s30 + $0x10] sm:$0xff] }
  0x20   : > { %501 = vmatpush.msk.msra.mxu0 %vm304_vm0, %v298_v6  ;;  %503 = vmatpush.msk.msra.mxu1 %vm304_vm0, %v299_v7  ;;  %v297_v9 = vld [vmem:[%s225_s30 + $0x18] sm:$0xff]  ;;  %v294_v10 = vld [vmem:[%s225_s30] sm:$0xff]  ;;  %v295_v11 = vld [vmem:[%s225_s30 + $0x8] sm:$0xff]  ;;  %vm300_vm1 = vcmask 187392   ;;  %s692_s6 = smov (!%p271_p9, %s498_s6), 3 }
  0x21   : > { %v293_v12 = vld [vmem:[%s681_s0] sm:$0xff]  ;;  %s273_s9 = scalar_lea.vmem %s683_s2, %s692_s6  ;;  %s500_s10 = sshll.u32 %s692_s6, 3 }
  0x22   : > { %325 = vmatpush.msra.mxu0 %v296_v8  ;;  %345 = vmatpush.msra.mxu1 %v297_v9  ;;  %v360_v13 = vld [vmem:[%s273_s9] sm:$0x3]  ;;  %s283_s18 = scalar_lea.vmem %s684_s3, %s500_s10 }
  0x23   : > { %v362_v14 = vperm.slane %v360_v13, 0  ;;  %v363_v15 = vperm.slane %v360_v13, 1 }
  0x24   : > { %326 = vmatpush.msra.mxu0 %v294_v10  ;;  %346 = vmatpush.msra.mxu1 %v295_v11 }
  0x25   : > { %502 = vmatmul.msk.f32.vlgmr.msra.gmra.mxu0 %vm300_vm1, %v293_v12  ;;  %504 = vmatmul.msk.f32.vlgmr.msra.gmra.mxu1 %vm300_vm1, %v293_v12 }
  0xa2   : > { %v328_v16 = vpop.f32.mrf.mxu0  ;;  %v348_v17 = vpop.f32.mrf.mxu1 }
  0xa3   : > { %v366_v18 = vadd.f32 %v362_v14, %v328_v16  ;;  %v367_v19 = vadd.f32 %v363_v15, %v348_v17 }
  0xa5   : > { %368 = vst [vmem:[%s283_s18] sm:$0xff] %v366_v18 }
  0xa6   : > { %369 = vst [vmem:[%s283_s18 + $0x8] sm:$0xff] %v367_v19 }
  0xa7 PF: > { %s13_s16 = sadd.s32 1, %s588_s16   ;;  %s685_s12 = smov %s576_s13 }
  0xa8   : > { %p10_p10 = scmp.ge.s32.totalorder %s13_s16, 4   ;;  %s686_s13 = smov %s645_s20 }
  0xa9   : > { %s687_s14 = smov %s584_s15  ;;  %s688_s15 = smov %s690_s17 }
  0xaa   :  { %12 = sbr.rel (!%p10_p10) target bundleno = 3 (0x3), region = 104 }

// kernel: tps_forward.15
= control target key start
LH: loop header
LB: loop body
LE: loop exit
PB: predicated region body
PF: predicated region fallthrough
CT: control target
= control target key end

     0   :  { %s759_s9 = smov 0   ;;  %s904_s0 = inlined_call_operand.vmem [shape: f32[2,2,512], index: 0, kind: input, shape index: {}]   ;;  %s905_s1 = inlined_call_operand.vmem [shape: f32[2,48,32], index: 1, kind: input, shape index: {}]   ;;  %s906_s2 = inlined_call_operand.vmem [shape: f32[2,3,512], index: 2, kind: output, shape index: {}]  }
   0x1 LB: > { %s689_s10 = sadd.s32 4294967295, %s742_s9   ;;  %p693_p0 = scmp.ge.s32.totalorder %s742_s9, 1  ;;  %s742_s9 = sphi %s759_s9, %s12_s9  }
   0x2   : > { %p122_p1 = scmp.lt.s32.totalorder %s742_s9, 3 }
   0x4   : > { %p123_p2 = pnand %p693_p0, %p122_p1 }
   0x5   : > { %p149_p3 = scmp.lt.s32.totalorder (!%p123_p2), %s689_s10, 1 }
   0x6   : > { %126 = sbr.rel (%p123_p2) target bundleno = 246 (0xf6), region = 28 }
   0xb   : > { %s908_s10 = smov (!%p149_p3, %s689_s10), 1  ;;  %v173_v0 = vlaneseq  ;;  %vm310_vm0 = vcmask 261120   ;;  %vm595_vm1 = vcmask 1043456   ;;  %vm603_vm2 = vcmask 1041409  }
   0xc   : > { %s725_s11 = sshll.u32 %s908_s10, 3  ;;  %s727_s15 = smul.u32 48, %s908_s10  ;;  %vm605_vm3 = vcmask 1045509   ;;  %vm608_vm4 = vcmask 1042434   ;;  %vm610_vm5 = vcmask 1046534  }
   0xd   : > { %s153_s14 = scalar_lea.vmem %s904_s0, %s725_s11  ;;  %v174_v3 = vshrl.u32 %v173_v0, 7  ;;  %s726_s19 = sshll.u32 %s908_s10, 4 }
   0xe   : > { %v164_v1 = vld [vmem:[%s153_s14] sm:$0xff]  ;;  %s804_s18 = scalar_lea.vmem %s905_s1, %s727_s15  ;;  %s163_s22 = scalar_lea.vmem %s906_s2, %s726_s19 }
   0xf   : > { %v165_v2 = vadd.f32 1.0, %v164_v1  ;;  %v177_v6 = vadd.s32 24, %v174_v3  ;;  %v175_v8 = vadd.s32 8, %v174_v3  ;;  %v176_v9 = vadd.s32 16, %v174_v3 }
  0x10   : > { %v782_v22 = vcvt.s32.f32 %v174_v3 }
  0x11   : > { %v773_v4 = vmul.f32 0.5, %v165_v2  ;;  %v181_v11 = vcvt.s32.f32 %v177_v6  ;;  %v776_v16 = vcvt.s32.f32 %v175_v8  ;;  %v180_v17 = vcvt.s32.f32 %v176_v9 }
  0x13   : > { %v167_v5 = vmul.f32 31.0, %v773_v4 }
  0x15   : > { %v168_v7 = vmax.f32 %v167_v5, 0.0 }
  0x17   : > { %v169_v10 = vmin.f32 %v168_v7, 31.0 }
  0x19   : > { %v183_v12 = vperm.slane %v169_v10, 0  ;;  %v184_v13 = vperm.slane %v169_v10, 2  ;;  %v185_v14 = vperm.slane %v169_v10, 4  ;;  %v186_v15 = vperm.slane %v169_v10, 6 }
  0x1b   : > { %v191_v18 = vperm.slane %v183_v12, 0  ;;  %v192_v19 = vperm.slane %v184_v13, 0  ;;  %v778_v20 = vperm.slane %v185_v14, 0  ;;  %v780_v21 = vperm.slane %v186_v15, 0 }
  0x1d   : > { %v207_v23 = vsub.f32 %v181_v11, %v191_v18  ;;  %v208_v24 = vsub.f32 %v181_v11, %v192_v19  ;;  %v209_v25 = vsub.f32 %v181_v11, %v778_v20  ;;  %v210_v26 = vsub.f32 %v181_v11, %v780_v21 }
  0x1e   : > { %v203_v27 = vsub.f32 %v180_v17, %v191_v18  ;;  %v204_v28 = vsub.f32 %v180_v17, %v192_v19  ;;  %v205_v29 = vsub.f32 %v180_v17, %v778_v20  ;;  %v206_v30 = vsub.f32 %v180_v17, %v780_v21 }
  0x1f   : > { %v223_v31 = vand.u32 2147483647, %v207_v23  ;;  %v224_v32 = vand.u32 2147483647, %v208_v24  ;;  %v225_v33 = vand.u32 2147483647, %v209_v25  ;;  %v199_v34 = vsub.f32 %v776_v16, %v191_v18 }
  0x20   : > { %v226_v35 = vand.u32 2147483647, %v210_v26  ;;  %v219_v36 = vand.u32 2147483647, %v203_v27  ;;  %v220_v37 = vand.u32 2147483647, %v204_v28  ;;  %v200_v38 = vsub.f32 %v776_v16, %v192_v19 }
  0x21   : > { %v239_v39 = vsub.f32 1.0, %v223_v31  ;;  %v240_v40 = vsub.f32 1.0, %v224_v32  ;;  %v241_v41 = vsub.f32 1.0, %v225_v33  ;;  %v221_v42 = vand.u32 2147483647, %v205_v29  ;;  %v304_v25 = vld [vmem:[%s804_s18] sm:$0xff] }
  0x22   : > { %v242_v43 = vsub.f32 1.0, %v226_v35  ;;  %v235_v44 = vsub.f32 1.0, %v219_v36  ;;  %v236_v45 = vsub.f32 1.0, %v220_v37  ;;  %v222_v46 = vand.u32 2147483647, %v206_v30  ;;  %v305_v27 = vld [vmem:[%s804_s18 + $0x8] sm:$0xff] }
  0x23   : > { %v255_v47 = vmax.f32 %v239_v39, 0.0  ;;  %v256_v48 = vmax.f32 %v240_v40, 0.0  ;;  %v257_v49 = vmax.f32 %v241_v41, 0.0  ;;  %v237_v50 = vsub.f32 1.0, %v221_v42  ;;  %v306_v28 = vld [vmem:[%s804_s18 + $0x10] sm:$0xff]  ;;  %v307_v29 = vld [vmem:[%s804_s18 + $0x18] sm:$0xff] }
  0x24   : > { %v258_v51 = vmax.f32 %v242_v43, 0.0  ;;  %v251_v52 = vmax.f32 %v235_v44, 0.0  ;;  %v252_v53 = vmax.f32 %v236_v45, 0.0  ;;  %v238_v54 = vsub.f32 1.0, %v222_v46  ;;  %v308_v30 = vld [vmem:[%s804_s18 + $0x20] sm:$0xff]  ;;  %v309_v31 = vld [vmem:[%s804_s18 + $0x28] sm:$0xff] }
  0x25   : > { %341 = vmatpush.msra.mxu0 %v255_v47  ;;  %376 = vmatpush.msra.mxu1 %v256_v48  ;;  %v253_v55 = vmax.f32 %v237_v50, 0.0  ;;  %v215_v56 = vand.u32 2147483647, %v199_v34  ;;  %v216_v57 = vand.u32 2147483647, %v200_v38  ;;  %v201_v58 = vsub.f32 %v776_v16, %v778_v20 }
  0x26   : > { %411 = vmatpush.msra.mxu2 %v257_v49  ;;  %446 = vmatpush.msra.mxu3 %v258_v51  ;;  %v254_v59 = vmax.f32 %v238_v54, 0.0  ;;  %v202_v60 = vsub.f32 %v776_v16, %v780_v21  ;;  %v195_v61 = vsub.f32 %v782_v22, %v191_v18  ;;  %v196_v62 = vsub.f32 %v782_v22, %v192_v19 }
  0x27   : > { %342 = vmatpush.msra.mxu0 %v251_v52  ;;  %377 = vmatpush.msra.mxu1 %v252_v53  ;;  %v231_v63 = vsub.f32 1.0, %v215_v56  ;;  %v232_v0 = vsub.f32 1.0, %v216_v57  ;;  %v217_v1 = vand.u32 2147483647, %v201_v58  ;;  %v197_v2 = vsub.f32 %v782_v22, %v778_v20 }
  0x28   : > { %412 = vmatpush.msra.mxu2 %v253_v55  ;;  %447 = vmatpush.msra.mxu3 %v254_v59  ;;  %v218_v3 = vand.u32 2147483647, %v202_v60  ;;  %v211_v5 = vand.u32 2147483647, %v195_v61  ;;  %v212_v6 = vand.u32 2147483647, %v196_v62  ;;  %v198_v7 = vsub.f32 %v782_v22, %v780_v21 }
  0x29   : > { %v247_v8 = vmax.f32 %v231_v63, 0.0  ;;  %v248_v9 = vmax.f32 %v232_v0, 0.0  ;;  %v233_v10 = vsub.f32 1.0, %v217_v1  ;;  %v213_v11 = vand.u32 2147483647, %v197_v2 }
  0x2a   : > { %v234_v12 = vsub.f32 1.0, %v218_v3  ;;  %v227_v13 = vsub.f32 1.0, %v211_v5  ;;  %v228_v14 = vsub.f32 1.0, %v212_v6  ;;  %v214_v15 = vand.u32 2147483647, %v198_v7 }
  0x2b   : > { %343 = vmatpush.msra.mxu0 %v247_v8  ;;  %378 = vmatpush.msra.mxu1 %v248_v9  ;;  %v249_v17 = vmax.f32 %v233_v10, 0.0  ;;  %v229_v18 = vsub.f32 1.0, %v213_v11  ;;  %v170_v32 = vmul.f32 15.0, %v773_v4 }
  0x2c   : > { %v250_v19 = vmax.f32 %v234_v12, 0.0  ;;  %v243_v20 = vmax.f32 %v227_v13, 0.0  ;;  %v244_v21 = vmax.f32 %v228_v14, 0.0  ;;  %v230_v23 = vsub.f32 1.0, %v214_v15 }
  0x2d   : > { %413 = vmatpush.msra.mxu2 %v249_v17  ;;  %v245_v24 = vmax.f32 %v229_v18, 0.0  ;;  %v171_v33 = vmax.f32 %v170_v32, 0.0 }
  0x2e   : > { %448 = vmatpush.msra.mxu3 %v250_v19  ;;  %344 = vmatpush.msra.mxu0 %v243_v20  ;;  %v246_v26 = vmax.f32 %v230_v23, 0.0 }
  0x2f   : > { %379 = vmatpush.msra.mxu1 %v244_v21  ;;  %414 = vmatpush.msra.mxu2 %v245_v24  ;;  %v172_v34 = vmin.f32 %v171_v33, 15.0 }
  0x30   : > { %449 = vmatpush.msra.mxu3 %v246_v26  ;;  %699 = vmatmul.msk.f32.vlgmr.msra.gmra.mxu0 %vm310_vm0, %v304_v25 }
  0x31   : > { %705 = vmatmul.msk.f32.vlgmr.msra.gmra.mxu1 %vm310_vm0, %v304_v25  ;;  %711 = vmatmul.msk.f32.vlgmr.msra.gmra.mxu2 %vm310_vm0, %v304_v25  ;;  %v261_v36 = vperm.slane %v172_v34, 3  ;;  %v260_v37 = vperm.slane %v172_v34, 1  ;;  %v263_v41 = vperm.slane %v172_v34, 7  ;;  %v262_v45 = vperm.slane %v172_v34, 5 }
  0x32   : > { %717 = vmatmul.msk.f32.vlgmr.msra.gmra.mxu3 %vm310_vm0, %v304_v25 }
  0x33   : > { %v269_v39 = vperm.slane %v261_v36, 1  ;;  %v268_v40 = vperm.slane %v260_v37, 1  ;;  %v271_v48 = vperm.slane %v263_v41, 1  ;;  %v270_v54 = vperm.slane %v262_v45, 1 }
  0x35   : > { %v277_v42 = vsub.f32 %v776_v16, %v269_v39  ;;  %v273_v44 = vsub.f32 %v782_v22, %v269_v39  ;;  %v272_v4 = vsub.f32 %v782_v22, %v268_v40  ;;  %v276_v49 = vsub.f32 %v776_v16, %v268_v40 }
  0x36   : > { %v279_v52 = vsub.f32 %v776_v16, %v271_v48  ;;  %v275_v56 = vsub.f32 %v782_v22, %v271_v48  ;;  %v274_v62 = vsub.f32 %v782_v22, %v270_v54  ;;  %v278_v7 = vsub.f32 %v776_v16, %v270_v54 }
  0x37   : > { %v285_v51 = vand.u32 2147483647, %v277_v42  ;;  %v281_v53 = vand.u32 2147483647, %v273_v44  ;;  %v280_v55 = vand.u32 2147483647, %v272_v4 }
  0x38   : > { %700 = vmatmul.msk.f32.gmra.mxu0 %vm310_vm0, %v305_v27  ;;  %v284_v57 = vand.u32 2147483647, %v276_v49  ;;  %v287_v60 = vand.u32 2147483647, %v279_v52  ;;  %v283_v2 = vand.u32 2147483647, %v275_v56 }
  0x39   : > { %706 = vmatmul.msk.f32.gmra.mxu1 %vm310_vm0, %v305_v27  ;;  %712 = vmatmul.msk.f32.gmra.mxu2 %vm310_vm0, %v305_v27  ;;  %v293_v58 = vsub.f32 1.0, %v285_v51  ;;  %v289_v61 = vsub.f32 1.0, %v281_v53  ;;  %v288_v1 = vsub.f32 1.0, %v280_v55  ;;  %v282_v10 = vand.u32 2147483647, %v274_v62 }
  0x3a   : > { %718 = vmatmul.msk.f32.gmra.mxu3 %vm310_vm0, %v305_v27  ;;  %v292_v3 = vsub.f32 1.0, %v284_v57  ;;  %v295_v8 = vsub.f32 1.0, %v287_v60  ;;  %v291_v12 = vsub.f32 1.0, %v283_v2  ;;  %v286_v14 = vand.u32 2147483647, %v278_v7 }
  0x3b   : > { %v846_v6 = vmax.f32 %v293_v58, 0.0  ;;  %v849_v9 = vmax.f32 %v289_v61, 0.0  ;;  %v296_v11 = vmax.f32 %v288_v1, 0.0  ;;  %v290_v20 = vsub.f32 1.0, %v282_v10 }
  0x3c   : > { %v851_v13 = vmax.f32 %v292_v3, 0.0  ;;  %v854_v15 = vmax.f32 %v295_v8, 0.0  ;;  %v857_v24 = vmax.f32 %v291_v12, 0.0 }
  0x3d   : > { %v864_v36 = vmax.f32 %v290_v20, 0.0 }
  0x40   : > { %701 = vmatmul.msk.f32.gmra.mxu0 %vm310_vm0, %v306_v28 }
  0x41   : > { %707 = vmatmul.msk.f32.gmra.mxu1 %vm310_vm0, %v306_v28  ;;  %713 = vmatmul.msk.f32.gmra.mxu2 %vm310_vm0, %v306_v28 }
  0x42   : > { %719 = vmatmul.msk.f32.gmra.mxu3 %vm310_vm0, %v306_v28 }
  0x48   : > { %702 = vmatmul.msk.f32.gmra.mxu0 %vm310_vm0, %v307_v29 }
  0x49   : > { %708 = vmatmul.msk.f32.gmra.mxu1 %vm310_vm0, %v307_v29  ;;  %714 = vmatmul.msk.f32.gmra.mxu2 %vm310_vm0, %v307_v29 }
  0x4a   : > { %720 = vmatmul.msk.f32.gmra.mxu3 %vm310_vm0, %v307_v29  ;;  %v294_v29 = vsub.f32 1.0, %v286_v14 }
  0x4c   : > { %v867_v39 = vmax.f32 %v294_v29, 0.0 }
  0x50   : > { %703 = vmatmul.msk.f32.gmra.mxu0 %vm310_vm0, %v308_v30 }
  0x51   : > { %709 = vmatmul.msk.f32.gmra.mxu1 %vm310_vm0, %v308_v30  ;;  %715 = vmatmul.msk.f32.gmra.mxu2 %vm310_vm0, %v308_v30 }
  0x52   : > { %721 = vmatmul.msk.f32.gmra.mxu3 %vm310_vm0, %v308_v30 }
  0x58   : > { %704 = vmatmul.msk.f32.gmra.mxu0 %vm310_vm0, %v309_v31 }
  0x59   : > { %710 = vmatmul.msk.f32.gmra.mxu1 %vm310_vm0, %v309_v31  ;;  %716 = vmatmul.msk.f32.gmra.mxu2 %vm310_vm0, %v309_v31 }
  0x5a   : > { %722 = vmatmul.msk.f32.gmra.mxu3 %vm310_vm0, %v309_v31 }
  0xad   : > { %v346_v35 = vpop.f32.mrf.mxu0 }
  0xae   : > { %v381_v38 = vpop.f32.mrf.mxu1  ;;  %v469_v23 = vmul.f32 %v346_v35, %v296_v11 }
  0xaf   : > { %v470_v19 = vmul.f32 %v381_v38, %v849_v9 }
  0xb4   : > { %v838_v43 = vpop.f32.mrf.mxu2 }
  0xb5   : > { %v451_v46 = vpop.f32.mrf.mxu3  ;;  %v349_v47 = vpop.f32.mrf.mxu0  ;;  %v471_v62 = vmul.f32 %v838_v43, %v864_v36 }
  0xb6   : > { %v384_v50 = vpop.f32.mrf.mxu1  ;;  %v473_v25 = vmul.f32 %v349_v47, %v851_v13  ;;  %v472_v35 = vmul.f32 %v451_v46, %v857_v24 }
  0xb7   : > { %v474_v22 = vmul.f32 %v384_v50, %v846_v6 }
  0xb8   : > { %v493_v37 = vadd.f32 %v473_v25, %v469_v23 }
  0xb9   : > { %v500_v28 = vadd.f32 %v474_v22, %v470_v19 }
  0xba   : > { %v494_v50 = vrot.slane %v493_v37, 4 }
  0xbb   : > { %v501_v38 = vrot.slane %v500_v28, 4 }
  0xbc   : > { %v419_v59 = vpop.f32.mrf.mxu2 }
  0xbd   : > { %v454_v63 = vpop.f32.mrf.mxu3  ;;  %v352_v0 = vpop.f32.mrf.mxu0  ;;  %v502_v53 = vadd.f32 %v501_v38, %v500_v28  ;;  %v475_v57 = vmul.f32 %v419_v59, %v867_v39 }
  0xbe   : > { %v387_v5 = vpop.f32.mrf.mxu1  ;;  %v477_v17 = vmul.f32 %v352_v0, %v296_v11  ;;  %v476_v32 = vmul.f32 %v454_v63, %v854_v15  ;;  %v495_v63 = vadd.f32 %v494_v50, %v493_v37 }
  0xbf   : > { %v478_v30 = vmul.f32 %v387_v5, %v849_v9  ;;  %v503_v2 = vrot.slane %v502_v53, 2  ;;  %v507_v5 = vadd.f32 %v475_v57, %v471_v62 }
  0xc0   : > { %v514_v42 = vadd.f32 %v476_v32, %v472_v35  ;;  %v496_v59 = vrot.slane %v495_v63, 2 }
  0xc1   : > { %v504_v43 = vadd.f32 %v503_v2, %v502_v53 }
  0xc2   : > { %v515_v58 = vrot.slane %v514_v42, 4 }
  0xc4   : > { %v422_v18 = vpop.f32.mrf.mxu2  ;;  %v516_v7 = vadd.f32 %v515_v58, %v514_v42 }
  0xc5   : > { %v457_v21 = vpop.f32.mrf.mxu3  ;;  %v355_v16 = vpop.f32.mrf.mxu0  ;;  %v479_v45 = vmul.f32 %v422_v18, %v864_v36 }
  0xc6   : > { %v481_v26 = vmul.f32 %v355_v16, %v851_v13  ;;  %v390_v27 = vpop.f32.mrf.mxu1  ;;  %v480_v51 = vmul.f32 %v457_v21, %v857_v24 }
  0xc7   : > { %v482_v31 = vmul.f32 %v390_v27, %v846_v6  ;;  %v517_v27 = vrot.slane %v516_v7, 2 }
  0xc8   : > { %v521_v33 = vadd.f32 %v481_v26, %v477_v17  ;;  %v508_v26 = vrot.slane %v507_v5, 4 }
  0xc9   : > { %v528_v34 = vadd.f32 %v482_v31, %v478_v30  ;;  %v518_v38 = vadd.f32 %v517_v27, %v516_v7 }
  0xca   : > { %v522_v40 = vrot.slane %v521_v33, 4  ;;  %v509_v37 = vadd.f32 %v508_v26, %v507_v5 }
  0xcb   : > { %v529_v41 = vrot.slane %v528_v34, 4 }
  0xcc   : > { %v425_v44 = vpop.f32.mrf.mxu2  ;;  %v523_v54 = vadd.f32 %v522_v40, %v521_v33  ;;  %v497_v33 = vadd.f32 %v496_v59, %v495_v63 }
  0xcd   : > { %v530_v47 = vadd.f32 %v529_v41, %v528_v34  ;;  %v483_v4 = vmul.f32 %v425_v44, %v867_v39  ;;  %v460_v48 = vpop.f32.mrf.mxu3  ;;  %v358_v49 = vpop.f32.mrf.mxu0  ;;  %v505_v34 = vrot.slane %v504_v43, 1 }
  0xce   : > { %v484_v46 = vmul.f32 %v460_v48, %v854_v15  ;;  %v393_v52 = vpop.f32.mrf.mxu1  ;;  %v524_v3 = vrot.slane %v523_v54, 2  ;;  %v485_v10 = vmul.f32 %v358_v49, %v296_v11  ;;  %v498_v58 = vrot.slane %v497_v33, 1 }
  0xcf   : > { %v531_v55 = vrot.slane %v530_v47, 2  ;;  %v535_v56 = vadd.f32 %v483_v4, %v479_v45  ;;  %v486_v23 = vmul.f32 %v393_v52, %v849_v9 }
  0xd0   : > { %v542_v60 = vadd.f32 %v484_v46, %v480_v51  ;;  %v525_v16 = vadd.f32 %v524_v3, %v523_v54  ;;  %v506_v51 = vadd.f32 %v505_v34, %v504_v43  ;;  %v510_v54 = vrot.slane %v509_v37, 2 }
  0xd1   : > { %v532_v61 = vadd.f32 %v531_v55, %v530_v47  ;;  %v536_v0 = vrot.slane %v535_v56, 4 }
  0xd2   : > { %v543_v1 = vrot.slane %v542_v60, 4  ;;  %v526_v35 = vrot.slane %v525_v16, 1  ;;  %v511_v2 = vadd.f32 %v510_v54, %v509_v37 }
  0xd3   : > { %v533_v22 = vrot.slane %v532_v61, 1  ;;  %v537_v18 = vadd.f32 %v536_v0, %v535_v56 }
  0xd4   : > { %v544_v8 = vadd.f32 %v543_v1, %v542_v60  ;;  %v428_v12 = vpop.f32.mrf.mxu2  ;;  %v527_v46 = vadd.f32 %v526_v35, %v525_v16 }
  0xd5   : > { %v463_v14 = vpop.f32.mrf.mxu3  ;;  %v361_v17 = vpop.f32.mrf.mxu0  ;;  %v534_v29 = vadd.f32 %v533_v22, %v532_v61  ;;  %v538_v31 = vrot.slane %v537_v18, 2  ;;  %v519_v61 = vrot.slane %v518_v38, 1 }
  0xd6   : > { %v545_v19 = vrot.slane %v544_v8, 2  ;;  %v489_v20 = vmul.f32 %v361_v17, %v851_v13  ;;  %v396_v21 = vpop.f32.mrf.mxu1  ;;  %v488_v48 = vmul.f32 %v463_v14, %v857_v24  ;;  %v589_v24 = vrot.slane %v506_v51, 4 }
  0xd7   : > { %v490_v25 = vmul.f32 %v396_v21, %v846_v6  ;;  %v591_v42 = vrot.slane %v534_v29, 4  ;;  %v487_v6 = vmul.f32 %v428_v12, %v864_v36  ;;  %v539_v4 = vadd.f32 %v538_v31, %v537_v18 }
  0xd8   : > { %v546_v28 = vadd.f32 %v545_v19, %v544_v8  ;;  %v549_v11 = vadd.f32 %v489_v20, %v485_v10  ;;  %v499_v8 = vadd.f32 %v498_v58, %v497_v33  ;;  %v520_v22 = vadd.f32 %v519_v61, %v518_v38 }
  0xd9   : > { %v556_v30 = vadd.f32 %v490_v25, %v486_v23  ;;  %v598_v36 = vsel %vm595_vm1, %v527_v46, %v591_v42  ;;  %v540_v62 = vrot.slane %v539_v4, 1  ;;  %v512_v21 = vrot.slane %v511_v2, 1 }
  0xda   : > { %v550_v32 = vrot.slane %v549_v11, 4  ;;  %v547_v40 = vrot.slane %v546_v28, 1  ;;  %v602_v3 = vrot.slane %v598_v36, 7  ;;  %v596_v59 = vsel %vm595_vm1, %v499_v8, %v589_v24 }
  0xdb   : > { %v557_v13 = vrot.slane %v556_v30, 4  ;;  %v541_v14 = vadd.f32 %v540_v62, %v539_v4  ;;  %v590_v26 = vrot.slane %v520_v22, 4  ;;  %v513_v31 = vadd.f32 %v512_v21, %v511_v2 }
  0xdc   : > { %v551_v41 = vadd.f32 %v550_v32, %v549_v11  ;;  %v431_v9 = vpop.f32.mrf.mxu2  ;;  %v548_v55 = vadd.f32 %v547_v40, %v546_v28  ;;  %v604_v43 = vsel %vm603_vm2, %v602_v3, %v596_v59 }
  0xdd   : > { %v558_v44 = vadd.f32 %v557_v13, %v556_v30  ;;  %v491_v45 = vmul.f32 %v431_v9, %v867_v39  ;;  %v466_v47 = vpop.f32.mrf.mxu3  ;;  %v606_v29 = vsel %vm605_vm3, %v602_v3, %v604_v43  ;;  %v597_v35 = vsel %vm595_vm1, %v513_v31, %v590_v26 }
  0xde   : > { %v552_v49 = vrot.slane %v551_v41, 2  ;;  %v492_v50 = vmul.f32 %v466_v47, %v854_v15  ;;  %v592_v5 = vrot.slane %v548_v55, 4 }
  0xdf   : > { %v559_v52 = vrot.slane %v558_v44, 2  ;;  %v563_v53 = vadd.f32 %v491_v45, %v487_v6 }
  0xe0   : > { %v553_v56 = vadd.f32 %v552_v49, %v551_v41  ;;  %v570_v57 = vadd.f32 %v492_v50, %v488_v48  ;;  %v599_v16 = vsel %vm595_vm1, %v541_v14, %v592_v5 }
  0xe1   : > { %v560_v60 = vadd.f32 %v559_v52, %v558_v44  ;;  %v564_v39 = vrot.slane %v563_v53, 4  ;;  %v612_v30 = vrot.slane %v599_v16, 7 }
  0xe2   : > { %v571_v63 = vrot.slane %v570_v57, 4  ;;  %v554_v0 = vrot.slane %v553_v56, 1 }
  0xe3   : > { %v561_v1 = vrot.slane %v560_v60, 1  ;;  %v565_v15 = vadd.f32 %v564_v39, %v563_v53  ;;  %v613_v38 = vsel %vm603_vm2, %v612_v30, %v597_v35 }
  0xe4   : > { %v572_v7 = vadd.f32 %v571_v63, %v570_v57  ;;  %v555_v18 = vadd.f32 %v554_v0, %v553_v56  ;;  %v614_v9 = vsel %vm605_vm3, %v612_v30, %v613_v38 }
  0xe5   : > { %v562_v10 = vadd.f32 %v561_v1, %v560_v60  ;;  %v566_v12 = vrot.slane %v565_v15, 2 }
  0xe6   : > { %v573_v17 = vrot.slane %v572_v7, 2 }
  0xe7   : > { %v593_v19 = vrot.slane %v562_v10, 4  ;;  %v567_v20 = vadd.f32 %v566_v12, %v565_v15 }
  0xe8   : > { %v574_v23 = vadd.f32 %v573_v17, %v572_v7 }
  0xe9   : > { %v600_v25 = vsel %vm595_vm1, %v555_v18, %v593_v19  ;;  %v568_v28 = vrot.slane %v567_v20, 1 }
  0xea   : > { %v607_v27 = vrot.slane %v600_v25, 6  ;;  %v575_v11 = vrot.slane %v574_v23, 1 }
  0xeb   : > { %v569_v13 = vadd.f32 %v568_v28, %v567_v20 }
  0xec   : > { %v609_v32 = vsel %vm608_vm4, %v607_v27, %v606_v29  ;;  %v576_v33 = vadd.f32 %v575_v11, %v574_v23 }
  0xed   : > { %v611_v34 = vsel %vm610_vm5, %v607_v27, %v609_v32 }
  0xee   : > { %620 = vst [vmem:[%s163_s22] sm:$0x77] %v611_v34  ;;  %v594_v37 = vrot.slane %v576_v33, 4 }
  0xf0   : > { %v601_v40 = vsel %vm595_vm1, %v569_v13, %v594_v37 }
  0xf1   : > { %v615_v41 = vrot.slane %v601_v40, 6 }
  0xf3   : > { %v616_v42 = vsel %vm608_vm4, %v615_v41, %v614_v9 }
  0xf4   : > { %v617_v6 = vsel %vm610_vm5, %v615_v41, %v616_v42 }
  0xf5   : > { %621 = vst [vmem:[%s163_s22 + $0x8] sm:$0x77] %v617_v6 }
  0xf6 PF: > { %s12_s9 = sadd.s32 1, %s742_s9  }
  0xf7   : > { %p9_p4 = scmp.ge.s32.totalorder %s12_s9, 4  }
  0xf9   :  { %11 = sbr.rel (!%p9_p4) target bundleno = 1 (0x1), region = 61 }

</bundles_post_ra>
